<compile_context>
chip_gen: v5e
topology: v5e:2x2
jax: 0.10.0
libtpu: 0.0.40
codegen_flags: <defaults>
</compile_context>

<pallas_src>
from functools import reduce

import jax
import jax.numpy as jnp
from jax.experimental import pallas as pl
from jax.experimental.pallas import tpu as pltpu

BN_EPS = 1e-5
LANE = 128


def round_up(x, m):
    return ((x + m - 1) // m) * m


# --------------------------------------------------------------------------
# Units computation — mirrors DenseDecoder._get_units exactly.
# --------------------------------------------------------------------------
def get_units(latent_dim, num_layers, output_shape):
    final_units = reduce(lambda a, b: a * b, output_shape)
    shrinkage = int((final_units // latent_dim) ** (1.0 / num_layers))
    units = [final_units // shrinkage ** i for i in range(num_layers)]
    units.reverse()
    return [latent_dim] + units


# --------------------------------------------------------------------------
# Pallas kernel.  Ref order: x, [W, b] * num_hidden, W_final, b_final, out
# Hot loop per hidden layer: MXU dot (bf16 x bf16 -> f32) -> +bias -> ReLU.
# --------------------------------------------------------------------------
def make_dense_decoder_kernel(num_hidden):
    def kernel(*refs):
        x_ref = refs[0]
        o_ref = refs[-1]
        params = refs[1:-1]

        h = x_ref[...]                                   # f32 (tile_b, latent)
        for i in range(num_hidden):
            w_ref = params[2 * i]
            b_ref = params[2 * i + 1]
            h = jnp.dot(h.astype(w_ref.dtype), w_ref[...],
                        preferred_element_type=jnp.float32)
            h = jnp.maximum(h + b_ref[...], 0.0)         # folded BN bias + ReLU

        w_f_ref = params[2 * num_hidden]
        b_f_ref = params[2 * num_hidden + 1]
        y = jnp.dot(h.astype(w_f_ref.dtype), w_f_ref[...],
                    preferred_element_type=jnp.float32) + b_f_ref[...]
        o_ref[...] = jax.nn.sigmoid(y)

    return kernel


# --------------------------------------------------------------------------
# Parameter prep: fold eval-mode BN into the Linear and zero-pad feature
# widths to multiples of 128.  Returns [W0, b0, W1, b1, ..., Wf, bf] with
# weights in `weight_dtype` (bf16 by default) and biases in f32.
# --------------------------------------------------------------------------
def fold_and_pad_params(raw_params, units, weight_dtype=jnp.bfloat16):
    num_hidden = len(units) - 2
    padded_units = [units[0]] + [round_up(u, LANE) for u in units[1:]]

    flat = []
    idx = 0
    in_pad = padded_units[0]
    for li in range(num_hidden):
        w, g, b, m, v = raw_params[idx:idx + 5]
        idx += 5
        out_u, out_pad = units[li + 1], padded_units[li + 1]

        scale = g * jax.lax.rsqrt(v + BN_EPS)            # (1, out_u)
        w_fold = w * scale                               # column-scale
        b_fold = b - m * scale

        w_p = jnp.zeros((in_pad, out_pad), jnp.float32)
        w_p = w_p.at[: w.shape[0], :out_u].set(w_fold)
        b_p = jnp.zeros((1, out_pad), jnp.float32).at[:, :out_u].set(b_fold)
        flat += [w_p.astype(weight_dtype), b_p]
        in_pad = out_pad

    w_last, b_last = raw_params[idx], raw_params[idx + 1]
    out_u, out_pad = units[-1], padded_units[-1]
    w_p = jnp.zeros((in_pad, out_pad), jnp.float32)
    w_p = w_p.at[: w_last.shape[0], :out_u].set(w_last)
    b_p = jnp.zeros((1, out_pad), jnp.float32).at[:, :out_u].set(b_last)
    flat += [w_p.astype(weight_dtype), b_p]

    return flat, padded_units


# --------------------------------------------------------------------------
# Wrapper: batch tiled along the grid ("parallel"), all params resident.
# --------------------------------------------------------------------------
def dense_decoder_forward(x, flat_params, padded_units, final_units,
                          output_shape, *, batch_tile=128):
    B, latent_dim = x.shape
    final_pad = padded_units[-1]
    num_hidden = len(padded_units) - 2

    pad_b = (-B) % batch_tile
    x_in = jnp.pad(x, ((0, pad_b), (0, 0))) if pad_b else x
    PB = B + pad_b
    grid = (PB // batch_tile,)

    in_specs = [pl.BlockSpec((batch_tile, latent_dim), lambda i: (i, 0))]
    for p in flat_params:
        # constant block index -> weight/bias stays resident in VMEM;
        # ndim bound explicitly to avoid the late-binding-lambda bug.
        in_specs.append(pl.BlockSpec(p.shape, lambda i, nd=p.ndim: (0,) * nd))

    out_spec = pl.BlockSpec((batch_tile, final_pad), lambda i: (i, 0))

    flops = 2 * PB * sum(int(p.shape[0]) * int(p.shape[1])
                         for p in flat_params[::2])
    bytes_accessed = (int(x_in.size) * 4 + PB * final_pad * 4 +
                      sum(int(p.size) * p.dtype.itemsize for p in flat_params))
    cost = pl.CostEstimate(flops=flops,
                           transcendentals=PB * final_pad,
                           bytes_accessed=bytes_accessed)

    out = pl.pallas_call(
        make_dense_decoder_kernel(num_hidden),
        out_shape=jax.ShapeDtypeStruct((PB, final_pad), jnp.float32),
        grid=grid,
        in_specs=in_specs,
        out_specs=out_spec,
        compiler_params=pltpu.CompilerParams(
            dimension_semantics=("parallel",)),
        cost_estimate=cost,
    )(x_in, *flat_params)

    out = out[:B, :final_units]
    # PyTorch: outputs.view(-1, *output_shape)
    return out.reshape((-1,) + tuple(output_shape))


# --------------------------------------------------------------------------
# Deterministic raw parameter construction (shapes follow DenseDecoder).
# --------------------------------------------------------------------------
def build_params(key, units):
    params = []
    num_hidden = len(units) - 2
    hidden_pairs = list(zip(units[:-2], units[1:-1]))  # pairwise(units[:-1])

    for (in_u, out_u) in hidden_pairs:
        key, k_w, k_g, k_b, k_m, k_v = jax.random.split(key, 6)
        w = jax.random.normal(k_w, (in_u, out_u), jnp.float32) * (1.0 / in_u ** 0.5)
        gamma = 1.0 + 0.1 * jax.random.normal(k_g, (1, out_u), jnp.float32)
        beta = 0.1 * jax.random.normal(k_b, (1, out_u), jnp.float32)
        run_mean = 0.1 * jax.random.normal(k_m, (1, out_u), jnp.float32)
        run_var = jnp.abs(jax.random.normal(k_v, (1, out_u), jnp.float32)) + 0.5
        params += [w, gamma, beta, run_mean, run_var]

    in_u, out_u = units[-2], units[-1]
    key, k_w, k_b = jax.random.split(key, 3)
    w_f = jax.random.normal(k_w, (in_u, out_u), jnp.float32) * (1.0 / in_u ** 0.5)
    b_f = 0.1 * jax.random.normal(k_b, (1, out_u), jnp.float32)
    params += [w_f, b_f]
    assert len(params) == 5 * num_hidden + 2
    return params


# --------------------------------------------------------------------------
# Pure-JAX f32 reference (un-folded, un-padded) for correctness checking.
# --------------------------------------------------------------------------
def reference_forward(x, params, units, output_shape):
    num_hidden = len(units) - 2
    h = x
    idx = 0
    for _ in range(num_hidden):
        w, g, b, m, v = params[idx:idx + 5]
        idx += 5
        h = h @ w
        h = (h - m) * jax.lax.rsqrt(v + BN_EPS) * g + b
        h = jnp.maximum(h, 0.0)
    w_f, b_f = params[idx], params[idx + 1]
    y = jax.nn.sigmoid(h @ w_f + b_f)
    return y.reshape((-1,) + tuple(output_shape))


if __name__ == "__main__":
    # DenseDecoder(latent_dim=32, num_layers=3, output_shape=(4, 16, 16))
    latent_dim = 32
    num_layers = 3
    output_shape = (4, 16, 16)          # final_units = 1024
    batch = 200                          # padded to 256 -> 2 parallel grid steps

    units = get_units(latent_dim, num_layers, output_shape)
    # units == [32, 113, 341, 1024]; padded hidden widths -> [32, 128, 384, 1024]

    key = jax.random.PRNGKey(0)
    key, k_x = jax.random.split(key)
    x = jax.random.normal(k_x, (batch, latent_dim), jnp.float32)
    raw_params = build_params(key, units)

    flat_params, padded_units = fold_and_pad_params(
        raw_params, units, weight_dtype=jnp.bfloat16)
    final_units = units[-1]

    out = dense_decoder_forward(x, flat_params, padded_units, final_units,
                                output_shape, batch_tile=128)
    out = jax.block_until_ready(out)

    ref = reference_forward(x, raw_params, units, output_shape)
    assert out.shape == (batch,) + output_shape, out.shape
    # bf16 weights + bf16 activations into the MXU (f32 accumulate) vs. a pure
    # f32 reference -> relaxed tolerance on the (0,1) sigmoid output.
    max_err = float(jnp.max(jnp.abs(out - ref)))
    assert jnp.allclose(out, ref, atol=3e-2, rtol=0.0), max_err

    print("KERNEL_OK")
</pallas_src>

<mosaic_0001>
module attributes {stable_mosaic.version = 11 : i64} {
  func.func @kernel(%arg0: i32, %arg1: memref<128x32xf32, #tpu.memory_space<vmem>>, %arg2: memref<32x128xbf16, #tpu.memory_space<vmem>>, %arg3: memref<1x128xf32, #tpu.memory_space<vmem>>, %arg4: memref<128x384xbf16, #tpu.memory_space<vmem>>, %arg5: memref<1x384xf32, #tpu.memory_space<vmem>>, %arg6: memref<384x1024xbf16, #tpu.memory_space<vmem>>, %arg7: memref<1x1024xf32, #tpu.memory_space<vmem>>, %arg8: memref<128x1024xf32, #tpu.memory_space<vmem>>) attributes {dimension_semantics = [#tpu.dimension_semantics<parallel>], iteration_bounds = array<i64: 2>, scalar_prefetch = 0 : i64, scratch_operands = 0 : i64, tpu.core_type = #tpu.core_type<tc>, window_params = [{transform_indices = @transform_0, window_bounds = array<i64: 128, 32>}, {pipeline_mode = #tpu.pipeline_mode<synchronous>, transform_indices = @transform_1, window_bounds = array<i64: 32, 128>}, {pipeline_mode = #tpu.pipeline_mode<synchronous>, transform_indices = @transform_2, window_bounds = array<i64: 1, 128>}, {pipeline_mode = #tpu.pipeline_mode<synchronous>, transform_indices = @transform_3, window_bounds = array<i64: 128, 384>}, {pipeline_mode = #tpu.pipeline_mode<synchronous>, transform_indices = @transform_4, window_bounds = array<i64: 1, 384>}, {pipeline_mode = #tpu.pipeline_mode<synchronous>, transform_indices = @transform_5, window_bounds = array<i64: 384, 1024>}, {pipeline_mode = #tpu.pipeline_mode<synchronous>, transform_indices = @transform_6, window_bounds = array<i64: 1, 1024>}, {transform_indices = @transform_7, window_bounds = array<i64: 128, 1024>}]} {
    %c0 = arith.constant 0 : index
    %c0_0 = arith.constant 0 : index
    %0 = vector.load %arg1[%c0, %c0_0] : memref<128x32xf32, #tpu.memory_space<vmem>>, vector<128x32xf32>
    %1 = arith.truncf %0 : vector<128x32xf32> to vector<128x32xbf16>
    %c0_1 = arith.constant 0 : index
    %c0_2 = arith.constant 0 : index
    %2 = vector.load %arg2[%c0_1, %c0_2] : memref<32x128xbf16, #tpu.memory_space<vmem>>, vector<32x128xbf16>
    %cst = arith.constant dense<0.000000e+00> : vector<128x128xf32>
    %3 = tpu.matmul %1, %2, %cst {dimension_numbers = #tpu.dot_dimension_numbers<[1], [0], [0], [1], [0, 0, 1, 1], [], []>} : vector<128x32xbf16>, vector<32x128xbf16>, vector<128x128xf32> -> vector<128x128xf32>
    %c0_3 = arith.constant 0 : index
    %c0_4 = arith.constant 0 : index
    %4 = vector.load %arg3[%c0_3, %c0_4] : memref<1x128xf32, #tpu.memory_space<vmem>>, vector<1x128xf32>
    %5 = vector.broadcast %4 : vector<1x128xf32> to vector<128x128xf32>
    %6 = arith.addf %3, %5 : vector<128x128xf32>
    %cst_5 = arith.constant 0.000000e+00 : f32
    %7 = vector.broadcast %cst_5 : f32 to vector<128x128xf32>
    %8 = arith.maximumf %6, %7 : vector<128x128xf32>
    %9 = arith.truncf %8 : vector<128x128xf32> to vector<128x128xbf16>
    %c0_6 = arith.constant 0 : index
    %c0_7 = arith.constant 0 : index
    %10 = vector.load %arg4[%c0_6, %c0_7] : memref<128x384xbf16, #tpu.memory_space<vmem>>, vector<128x384xbf16>
    %cst_8 = arith.constant dense<0.000000e+00> : vector<128x384xf32>
    %11 = tpu.matmul %9, %10, %cst_8 {dimension_numbers = #tpu.dot_dimension_numbers<[1], [0], [0], [1], [0, 0, 1, 1], [], []>} : vector<128x128xbf16>, vector<128x384xbf16>, vector<128x384xf32> -> vector<128x384xf32>
    %c0_9 = arith.constant 0 : index
    %c0_10 = arith.constant 0 : index
    %12 = vector.load %arg5[%c0_9, %c0_10] : memref<1x384xf32, #tpu.memory_space<vmem>>, vector<1x384xf32>
    %13 = vector.broadcast %12 : vector<1x384xf32> to vector<128x384xf32>
    %14 = arith.addf %11, %13 : vector<128x384xf32>
    %cst_11 = arith.constant 0.000000e+00 : f32
    %15 = vector.broadcast %cst_11 : f32 to vector<128x384xf32>
    %16 = arith.maximumf %14, %15 : vector<128x384xf32>
    %17 = arith.truncf %16 : vector<128x384xf32> to vector<128x384xbf16>
    %c0_12 = arith.constant 0 : index
    %c0_13 = arith.constant 0 : index
    %18 = vector.load %arg6[%c0_12, %c0_13] : memref<384x1024xbf16, #tpu.memory_space<vmem>>, vector<384x1024xbf16>
    %cst_14 = arith.constant dense<0.000000e+00> : vector<128x1024xf32>
    %19 = tpu.matmul %17, %18, %cst_14 {dimension_numbers = #tpu.dot_dimension_numbers<[1], [0], [0], [1], [0, 0, 1, 1], [], []>} : vector<128x384xbf16>, vector<384x1024xbf16>, vector<128x1024xf32> -> vector<128x1024xf32>
    %c0_15 = arith.constant 0 : index
    %c0_16 = arith.constant 0 : index
    %20 = vector.load %arg7[%c0_15, %c0_16] : memref<1x1024xf32, #tpu.memory_space<vmem>>, vector<1x1024xf32>
    %21 = vector.broadcast %20 : vector<1x1024xf32> to vector<128x1024xf32>
    %22 = arith.addf %19, %21 : vector<128x1024xf32>
    %23 = arith.negf %22 : vector<128x1024xf32>
    %24 = math.exp %23 : vector<128x1024xf32>
    %cst_17 = arith.constant 1.000000e+00 : f32
    %25 = vector.broadcast %cst_17 : f32 to vector<128x1024xf32>
    %26 = arith.addf %25, %24 : vector<128x1024xf32>
    %27 = arith.divf %25, %26 : vector<128x1024xf32>
    %c0_18 = arith.constant 0 : index
    %c0_19 = arith.constant 0 : index
    %28 = vector.load %arg8[%c0_18, %c0_19] : memref<128x1024xf32, #tpu.memory_space<vmem>>, vector<128x1024xf32>
    tpu.vector_store %arg8[%c0_18, %c0_19], %27 {strides = array<i32>} : memref<128x1024xf32, #tpu.memory_space<vmem>>, vector<128x1024xf32>,
    return
  }
  func.func @transform_0(%arg0: i32) -> (i32, i32) {
    %c0_i32 = arith.constant 0 : i32
    %c0_i32_0 = arith.constant 0 : i32
    return %arg0, %c0_i32 : i32, i32
  }
  func.func @transform_1(%arg0: i32) -> (i32, i32) {
    %c0_i32 = arith.constant 0 : i32
    %c0_i32_0 = arith.constant 0 : i32
    %c0_i32_1 = arith.constant 0 : i32
    return %c0_i32, %c0_i32_0 : i32, i32
  }
  func.func @transform_2(%arg0: i32) -> (i32, i32) {
    %c0_i32 = arith.constant 0 : i32
    %c0_i32_0 = arith.constant 0 : i32
    %c0_i32_1 = arith.constant 0 : i32
    return %c0_i32, %c0_i32_0 : i32, i32
  }
  func.func @transform_3(%arg0: i32) -> (i32, i32) {
    %c0_i32 = arith.constant 0 : i32
    %c0_i32_0 = arith.constant 0 : i32
    %c0_i32_1 = arith.constant 0 : i32
    return %c0_i32, %c0_i32_0 : i32, i32
  }
  func.func @transform_4(%arg0: i32) -> (i32, i32) {
    %c0_i32 = arith.constant 0 : i32
    %c0_i32_0 = arith.constant 0 : i32
    %c0_i32_1 = arith.constant 0 : i32
    return %c0_i32, %c0_i32_0 : i32, i32
  }
  func.func @transform_5(%arg0: i32) -> (i32, i32) {
    %c0_i32 = arith.constant 0 : i32
    %c0_i32_0 = arith.constant 0 : i32
    %c0_i32_1 = arith.constant 0 : i32
    return %c0_i32, %c0_i32_0 : i32, i32
  }
  func.func @transform_6(%arg0: i32) -> (i32, i32) {
    %c0_i32 = arith.constant 0 : i32
    %c0_i32_0 = arith.constant 0 : i32
    %c0_i32_1 = arith.constant 0 : i32
    return %c0_i32, %c0_i32_0 : i32, i32
  }
  func.func @transform_7(%arg0: i32) -> (i32, i32) {
    %c0_i32 = arith.constant 0 : i32
    %c0_i32_0 = arith.constant 0 : i32
    return %arg0, %c0_i32 : i32, i32
  }
}

</mosaic_0001>

<bundles_post_ra>
// kernel: tpu_custom_call.1
= control target key start
LH: loop header
LB: loop body
LE: loop exit
PB: predicated region body
PF: predicated region fallthrough
CT: control target
= control target key end

     0   :  { %12 = vsyncpa [#allocation3], 0  ;;  %s10679_s0 = inlined_call_operand.vmem [shape: f32[256,32], index: 0, kind: input, shape index: {}]   ;;  %s10680_s1 = inlined_call_operand.vmem [shape: bf16[32,128], index: 1, kind: input, shape index: {}]   ;;  %s10681_s2 = inlined_call_operand.vmem [shape: f32[1,128], index: 2, kind: input, shape index: {}]   ;;  %s10682_s3 = inlined_call_operand.vmem [shape: bf16[128,384], index: 3, kind: input, shape index: {}]   ;;  %s10683_s4 = inlined_call_operand.vmem [shape: f32[1,384], index: 4, kind: input, shape index: {}]   ;;  %s10684_s5 = inlined_call_operand.hbm [shape: bf16[384,1024], index: 5, kind: input, shape index: {}]   ;;  %s10685_s6 = inlined_call_operand.vmem [shape: f32[1,1024], index: 6, kind: input, shape index: {}]   ;;  %s10686_s7 = inlined_call_operand.hbm [shape: f32[256,1024], index: 7, kind: output, shape index: {}]  }
   0x1   :  { %13 = vsyncpa [#allocation4], 0 }
   0x2   :  { %15 = vsyncpa [#allocation4 + $0x1], 0  ;;  %s7781_s24 = smov 0   ;;  %s7783_s25 = smov 0  }
   0x3   :  { %s7785_s26 = smov 0   ;;  %s7787_s27 = smov 0  }
   0x4 LB: > { %s7802_s28 = sadd.s32 4294967295, %s7734_s27   ;;  %s5824_s29 = sadd.s32 4294967294, %s7734_s27   ;;  %s7734_s27 = sphi %s7787_s27, %s10865_s27   ;;  %s7730_s26 = sphi %s7785_s26, %s10864_s26   ;;  %s7726_s25 = sphi %s7783_s25, %s10863_s25   ;;  %s7722_s24 = sphi %s7781_s24, %s10862_s24  }
   0x5   : > { %s7806_s30 = sadd.s32 1, %s7734_s27   ;;  %s180_s8 = sadd.s32 1, %s7730_s26 }
   0x6   : > { %s177_s9 = ssub.s32 %s7734_s27, %s7806_s30  ;;  %p190_p0 = scmp.ne.s32.totalorder %s7730_s26, %s7726_s25 }
   0x7   : > { %p178_p1 = scmp.eq.s32.totalorder %s177_s9, 0  ;;  %p191_p2 = scmp.eq.s32.totalorder %s7802_s28, 1 }
   0x8   : > { %p196_p3 = scmp.ne.s32.totalorder %s7726_s25, %s7722_s24  ;;  %p197_p4 = scmp.eq.s32.totalorder %s5824_s29, 1 }
   0x9   : > { %s7817_s10 = scalar_select %p178_p1, %s7730_s26, %s180_s8  }
   0xa   : > { %p7819_p5 = por %p191_p2, %p190_p0  ;;  %p7823_p6 = por %p197_p4, %p196_p3 }
   0xb   : > { %p5825_p7 = scmp.ge.s32.totalorder %s7734_s27, 1  ;;  %p204_p8 = scmp.lt.s32.totalorder %s7734_s27, 3 }
   0xc   : > { %p7081_p9 = scmp.eq.s32.totalorder %s7802_s28, 0  ;;  %s227_s15 = sshll.u32 %s10684_s5, 4  ;;  %s228_s15 = int_to_ptr.hbm [resolvable:$true] %s227_s15 }
   0xd   : > { %p205_p10 = pnand %p5825_p7, %p204_p8  ;;  %s7736_s16 = smov [#allocation2]  }
   0xe   : > { %s229_s17 = sshll.u32 %s7736_s16, 4  ;;  %s7737_s18 = smov 512   ;;  %s230_s17 = int_to_ptr.vmem [resolvable:$true] %s229_s17 }
   0xf   : > { %p7073_p11 = pneg %p205_p10  ;;  %s7738_s19 = smov 32  }
  0x10   : > { %257 = sbr.rel (%p205_p10) target bundleno = 1273 (0x4f9), region = 48 }
  0x11   : > { %p7074_p12 = pnand %p7081_p9, %p7073_p11 }
  0x13   : > { %7076 = dma.hbm_to_vmem [thread:$0]  (!%p7074_p12), %s228_s15, 24576, %s230_s17, [#allocation3], %s7737_s18, %s7737_s18, %s7738_s19  }
  0x15   : > { %7713 = dma.done.wait (%p7081_p9), [#allocation3], 24576  }
  0x16   : > { %7715 = vsyncadd (%p7081_p9), [#allocation3], 4294942720  ;;  %s5831_s20 = sshll.u32 %s7802_s28, 4  ;;  %v6848_v0 = vld [vmem:[%s10680_s1 + $0x8] sm:$0xff]  ;;  %v6847_v1 = vld [vmem:[%s10680_s1] sm:$0xff]  ;;  %vm342_vm0 = vcmask 261120  }
  0x17   : > { %p291_p13 = scmp.lt.s32.totalorder %s5831_s20, 31  ;;  %373 = vmatpush.bf16.msra.mxu0 %v6848_v0  ;;  %v5935_v17 = vld [vmem:[%s10682_s3 + $0xa8] sm:$0xf]  ;;  %v6871_v18 = vld [vmem:[%s10682_s3 + $0xb0] sm:$0xf0]  ;;  %s287_s9 = sand.u32 1, %s7726_s25  }
  0x18   : > { %v6870_v19 = vld [vmem:[%s10682_s3 + $0xac] sm:$0xf]  ;;  %v5936_v20 = vor.u32 %v6871_v18, %v5935_v17  ;;  %v5937_v21 = vld [vmem:[%s10682_s3 + $0xb4] sm:$0xf0]  ;;  %v5943_v22 = vld [vmem:[%s10682_s3 + $0xb0] sm:$0xf] }
  0x19   : > { %s10867_s20 = smov (!%p291_p13, %s5831_s20), 31  ;;  %v6872_v23 = vld [vmem:[%s10682_s3 + $0xb8] sm:$0xf0]  ;;  %v5940_v24 = vor.u32 %v6870_v19, %v5937_v21  ;;  %v5923_v29 = vld [vmem:[%s10682_s3 + $0x90] sm:$0xf]  ;;  %s5830_s13 = sshll.u32 %s287_s9, 10 }
  0x1a   : > { %s5832_s21 = sshll.u32 %s10867_s20, 3  ;;  %v5944_v25 = vor.u32 %v6872_v23, %v5943_v22  ;;  %608 = vmatpush.bf16.msra.mxu1 %v5936_v20  ;;  %v6868_v30 = vld [vmem:[%s10682_s3 + $0x98] sm:$0xf0]  ;;  %v6867_v31 = vld [vmem:[%s10682_s3 + $0x94] sm:$0xf]  ;;  %s8223_s14 = scalar_lea.vmem [#allocation5], %s5830_s13 }
  0x1b   : > { %s7843_s29 = scalar_lea.vmem %s10679_s0, %s5832_s21  ;;  %374 = vmatpush.bf16.msra.mxu0 %v6847_v1  ;;  %657 = vmatpush.bf16.msra.mxu2 %v5940_v24  ;;  %v5924_v32 = vor.u32 %v6868_v30, %v5923_v29  ;;  %v5925_v33 = vld [vmem:[%s10682_s3 + $0x9c] sm:$0xf0]  ;;  %v5931_v34 = vld [vmem:[%s10682_s3 + $0x98] sm:$0xf]  ;;  %v6869_v35 = vld [vmem:[%s10682_s3 + $0xa0] sm:$0xf0] }
  0x1c   : > { %v298_v2 = vld [vmem:[%s7843_s29] sm:$0xff]  ;;  %v299_v3 = vld [vmem:[%s7843_s29 + $0x8] sm:$0xff]  ;;  %v300_v5 = vld [vmem:[%s7843_s29 + $0x10] sm:$0xff]  ;;  %706 = vmatpush.bf16.msra.mxu3 %v5944_v25  ;;  %v5928_v36 = vor.u32 %v6867_v31, %v5925_v33  ;;  %v5932_v37 = vor.u32 %v6869_v35, %v5931_v34  ;;  %s7066_s22 = sshll.u32 %s7802_s28, 10  ;;  %s5747_s28 = sshll.u32 %s8223_s14, 4  ;;  %s5748_s28 = int_to_ptr.vmem [resolvable:$true] %s5747_s28 }
  0x1d   : > { %v314_v4 = vpack.c.bf16 %v299_v3, %v298_v2  ;;  %v301_v6 = vld [vmem:[%s7843_s29 + $0x18] sm:$0xff]  ;;  %v302_v8 = vld [vmem:[%s7843_s29 + $0x20] sm:$0xff]  ;;  %v303_v9 = vld [vmem:[%s7843_s29 + $0x28] sm:$0xff]  ;;  %s5746_s13 = scalar_lea.hbm %s10686_s7, %s7066_s22  ;;  %s5734_s16 = scalar_lea.sflag [#allocation4], %s287_s9 }
  0x1e   : > { %v315_v7 = vpack.c.bf16 %v301_v6, %v300_v5  ;;  %v316_v10 = vpack.c.bf16 %v303_v9, %v302_v8  ;;  %v304_v11 = vld [vmem:[%s7843_s29 + $0x30] sm:$0xff]  ;;  %v305_v12 = vld [vmem:[%s7843_s29 + $0x38] sm:$0xff]  ;;  %v306_v14 = vld [vmem:[%s7843_s29 + $0x40] sm:$0xff]  ;;  %609 = vmatpush.bf16.msra.mxu1 %v5924_v32  ;;  %s5749_s15 = sshll.u32 %s5746_s13, 4  ;;  %s7688_s21 = scalar_lea.hbm %s10686_s7, 2048  ;;  %s5750_s15 = int_to_ptr.hbm [resolvable:$true] %s5749_s15 }
  0x1f   : > { %5841 = vmatmul.msk.bf16.vlgmr.msra.gmra.mxu0 %vm342_vm0, %v314_v4  ;;  %v317_v13 = vpack.c.bf16 %v305_v12, %v304_v11  ;;  %v307_v15 = vld [vmem:[%s7843_s29 + $0x48] sm:$0xff]  ;;  %v308_v26 = vld [vmem:[%s7843_s29 + $0x50] sm:$0xff]  ;;  %v309_v27 = vld [vmem:[%s7843_s29 + $0x58] sm:$0xff]  ;;  %658 = vmatpush.bf16.msra.mxu2 %v5928_v36  ;;  %s7682_s17 = sshra.s32 %s5750_s15, 4  ;;  %s7683_s17 = int_to_ptr.hbm [resolvable:$true] %s7682_s17 }
  0x20   : > { %v318_v16 = vpack.c.bf16 %v307_v15, %v306_v14  ;;  %v319_v28 = vpack.c.bf16 %v309_v27, %v308_v26  ;;  %v5911_v38 = vld [vmem:[%s10682_s3 + $0x78] sm:$0xf]  ;;  %v6865_v39 = vld [vmem:[%s10682_s3 + $0x80] sm:$0xf0]  ;;  %v6864_v40 = vld [vmem:[%s10682_s3 + $0x7c] sm:$0xf]  ;;  %707 = vmatpush.bf16.msra.mxu3 %v5932_v37  ;;  %p7689_p3 = scmp.lt.s32.totalorder %s7683_s17, %s10686_s7 }
  0x21   : > { %v5912_v41 = vor.u32 %v6865_v39, %v5911_v38  ;;  %v5913_v42 = vld [vmem:[%s10682_s3 + $0x84] sm:$0xf0]  ;;  %v5919_v43 = vld [vmem:[%s10682_s3 + $0x80] sm:$0xf]  ;;  %v6866_v44 = vld [vmem:[%s10682_s3 + $0x88] sm:$0xf0] }
  0x22   : > { %v5916_v45 = vor.u32 %v6864_v40, %v5913_v42  ;;  %v5920_v46 = vor.u32 %v6866_v44, %v5919_v43  ;;  %v5899_v47 = vld [vmem:[%s10682_s3 + $0x60] sm:$0xf]  ;;  %v6862_v48 = vld [vmem:[%s10682_s3 + $0x68] sm:$0xf0]  ;;  %v6861_v49 = vld [vmem:[%s10682_s3 + $0x64] sm:$0xf] }
  0x23   : > { %v5901_v50 = vld [vmem:[%s10682_s3 + $0x6c] sm:$0xf0]  ;;  %v5907_v51 = vld [vmem:[%s10682_s3 + $0x68] sm:$0xf]  ;;  %v6863_v52 = vld [vmem:[%s10682_s3 + $0x70] sm:$0xf0]  ;;  %610 = vmatpush.bf16.msra.mxu1 %v5912_v41  ;;  %v5900_v53 = vor.u32 %v6862_v48, %v5899_v47 }
  0x24   : > { %659 = vmatpush.bf16.msra.mxu2 %v5916_v45  ;;  %708 = vmatpush.bf16.msra.mxu3 %v5920_v46  ;;  %v5904_v54 = vor.u32 %v6861_v49, %v5901_v50  ;;  %v5908_v55 = vor.u32 %v6863_v52, %v5907_v51  ;;  %v310_v56 = vld [vmem:[%s7843_s29 + $0x60] sm:$0xff]  ;;  %v311_v57 = vld [vmem:[%s7843_s29 + $0x68] sm:$0xff]  ;;  %v6859_v59 = vld [vmem:[%s10682_s3 + $0x50] sm:$0xf0]  ;;  %s7684_s18 = scalar_lea.hbm %s7683_s17, 1024 }
  0x25   : > { %v5887_v58 = vld [vmem:[%s10682_s3 + $0x48] sm:$0xf]  ;;  %v6858_v60 = vld [vmem:[%s10682_s3 + $0x4c] sm:$0xf]  ;;  %v5889_v62 = vld [vmem:[%s10682_s3 + $0x54] sm:$0xf0]  ;;  %v320_v1 = vpack.c.bf16 %v311_v57, %v310_v56  ;;  %p7685_p0 = scmp.ne.s32.totalorder %s7683_s17, %s7684_s18  ;;  %p7690_p4 = scmp.lt.s32.totalorder %s7688_s21, %s7684_s18 }
  0x26   : > { %v5888_v61 = vor.u32 %v6859_v59, %v5887_v58  ;;  %v5895_v63 = vld [vmem:[%s10682_s3 + $0x50] sm:$0xf]  ;;  %v6860_v0 = vld [vmem:[%s10682_s3 + $0x58] sm:$0xf0]  ;;  %v5892_v2 = vor.u32 %v6858_v60, %v5889_v62  ;;  %v6855_v6 = vld [vmem:[%s10682_s3 + $0x34] sm:$0xf] }
  0x27   : > { %611 = vmatpush.bf16.msra.mxu1 %v5900_v53  ;;  %v5896_v3 = vor.u32 %v6860_v0, %v5895_v63  ;;  %v5875_v4 = vld [vmem:[%s10682_s3 + $0x30] sm:$0xf]  ;;  %v6856_v5 = vld [vmem:[%s10682_s3 + $0x38] sm:$0xf0]  ;;  %v5877_v8 = vld [vmem:[%s10682_s3 + $0x3c] sm:$0xf0]  ;;  %p7686_p1 = pnand %p7685_p0, %p7819_p5  ;;  %p7691_p7 = por %p7690_p4, %p7689_p3 }
  0x28   : > { %660 = vmatpush.bf16.msra.mxu2 %v5904_v54  ;;  %709 = vmatpush.bf16.msra.mxu3 %v5908_v55  ;;  %v5883_v9 = vld [vmem:[%s10682_s3 + $0x38] sm:$0xf]  ;;  %v5880_v11 = vor.u32 %v6855_v6, %v5877_v8  ;;  %v6853_v14 = vld [vmem:[%s10682_s3 + $0x20] sm:$0xf0]  ;;  %v6852_v15 = vld [vmem:[%s10682_s3 + $0x1c] sm:$0xf] }
  0x29   : > { %v5865_v17 = vld [vmem:[%s10682_s3 + $0x24] sm:$0xf0]  ;;  %v5871_v18 = vld [vmem:[%s10682_s3 + $0x20] sm:$0xf]  ;;  %v6854_v19 = vld [vmem:[%s10682_s3 + $0x28] sm:$0xf0]  ;;  %p7687_p2 = pneg %p7686_p1 }
  0x2a   : > { %v5868_v20 = vor.u32 %v6852_v15, %v5865_v17  ;;  %v5872_v21 = vor.u32 %v6854_v19, %v5871_v18  ;;  %v5851_v22 = vld [vmem:[%s10682_s3] sm:$0xf]  ;;  %v6850_v23 = vld [vmem:[%s10682_s3 + $0x8] sm:$0xf0]  ;;  %v6849_v24 = vld [vmem:[%s10682_s3 + $0x4] sm:$0xf] }
  0x2b   : > { %612 = vmatpush.bf16.msra.mxu1 %v5888_v61  ;;  %v5852_v25 = vor.u32 %v6850_v23, %v5851_v22  ;;  %v5853_v26 = vld [vmem:[%s10682_s3 + $0xc] sm:$0xf0]  ;;  %v5859_v27 = vld [vmem:[%s10682_s3 + $0x8] sm:$0xf]  ;;  %v313_v32 = vld [vmem:[%s7843_s29 + $0x78] sm:$0xff]  ;;  %p7692_p8 = pnand %p7691_p7, %p7687_p2 }
  0x2c   : > { %661 = vmatpush.bf16.msra.mxu2 %v5892_v2  ;;  %710 = vmatpush.bf16.msra.mxu3 %v5896_v3  ;;  %v5856_v29 = vor.u32 %v6849_v24, %v5853_v26  ;;  %v312_v31 = vld [vmem:[%s7843_s29 + $0x70] sm:$0xff]  ;;  %v8022_v35 = vld [vmem:[%s10681_s2] ss:$0 sm:$0xff]  ;;  %v6929_v39 = vld [vmem:[#allocation2 + $0x1c4] sm:$0xf] }
  0x2d   : > { %v321_v33 = vpack.c.bf16 %v313_v32, %v312_v31  ;;  %v6683_v36 = vld [vmem:[#allocation2 + $0x5c0] sm:$0xf]  ;;  %v6173_v40 = vld [vmem:[#allocation2 + $0x1e0] sm:$0xf0] }
  0x2e   : > { %v7061_v37 = vld [vmem:[#allocation2 + $0x5dc] sm:$0xf0]  ;;  %v6176_v42 = vor.u32 %v6929_v39, %v6173_v40  ;;  %v6921_v58 = vld [vmem:[#allocation2 + $0x184] sm:$0xf] }
  0x2f   : > { %5842 = vmatmul.msk.bf16.gmra.mxu0 %vm342_vm0, %v315_v7  ;;  %v5876_v7 = vor.u32 %v6856_v5, %v5875_v4  ;;  %v6684_v38 = vor.u32 %v7061_v37, %v6683_v36  ;;  %v6427_v41 = vld [vmem:[#allocation2 + $0x3c0] sm:$0xf]  ;;  %v6141_v59 = vld [vmem:[#allocation2 + $0x1a0] sm:$0xf0] }
  0x30   : > { %662 = vmatpush.bf16.msra.mxu2 %v5880_v11  ;;  %v6997_v43 = vld [vmem:[#allocation2 + $0x3dc] sm:$0xf0]  ;;  %v6144_v61 = vor.u32 %v6921_v58, %v6141_v59  ;;  %v6905_v32 = vld [vmem:[#allocation2 + $0x104] sm:$0xf] }
  0x31   : > { %613 = vmatpush.bf16.msra.mxu1 %v5876_v7  ;;  %v6428_v44 = vor.u32 %v6997_v43, %v6427_v41  ;;  %v6171_v50 = vld [vmem:[#allocation2 + $0x1c0] sm:$0xf] }
  0x32   : > { %v6933_v51 = vld [vmem:[#allocation2 + $0x1dc] sm:$0xf0] }
  0x33   : > { %v6172_v52 = vor.u32 %v6933_v51, %v6171_v50  ;;  %v6651_v55 = vld [vmem:[#allocation2 + $0x580] sm:$0xf] }
  0x34   : > { %663 = vmatpush.bf16.msra.mxu2 %v5868_v20  ;;  %v7053_v56 = vld [vmem:[#allocation2 + $0x59c] sm:$0xf0] }
  0x35   : > { %1997 = vmatpush.bf16.msrb.mxu0 %v6172_v52  ;;  %v6652_v57 = vor.u32 %v7053_v56, %v6651_v55  ;;  %v6395_v60 = vld [vmem:[#allocation2 + $0x380] sm:$0xf]  ;;  %v6897_v52 = vld [vmem:[#allocation2 + $0xc4] sm:$0xf] }
  0x36   : > { %v6989_v62 = vld [vmem:[#allocation2 + $0x39c] sm:$0xf0] }
  0x37   : > { %v6396_v63 = vor.u32 %v6989_v62, %v6395_v60  ;;  %v6139_v5 = vld [vmem:[#allocation2 + $0x180] sm:$0xf] }
  0x38   : > { %664 = vmatpush.bf16.msra.mxu2 %v5856_v29  ;;  %v6925_v6 = vld [vmem:[#allocation2 + $0x19c] sm:$0xf0] }
  0x39   : > { %v6140_v7 = vor.u32 %v6925_v6, %v6139_v5  ;;  %v7045_v11 = vld [vmem:[#allocation2 + $0x55c] sm:$0xf0] }
  0x3a   : > { %v6363_v15 = vld [vmem:[#allocation2 + $0x340] sm:$0xf] }
  0x3b   : > { %1998 = vmatpush.bf16.msrb.mxu0 %v6140_v7  ;;  %v6981_v17 = vld [vmem:[#allocation2 + $0x35c] sm:$0xf0]  ;;  %v6889_v7 = vld [vmem:[#allocation2 + $0x84] sm:$0xf] }
  0x3c   : > { %2095 = vmatpush.bf16.msrb.mxu2 %v6684_v38  ;;  %v6364_v18 = vor.u32 %v6981_v17, %v6363_v15  ;;  %v6107_v24 = vld [vmem:[#allocation2 + $0x140] sm:$0xf] }
  0x3d   : > { %v6587_v29 = vld [vmem:[#allocation2 + $0x500] sm:$0xf] }
  0x3e   : > { %v6973_v37 = vld [vmem:[#allocation2 + $0x31c] sm:$0xf0] }
  0x3f   : > { %5843 = vmatmul.msk.bf16.gmra.mxu0 %vm342_vm0, %v316_v10  ;;  %v6857_v10 = vld [vmem:[%s10682_s3 + $0x40] sm:$0xf0]  ;;  %v7029_v50 = vld [vmem:[#allocation2 + $0x4dc] sm:$0xf0] }
  0x40   : > { %v5884_v12 = vor.u32 %v6857_v10, %v5883_v9  ;;  %2096 = vmatpush.bf16.msrb.mxu2 %v6652_v57  ;;  %v6619_v10 = vld [vmem:[#allocation2 + $0x540] sm:$0xf] }
  0x41   : > { %v6965_v56 = vld [vmem:[#allocation2 + $0x2dc] sm:$0xf0] }
  0x42   : > { %711 = vmatpush.bf16.msra.mxu3 %v5884_v12  ;;  %v6620_v12 = vor.u32 %v7045_v11, %v6619_v10  ;;  %v7021_v5 = vld [vmem:[#allocation2 + $0x49c] sm:$0xf0] }
  0x43   : > { %v6957_v11 = vld [vmem:[#allocation2 + $0x29c] sm:$0xf0] }
  0x44   : > { %2097 = vmatpush.bf16.msrb.mxu2 %v6620_v12 }
  0x46   : > { %712 = vmatpush.bf16.msra.mxu3 %v5872_v21 }
  0x4f   : > { %5844 = vmatmul.msk.bf16.gmra.mxu0 %vm342_vm0, %v317_v13  ;;  %v5863_v13 = vld [vmem:[%s10682_s3 + $0x18] sm:$0xf] }
  0x5f   : > { %5845 = vmatmul.msk.bf16.gmra.mxu0 %vm342_vm0, %v318_v16  ;;  %v5864_v16 = vor.u32 %v6853_v14, %v5863_v13  ;;  %v6913_v13 = vld [vmem:[#allocation2 + $0x144] sm:$0xf] }
  0x60   : > { %v6109_v14 = vld [vmem:[#allocation2 + $0x160] sm:$0xf0] }
  0x61   : > { %614 = vmatpush.bf16.msra.mxu1 %v5864_v16  ;;  %v6112_v16 = vor.u32 %v6913_v13, %v6109_v14 }
  0x65   : > { %615 = vmatpush.bf16.msra.mxu1 %v5852_v25  ;;  %v6917_v25 = vld [vmem:[#allocation2 + $0x15c] sm:$0xf0] }
  0x66   : > { %v6108_v26 = vor.u32 %v6917_v25, %v6107_v24  ;;  %v7013_v24 = vld [vmem:[#allocation2 + $0x45c] sm:$0xf0]  ;;  %v6881_v25 = vld [vmem:[#allocation2 + $0x44] sm:$0xf] }
  0x68   : > { %1999 = vmatpush.bf16.msrb.mxu0 %v6108_v26 }
  0x69   : > { %2046 = vmatpush.bf16.msrb.mxu1 %v6428_v44  ;;  %v6075_v44 = vld [vmem:[#allocation2 + $0x100] sm:$0xf] }
  0x6d   : > { %2047 = vmatpush.bf16.msrb.mxu1 %v6396_v63  ;;  %v6043_v63 = vld [vmem:[#allocation2 + $0xc0] sm:$0xf] }
  0x6f   : > { %5846 = vmatmul.msk.bf16.gmra.mxu0 %vm342_vm0, %v319_v28  ;;  %v6851_v28 = vld [vmem:[%s10682_s3 + $0x10] sm:$0xf0] }
  0x70   : > { %v5860_v30 = vor.u32 %v6851_v28, %v5859_v27 }
  0x71   : > { %2048 = vmatpush.bf16.msrb.mxu1 %v6364_v18  ;;  %v6011_v18 = vld [vmem:[#allocation2 + $0x80] sm:$0xf] }
  0x72   : > { %713 = vmatpush.bf16.msra.mxu3 %v5860_v30  ;;  %v7037_v30 = vld [vmem:[#allocation2 + $0x51c] sm:$0xf0] }
  0x73   : > { %v6588_v31 = vor.u32 %v7037_v30, %v6587_v29  ;;  %v6949_v29 = vld [vmem:[#allocation2 + $0x25c] sm:$0xf0] }
  0x75   : > { %2098 = vmatpush.bf16.msrb.mxu2 %v6588_v31 }
  0x76   : > { %2144 = vmatpush.bf16.msrb.mxu3 %v6176_v42 }
  0x7a   : > { %2145 = vmatpush.bf16.msrb.mxu3 %v6144_v61 }
  0x7e   : > { %2146 = vmatpush.bf16.msrb.mxu3 %v6112_v16 }
  0x7f   : > { %5847 = vmatmul.msk.bf16.gmra.mxu0 %vm342_vm0, %v320_v1 }
  0x8f   : > { %5848 = vmatmul.msk.bf16.gmra.mxu0 %vm342_vm0, %v321_v33  ;;  %v6077_v33 = vld [vmem:[#allocation2 + $0x120] sm:$0xf0] }
  0x90   : > { %v6080_v36 = vor.u32 %v6905_v32, %v6077_v33  ;;  %v5979_v32 = vld [vmem:[#allocation2 + $0x40] sm:$0xf] }
  0x91   : > { %v6885_v33 = vld [vmem:[#allocation2 + $0x5c] sm:$0xf0] }
  0x92   : > { %2147 = vmatpush.bf16.msrb.mxu3 %v6080_v36 }
  0x9c   : > { %v376_v34 = vpop.f32.mrf.mxu0 }
  0x9d   : > { %v377_v45 = vadd.f32 %v8022_v35, %v376_v34  ;;  %v6331_v34 = vld [vmem:[#allocation2 + $0x300] sm:$0xf] }
  0x9e   : > { %v6332_v38 = vor.u32 %v6973_v37, %v6331_v34  ;;  %v5980_v34 = vor.u32 %v6885_v33, %v5979_v32 }
  0x9f   : > { %v416_v48 = vmax.f32 %v377_v45, 0.0  ;;  %v6909_v45 = vld [vmem:[#allocation2 + $0x11c] sm:$0xf0] }
  0xa0   : > { %2049 = vmatpush.bf16.msrb.mxu1 %v6332_v38 }
  0xa4   : > { %v378_v46 = vpop.f32.mrf.mxu0 }
  0xa5   : > { %v379_v47 = vadd.f32 %v8022_v35, %v378_v46  ;;  %v6076_v46 = vor.u32 %v6909_v45, %v6075_v44 }
  0xa7   : > { %v417_v49 = vmax.f32 %v379_v47, 0.0  ;;  %2000 = vmatpush.bf16.msrb.mxu0 %v6076_v46  ;;  %v6873_v46 = vld [vmem:[#allocation2 + $0x4] sm:$0xf] }
  0xa9   : > { %v432_v53 = vpack.c.bf16 %v417_v49, %v416_v48  ;;  %v6555_v49 = vld [vmem:[#allocation2 + $0x4c0] sm:$0xf] }
  0xaa   : > { %v6556_v51 = vor.u32 %v7029_v50, %v6555_v49 }
  0xab   : > { %616 = vmatmul.bf16.vlgmr.msra.gmra.mxu1 %v432_v53  ;;  %665 = vmatmul.bf16.vlgmr.msra.gmra.mxu2 %v432_v53 }
  0xac   : > { %714 = vmatmul.bf16.vlgmr.msra.gmra.mxu3 %v432_v53  ;;  %v381_v54 = vpop.f32.mrf.mxu0  ;;  %v6045_v53 = vld [vmem:[#allocation2 + $0xe0] sm:$0xf0]  ;;  %2099 = vmatpush.bf16.msrb.mxu2 %v6556_v51  ;;  %v6877_v51 = vld [vmem:[#allocation2 + $0x1c] sm:$0xf0] }
  0xad   : > { %v382_v0 = vadd.f32 %v8022_v35, %v381_v54  ;;  %v6299_v54 = vld [vmem:[#allocation2 + $0x2c0] sm:$0xf]  ;;  %v6048_v55 = vor.u32 %v6897_v52, %v6045_v53 }
  0xae   : > { %v6300_v57 = vor.u32 %v6965_v56, %v6299_v54  ;;  %v6941_v56 = vld [vmem:[#allocation2 + $0x21c] sm:$0xf0] }
  0xaf   : > { %v418_v3 = vmax.f32 %v382_v0, 0.0  ;;  %2148 = vmatpush.bf16.msrb.mxu3 %v6048_v55  ;;  %v6901_v0 = vld [vmem:[#allocation2 + $0xdc] sm:$0xf0] }
  0xb0   : > { %2050 = vmatpush.bf16.msrb.mxu1 %v6300_v57  ;;  %v6203_v55 = vld [vmem:[#allocation2 + $0x200] sm:$0xf] }
  0xb1   : > { %v6204_v57 = vor.u32 %v6941_v56, %v6203_v55  ;;  %v6371_v55 = vld [vmem:[#allocation2 + $0x348] sm:$0xf] }
  0xb2   : > { %v6982_v56 = vld [vmem:[#allocation2 + $0x364] sm:$0xf0] }
  0xb4   : > { %v383_v1 = vpop.f32.mrf.mxu0 }
  0xb5   : > { %v384_v2 = vadd.f32 %v8022_v35, %v383_v1  ;;  %v6044_v1 = vor.u32 %v6901_v0, %v6043_v63  ;;  %v6435_v0 = vld [vmem:[#allocation2 + $0x3c8] sm:$0xf] }
  0xb7   : > { %v419_v4 = vmax.f32 %v384_v2, 0.0  ;;  %2001 = vmatpush.bf16.msrb.mxu0 %v6044_v1  ;;  %v6998_v1 = vld [vmem:[#allocation2 + $0x3e4] sm:$0xf0] }
  0xb9   : > { %v433_v8 = vpack.c.bf16 %v419_v4, %v418_v3  ;;  %v6523_v4 = vld [vmem:[#allocation2 + $0x480] sm:$0xf] }
  0xba   : > { %v6524_v6 = vor.u32 %v7021_v5, %v6523_v4  ;;  %v6993_v4 = vld [vmem:[#allocation2 + $0x3c4] sm:$0xf] }
  0xbb   : > { %621 = vmatmul.bf16.gmra.mxu1 %v433_v8  ;;  %670 = vmatmul.bf16.gmra.mxu2 %v433_v8 }
  0xbc   : > { %719 = vmatmul.bf16.gmra.mxu3 %v433_v8  ;;  %v386_v9 = vpop.f32.mrf.mxu0  ;;  %v6013_v8 = vld [vmem:[#allocation2 + $0xa0] sm:$0xf0]  ;;  %2100 = vmatpush.bf16.msrb.mxu2 %v6524_v6 }
  0xbd   : > { %v387_v19 = vadd.f32 %v8022_v35, %v386_v9  ;;  %v6267_v9 = vld [vmem:[#allocation2 + $0x280] sm:$0xf]  ;;  %v6016_v10 = vor.u32 %v6889_v7, %v6013_v8  ;;  %v6429_v6 = vld [vmem:[#allocation2 + $0x3e0] sm:$0xf0] }
  0xbe   : > { %v6268_v12 = vor.u32 %v6957_v11, %v6267_v9  ;;  %v6432_v7 = vor.u32 %v6993_v4, %v6429_v6  ;;  %v472_v8 = vld [vmem:[%s10683_s4] sm:$0x7] }
  0xbf   : > { %v420_v22 = vmax.f32 %v387_v19, 0.0  ;;  %2149 = vmatpush.bf16.msrb.mxu3 %v6016_v10  ;;  %v6893_v19 = vld [vmem:[#allocation2 + $0x9c] sm:$0xf0]  ;;  %v8043_v10 = vperm.slane %v472_v8, 0 }
  0xc0   : > { %2051 = vmatpush.bf16.msrb.mxu1 %v6268_v12  ;;  %v6147_v12 = vld [vmem:[#allocation2 + $0x188] sm:$0xf] }
  0xc4   : > { %v388_v20 = vpop.f32.mrf.mxu0 }
  0xc5   : > { %v389_v21 = vadd.f32 %v8022_v35, %v388_v20  ;;  %v6012_v20 = vor.u32 %v6893_v19, %v6011_v18  ;;  %v8046_v18 = vperm.slane %v472_v8, 1 }
  0xc7   : > { %v421_v23 = vmax.f32 %v389_v21, 0.0  ;;  %2002 = vmatpush.bf16.msrb.mxu0 %v6012_v20  ;;  %v8049_v20 = vperm.slane %v472_v8, 2 }
  0xc9   : > { %v434_v27 = vpack.c.bf16 %v421_v23, %v420_v22  ;;  %v6491_v23 = vld [vmem:[#allocation2 + $0x440] sm:$0xf] }
  0xca   : > { %v6492_v26 = vor.u32 %v7013_v24, %v6491_v23 }
  0xcb   : > { %626 = vmatmul.bf16.gmra.mxu1 %v434_v27  ;;  %675 = vmatmul.bf16.gmra.mxu2 %v434_v27 }
  0xcc   : > { %724 = vmatmul.bf16.gmra.mxu3 %v434_v27  ;;  %v391_v28 = vpop.f32.mrf.mxu0  ;;  %v5981_v27 = vld [vmem:[#allocation2 + $0x60] sm:$0xf0]  ;;  %2101 = vmatpush.bf16.msrb.mxu2 %v6492_v26 }
  0xcd   : > { %v392_v39 = vadd.f32 %v8022_v35, %v391_v28  ;;  %v6235_v28 = vld [vmem:[#allocation2 + $0x240] sm:$0xf]  ;;  %v5984_v30 = vor.u32 %v6881_v25, %v5981_v27  ;;  %2003 = vmatpush.bf16.msrb.mxu0 %v5980_v34  ;;  %v6397_v34 = vld [vmem:[#allocation2 + $0x3a0] sm:$0xf0] }
  0xce   : > { %v6236_v31 = vor.u32 %v6949_v29, %v6235_v28  ;;  %v7049_v28 = vld [vmem:[#allocation2 + $0x584] sm:$0xf] }
  0xcf   : > { %v422_v42 = vmax.f32 %v392_v39, 0.0  ;;  %2150 = vmatpush.bf16.msrb.mxu3 %v5984_v30  ;;  %v6653_v29 = vld [vmem:[#allocation2 + $0x5a0] sm:$0xf0] }
  0xd0   : > { %2052 = vmatpush.bf16.msrb.mxu1 %v6236_v31  ;;  %v6985_v30 = vld [vmem:[#allocation2 + $0x384] sm:$0xf]  ;;  %v6656_v33 = vor.u32 %v7049_v28, %v6653_v29  ;;  %v6974_v28 = vld [vmem:[#allocation2 + $0x324] sm:$0xf0] }
  0xd4   : > { %v393_v40 = vpop.f32.mrf.mxu0  ;;  %2053 = vmatpush.bf16.msrb.mxu1 %v6204_v57 }
  0xd5   : > { %v394_v41 = vadd.f32 %v8022_v35, %v393_v40 }
  0xd7   : > { %v423_v43 = vmax.f32 %v394_v41, 0.0 }
  0xd9   : > { %v435_v47 = vpack.c.bf16 %v423_v43, %v422_v42  ;;  %v6459_v42 = vld [vmem:[#allocation2 + $0x400] sm:$0xf] }
  0xda   : > { %v7005_v43 = vld [vmem:[#allocation2 + $0x41c] sm:$0xf0] }
  0xdb   : > { %631 = vmatmul.bf16.gmra.mxu1 %v435_v47  ;;  %680 = vmatmul.bf16.gmra.mxu2 %v435_v47  ;;  %v6460_v45 = vor.u32 %v7005_v43, %v6459_v42 }
  0xdc   : > { %729 = vmatmul.bf16.gmra.mxu3 %v435_v47  ;;  %v396_v48 = vpop.f32.mrf.mxu0  ;;  %v5949_v47 = vld [vmem:[#allocation2 + $0x20] sm:$0xf0] }
  0xdd   : > { %v397_v58 = vadd.f32 %v8022_v35, %v396_v48  ;;  %2102 = vmatpush.bf16.msrb.mxu2 %v6460_v45  ;;  %v5947_v48 = vld [vmem:[#allocation2] sm:$0xf]  ;;  %v5952_v50 = vor.u32 %v6873_v46, %v5949_v47 }
  0xde   : > { %v5948_v53 = vor.u32 %v6877_v51, %v5947_v48  ;;  %v6115_v48 = vld [vmem:[#allocation2 + $0x148] sm:$0xf] }
  0xdf   : > { %v424_v61 = vmax.f32 %v397_v58, 0.0  ;;  %2151 = vmatpush.bf16.msrb.mxu3 %v5952_v50 }
  0xe0   : > { %2004 = vmatpush.bf16.msrb.mxu0 %v5948_v53 }
  0xe4   : > { %v398_v59 = vpop.f32.mrf.mxu0  ;;  %2193 = vmatpush.bf16.msra.mxu0 %v6432_v7 }
  0xe5   : > { %v399_v60 = vadd.f32 %v8022_v35, %v398_v59 }
  0xe7   : > { %v425_v62 = vmax.f32 %v399_v60, 0.0 }
  0xe9   : > { %v436_v2 = vpack.c.bf16 %v425_v62, %v424_v61  ;;  %v6179_v61 = vld [vmem:[#allocation2 + $0x1c8] sm:$0xf] }
  0xea   : > { %v6934_v62 = vld [vmem:[#allocation2 + $0x1e4] sm:$0xf0] }
  0xeb   : > { %636 = vmatmul.bf16.gmra.mxu1 %v436_v2  ;;  %685 = vmatmul.bf16.gmra.mxu2 %v436_v2  ;;  %v6180_v63 = vor.u32 %v6934_v62, %v6179_v61  ;;  %v7041_v62 = vld [vmem:[#allocation2 + $0x544] sm:$0xf] }
  0xec   : > { %734 = vmatmul.bf16.gmra.mxu3 %v436_v2  ;;  %v401_v3 = vpop.f32.mrf.mxu0  ;;  %v6436_v2 = vor.u32 %v6998_v1, %v6435_v0  ;;  %v6977_v0 = vld [vmem:[#allocation2 + $0x344] sm:$0xf] }
  0xed   : > { %v402_v13 = vadd.f32 %v8022_v35, %v401_v3  ;;  %2291 = vmatpush.bf16.msra.mxu2 %v6180_v63  ;;  %v6685_v3 = vld [vmem:[#allocation2 + $0x5e0] sm:$0xf0] }
  0xee   : > { %2340 = vmatpush.bf16.msra.mxu3 %v6436_v2  ;;  %v6621_v63 = vld [vmem:[#allocation2 + $0x560] sm:$0xf0] }
  0xef   : > { %v426_v16 = vmax.f32 %v402_v13, 0.0  ;;  %v6926_v13 = vld [vmem:[#allocation2 + $0x1a4] sm:$0xf0] }
  0xf4   : > { %v403_v14 = vpop.f32.mrf.mxu0 }
  0xf5   : > { %v404_v15 = vadd.f32 %v8022_v35, %v403_v14 }
  0xf7   : > { %v427_v17 = vmax.f32 %v404_v15, 0.0 }
  0xf9   : > { %v437_v21 = vpack.c.bf16 %v427_v17, %v426_v16  ;;  %v6148_v16 = vor.u32 %v6926_v13, %v6147_v12 }
  0xfb   : > { %641 = vmatmul.bf16.gmra.mxu1 %v437_v21  ;;  %690 = vmatmul.bf16.gmra.mxu2 %v437_v21 }
  0xfc   : > { %739 = vmatmul.bf16.gmra.mxu3 %v437_v21  ;;  %v406_v22 = vpop.f32.mrf.mxu0  ;;  %2292 = vmatpush.bf16.msra.mxu2 %v6148_v16  ;;  %v6403_v21 = vld [vmem:[#allocation2 + $0x388] sm:$0xf] }
  0xfd   : > { %v407_v36 = vadd.f32 %v8022_v35, %v406_v22  ;;  %v6990_v22 = vld [vmem:[#allocation2 + $0x3a4] sm:$0xf0] }
  0xfe   : > { %v6404_v25 = vor.u32 %v6990_v22, %v6403_v21 }
  0xff   : > { %v428_v39 = vmax.f32 %v407_v36, 0.0 }
 0x100   : > { %2341 = vmatpush.bf16.msra.mxu3 %v6404_v25 }
 0x104   : > { %v408_v37 = vpop.f32.mrf.mxu0 }
 0x105   : > { %v409_v38 = vadd.f32 %v8022_v35, %v408_v37 }
 0x107   : > { %v429_v40 = vmax.f32 %v409_v38, 0.0  ;;  %v6400_v38 = vor.u32 %v6985_v30, %v6397_v34  ;;  %v7033_v34 = vld [vmem:[#allocation2 + $0x504] sm:$0xf] }
 0x109   : > { %v438_v41 = vpack.c.bf16 %v429_v40, %v428_v39  ;;  %2194 = vmatpush.bf16.msra.mxu0 %v6400_v38 }
 0x10b   : > { %646 = vmatmul.bf16.gmra.mxu1 %v438_v41  ;;  %695 = vmatmul.bf16.gmra.mxu2 %v438_v41 }
 0x10c   : > { %744 = vmatmul.bf16.gmra.mxu3 %v438_v41  ;;  %v411_v44 = vpop.f32.mrf.mxu0 }
 0x10d   : > { %v412_v49 = vadd.f32 %v8022_v35, %v411_v44 }
 0x10f   : > { %v430_v58 = vmax.f32 %v412_v49, 0.0  ;;  %v6918_v49 = vld [vmem:[#allocation2 + $0x164] sm:$0xf0] }
 0x114   : > { %v413_v52 = vpop.f32.mrf.mxu0 }
 0x115   : > { %v414_v54 = vadd.f32 %v8022_v35, %v413_v52  ;;  %v7057_v35 = vld [vmem:[#allocation2 + $0x5c4] sm:$0xf]  ;;  %v6116_v52 = vor.u32 %v6918_v49, %v6115_v48 }
 0x116   : > { %v6688_v5 = vor.u32 %v7057_v35, %v6685_v3  ;;  %v6624_v35 = vor.u32 %v7041_v62, %v6621_v63  ;;  %v6365_v3 = vld [vmem:[#allocation2 + $0x360] sm:$0xf0] }
 0x117   : > { %v431_v59 = vmax.f32 %v414_v54, 0.0  ;;  %2293 = vmatpush.bf16.msra.mxu2 %v6116_v52  ;;  %v6368_v6 = vor.u32 %v6977_v0, %v6365_v3  ;;  %v6307_v0 = vld [vmem:[#allocation2 + $0x2c8] sm:$0xf] }
 0x118   : > { %2242 = vmatpush.bf16.msra.mxu1 %v6688_v5 }
 0x119   : > { %v439_v60 = vpack.c.bf16 %v431_v59, %v430_v58  ;;  %v6372_v59 = vor.u32 %v6982_v56, %v6371_v55  ;;  %2195 = vmatpush.bf16.msra.mxu0 %v6368_v6  ;;  %v6051_v56 = vld [vmem:[#allocation2 + $0xc8] sm:$0xf]  ;;  %v7025_v6 = vld [vmem:[#allocation2 + $0x4c4] sm:$0xf] }
 0x11b   : > { %651 = vmatmul.bf16.gmra.mxu1 %v439_v60  ;;  %700 = vmatmul.bf16.gmra.mxu2 %v439_v60 }
 0x11c   : > { %749 = vmatmul.bf16.gmra.mxu3 %v439_v60  ;;  %2243 = vmatpush.bf16.msra.mxu1 %v6656_v33 }
 0x11d   : > { %2342 = vmatpush.bf16.msra.mxu3 %v6372_v59 }
 0x120   : > { %2244 = vmatpush.bf16.msra.mxu1 %v6624_v35 }
 0x128   : > { %v617_v9 = vpop.f32.mrf.mxu1 }
 0x129   : > { %v618_v14 = vadd.f32 %v617_v9, %v8043_v10 }
 0x12b   : > { %v755_v23 = vmax.f32 %v618_v14, 0.0 }
 0x12e   : > { %v666_v11 = vpop.f32.mrf.mxu2 }
 0x12f   : > { %v715_v15 = vpop.f32.mrf.mxu3  ;;  %v667_v26 = vadd.f32 %v666_v11, %v8046_v18 }
 0x130   : > { %v619_v17 = vpop.f32.mrf.mxu1  ;;  %v716_v31 = vadd.f32 %v715_v15, %v8049_v20 }
 0x131   : > { %v620_v19 = vadd.f32 %v619_v17, %v8043_v10  ;;  %v756_v41 = vmax.f32 %v667_v26, 0.0  ;;  %v6083_v17 = vld [vmem:[#allocation2 + $0x108] sm:$0xf] }
 0x132   : > { %v757_v43 = vmax.f32 %v716_v31, 0.0  ;;  %v6339_v26 = vld [vmem:[#allocation2 + $0x308] sm:$0xf] }
 0x133   : > { %v758_v24 = vmax.f32 %v620_v19, 0.0  ;;  %v6910_v19 = vld [vmem:[#allocation2 + $0x124] sm:$0xf0]  ;;  %v6340_v31 = vor.u32 %v6974_v28, %v6339_v26 }
 0x135   : > { %v8052_v27 = vpack.c.bf16 %v758_v24, %v755_v23  ;;  %v6084_v23 = vor.u32 %v6910_v19, %v6083_v17  ;;  %2343 = vmatpush.bf16.msra.mxu3 %v6340_v31  ;;  %v6019_v31 = vld [vmem:[#allocation2 + $0x88] sm:$0xf] }
 0x136   : > { %v668_v32 = vpop.f32.mrf.mxu2 }
 0x137   : > { %v669_v36 = vadd.f32 %v668_v32, %v8046_v18  ;;  %v717_v37 = vpop.f32.mrf.mxu3  ;;  %2005 = vmatmul.bf16.vlgmr.msrb.gmra.mxu0 %v8052_v27  ;;  %2152 = vmatmul.bf16.vlgmr.msrb.gmra.mxu3 %v8052_v27 }
 0x138   : > { %v718_v39 = vadd.f32 %v717_v37, %v8049_v20  ;;  %v622_v40 = vpop.f32.mrf.mxu1  ;;  %2294 = vmatpush.bf16.msra.mxu2 %v6084_v23  ;;  %v6969_v37 = vld [vmem:[#allocation2 + $0x304] sm:$0xf] }
 0x139   : > { %v759_v42 = vmax.f32 %v669_v36, 0.0  ;;  %v623_v50 = vadd.f32 %v622_v40, %v8043_v10  ;;  %v6589_v36 = vld [vmem:[#allocation2 + $0x520] sm:$0xf0] }
 0x13a   : > { %v760_v44 = vmax.f32 %v718_v39, 0.0  ;;  %v6592_v40 = vor.u32 %v7033_v34, %v6589_v36 }
 0x13b   : > { %v8059_v45 = vpack.c.bf16 %v759_v42, %v756_v41  ;;  %v761_v57 = vmax.f32 %v623_v50, 0.0  ;;  %v6333_v41 = vld [vmem:[#allocation2 + $0x320] sm:$0xf0] }
 0x13c   : > { %v8061_v46 = vpack.c.bf16 %v760_v44, %v757_v43  ;;  %v6336_v44 = vor.u32 %v6969_v37, %v6333_v41  ;;  %2245 = vmatpush.bf16.msra.mxu1 %v6592_v40  ;;  %v6275_v40 = vld [vmem:[#allocation2 + $0x288] sm:$0xf] }
 0x13d   : > { %10713 = vst [vmem:[#allocation8_spill] sm:$0xff] %v8059_v45  ;;  %2054 = vmatmul.bf16.vlgmr.msrb.gmra.mxu1 %v8059_v45  ;;  %v6958_v41 = vld [vmem:[#allocation2 + $0x2a4] sm:$0xf0] }
 0x13e   : > { %10714 = vst [vmem:[#allocation9_spill] sm:$0xff] %v8061_v46  ;;  %2103 = vmatmul.bf16.vlgmr.msrb.gmra.mxu2 %v8061_v46  ;;  %v671_v47 = vpop.f32.mrf.mxu2  ;;  %2196 = vmatpush.bf16.msra.mxu0 %v6336_v44  ;;  %v6276_v44 = vor.u32 %v6958_v41, %v6275_v40 }
 0x13f   : > { %v720_v51 = vpop.f32.mrf.mxu3  ;;  %v672_v60 = vadd.f32 %v671_v47, %v8046_v18 }
 0x140   : > { %v624_v53 = vpop.f32.mrf.mxu1  ;;  %v721_v1 = vadd.f32 %v720_v51, %v8049_v20 }
 0x141   : > { %v625_v54 = vadd.f32 %v624_v53, %v8043_v10  ;;  %v762_v9 = vmax.f32 %v672_v60, 0.0 }
 0x142   : > { %v763_v12 = vmax.f32 %v721_v1, 0.0  ;;  %v6966_v1 = vld [vmem:[#allocation2 + $0x2e4] sm:$0xf0] }
 0x143   : > { %v764_v58 = vmax.f32 %v625_v54, 0.0  ;;  %v6308_v3 = vor.u32 %v6966_v1, %v6307_v0 }
 0x145   : > { %v8068_v61 = vpack.c.bf16 %v764_v58, %v761_v57  ;;  %v6902_v57 = vld [vmem:[#allocation2 + $0xe4] sm:$0xf0]  ;;  %2344 = vmatpush.bf16.msra.mxu3 %v6308_v3 }
 0x146   : > { %v673_v2 = vpop.f32.mrf.mxu2  ;;  %v6052_v60 = vor.u32 %v6902_v57, %v6051_v56  ;;  %v6269_v57 = vld [vmem:[#allocation2 + $0x2a0] sm:$0xf0] }
 0x147   : > { %10715 = vst [vmem:[#allocation10_spill] sm:$0xff] %v8068_v61  ;;  %v674_v4 = vadd.f32 %v673_v2, %v8046_v18  ;;  %v722_v5 = vpop.f32.mrf.mxu3  ;;  %2010 = vmatmul.bf16.gmra.mxu0 %v8068_v61  ;;  %2157 = vmatmul.bf16.gmra.mxu3 %v8068_v61 }
 0x148   : > { %v723_v7 = vadd.f32 %v722_v5, %v8049_v20  ;;  %v627_v8 = vpop.f32.mrf.mxu1  ;;  %2295 = vmatpush.bf16.msra.mxu2 %v6052_v60 }
 0x149   : > { %v765_v11 = vmax.f32 %v674_v4, 0.0  ;;  %v628_v21 = vadd.f32 %v627_v8, %v8043_v10  ;;  %v6961_v8 = vld [vmem:[#allocation2 + $0x2c4] sm:$0xf]  ;;  %2345 = vmatpush.bf16.msra.mxu3 %v6276_v44 }
 0x14a   : > { %v766_v13 = vmax.f32 %v723_v7, 0.0  ;;  %v6557_v7 = vld [vmem:[#allocation2 + $0x4e0] sm:$0xf0] }
 0x14b   : > { %v8075_v14 = vpack.c.bf16 %v765_v11, %v762_v9  ;;  %v767_v29 = vmax.f32 %v628_v21, 0.0 }
 0x14c   : > { %v8077_v15 = vpack.c.bf16 %v766_v13, %v763_v12  ;;  %v6560_v12 = vor.u32 %v7025_v6, %v6557_v7  ;;  %v6301_v13 = vld [vmem:[#allocation2 + $0x2e0] sm:$0xf0]  ;;  %v5987_v7 = vld [vmem:[#allocation2 + $0x48] sm:$0xf] }
 0x14d   : > { %10716 = vst [vmem:[#allocation11_spill] sm:$0xff] %v8075_v14  ;;  %2059 = vmatmul.bf16.gmra.mxu1 %v8075_v14  ;;  %v6304_v19 = vor.u32 %v6961_v8, %v6301_v13  ;;  %v6886_v8 = vld [vmem:[#allocation2 + $0x64] sm:$0xf0] }
 0x14e   : > { %10717 = vst [vmem:[#allocation12_spill] sm:$0xff] %v8077_v15  ;;  %2108 = vmatmul.bf16.gmra.mxu2 %v8077_v15  ;;  %v676_v16 = vpop.f32.mrf.mxu2  ;;  %2246 = vmatpush.bf16.msra.mxu1 %v6560_v12  ;;  %v5988_v12 = vor.u32 %v6886_v8, %v5987_v7  ;;  %v6937_v7 = vld [vmem:[#allocation2 + $0x204] sm:$0xf] }
 0x14f   : > { %v725_v22 = vpop.f32.mrf.mxu3  ;;  %v677_v32 = vadd.f32 %v676_v16, %v8046_v18  ;;  %2197 = vmatpush.bf16.msra.mxu0 %v6304_v19  ;;  %v6950_v19 = vld [vmem:[#allocation2 + $0x264] sm:$0xf0]  ;;  %v6205_v8 = vld [vmem:[#allocation2 + $0x220] sm:$0xf0] }
 0x150   : > { %v629_v24 = vpop.f32.mrf.mxu1  ;;  %v726_v38 = vadd.f32 %v725_v22, %v8049_v20 }
 0x151   : > { %v630_v25 = vadd.f32 %v629_v24, %v8043_v10  ;;  %v768_v49 = vmax.f32 %v677_v32, 0.0  ;;  %v6894_v32 = vld [vmem:[#allocation2 + $0xa4] sm:$0xf0] }
 0x152   : > { %v769_v51 = vmax.f32 %v726_v38, 0.0  ;;  %v6020_v37 = vor.u32 %v6894_v32, %v6019_v31  ;;  %v6945_v31 = vld [vmem:[#allocation2 + $0x244] sm:$0xf] }
 0x153   : > { %v770_v30 = vmax.f32 %v630_v25, 0.0 }
 0x154   : > { %2296 = vmatpush.bf16.msra.mxu2 %v6020_v37  ;;  %v6237_v37 = vld [vmem:[#allocation2 + $0x260] sm:$0xf0] }
 0x155   : > { %v8084_v33 = vpack.c.bf16 %v770_v30, %v767_v29  ;;  %v6240_v40 = vor.u32 %v6945_v31, %v6237_v37 }
 0x156   : > { %v678_v39 = vpop.f32.mrf.mxu2 }
 0x157   : > { %10718 = vst [vmem:[#allocation13_spill] sm:$0xff] %v8084_v33  ;;  %v679_v42 = vadd.f32 %v678_v39, %v8046_v18  ;;  %v727_v43 = vpop.f32.mrf.mxu3  ;;  %2015 = vmatmul.bf16.gmra.mxu0 %v8084_v33  ;;  %2162 = vmatmul.bf16.gmra.mxu3 %v8084_v33 }
 0x158   : > { %v728_v47 = vadd.f32 %v727_v43, %v8049_v20  ;;  %v632_v48 = vpop.f32.mrf.mxu1  ;;  %2297 = vmatpush.bf16.msra.mxu2 %v5988_v12  ;;  %v6208_v12 = vor.u32 %v6937_v7, %v6205_v8  ;;  %v8180_v8 = vld [vmem:[%s10685_s6] sm:$0xff] }
 0x159   : > { %v771_v50 = vmax.f32 %v679_v42, 0.0  ;;  %v633_v58 = vadd.f32 %v632_v48, %v8043_v10 }
 0x15a   : > { %v772_v52 = vmax.f32 %v728_v47, 0.0 }
 0x15b   : > { %v8091_v53 = vpack.c.bf16 %v771_v50, %v768_v49  ;;  %v773_v2 = vmax.f32 %v633_v58, 0.0  ;;  %v7017_v49 = vld [vmem:[#allocation2 + $0x484] sm:$0xf] }
 0x15c   : > { %v8093_v54 = vpack.c.bf16 %v772_v52, %v769_v51  ;;  %v6525_v50 = vld [vmem:[#allocation2 + $0x4a0] sm:$0xf0] }
 0x15d   : > { %10719 = vst [vmem:[#allocation14_spill] sm:$0xff] %v8091_v53  ;;  %2064 = vmatmul.bf16.gmra.mxu1 %v8091_v53  ;;  %v6953_v51 = vld [vmem:[#allocation2 + $0x284] sm:$0xf]  ;;  %v6528_v56 = vor.u32 %v7017_v49, %v6525_v50 }
 0x15e   : > { %10720 = vst [vmem:[#allocation15_spill] sm:$0xff] %v8093_v54  ;;  %2113 = vmatmul.bf16.gmra.mxu2 %v8093_v54  ;;  %v681_v55 = vpop.f32.mrf.mxu2  ;;  %v6272_v60 = vor.u32 %v6953_v51, %v6269_v57  ;;  %v6211_v57 = vld [vmem:[#allocation2 + $0x208] sm:$0xf] }
 0x15f   : > { %v730_v59 = vpop.f32.mrf.mxu3  ;;  %v682_v4 = vadd.f32 %v681_v55, %v8046_v18  ;;  %2247 = vmatpush.bf16.msra.mxu1 %v6528_v56  ;;  %v6878_v56 = vld [vmem:[#allocation2 + $0x24] sm:$0xf0] }
 0x160   : > { %v634_v62 = vpop.f32.mrf.mxu1  ;;  %v731_v9 = vadd.f32 %v730_v59, %v8049_v20  ;;  %2198 = vmatpush.bf16.msra.mxu0 %v6272_v60 }
 0x161   : > { %v635_v63 = vadd.f32 %v634_v62, %v8043_v10  ;;  %v774_v23 = vmax.f32 %v682_v4, 0.0 }
 0x162   : > { %v775_v25 = vmax.f32 %v731_v9, 0.0 }
 0x163   : > { %v776_v35 = vmax.f32 %v635_v63, 0.0 }
 0x164   : > { %2199 = vmatpush.bf16.msra.mxu0 %v6240_v40  ;;  %v7058_v40 = vld [vmem:[#allocation2 + $0x5cc] sm:$0xf] }
 0x165   : > { %v8100_v5 = vpack.c.bf16 %v776_v35, %v773_v2 }
 0x166   : > { %v683_v11 = vpop.f32.mrf.mxu2 }
 0x167   : > { %v684_v16 = vadd.f32 %v683_v11, %v8046_v18  ;;  %v732_v17 = vpop.f32.mrf.mxu3  ;;  %2020 = vmatmul.bf16.gmra.mxu0 %v8100_v5  ;;  %2167 = vmatmul.bf16.gmra.mxu3 %v8100_v5 }
 0x168   : > { %v733_v21 = vadd.f32 %v732_v17, %v8049_v20  ;;  %v637_v22 = vpop.f32.mrf.mxu1  ;;  %v6243_v17 = vld [vmem:[#allocation2 + $0x248] sm:$0xf]  ;;  %2200 = vmatpush.bf16.msra.mxu0 %v6208_v12 }
 0x169   : > { %v777_v24 = vmax.f32 %v684_v16, 0.0  ;;  %v638_v34 = vadd.f32 %v637_v22, %v8043_v10 }
 0x16a   : > { %v778_v26 = vmax.f32 %v733_v21, 0.0 }
 0x16b   : > { %v8107_v28 = vpack.c.bf16 %v777_v24, %v774_v23  ;;  %v779_v42 = vmax.f32 %v638_v34, 0.0  ;;  %v6244_v23 = vor.u32 %v6950_v19, %v6243_v17 }
 0x16c   : > { %v8109_v29 = vpack.c.bf16 %v778_v26, %v775_v25  ;;  %v7009_v26 = vld [vmem:[#allocation2 + $0x444] sm:$0xf] }
 0x16d   : > { %2069 = vmatmul.bf16.gmra.mxu1 %v8107_v28  ;;  %2346 = vmatpush.bf16.msra.mxu3 %v6244_v23 }
 0x16e   : > { %2118 = vmatmul.bf16.gmra.mxu2 %v8109_v29  ;;  %v686_v30 = vpop.f32.mrf.mxu2 }
 0x16f   : > { %v735_v36 = vpop.f32.mrf.mxu3  ;;  %v687_v47 = vadd.f32 %v686_v30, %v8046_v18  ;;  %v6493_v30 = vld [vmem:[#allocation2 + $0x460] sm:$0xf0] }
 0x170   : > { %v639_v38 = vpop.f32.mrf.mxu1  ;;  %v736_v52 = vadd.f32 %v735_v36, %v8049_v20  ;;  %v6496_v36 = vor.u32 %v7009_v26, %v6493_v30 }
 0x171   : > { %v640_v39 = vadd.f32 %v639_v38, %v8043_v10  ;;  %v780_v0 = vmax.f32 %v687_v47, 0.0 }
 0x172   : > { %v781_v2 = vmax.f32 %v736_v52, 0.0  ;;  %2248 = vmatpush.bf16.msra.mxu1 %v6496_v36 }
 0x173   : > { %v782_v43 = vmax.f32 %v640_v39, 0.0 }
 0x175   : > { %v8116_v48 = vpack.c.bf16 %v782_v43, %v779_v42 }
 0x176   : > { %v688_v55 = vpop.f32.mrf.mxu2 }
 0x177   : > { %v689_v58 = vadd.f32 %v688_v55, %v8046_v18  ;;  %v737_v59 = vpop.f32.mrf.mxu3  ;;  %2025 = vmatmul.bf16.gmra.mxu0 %v8116_v48  ;;  %2172 = vmatmul.bf16.gmra.mxu3 %v8116_v48  ;;  %v5955_v55 = vld [vmem:[#allocation2 + $0x8] sm:$0xf] }
 0x178   : > { %v738_v62 = vadd.f32 %v737_v59, %v8049_v20  ;;  %v642_v63 = vpop.f32.mrf.mxu1  ;;  %v5956_v60 = vor.u32 %v6878_v56, %v5955_v55 }
 0x179   : > { %v783_v1 = vmax.f32 %v689_v58, 0.0  ;;  %v643_v9 = vadd.f32 %v642_v63, %v8043_v10  ;;  %v7001_v63 = vld [vmem:[#allocation2 + $0x404] sm:$0xf] }
 0x17a   : > { %v784_v35 = vmax.f32 %v738_v62, 0.0  ;;  %v6942_v62 = vld [vmem:[#allocation2 + $0x224] sm:$0xf0]  ;;  %2298 = vmatpush.bf16.msra.mxu2 %v5956_v60 }
 0x17b   : > { %v8123_v3 = vpack.c.bf16 %v783_v1, %v780_v0  ;;  %v785_v21 = vmax.f32 %v643_v9, 0.0  ;;  %v6461_v0 = vld [vmem:[#allocation2 + $0x420] sm:$0xf0] }
 0x17c   : > { %v8125_v4 = vpack.c.bf16 %v784_v35, %v781_v2  ;;  %v6212_v2 = vor.u32 %v6942_v62, %v6211_v57  ;;  %v6464_v35 = vor.u32 %v7001_v63, %v6461_v0 }
 0x17d   : > { %2074 = vmatmul.bf16.gmra.mxu1 %v8123_v3 }
 0x17e   : > { %2123 = vmatmul.bf16.gmra.mxu2 %v8125_v4  ;;  %v691_v6 = vpop.f32.mrf.mxu2  ;;  %2347 = vmatpush.bf16.msra.mxu3 %v6212_v2 }
 0x17f   : > { %v740_v11 = vpop.f32.mrf.mxu3  ;;  %v692_v24 = vadd.f32 %v691_v6, %v8046_v18  ;;  %2249 = vmatpush.bf16.msra.mxu1 %v6464_v35 }
 0x180   : > { %v644_v13 = vpop.f32.mrf.mxu1  ;;  %v741_v32 = vadd.f32 %v740_v11, %v8049_v20 }
 0x181   : > { %v645_v16 = vadd.f32 %v644_v13, %v8043_v10  ;;  %v786_v43 = vmax.f32 %v692_v24, 0.0 }
 0x182   : > { %v787_v47 = vmax.f32 %v741_v32, 0.0 }
 0x183   : > { %v788_v22 = vmax.f32 %v645_v16, 0.0 }
 0x185   : > { %v8132_v25 = vpack.c.bf16 %v788_v22, %v785_v21 }
 0x186   : > { %v693_v34 = vpop.f32.mrf.mxu2 }
 0x187   : > { %v694_v38 = vadd.f32 %v693_v34, %v8046_v18  ;;  %v742_v39 = vpop.f32.mrf.mxu3  ;;  %2030 = vmatmul.bf16.gmra.mxu0 %v8132_v25  ;;  %2177 = vmatmul.bf16.gmra.mxu3 %v8132_v25 }
 0x188   : > { %v743_v41 = vadd.f32 %v742_v39, %v8049_v20  ;;  %v647_v42 = vpop.f32.mrf.mxu1  ;;  %v6437_v39 = vld [vmem:[#allocation2 + $0x3e8] sm:$0xf0] }
 0x189   : > { %v789_v44 = vmax.f32 %v694_v38, 0.0  ;;  %v648_v58 = vadd.f32 %v647_v42, %v8043_v10  ;;  %v6994_v38 = vld [vmem:[#allocation2 + $0x3cc] sm:$0xf] }
 0x18a   : > { %v790_v49 = vmax.f32 %v743_v41, 0.0 }
 0x18b   : > { %v8139_v50 = vpack.c.bf16 %v789_v44, %v786_v43  ;;  %v791_v9 = vmax.f32 %v648_v58, 0.0  ;;  %v6440_v43 = vor.u32 %v6994_v38, %v6437_v39  ;;  %v6693_v44 = vld [vmem:[#allocation2 + $0x5e8] sm:$0xf0] }
 0x18c   : > { %v8141_v51 = vpack.c.bf16 %v790_v49, %v787_v47  ;;  %v6696_v49 = vor.u32 %v7058_v40, %v6693_v44  ;;  %v7050_v44 = vld [vmem:[#allocation2 + $0x58c] sm:$0xf] }
 0x18d   : > { %10721 = vst [vmem:[#allocation16_spill] sm:$0xff] %v8139_v50  ;;  %2079 = vmatmul.bf16.gmra.mxu1 %v8139_v50  ;;  %2487 = vmatpush.bf16.msrb.mxu2 %v6440_v43  ;;  %v6405_v43 = vld [vmem:[#allocation2 + $0x3a8] sm:$0xf0] }
 0x18e   : > { %10722 = vst [vmem:[#allocation17_spill] sm:$0xff] %v8141_v51  ;;  %2128 = vmatmul.bf16.gmra.mxu2 %v8141_v51  ;;  %v696_v52 = vpop.f32.mrf.mxu2  ;;  %2536 = vmatpush.bf16.msrb.mxu3 %v6696_v49 }
 0x18f   : > { %v745_v59 = vpop.f32.mrf.mxu3  ;;  %v697_v13 = vadd.f32 %v696_v52, %v8046_v18 }
 0x190   : > { %v649_v1 = vpop.f32.mrf.mxu1  ;;  %v746_v17 = vadd.f32 %v745_v59, %v8049_v20 }
 0x191   : > { %v650_v6 = vadd.f32 %v649_v1, %v8043_v10  ;;  %v792_v26 = vmax.f32 %v697_v13, 0.0 }
 0x192   : > { %v793_v31 = vmax.f32 %v746_v17, 0.0 }
 0x193   : > { %v794_v11 = vmax.f32 %v650_v6, 0.0 }
 0x195   : > { %v8148_v16 = vpack.c.bf16 %v794_v11, %v791_v9 }
 0x196   : > { %v698_v19 = vpop.f32.mrf.mxu2 }
 0x197   : > { %10723 = vst [vmem:[#allocation18_spill] sm:$0xff] %v8148_v16  ;;  %v699_v21 = vadd.f32 %v698_v19, %v8046_v18  ;;  %v747_v22 = vpop.f32.mrf.mxu3  ;;  %2035 = vmatmul.bf16.gmra.mxu0 %v8148_v16  ;;  %2182 = vmatmul.bf16.gmra.mxu3 %v8148_v16  ;;  %v6930_v19 = vld [vmem:[#allocation2 + $0x1cc] sm:$0xf] }
 0x198   : > { %v748_v23 = vadd.f32 %v747_v22, %v8049_v20  ;;  %v652_v24 = vpop.f32.mrf.mxu1  ;;  %v6691_v22 = vld [vmem:[#allocation2 + $0x5c8] sm:$0xf] }
 0x199   : > { %v795_v30 = vmax.f32 %v699_v21, 0.0  ;;  %v653_v41 = vadd.f32 %v652_v24, %v8043_v10  ;;  %v6181_v21 = vld [vmem:[#allocation2 + $0x1e8] sm:$0xf0] }
 0x19a   : > { %v796_v32 = vmax.f32 %v748_v23, 0.0  ;;  %v6184_v24 = vor.u32 %v6930_v19, %v6181_v21 }
 0x19b   : > { %v8155_v34 = vpack.c.bf16 %v795_v30, %v792_v26  ;;  %v797_v55 = vmax.f32 %v653_v41, 0.0  ;;  %v7062_v26 = vld [vmem:[#allocation2 + $0x5e4] sm:$0xf0] }
 0x19c   : > { %v8157_v36 = vpack.c.bf16 %v796_v32, %v793_v31  ;;  %2438 = vmatpush.bf16.msrb.mxu1 %v6184_v24 }
 0x19d   : > { %10724 = vst [vmem:[#allocation19_spill] sm:$0xff] %v8155_v34  ;;  %2084 = vmatmul.bf16.gmra.mxu1 %v8155_v34 }
 0x19e   : > { %2133 = vmatmul.bf16.gmra.mxu2 %v8157_v36  ;;  %v701_v37 = vpop.f32.mrf.mxu2 }
 0x19f   : > { %v750_v42 = vpop.f32.mrf.mxu3  ;;  %v702_v57 = vadd.f32 %v701_v37, %v8046_v18  ;;  %v6692_v37 = vor.u32 %v7062_v26, %v6691_v22 }
 0x1a0   : > { %v654_v47 = vpop.f32.mrf.mxu1  ;;  %v751_v59 = vadd.f32 %v750_v42, %v8049_v20  ;;  %v6986_v42 = vld [vmem:[#allocation2 + $0x38c] sm:$0xf] }
 0x1a1   : > { %v655_v52 = vadd.f32 %v654_v47, %v8043_v10  ;;  %v798_v0 = vmax.f32 %v702_v57, 0.0  ;;  %2389 = vmatpush.bf16.msrb.mxu0 %v6692_v37  ;;  %v6408_v49 = vor.u32 %v6986_v42, %v6405_v43  ;;  %v6978_v42 = vld [vmem:[#allocation2 + $0x34c] sm:$0xf] }
 0x1a2   : > { %v799_v2 = vmax.f32 %v751_v59, 0.0  ;;  %v6373_v43 = vld [vmem:[#allocation2 + $0x368] sm:$0xf0] }
 0x1a3   : > { %v800_v56 = vmax.f32 %v655_v52, 0.0  ;;  %v6661_v52 = vld [vmem:[#allocation2 + $0x5a8] sm:$0xf0]  ;;  %2488 = vmatpush.bf16.msrb.mxu2 %v6408_v49  ;;  %v6376_v49 = vor.u32 %v6978_v42, %v6373_v43 }
 0x1a4   : > { %v6664_v59 = vor.u32 %v7050_v44, %v6661_v52  ;;  %v7042_v52 = vld [vmem:[#allocation2 + $0x54c] sm:$0xf] }
 0x1a5   : > { %v8164_v58 = vpack.c.bf16 %v800_v56, %v797_v55 }
 0x1a6   : > { %v703_v60 = vpop.f32.mrf.mxu2  ;;  %2537 = vmatpush.bf16.msrb.mxu3 %v6664_v59 }
 0x1a7   : > { %v704_v62 = vadd.f32 %v703_v60, %v8046_v18  ;;  %v752_v63 = vpop.f32.mrf.mxu3  ;;  %2040 = vmatmul.bf16.gmra.mxu0 %v8164_v58  ;;  %2187 = vmatmul.bf16.gmra.mxu3 %v8164_v58 }
 0x1a8   : > { %v753_v10 = vadd.f32 %v752_v63, %v8049_v20  ;;  %v8185_v20 = vperm.slane %v8180_v8, 0  ;;  %2489 = vmatpush.bf16.msrb.mxu2 %v6376_v49 }
 0x1a9   : > { %v801_v1 = vmax.f32 %v704_v62, 0.0 }
 0x1aa   : > { %v802_v35 = vmax.f32 %v753_v10, 0.0 }
 0x1ab   : > { %v8171_v6 = vpack.c.bf16 %v801_v1, %v798_v0 }
 0x1ac   : > { %v8173_v7 = vpack.c.bf16 %v802_v35, %v799_v2  ;;  %v6922_v2 = vld [vmem:[#allocation2 + $0x18c] sm:$0xf] }
 0x1ad   : > { %2089 = vmatmul.bf16.gmra.mxu1 %v8171_v6  ;;  %v6149_v35 = vld [vmem:[#allocation2 + $0x1a8] sm:$0xf0] }
 0x1ae   : > { %2138 = vmatmul.bf16.gmra.mxu2 %v8173_v7 }
 0x1b4   : > { %v2006_v18 = vpop.f32.mrf.mxu0 }
 0x1b5   : > { %v2007_v13 = vadd.f32 %v2006_v18, %v8185_v20  ;;  %v6659_v18 = vld [vmem:[#allocation2 + $0x588] sm:$0xf] }
 0x1b7   : > { %2201 = vmatmul.bf16.vlgmr.msra.gmra.mxu0 %v8059_v45  ;;  %2348 = vmatmul.bf16.vlgmr.msra.gmra.mxu3 %v8059_v45 }
 0x1ba   : > { %v2055_v9 = vpop.f32.mrf.mxu1  ;;  %v8187_v11 = vpop.f32.mrf.mxu3 }
 0x1bb   : > { %v2056_v17 = vadd.f32 %v2055_v9, %v2007_v13  ;;  %v7054_v13 = vld [vmem:[#allocation2 + $0x5a4] sm:$0xf0] }
 0x1bc   : > { %v2008_v12 = vpop.f32.mrf.mxu0  ;;  %v6660_v22 = vor.u32 %v7054_v13, %v6659_v18 }
 0x1bd   : > { %2250 = vmatmul.bf16.vlgmr.msra.gmra.mxu1 %v8061_v46  ;;  %v2009_v40 = vadd.f32 %v2008_v12, %v8185_v20  ;;  %v6152_v12 = vor.u32 %v6922_v2, %v6149_v35 }
 0x1be   : > { %2299 = vmatmul.bf16.vlgmr.msra.gmra.mxu2 %v8052_v27  ;;  %2390 = vmatpush.bf16.msrb.mxu0 %v6660_v22 }
 0x1bf   : > { %2439 = vmatpush.bf16.msrb.mxu1 %v6152_v12 }
 0x1c1   : > { %v2104_v23 = vpop.f32.mrf.mxu2 }
 0x1c2   : > { %v2105_v30 = vadd.f32 %v2104_v23, %v2056_v17  ;;  %v2057_v31 = vpop.f32.mrf.mxu1  ;;  %v8192_v32 = vpop.f32.mrf.mxu3 }
 0x1c3   : > { %v2058_v41 = vadd.f32 %v2057_v31, %v2009_v40 }
 0x1c4   : > { %v6713_v38 = vmul.f32 -1.442695, %v2105_v30  ;;  %v2011_v39 = vpop.f32.mrf.mxu0 }
 0x1c5   : > { %v2012_v0 = vadd.f32 %v2011_v39, %v8185_v20 }
 0x1c6   : > { %7122 = vpow2.f32 %v6713_v38 }
 0x1c7   : > { %2206 = vmatmul.bf16.gmra.mxu0 %v8075_v14  ;;  %2353 = vmatmul.bf16.gmra.mxu3 %v8075_v14 }
 0x1c9   : > { %v2106_v47 = vpop.f32.mrf.mxu2 }
 0x1ca   : > { %v2107_v55 = vadd.f32 %v2106_v47, %v2058_v41  ;;  %v2060_v56 = vpop.f32.mrf.mxu1  ;;  %v8197_v57 = vpop.f32.mrf.mxu3 }
 0x1cb   : > { %v2061_v1 = vadd.f32 %v2060_v56, %v2012_v0 }
 0x1cc   : > { %v7123_v60 = vpop.eup %7122  ;;  %v6721_v62 = vmul.f32 -1.442695, %v2107_v55  ;;  %v2013_v63 = vpop.f32.mrf.mxu0  ;;  %v6629_v55 = vld [vmem:[#allocation2 + $0x568] sm:$0xf0] }
 0x1cd   : > { %v3557_v10 = vadd.f32 1.0, %v7123_v60  ;;  %2255 = vmatmul.bf16.gmra.mxu1 %v8077_v15  ;;  %v2014_v38 = vadd.f32 %v2013_v63, %v8185_v20  ;;  %v6632_v63 = vor.u32 %v7042_v52, %v6629_v55 }
 0x1ce   : > { %7124 = vpow2.f32 %v6721_v62  ;;  %2304 = vmatmul.bf16.gmra.mxu2 %v8068_v61 }
 0x1cf   : > { %7126 = vrcp.f32 %v3557_v10  ;;  %v3694_v39 = vand.u32 2147483647, %v3557_v10  ;;  %v3696_v44 = vand.u32 2147483648, %v3557_v10  ;;  %vm3690_vm2 = vweird.f32 %v3557_v10  ;;  %2538 = vmatpush.bf16.msrb.mxu3 %v6632_v63 }
 0x1d1   : > { %v2109_v9 = vpop.f32.mrf.mxu2  ;;  %vm3695_vm4 = vcmp.eq.f32.partialorder %v3694_v39, 8.507059e+37 }
 0x1d2   : > { %v2110_v17 = vadd.f32 %v2109_v9, %v2061_v1  ;;  %v2062_v19 = vpop.f32.mrf.mxu1  ;;  %v8202_v21 = vpop.f32.mrf.mxu3  ;;  %v3697_v9 = vor.u32 1.1754944e-38, %v3696_v44 }
 0x1d3   : > { %v2063_v41 = vadd.f32 %v2062_v19, %v2014_v38 }
 0x1d4   : > { %v7125_v23 = vpop.eup %7124  ;;  %v6729_v24 = vmul.f32 -1.442695, %v2110_v17  ;;  %v2016_v26 = vpop.f32.mrf.mxu0 }
 0x1d5   : > { %v7127_v30 = vpop.eup %7126  ;;  %v8204_v31 = vadd.f32 1.0, %v7125_v23  ;;  %v2017_v19 = vadd.f32 %v2016_v26, %v8185_v20 }
 0x1d6   : > { %v3686_v37 = vmul.f32 %v7127_v30, %v3557_v10  ;;  %7128 = vpow2.f32 %v6729_v24  ;;  %vm3691_vm1 = vweird.f32 %v7127_v30 }
 0x1d7   : > { %7130 = vrcp.f32 %v8204_v31  ;;  %2211 = vmatmul.bf16.gmra.mxu0 %v8091_v53  ;;  %2358 = vmatmul.bf16.gmra.mxu3 %v8091_v53  ;;  %vm3692_vm3 = vmor %vm3690_vm2, %vm3691_vm1  ;;  %v3814_v22 = vand.u32 2147483647, %v8204_v31  ;;  %v3816_v38 = vand.u32 2147483648, %v8204_v31  ;;  %vm3810_vm6 = vweird.f32 %v8204_v31 }
 0x1d8   : > { %v3687_v40 = vsub.f32 1.0, %v3686_v37  ;;  %v6914_v37 = vld [vmem:[#allocation2 + $0x14c] sm:$0xf] }
 0x1d9   : > { %v2111_v47 = vpop.f32.mrf.mxu2  ;;  %vm3815_vm8 = vcmp.eq.f32.partialorder %v3814_v22, 8.507059e+37  ;;  %v3817_v63 = vor.u32 1.1754944e-38, %v3816_v38 }
 0x1da   : > { %v3688_v56 = vmul.f32 %v7127_v30, %v3687_v40  ;;  %v2112_v59 = vadd.f32 %v2111_v47, %v2063_v41  ;;  %v2065_v60 = vpop.f32.mrf.mxu1  ;;  %v8213_v62 = vpop.f32.mrf.mxu3  ;;  %v6627_v40 = vld [vmem:[#allocation2 + $0x548] sm:$0xf] }
 0x1db   : > { %v2066_v24 = vadd.f32 %v2065_v60, %v2017_v19  ;;  %v7046_v41 = vld [vmem:[#allocation2 + $0x564] sm:$0xf0] }
 0x1dc   : > { %v7129_v0 = vpop.eup %7128  ;;  %v3689_v1 = vadd.f32 %v7127_v30, %v3688_v56  ;;  %v6737_v2 = vmul.f32 -1.442695, %v2112_v59  ;;  %v2018_v35 = vpop.f32.mrf.mxu0  ;;  %v6628_v49 = vor.u32 %v7046_v41, %v6627_v40 }
 0x1dd   : > { %v7131_v18 = vpop.eup %7130  ;;  %v8215_v12 = vadd.f32 1.0, %v7129_v0  ;;  %2260 = vmatmul.bf16.gmra.mxu1 %v8093_v54 }
 0x1de   : > { %v3693_v13 = vsel %vm3692_vm3, %v7127_v30, %v3689_v1  ;;  %v3806_v17 = vmul.f32 %v7131_v18, %v8204_v31  ;;  %7132 = vpow2.f32 %v6737_v2  ;;  %2309 = vmatmul.bf16.gmra.mxu2 %v8084_v33  ;;  %v6117_v30 = vld [vmem:[#allocation2 + $0x168] sm:$0xf0]  ;;  %vm3811_vm5 = vweird.f32 %v7131_v18  ;;  %2391 = vmatpush.bf16.msrb.mxu0 %v6628_v49 }
 0x1df   : > { %v3698_v10 = vsel %vm3695_vm4, %v3697_v9, %v3693_v13  ;;  %7134 = vrcp.f32 %v8215_v12  ;;  %v6120_v26 = vor.u32 %v6914_v37, %v6117_v30  ;;  %vm3812_vm7 = vmor %vm3810_vm6, %vm3811_vm5  ;;  %v2019_v9 = vadd.f32 %v2018_v35, %v8185_v20 }
 0x1e0   : > { %5605 = vst [vmem:[%s8223_s14] sm:$0xff] %v3698_v10  ;;  %v3807_v23 = vsub.f32 1.0, %v3806_v17  ;;  %v3934_v17 = vand.u32 2147483647, %v8215_v12  ;;  %v6970_v10 = vld [vmem:[#allocation2 + $0x30c] sm:$0xf]  ;;  %vm3930_vm10 = vweird.f32 %v8215_v12 }
 0x1e1   : > { %v2114_v39 = vpop.f32.mrf.mxu2  ;;  %2440 = vmatpush.bf16.msrb.mxu1 %v6120_v26  ;;  %v6597_v26 = vld [vmem:[#allocation2 + $0x528] sm:$0xf0] }
 0x1e2   : > { %v3808_v42 = vmul.f32 %v7131_v18, %v3807_v23  ;;  %v2115_v43 = vadd.f32 %v2114_v39, %v2066_v24  ;;  %v2067_v44 = vpop.f32.mrf.mxu1  ;;  %v8227_v47 = vpop.f32.mrf.mxu3  ;;  %v6341_v23 = vld [vmem:[#allocation2 + $0x328] sm:$0xf0]  ;;  %vm3935_vm12 = vcmp.eq.f32.partialorder %v3934_v17, 8.507059e+37 }
 0x1e3   : > { %v2068_v19 = vadd.f32 %v2067_v44, %v2019_v9  ;;  %v7034_v24 = vld [vmem:[#allocation2 + $0x50c] sm:$0xf]  ;;  %v6344_v39 = vor.u32 %v6970_v10, %v6341_v23  ;;  %v6595_v10 = vld [vmem:[#allocation2 + $0x508] sm:$0xf] }
 0x1e4   : > { %v7133_v52 = vpop.eup %7132  ;;  %v3809_v55 = vadd.f32 %v7131_v18, %v3808_v42  ;;  %v6745_v56 = vmul.f32 -1.442695, %v2115_v43  ;;  %v2021_v59 = vpop.f32.mrf.mxu0  ;;  %v6600_v40 = vor.u32 %v7034_v24, %v6597_v26 }
 0x1e5   : > { %v7135_v60 = vpop.eup %7134  ;;  %v8230_v0 = vadd.f32 1.0, %v7133_v52  ;;  %2490 = vmatpush.bf16.msrb.mxu2 %v6344_v39 }
 0x1e6   : > { %v3813_v1 = vsel %vm3812_vm7, %v7131_v18, %v3809_v55  ;;  %v3926_v2 = vmul.f32 %v7135_v60, %v8215_v12  ;;  %7136 = vpow2.f32 %v6745_v56  ;;  %v3936_v18 = vand.u32 2147483648, %v8215_v12  ;;  %2539 = vmatpush.bf16.msrb.mxu3 %v6600_v40 }
 0x1e7   : > { %v3818_v13 = vsel %vm3815_vm8, %v3817_v63, %v3813_v1  ;;  %7138 = vrcp.f32 %v8230_v0  ;;  %2216 = vmatmul.bf16.gmra.mxu0 %v8107_v28  ;;  %2363 = vmatmul.bf16.gmra.mxu3 %v8107_v28  ;;  %vm3931_vm9 = vweird.f32 %v7135_v60  ;;  %v2022_v1 = vadd.f32 %v2021_v59, %v8185_v20 }
 0x1e8   : > { %5613 = vst [vmem:[%s8223_s14 + $0x40] sm:$0xff] %v3818_v13  ;;  %v3927_v31 = vsub.f32 1.0, %v3926_v2  ;;  %vm3932_vm11 = vmor %vm3930_vm10, %vm3931_vm9  ;;  %v3937_v52 = vor.u32 1.1754944e-38, %v3936_v18  ;;  %v4054_v9 = vand.u32 2147483647, %v8230_v0  ;;  %v4056_v17 = vand.u32 2147483648, %v8230_v0 }
 0x1e9   : > { %v2116_v22 = vpop.f32.mrf.mxu2  ;;  %vm4050_vm14 = vweird.f32 %v8230_v0 }
 0x1ea   : > { %v3928_v35 = vmul.f32 %v7135_v60, %v3927_v31  ;;  %v2117_v37 = vadd.f32 %v2116_v22, %v2068_v19  ;;  %v2070_v30 = vpop.f32.mrf.mxu1  ;;  %v8240_v38 = vpop.f32.mrf.mxu3  ;;  %v6906_v31 = vld [vmem:[#allocation2 + $0x10c] sm:$0xf]  ;;  %vm4055_vm0 = vcmp.eq.f32.partialorder %v4054_v9, 8.507059e+37 }
 0x1eb   : > { %v2071_v13 = vadd.f32 %v2070_v30, %v2022_v1  ;;  %v6962_v9 = vld [vmem:[#allocation2 + $0x2cc] sm:$0xf] }
 0x1ec   : > { %v7137_v41 = vpop.eup %7136  ;;  %v3929_v42 = vadd.f32 %v7135_v60, %v3928_v35  ;;  %v6753_v43 = vmul.f32 -1.442695, %v2117_v37  ;;  %v2023_v44 = vpop.f32.mrf.mxu0  ;;  %v7038_v35 = vld [vmem:[#allocation2 + $0x524] sm:$0xf0] }
 0x1ed   : > { %v7139_v49 = vpop.eup %7138  ;;  %v8243_v55 = vadd.f32 1.0, %v7137_v41  ;;  %2265 = vmatmul.bf16.gmra.mxu1 %v8109_v29  ;;  %v6596_v37 = vor.u32 %v7038_v35, %v6595_v10 }
 0x1ee   : > { %v3933_v56 = vsel %vm3932_vm11, %v7135_v60, %v3929_v42  ;;  %v4046_v63 = vmul.f32 %v7139_v49, %v8230_v0  ;;  %7140 = vpow2.f32 %v6753_v43  ;;  %2314 = vmatmul.bf16.gmra.mxu2 %v8100_v5  ;;  %v6085_v60 = vld [vmem:[#allocation2 + $0x128] sm:$0xf0]  ;;  %vm4051_vm13 = vweird.f32 %v7139_v49 }
 0x1ef   : > { %v3938_v12 = vsel %vm3935_vm12, %v3937_v52, %v3933_v56  ;;  %7142 = vrcp.f32 %v8243_v55  ;;  %v6088_v22 = vor.u32 %v6906_v31, %v6085_v60  ;;  %vm4052_vm15 = vmor %vm4050_vm14, %vm4051_vm13  ;;  %v4057_v42 = vor.u32 1.1754944e-38, %v4056_v17  ;;  %2392 = vmatpush.bf16.msrb.mxu0 %v6596_v37  ;;  %v6309_v31 = vld [vmem:[#allocation2 + $0x2e8] sm:$0xf0] }
 0x1f0   : > { %5621 = vst [vmem:[%s8223_s14 + $0x80] sm:$0xff] %v3938_v12  ;;  %v4047_v2 = vsub.f32 1.0, %v4046_v63  ;;  %v2024_v63 = vadd.f32 %v2023_v44, %v8185_v20  ;;  %v4174_v12 = vand.u32 2147483647, %v8243_v55  ;;  %v7026_v17 = vld [vmem:[#allocation2 + $0x4cc] sm:$0xf]  ;;  %vm4170_vm2 = vweird.f32 %v8243_v55 }
 0x1f1   : > { %v2119_v19 = vpop.f32.mrf.mxu2  ;;  %2441 = vmatpush.bf16.msrb.mxu1 %v6088_v22 }
 0x1f2   : > { %v4048_v18 = vmul.f32 %v7139_v49, %v4047_v2  ;;  %v2120_v59 = vadd.f32 %v2119_v19, %v2071_v13  ;;  %v2072_v23 = vpop.f32.mrf.mxu1  ;;  %v8253_v24 = vpop.f32.mrf.mxu3  ;;  %vm4175_vm4 = vcmp.eq.f32.partialorder %v4174_v12, 8.507059e+37 }
 0x1f3   : > { %v2073_v2 = vadd.f32 %v2072_v23, %v2024_v63 }
 0x1f4   : > { %v7141_v39 = vpop.eup %7140  ;;  %v4049_v26 = vadd.f32 %v7139_v49, %v4048_v18  ;;  %v6761_v30 = vmul.f32 -1.442695, %v2120_v59  ;;  %v2026_v40 = vpop.f32.mrf.mxu0  ;;  %v6312_v18 = vor.u32 %v6962_v9, %v6309_v31  ;;  %v6565_v59 = vld [vmem:[#allocation2 + $0x4e8] sm:$0xf0] }
 0x1f5   : > { %v7143_v41 = vpop.eup %7142  ;;  %v8256_v43 = vadd.f32 1.0, %v7141_v39  ;;  %v6568_v22 = vor.u32 %v7026_v17, %v6565_v59  ;;  %v2027_v63 = vadd.f32 %v2026_v40, %v8185_v20 }
 0x1f6   : > { %v4053_v52 = vsel %vm4052_vm15, %v7139_v49, %v4049_v26  ;;  %v4166_v56 = vmul.f32 %v7143_v41, %v8243_v55  ;;  %7144 = vpow2.f32 %v6761_v30  ;;  %v4176_v49 = vand.u32 2147483648, %v8243_v55  ;;  %2491 = vmatpush.bf16.msrb.mxu2 %v6312_v18  ;;  %v7030_v18 = vld [vmem:[#allocation2 + $0x4e4] sm:$0xf0] }
 0x1f7   : > { %v4058_v1 = vsel %vm4055_vm0, %v4057_v42, %v4053_v52  ;;  %7146 = vrcp.f32 %v8256_v43  ;;  %2221 = vmatmul.bf16.gmra.mxu0 %v8123_v3  ;;  %2368 = vmatmul.bf16.gmra.mxu3 %v8123_v3  ;;  %vm4171_vm1 = vweird.f32 %v7143_v41  ;;  %v4296_v9 = vand.u32 2147483648, %v8256_v43 }
 0x1f8   : > { %5629 = vst [vmem:[%s8223_s14 + $0xc0] sm:$0xff] %v4058_v1  ;;  %v4167_v0 = vsub.f32 1.0, %v4166_v56  ;;  %vm4172_vm3 = vmor %vm4170_vm2, %vm4171_vm1  ;;  %v4177_v30 = vor.u32 1.1754944e-38, %v4176_v49  ;;  %2540 = vmatpush.bf16.msrb.mxu3 %v6568_v22  ;;  %vm4290_vm6 = vweird.f32 %v8256_v43 }
 0x1f9   : > { %v2121_v13 = vpop.f32.mrf.mxu2 }
 0x1fa   : > { %v4168_v44 = vmul.f32 %v7143_v41, %v4167_v0  ;;  %v2122_v19 = vadd.f32 %v2121_v13, %v2073_v2  ;;  %v2075_v60 = vpop.f32.mrf.mxu1  ;;  %v8266_v10 = vpop.f32.mrf.mxu3  ;;  %v4294_v0 = vand.u32 2147483647, %v8256_v43  ;;  %v6898_v2 = vld [vmem:[#allocation2 + $0xcc] sm:$0xf]  ;;  %v6563_v13 = vld [vmem:[#allocation2 + $0x4c8] sm:$0xf] }
 0x1fb   : > { %v2076_v12 = vadd.f32 %v2075_v60, %v2027_v63  ;;  %v6564_v59 = vor.u32 %v7030_v18, %v6563_v13  ;;  %v6533_v18 = vld [vmem:[#allocation2 + $0x4a8] sm:$0xf0] }
 0x1fc   : > { %v7145_v35 = vpop.eup %7144  ;;  %v4169_v37 = vadd.f32 %v7143_v41, %v4168_v44  ;;  %v6769_v23 = vmul.f32 -1.442695, %v2122_v19  ;;  %v2028_v39 = vpop.f32.mrf.mxu0  ;;  %vm4295_vm8 = vcmp.eq.f32.partialorder %v4294_v0, 8.507059e+37 }
 0x1fd   : > { %v7147_v26 = vpop.eup %7146  ;;  %v8269_v42 = vadd.f32 1.0, %v7145_v35  ;;  %2270 = vmatmul.bf16.gmra.mxu1 %v8125_v4  ;;  %2393 = vmatpush.bf16.msrb.mxu0 %v6564_v59 }
 0x1fe   : > { %v4173_v52 = vsel %vm4172_vm3, %v7143_v41, %v4169_v37  ;;  %v4286_v56 = vmul.f32 %v7147_v26, %v8256_v43  ;;  %7148 = vpow2.f32 %v6769_v23  ;;  %2319 = vmatmul.bf16.gmra.mxu2 %v8116_v48  ;;  %v6053_v41 = vld [vmem:[#allocation2 + $0xe8] sm:$0xf0]  ;;  %vm4291_vm5 = vweird.f32 %v7147_v26 }
 0x1ff   : > { %v4178_v55 = vsel %vm4175_vm4, %v4177_v30, %v4173_v52  ;;  %7150 = vrcp.f32 %v8269_v42  ;;  %v6056_v17 = vor.u32 %v6898_v2, %v6053_v41  ;;  %vm4292_vm7 = vmor %vm4290_vm6, %vm4291_vm5  ;;  %v4297_v30 = vor.u32 1.1754944e-38, %v4296_v9  ;;  %v6954_v2 = vld [vmem:[#allocation2 + $0x28c] sm:$0xf] }
 0x200   : > { %5637 = vst [vmem:[%s8223_s14 + $0x100] sm:$0xff] %v4178_v55  ;;  %v4287_v1 = vsub.f32 1.0, %v4286_v56  ;;  %v2029_v55 = vadd.f32 %v2028_v39, %v8185_v20  ;;  %v4414_v0 = vand.u32 2147483647, %v8269_v42  ;;  %v7018_v41 = vld [vmem:[#allocation2 + $0x48c] sm:$0xf]  ;;  %vm4410_vm10 = vweird.f32 %v8269_v42 }
 0x201   : > { %v2124_v49 = vpop.f32.mrf.mxu2  ;;  %2442 = vmatpush.bf16.msrb.mxu1 %v6056_v17  ;;  %v6536_v59 = vor.u32 %v7018_v41, %v6533_v18 }
 0x202   : > { %v4288_v31 = vmul.f32 %v7147_v26, %v4287_v1  ;;  %v2125_v40 = vadd.f32 %v2124_v49, %v2076_v12  ;;  %v2077_v44 = vpop.f32.mrf.mxu1  ;;  %v8279_v19 = vpop.f32.mrf.mxu3  ;;  %v6277_v49 = vld [vmem:[#allocation2 + $0x2a8] sm:$0xf0]  ;;  %vm4415_vm12 = vcmp.eq.f32.partialorder %v4414_v0, 8.507059e+37 }
 0x203   : > { %v2078_v12 = vadd.f32 %v2077_v44, %v2029_v55  ;;  %v6280_v17 = vor.u32 %v6954_v2, %v6277_v49  ;;  %2541 = vmatpush.bf16.msrb.mxu3 %v6536_v59  ;;  %v7010_v0 = vld [vmem:[#allocation2 + $0x44c] sm:$0xf]  ;;  %v6499_v59 = vld [vmem:[#allocation2 + $0x448] sm:$0xf] }
 0x204   : > { %v7149_v22 = vpop.eup %7148  ;;  %v4289_v35 = vadd.f32 %v7147_v26, %v4288_v31  ;;  %v6777_v60 = vmul.f32 -1.442695, %v2125_v40  ;;  %v2031_v37 = vpop.f32.mrf.mxu0 }
 0x205   : > { %v7151_v23 = vpop.eup %7150  ;;  %v8282_v52 = vadd.f32 1.0, %v7149_v22  ;;  %v6531_v22 = vld [vmem:[#allocation2 + $0x488] sm:$0xf]  ;;  %2492 = vmatpush.bf16.msrb.mxu2 %v6280_v17  ;;  %v2032_v2 = vadd.f32 %v2031_v37, %v8185_v20  ;;  %v6021_v37 = vld [vmem:[#allocation2 + $0xa8] sm:$0xf0] }
 0x206   : > { %v4293_v56 = vsel %vm4292_vm7, %v7147_v26, %v4289_v35  ;;  %v4406_v63 = vmul.f32 %v7151_v23, %v8269_v42  ;;  %7152 = vpow2.f32 %v6777_v60  ;;  %v4416_v26 = vand.u32 2147483648, %v8269_v42  ;;  %v7022_v35 = vld [vmem:[#allocation2 + $0x4a4] sm:$0xf0] }
 0x207   : > { %v4298_v1 = vsel %vm4295_vm8, %v4297_v30, %v4293_v56  ;;  %7154 = vrcp.f32 %v8282_v52  ;;  %2226 = vmatmul.bf16.gmra.mxu0 %v8139_v50  ;;  %2373 = vmatmul.bf16.gmra.mxu3 %v8139_v50  ;;  %vm4411_vm9 = vweird.f32 %v7151_v23  ;;  %v4534_v41 = vand.u32 2147483647, %v8282_v52 }
 0x208   : > { %5645 = vst [vmem:[%s8223_s14 + $0x140] sm:$0xff] %v4298_v1  ;;  %v4407_v43 = vsub.f32 1.0, %v4406_v63  ;;  %v6532_v63 = vor.u32 %v7022_v35, %v6531_v22  ;;  %vm4412_vm11 = vmor %vm4410_vm10, %vm4411_vm9  ;;  %v4417_v1 = vor.u32 1.1754944e-38, %v4416_v26  ;;  %v6501_v26 = vld [vmem:[#allocation2 + $0x468] sm:$0xf0]  ;;  %v4536_v17 = vand.u32 2147483648, %v8282_v52 }
 0x209   : > { %v2126_v9 = vpop.f32.mrf.mxu2  ;;  %vm4530_vm14 = vweird.f32 %v8282_v52  ;;  %vm8315_vm15 = vcmp.eq.f32.partialorder %v4534_v41, 8.507059e+37 }
 0x20a   : > { %v4408_v39 = vmul.f32 %v7151_v23, %v4407_v43  ;;  %v2127_v13 = vadd.f32 %v2126_v9, %v2078_v12  ;;  %v2080_v31 = vpop.f32.mrf.mxu1  ;;  %v8292_v40 = vpop.f32.mrf.mxu3  ;;  %2394 = vmatpush.bf16.msrb.mxu0 %v6532_v63  ;;  %v7014_v63 = vld [vmem:[#allocation2 + $0x464] sm:$0xf0] }
 0x20c   : > { %v7153_v60 = vpop.eup %7152  ;;  %v4409_v30 = vadd.f32 %v7151_v23, %v4408_v39  ;;  %v6785_v44 = vmul.f32 -1.442695, %v2127_v13  ;;  %v2033_v56 = vpop.f32.mrf.mxu0  ;;  %v2081_v39 = vadd.f32 %v2080_v31, %v2032_v2  ;;  %v6504_v13 = vor.u32 %v7010_v0, %v6501_v26 }
 0x20d   : > { %v8295_v55 = vpop.eup %7154  ;;  %v8298_v43 = vadd.f32 1.0, %v7153_v60  ;;  %2275 = vmatmul.bf16.gmra.mxu1 %v8141_v51  ;;  %v6500_v31 = vor.u32 %v7014_v63, %v6499_v59  ;;  %v6245_v59 = vld [vmem:[#allocation2 + $0x268] sm:$0xf0] }
 0x20e   : > { %v4413_v12 = vsel %vm4412_vm11, %v7151_v23, %v4409_v30  ;;  %v4526_v42 = vmul.f32 %v8295_v55, %v8282_v52  ;;  %7156 = vpow2.f32 %v6785_v44  ;;  %2324 = vmatmul.bf16.gmra.mxu2 %v8132_v25  ;;  %v6890_v23 = vld [vmem:[#allocation2 + $0x8c] sm:$0xf]  ;;  %vm4531_vm13 = vweird.f32 %v8295_v55  ;;  %2542 = vmatpush.bf16.msrb.mxu3 %v6504_v13 }
 0x20f   : > { %v4418_v9 = vsel %vm4415_vm12, %v4417_v1, %v4413_v12  ;;  %7158 = vrcp.f32 %v8298_v43  ;;  %v6024_v60 = vor.u32 %v6890_v23, %v6021_v37  ;;  %v7002_v1 = vld [vmem:[#allocation2 + $0x40c] sm:$0xf]  ;;  %v7006_v23 = vld [vmem:[#allocation2 + $0x424] sm:$0xf0]  ;;  %vm4532_vm0 = vmor %vm4530_vm14, %vm4531_vm13  ;;  %v4537_v52 = vor.u32 1.1754944e-38, %v4536_v17  ;;  %2395 = vmatpush.bf16.msrb.mxu0 %v6500_v31 }
 0x210   : > { %5653 = vst [vmem:[%s8223_s14 + $0x180] sm:$0xff] %v4418_v9  ;;  %v4527_v49 = vsub.f32 1.0, %v4526_v42  ;;  %v6469_v12 = vld [vmem:[#allocation2 + $0x428] sm:$0xf0]  ;;  %v6467_v42 = vld [vmem:[#allocation2 + $0x408] sm:$0xf]  ;;  %vm4650_vm2 = vweird.f32 %v8298_v43 }
 0x211   : > { %v2129_v18 = vpop.f32.mrf.mxu2  ;;  %2443 = vmatpush.bf16.msrb.mxu1 %v6024_v60  ;;  %v6946_v37 = vld [vmem:[#allocation2 + $0x24c] sm:$0xf]  ;;  %v6468_v41 = vor.u32 %v7006_v23, %v6467_v42  ;;  %v2034_v60 = vadd.f32 %v2033_v56, %v8185_v20 }
 0x212   : > { %v4528_v22 = vmul.f32 %v8295_v55, %v4527_v49  ;;  %v2130_v35 = vadd.f32 %v2129_v18, %v2081_v39  ;;  %v2082_v30 = vpop.f32.mrf.mxu1  ;;  %v8311_v44 = vpop.f32.mrf.mxu3  ;;  %v6472_v39 = vor.u32 %v7002_v1, %v6469_v12  ;;  %v6882_v63 = vld [vmem:[#allocation2 + $0x4c] sm:$0xf]  ;;  %v4654_v12 = vand.u32 2147483647, %v8298_v43 }
 0x213   : > { %v5989_v1 = vld [vmem:[#allocation2 + $0x68] sm:$0xf0]  ;;  %v2083_v31 = vadd.f32 %v2082_v30, %v2034_v60  ;;  %v6248_v42 = vor.u32 %v6946_v37, %v6245_v59  ;;  %2396 = vmatpush.bf16.msrb.mxu0 %v6468_v41 }
 0x214   : > { %v7157_v2 = vpop.eup %7156  ;;  %v4529_v9 = vadd.f32 %v8295_v55, %v4528_v22  ;;  %v6793_v26 = vmul.f32 -1.442695, %v2130_v35  ;;  %v2036_v49 = vpop.f32.mrf.mxu0  ;;  %2543 = vmatpush.bf16.msrb.mxu3 %v6472_v39  ;;  %v5992_v56 = vor.u32 %v6882_v63, %v5989_v1  ;;  %v6213_v39 = vld [vmem:[#allocation2 + $0x228] sm:$0xf0]  ;;  %vm4655_vm4 = vcmp.eq.f32.partialorder %v4654_v12, 8.507059e+37 }
 0x215   : > { %v7159_v13 = vpop.eup %7158  ;;  %v8321_v18 = vadd.f32 1.0, %v7157_v2  ;;  %v4656_v2 = vand.u32 2147483648, %v8298_v43  ;;  %2493 = vmatpush.bf16.msrb.mxu2 %v6248_v42 }
 0x216   : > { %v4533_v22 = vsel %vm4532_vm0, %v8295_v55, %v4529_v9  ;;  %v4646_v35 = vmul.f32 %v7159_v13, %v8298_v43  ;;  %7160 = vpow2.f32 %v6793_v26  ;;  %v6938_v26 = vld [vmem:[#allocation2 + $0x20c] sm:$0xf]  ;;  %vm4651_vm1 = vweird.f32 %v7159_v13  ;;  %2444 = vmatpush.bf16.msrb.mxu1 %v5992_v56 }
 0x217   : > { %v4538_v17 = vsel %vm8315_vm15, %v4537_v52, %v4533_v22  ;;  %7162 = vrcp.f32 %v8321_v18  ;;  %2231 = vmatmul.bf16.gmra.mxu0 %v8155_v34  ;;  %2378 = vmatmul.bf16.gmra.mxu3 %v8155_v34  ;;  %v6874_v34 = vld [vmem:[#allocation2 + $0xc] sm:$0xf]  ;;  %vm4652_vm3 = vmor %vm4650_vm2, %vm4651_vm1  ;;  %v4657_v1 = vor.u32 1.1754944e-38, %v4656_v2  ;;  %v4774_v12 = vand.u32 2147483647, %v8321_v18 }
 0x218   : > { %5661 = vst [vmem:[%s8223_s14 + $0x1c0] sm:$0xff] %v4538_v17  ;;  %v4647_v55 = vsub.f32 1.0, %v4646_v35  ;;  %v5957_v17 = vld [vmem:[#allocation2 + $0x28] sm:$0xf0]  ;;  %v6216_v35 = vor.u32 %v6938_v26, %v6213_v39  ;;  %v4776_v2 = vand.u32 2147483648, %v8321_v18  ;;  %vm4770_vm6 = vweird.f32 %v8321_v18 }
 0x219   : > { %v2131_v9 = vpop.f32.mrf.mxu2  ;;  %v5960_v30 = vor.u32 %v6874_v34, %v5957_v17  ;;  %v2037_v34 = vadd.f32 %v2036_v49, %v8185_v20  ;;  %vm4775_vm8 = vcmp.eq.f32.partialorder %v4774_v12, 8.507059e+37 }
 0x21a   : > { %v4648_v0 = vmul.f32 %v7159_v13, %v4647_v55  ;;  %v2132_v23 = vadd.f32 %v2131_v9, %v2083_v31  ;;  %v2085_v52 = vpop.f32.mrf.mxu1  ;;  %v8334_v22 = vpop.f32.mrf.mxu3  ;;  %2494 = vmatpush.bf16.msrb.mxu2 %v6216_v35 }
 0x21b   : > { %2445 = vmatpush.bf16.msrb.mxu1 %v5960_v30  ;;  %v2086_v9 = vadd.f32 %v2085_v52, %v2037_v34  ;;  %v4777_v52 = vor.u32 1.1754944e-38, %v4776_v2 }
 0x21c   : > { %v7161_v37 = vpop.eup %7160  ;;  %v4649_v59 = vadd.f32 %v7159_v13, %v4648_v0  ;;  %v6801_v60 = vmul.f32 -1.442695, %v2132_v23  ;;  %v2038_v63 = vpop.f32.mrf.mxu0 }
 0x21d   : > { %v7163_v41 = vpop.eup %7162  ;;  %v3637_v55 = vadd.f32 1.0, %v7161_v37  ;;  %2280 = vmatmul.bf16.gmra.mxu1 %v8157_v36 }
 0x21e   : > { %v4653_v31 = vsel %vm4652_vm3, %v7159_v13, %v4649_v59  ;;  %v4766_v42 = vmul.f32 %v7163_v41, %v8321_v18  ;;  %7164 = vpow2.f32 %v6801_v60  ;;  %2329 = vmatmul.bf16.gmra.mxu2 %v8148_v16  ;;  %vm4771_vm5 = vweird.f32 %v7163_v41 }
 0x21f   : > { %v4658_v43 = vsel %vm4655_vm4, %v4657_v1, %v4653_v31  ;;  %7166 = vrcp.f32 %v3637_v55  ;;  %vm4772_vm7 = vmor %vm4770_vm6, %vm4771_vm5  ;;  %v2039_v31 = vadd.f32 %v2038_v63, %v8185_v20  ;;  %vm4890_vm10 = vweird.f32 %v3637_v55 }
 0x220   : > { %5669 = vst [vmem:[%s8223_s14 + $0x200] sm:$0xff] %v4658_v43  ;;  %v4767_v56 = vsub.f32 1.0, %v4766_v42  ;;  %v4894_v43 = vand.u32 2147483647, %v3637_v55 }
 0x221   : > { %v2134_v26 = vpop.f32.mrf.mxu2 }
 0x222   : > { %v4768_v13 = vmul.f32 %v7163_v41, %v4767_v56  ;;  %v2135_v39 = vadd.f32 %v2134_v26, %v2086_v9  ;;  %v2087_v0 = vpop.f32.mrf.mxu1  ;;  %v8345_v49 = vpop.f32.mrf.mxu3  ;;  %v4896_v56 = vand.u32 2147483648, %v3637_v55  ;;  %vm4895_vm12 = vcmp.eq.f32.partialorder %v4894_v43, 8.507059e+37 }
 0x223   : > { %v2088_v34 = vadd.f32 %v2087_v0, %v2039_v31 }
 0x224   : > { %v7165_v23 = vpop.eup %7164  ;;  %v4769_v17 = vadd.f32 %v7163_v41, %v4768_v13  ;;  %v6809_v35 = vmul.f32 -1.442695, %v2135_v39  ;;  %v2041_v30 = vpop.f32.mrf.mxu0 }
 0x225   : > { %v7167_v37 = vpop.eup %7166  ;;  %v3645_v59 = vadd.f32 1.0, %v7165_v23 }
 0x226   : > { %v4773_v60 = vsel %vm4772_vm7, %v7163_v41, %v4769_v17  ;;  %v4886_v1 = vmul.f32 %v7167_v37, %v3637_v55  ;;  %7168 = vpow2.f32 %v6809_v35  ;;  %vm4891_vm9 = vweird.f32 %v7167_v37 }
 0x227   : > { %v4778_v42 = vsel %vm4775_vm8, %v4777_v52, %v4773_v60  ;;  %7170 = vrcp.f32 %v3645_v59  ;;  %2236 = vmatmul.bf16.gmra.mxu0 %v8171_v6  ;;  %2383 = vmatmul.bf16.gmra.mxu3 %v8171_v6  ;;  %vm4892_vm11 = vmor %vm4890_vm10, %vm4891_vm9  ;;  %v4897_v35 = vor.u32 1.1754944e-38, %v4896_v56  ;;  %vm5010_vm14 = vweird.f32 %v3645_v59 }
 0x228   : > { %5677 = vst [vmem:[%s8223_s14 + $0x240] sm:$0xff] %v4778_v42  ;;  %v4887_v18 = vsub.f32 1.0, %v4886_v1  ;;  %v2042_v1 = vadd.f32 %v2041_v30, %v8185_v20  ;;  %v8364_v30 = vperm.slane %v8180_v8, 1 }
 0x229   : > { %v2136_v9 = vpop.f32.mrf.mxu2 }
 0x22a   : > { %v4888_v12 = vmul.f32 %v7167_v37, %v4887_v18  ;;  %v2137_v2 = vadd.f32 %v2136_v9, %v2088_v34  ;;  %v2090_v41 = vpop.f32.mrf.mxu1  ;;  %v8352_v26 = vpop.f32.mrf.mxu3  ;;  %v5014_v18 = vand.u32 2147483647, %v3645_v59  ;;  %v5016_v34 = vand.u32 2147483648, %v3645_v59 }
 0x22b   : > { %v2091_v42 = vadd.f32 %v2090_v41, %v2042_v1  ;;  %v2154_v8 = vadd.f32 %v8187_v11, %v8364_v30 }
 0x22c   : > { %v7169_v63 = vpop.eup %7168  ;;  %v4889_v13 = vadd.f32 %v7167_v37, %v4888_v12  ;;  %v6817_v39 = vmul.f32 -1.442695, %v2137_v2  ;;  %v2043_v23 = vpop.f32.mrf.mxu0  ;;  %vm5015_vm0 = vcmp.eq.f32.partialorder %v5014_v18, 8.507059e+37  ;;  %v5017_v41 = vor.u32 1.1754944e-38, %v5016_v34 }
 0x22d   : > { %v7171_v17 = vpop.eup %7170  ;;  %v8354_v0 = vadd.f32 1.0, %v7169_v63  ;;  %2285 = vmatmul.bf16.gmra.mxu1 %v8173_v7 }
 0x22e   : > { %v4893_v52 = vsel %vm4892_vm11, %v7167_v37, %v4889_v13  ;;  %v5006_v60 = vmul.f32 %v7171_v17, %v3645_v59  ;;  %7172 = vpow2.f32 %v6817_v39  ;;  %2334 = vmatmul.bf16.gmra.mxu2 %v8164_v58  ;;  %vm5011_vm13 = vweird.f32 %v7171_v17 }
 0x22f   : > { %v4898_v31 = vsel %vm4895_vm12, %v4897_v35, %v4893_v52  ;;  %7174 = vrcp.f32 %v8354_v0  ;;  %vm5012_vm15 = vmor %vm5010_vm14, %vm5011_vm13  ;;  %vm5130_vm2 = vweird.f32 %v8354_v0 }
 0x230   : > { %5685 = vst [vmem:[%s8223_s14 + $0x280] sm:$0xff] %v4898_v31  ;;  %v5007_v55 = vsub.f32 1.0, %v5006_v60  ;;  %v2044_v31 = vadd.f32 %v2043_v23, %v8185_v20  ;;  %v7634_v20 = vld [vmem:[%s10685_s6] sm:$0xff] }
 0x231   : > { %v2139_v43 = vpop.f32.mrf.mxu2  ;;  %v8380_v23 = vperm.slane %v7634_v20, 2  ;;  %v6443_v20 = vld [vmem:[#allocation2 + $0x3d0] sm:$0xf] }
 0x232   : > { %v5008_v56 = vmul.f32 %v7171_v17, %v5007_v55  ;;  %v2140_v9 = vadd.f32 %v2139_v43, %v2091_v42  ;;  %v2092_v12 = vpop.f32.mrf.mxu1  ;;  %v8361_v37 = vpop.f32.mrf.mxu3  ;;  %v5134_v43 = vand.u32 2147483647, %v8354_v0 }
 0x233   : > { %v2093_v42 = vadd.f32 %v2092_v12, %v2044_v31  ;;  %v7063_v12 = vld [vmem:[#allocation2 + $0x5ec] sm:$0xf0] }
 0x234   : > { %v7173_v2 = vpop.eup %7172  ;;  %v5009_v63 = vadd.f32 %v7171_v17, %v5008_v56  ;;  %v6825_v13 = vmul.f32 -1.442695, %v2140_v9  ;;  %v2202_v39 = vpop.f32.mrf.mxu0  ;;  %vm5135_vm4 = vcmp.eq.f32.partialorder %v5134_v43, 8.507059e+37 }
 0x235   : > { %v7175_v35 = vpop.eup %7174  ;;  %v8366_v52 = vadd.f32 1.0, %v7173_v2  ;;  %v2203_v18 = vadd.f32 %v2202_v39, %v2154_v8 }
 0x236   : > { %v5013_v60 = vsel %vm5012_vm15, %v7171_v17, %v5009_v63  ;;  %v5126_v1 = vmul.f32 %v7175_v35, %v8354_v0  ;;  %7176 = vpow2.f32 %v6825_v13  ;;  %v5136_v17 = vand.u32 2147483648, %v8354_v0  ;;  %v6699_v13 = vld [vmem:[#allocation2 + $0x5d0] sm:$0xf] }
 0x237   : > { %v5018_v55 = vsel %vm5015_vm0, %v5017_v41, %v5013_v60  ;;  %7178 = vrcp.f32 %v8366_v52  ;;  %2397 = vmatmul.bf16.vlgmr.msrb.gmra.mxu0 %v8061_v46  ;;  %2544 = vmatmul.bf16.vlgmr.msrb.gmra.mxu3 %v8061_v46  ;;  %vm5131_vm1 = vweird.f32 %v7175_v35  ;;  %v6931_v41 = vld [vmem:[#allocation2 + $0x1d4] sm:$0xf]  ;;  %v6700_v8 = vor.u32 %v7063_v12, %v6699_v13 }
 0x238   : > { %5693 = vst [vmem:[%s8223_s14 + $0x2c0] sm:$0xff] %v5018_v55  ;;  %v5127_v59 = vsub.f32 1.0, %v5126_v1  ;;  %v6189_v55 = vld [vmem:[#allocation2 + $0x1f0] sm:$0xf0]  ;;  %vm5132_vm3 = vmor %vm5130_vm2, %vm5131_vm1  ;;  %v5137_v46 = vor.u32 1.1754944e-38, %v5136_v17  ;;  %vm5250_vm6 = vweird.f32 %v8366_v52 }
 0x239   : > { %v2141_v34 = vpop.f32.mrf.mxu2  ;;  %2683 = vmatpush.bf16.msra.mxu2 %v6700_v8  ;;  %v6935_v8 = vld [vmem:[#allocation2 + $0x1ec] sm:$0xf0] }
 0x23a   : > { %v5128_v11 = vmul.f32 %v7175_v35, %v5127_v59  ;;  %v2142_v56 = vadd.f32 %v2141_v34, %v2093_v42  ;;  %v2251_v9 = vpop.f32.mrf.mxu1  ;;  %v2349_v2 = vpop.f32.mrf.mxu3  ;;  %v6192_v34 = vor.u32 %v6931_v41, %v6189_v55 }
 0x23b   : > { %v2252_v63 = vadd.f32 %v2251_v9, %v2203_v18  ;;  %v6999_v9 = vld [vmem:[#allocation2 + $0x3ec] sm:$0xf0] }
 0x23c   : > { %v7177_v60 = vpop.eup %7176  ;;  %v5129_v39 = vadd.f32 %v7175_v35, %v5128_v11  ;;  %v6833_v1 = vmul.f32 -1.442695, %v2142_v56  ;;  %v2204_v31 = vpop.f32.mrf.mxu0  ;;  %v2156_v56 = vadd.f32 %v8192_v32, %v8364_v30  ;;  %2732 = vmatpush.bf16.msra.mxu3 %v6192_v34 }
 0x23d   : > { %v7179_v59 = vpop.eup %7178  ;;  %v8385_v42 = vadd.f32 1.0, %v7177_v60  ;;  %v6714_v18 = vmul.f32 -1.442695, %v2252_v63  ;;  %2446 = vmatmul.bf16.vlgmr.msrb.gmra.mxu1 %v8052_v27  ;;  %v6444_v63 = vor.u32 %v6999_v9, %v6443_v20  ;;  %v5254_v60 = vand.u32 2147483647, %v8366_v52 }
 0x23e   : > { %v5133_v11 = vsel %vm5132_vm3, %v7175_v35, %v5129_v39  ;;  %v5246_v0 = vmul.f32 %v7179_v59, %v8366_v52  ;;  %7180 = vpow2.f32 %v6833_v1  ;;  %2495 = vmatmul.bf16.vlgmr.msrb.gmra.mxu2 %v8059_v45  ;;  %v5256_v35 = vand.u32 2147483648, %v8366_v52  ;;  %v6187_v1 = vld [vmem:[#allocation2 + $0x1d0] sm:$0xf] }
 0x23f   : > { %v5138_v13 = vsel %vm5135_vm4, %v5137_v46, %v5133_v11  ;;  %7182 = vrcp.f32 %v8385_v42  ;;  %v2205_v43 = vadd.f32 %v2204_v31, %v2156_v56  ;;  %vm5251_vm5 = vweird.f32 %v7179_v59  ;;  %2634 = vmatpush.bf16.msra.mxu1 %v6444_v63 }
 0x240   : > { %5701 = vst [vmem:[%s8223_s14 + $0x300] sm:$0xff] %v5138_v13  ;;  %v5247_v17 = vsub.f32 1.0, %v5246_v0  ;;  %7184 = vpow2.f32 %v6714_v18  ;;  %v6188_v34 = vor.u32 %v6935_v8, %v6187_v1  ;;  %vm5252_vm7 = vmor %vm5250_vm6, %vm5251_vm5  ;;  %v5257_v0 = vor.u32 1.1754944e-38, %v5256_v35 }
 0x241   : > { %v2300_v12 = vpop.f32.mrf.mxu2  ;;  %vm5255_vm8 = vcmp.eq.f32.partialorder %v5254_v60, 8.507059e+37  ;;  %v2159_v52 = vadd.f32 %v8197_v57, %v8364_v30  ;;  %v5374_v57 = vand.u32 2147483647, %v8385_v42  ;;  %vm5370_vm10 = vweird.f32 %v8385_v42 }
 0x242   : > { %v5248_v41 = vmul.f32 %v7179_v59, %v5247_v17  ;;  %v2301_v39 = vadd.f32 %v2300_v12, %v8380_v23  ;;  %v2253_v46 = vpop.f32.mrf.mxu1  ;;  %v8397_v32 = vpop.f32.mrf.mxu3  ;;  %2585 = vmatpush.bf16.msra.mxu0 %v6188_v34  ;;  %v6923_v34 = vld [vmem:[#allocation2 + $0x194] sm:$0xf] }
 0x243   : > { %v2254_v55 = vadd.f32 %v2253_v46, %v2205_v43  ;;  %v7055_v46 = vld [vmem:[#allocation2 + $0x5ac] sm:$0xf0]  ;;  %vm5375_vm12 = vcmp.eq.f32.partialorder %v5374_v57, 8.507059e+37 }
 0x244   : > { %v7181_v18 = vpop.eup %7180  ;;  %v5249_v20 = vadd.f32 %v7179_v59, %v5248_v41  ;;  %v2207_v31 = vpop.f32.mrf.mxu0  ;;  %v8400_v9 = vadd.f32 %v2349_v2, %v2301_v39  ;;  %v6667_v39 = vld [vmem:[#allocation2 + $0x590] sm:$0xf] }
 0x245   : > { %v7183_v11 = vpop.eup %7182  ;;  %v8403_v56 = vadd.f32 1.0, %v7181_v18  ;;  %v6722_v13 = vmul.f32 -1.442695, %v2254_v55  ;;  %v2208_v41 = vadd.f32 %v2207_v31, %v2159_v52  ;;  %v6157_v18 = vld [vmem:[#allocation2 + $0x1b0] sm:$0xf0] }
 0x246   : > { %v7185_v17 = vpop.eup %7184  ;;  %v5253_v63 = vsel %vm5252_vm7, %v7179_v59, %v5249_v20  ;;  %v5366_v43 = vmul.f32 %v7183_v11, %v8385_v42  ;;  %v5376_v59 = vand.u32 2147483648, %v8385_v42  ;;  %vm5371_vm9 = vweird.f32 %v7183_v11  ;;  %v6991_v52 = vld [vmem:[#allocation2 + $0x3ac] sm:$0xf0] }
 0x247   : > { %v5258_v12 = vsel %vm5255_vm8, %v5257_v0, %v5253_v63  ;;  %7186 = vrcp.f32 %v8403_v56  ;;  %2402 = vmatmul.bf16.gmra.mxu0 %v8077_v15  ;;  %2549 = vmatmul.bf16.gmra.mxu3 %v8077_v15  ;;  %v8412_v35 = vadd.f32 1.0, %v7185_v17  ;;  %v6668_v63 = vor.u32 %v7055_v46, %v6667_v39  ;;  %vm5372_vm11 = vmor %vm5370_vm10, %vm5371_vm9 }
 0x248   : > { %5709 = vst [vmem:[%s8223_s14 + $0x340] sm:$0xff] %v5258_v12  ;;  %v5367_v2 = vsub.f32 1.0, %v5366_v43  ;;  %7188 = vpow2.f32 %v6722_v13  ;;  %v6411_v13 = vld [vmem:[#allocation2 + $0x390] sm:$0xf]  ;;  %v6160_v43 = vor.u32 %v6923_v34, %v6157_v18  ;;  %v5377_v15 = vor.u32 1.1754944e-38, %v5376_v59 }
 0x249   : > { %v2302_v60 = vpop.f32.mrf.mxu2  ;;  %7190 = vrcp.f32 %v8412_v35  ;;  %v6412_v39 = vor.u32 %v6991_v52, %v6411_v13  ;;  %2684 = vmatpush.bf16.msra.mxu2 %v6668_v63  ;;  %vm5490_vm14 = vweird.f32 %v8403_v56  ;;  %vm3705_vm2 = vweird.f32 %v8412_v35 }
 0x24a   : > { %v5368_v1 = vmul.f32 %v7183_v11, %v5367_v2  ;;  %v2256_v8 = vpop.f32.mrf.mxu1  ;;  %v2354_v55 = vpop.f32.mrf.mxu3  ;;  %v2303_v20 = vadd.f32 %v2302_v60, %v8380_v23  ;;  %v2161_v2 = vadd.f32 %v8202_v21, %v8364_v30  ;;  %2733 = vmatpush.bf16.msra.mxu3 %v6160_v43 }
 0x24b   : > { %v2257_v0 = vadd.f32 %v2256_v8, %v2208_v41  ;;  %2635 = vmatpush.bf16.msra.mxu1 %v6412_v39 }
 0x24c   : > { %v5369_v17 = vadd.f32 %v7183_v11, %v5368_v1  ;;  %v2209_v31 = vpop.f32.mrf.mxu0  ;;  %v8428_v21 = vadd.f32 %v8397_v32, %v2303_v20 }
 0x24d   : > { %v7187_v12 = vpop.eup %7186  ;;  %v6730_v45 = vmul.f32 -1.442695, %v2257_v0  ;;  %2451 = vmatmul.bf16.gmra.mxu1 %v8068_v61  ;;  %v2210_v34 = vadd.f32 %v2209_v31, %v2161_v2  ;;  %v6927_v0 = vld [vmem:[#allocation2 + $0x1ac] sm:$0xf0]  ;;  %v3711_v31 = vand.u32 2147483648, %v8412_v35 }
 0x24e   : > { %v7189_v41 = vpop.eup %7188  ;;  %v5373_v60 = vsel %vm5372_vm11, %v7183_v11, %v5369_v17  ;;  %v5486_v42 = vmul.f32 %v7187_v12, %v8403_v56  ;;  %2500 = vmatmul.bf16.gmra.mxu2 %v8075_v14  ;;  %v5496_v11 = vand.u32 2147483648, %v8403_v56  ;;  %vm5491_vm13 = vweird.f32 %v7187_v12 }
 0x24f   : > { %v5378_v46 = vsel %vm5375_vm12, %v5377_v15, %v5373_v60  ;;  %v8425_v1 = vadd.f32 1.0, %v7189_v41  ;;  %7192 = vpow2.f32 %v6730_v45  ;;  %v7191_v59 = vpop.eup %7190  ;;  %v6155_v15 = vld [vmem:[#allocation2 + $0x190] sm:$0xf]  ;;  %v5494_v45 = vand.u32 2147483647, %v8403_v56  ;;  %vm5492_vm15 = vmor %vm5490_vm14, %vm5491_vm13 }
 0x250   : > { %5717 = vst [vmem:[%s8223_s14 + $0x380] sm:$0xff] %v5378_v46  ;;  %v5487_v8 = vsub.f32 1.0, %v5486_v42  ;;  %v3701_v57 = vmul.f32 %v7191_v59, %v8412_v35  ;;  %v6156_v52 = vor.u32 %v6927_v0, %v6155_v15  ;;  %v5497_v60 = vor.u32 1.1754944e-38, %v5496_v11 }
 0x251   : > { %7194 = vrcp.f32 %v8425_v1  ;;  %v2305_v18 = vpop.f32.mrf.mxu2  ;;  %vm3706_vm0 = vweird.f32 %v7191_v59  ;;  %v2164_v56 = vadd.f32 %v8213_v62, %v8364_v30  ;;  %vm5495_vm1 = vcmp.eq.f32.partialorder %v5494_v45, 8.507059e+37 }
 0x252   : > { %v5488_v13 = vmul.f32 %v7187_v12, %v5487_v8  ;;  %v2306_v32 = vadd.f32 %v2305_v18, %v8380_v23  ;;  %v2258_v20 = vpop.f32.mrf.mxu1  ;;  %v2356_v17 = vpop.f32.mrf.mxu3  ;;  %v3702_v63 = vsub.f32 1.0, %v3701_v57  ;;  %v3709_v8 = vand.u32 2147483647, %v8412_v35  ;;  %2586 = vmatpush.bf16.msra.mxu0 %v6156_v52  ;;  %vm3707_vm3 = vmor %vm3705_vm2, %vm3706_vm0 }
 0x253   : > { %v2259_v43 = vadd.f32 %v2258_v20, %v2210_v34  ;;  %v3712_v0 = vor.u32 1.1754944e-38, %v3711_v31  ;;  %v3829_v31 = vand.u32 2147483647, %v8425_v1  ;;  %vm3825_vm6 = vweird.f32 %v8425_v1 }
 0x254   : > { %v5489_v41 = vadd.f32 %v7187_v12, %v5488_v13  ;;  %v2212_v2 = vpop.f32.mrf.mxu0  ;;  %v8438_v42 = vadd.f32 %v2354_v55, %v2306_v32  ;;  %v3703_v46 = vmul.f32 %v7191_v59, %v3702_v63  ;;  %vm3710_vm4 = vcmp.eq.f32.partialorder %v3709_v8, 8.507059e+37  ;;  %v6635_v32 = vld [vmem:[#allocation2 + $0x550] sm:$0xf] }
 0x255   : > { %v7193_v39 = vpop.eup %7192  ;;  %v6738_v18 = vmul.f32 -1.442695, %v2259_v43  ;;  %v2213_v13 = vadd.f32 %v2212_v2, %v2164_v56  ;;  %vm3830_vm8 = vcmp.eq.f32.partialorder %v3829_v31, 8.507059e+37 }
 0x256   : > { %v5493_v57 = vsel %vm5492_vm15, %v7187_v12, %v5489_v41  ;;  %v8444_v11 = vadd.f32 1.0, %v7193_v39  ;;  %v3704_v15 = vadd.f32 %v7191_v59, %v3703_v46  ;;  %v7047_v41 = vld [vmem:[#allocation2 + $0x56c] sm:$0xf0]  ;;  %v3831_v39 = vand.u32 2147483648, %v8425_v1 }
 0x257   : > { %v7195_v34 = vpop.eup %7194  ;;  %v5498_v55 = vsel %vm5495_vm1, %v5497_v60, %v5493_v57  ;;  %7196 = vpow2.f32 %v6738_v18  ;;  %2407 = vmatmul.bf16.gmra.mxu0 %v8093_v54  ;;  %2554 = vmatmul.bf16.gmra.mxu3 %v8093_v54  ;;  %v6915_v60 = vld [vmem:[#allocation2 + $0x154] sm:$0xf]  ;;  %v6636_v18 = vor.u32 %v7047_v41, %v6635_v32  ;;  %v6379_v57 = vld [vmem:[#allocation2 + $0x350] sm:$0xf] }
 0x258   : > { %5725 = vst [vmem:[%s8223_s14 + $0x3c0] sm:$0xff] %v5498_v55  ;;  %v3821_v62 = vmul.f32 %v7195_v34, %v8425_v1  ;;  %7198 = vrcp.f32 %v8444_v11  ;;  %v3708_v12 = vsel %vm3707_vm3, %v7191_v59, %v3704_v15  ;;  %v6125_v59 = vld [vmem:[#allocation2 + $0x170] sm:$0xf0]  ;;  %vm3826_vm5 = vweird.f32 %v7195_v34  ;;  %v6983_v55 = vld [vmem:[#allocation2 + $0x36c] sm:$0xf0] }
 0x259   : > { %v2307_v45 = vpop.f32.mrf.mxu2  ;;  %v3713_v35 = vsel %vm3710_vm4, %v3712_v0, %v3708_v12  ;;  %v6128_v56 = vor.u32 %v6915_v60, %v6125_v59  ;;  %2685 = vmatpush.bf16.msra.mxu2 %v6636_v18  ;;  %v6380_v12 = vor.u32 %v6983_v55, %v6379_v57  ;;  %vm3827_vm7 = vmor %vm3825_vm6, %vm3826_vm5  ;;  %v3832_v32 = vor.u32 1.1754944e-38, %v3831_v39  ;;  %v6919_v18 = vld [vmem:[#allocation2 + $0x16c] sm:$0xf0] }
 0x25a   : > { %v3822_v20 = vsub.f32 1.0, %v3821_v62  ;;  %v2308_v63 = vadd.f32 %v2307_v45, %v8380_v23  ;;  %v2261_v43 = vpop.f32.mrf.mxu1  ;;  %v2359_v52 = vpop.f32.mrf.mxu3  ;;  %5606 = vst [vmem:[%s8223_s14 + $0x8] sm:$0xff] %v3713_v35  ;;  %vm3945_vm10 = vweird.f32 %v8444_v11 }
 0x25b   : > { %v2262_v46 = vadd.f32 %v2261_v43, %v2213_v13  ;;  %2734 = vmatpush.bf16.msra.mxu3 %v6128_v56  ;;  %2636 = vmatpush.bf16.msra.mxu1 %v6380_v12 }
 0x25c   : > { %v3823_v8 = vmul.f32 %v7195_v34, %v3822_v20  ;;  %v2214_v2 = vpop.f32.mrf.mxu0  ;;  %v8457_v15 = vadd.f32 %v2356_v17, %v2308_v63  ;;  %v2166_v17 = vadd.f32 %v8227_v47, %v8364_v30  ;;  %v3951_v47 = vand.u32 2147483648, %v8444_v11 }
 0x25d   : > { %v7197_v0 = vpop.eup %7196  ;;  %v6746_v62 = vmul.f32 -1.442695, %v2262_v46  ;;  %2456 = vmatmul.bf16.gmra.mxu1 %v8084_v33  ;;  %v6123_v46 = vld [vmem:[#allocation2 + $0x150] sm:$0xf] }
 0x25e   : > { %v7199_v45 = vpop.eup %7198  ;;  %v3824_v35 = vadd.f32 %v7195_v34, %v3823_v8  ;;  %v8461_v13 = vadd.f32 1.0, %v7197_v0  ;;  %2505 = vmatmul.bf16.gmra.mxu2 %v8091_v53  ;;  %v2215_v41 = vadd.f32 %v2214_v2, %v2166_v17  ;;  %v6124_v56 = vor.u32 %v6919_v18, %v6123_v46 }
 0x25f   : > { %v3941_v20 = vmul.f32 %v7199_v45, %v8444_v11  ;;  %7200 = vpow2.f32 %v6746_v62  ;;  %vm3946_vm9 = vweird.f32 %v7199_v45  ;;  %v2169_v17 = vadd.f32 %v8240_v38, %v8364_v30 }
 0x260   : > { %v3828_v63 = vsel %vm3827_vm7, %v7195_v34, %v3824_v35  ;;  %7202 = vrcp.f32 %v8461_v13  ;;  %v3949_v34 = vand.u32 2147483647, %v8444_v11  ;;  %2587 = vmatpush.bf16.msra.mxu0 %v6124_v56  ;;  %vm3947_vm11 = vmor %vm3945_vm10, %vm3946_vm9  ;;  %v4069_v38 = vand.u32 2147483647, %v8461_v13 }
 0x261   : > { %v3833_v1 = vsel %vm3830_vm8, %v3832_v32, %v3828_v63  ;;  %v3942_v43 = vsub.f32 1.0, %v3941_v20  ;;  %v2310_v60 = vpop.f32.mrf.mxu2  ;;  %v3952_v32 = vor.u32 1.1754944e-38, %v3951_v47  ;;  %vm4065_vm14 = vweird.f32 %v8461_v13 }
 0x262   : > { %5614 = vst [vmem:[%s8223_s14 + $0x48] sm:$0xff] %v3833_v1  ;;  %v2311_v59 = vadd.f32 %v2310_v60, %v8380_v23  ;;  %v2263_v39 = vpop.f32.mrf.mxu1  ;;  %v2361_v8 = vpop.f32.mrf.mxu3  ;;  %vm3950_vm12 = vcmp.eq.f32.partialorder %v3949_v34, 8.507059e+37  ;;  %v6603_v60 = vld [vmem:[#allocation2 + $0x510] sm:$0xf]  ;;  %vm4070_vm0 = vcmp.eq.f32.partialorder %v4069_v38, 8.507059e+37 }
 0x263   : > { %v3943_v57 = vmul.f32 %v7199_v45, %v3942_v43  ;;  %v2264_v31 = vadd.f32 %v2263_v39, %v2215_v41  ;;  %v6907_v39 = vld [vmem:[#allocation2 + $0x114] sm:$0xf] }
 0x264   : > { %v2217_v55 = vpop.f32.mrf.mxu0  ;;  %v8473_v0 = vadd.f32 %v2359_v52, %v2311_v59  ;;  %v7039_v59 = vld [vmem:[#allocation2 + $0x52c] sm:$0xf0] }
 0x265   : > { %v7201_v2 = vpop.eup %7200  ;;  %v3944_v62 = vadd.f32 %v7199_v45, %v3943_v57  ;;  %v6754_v12 = vmul.f32 -1.442695, %v2264_v31  ;;  %v2218_v43 = vadd.f32 %v2217_v55, %v2169_v17  ;;  %v6604_v34 = vor.u32 %v7039_v59, %v6603_v60  ;;  %v6093_v31 = vld [vmem:[#allocation2 + $0x130] sm:$0xf0] }
 0x266   : > { %v7203_v35 = vpop.eup %7202  ;;  %v8478_v20 = vadd.f32 1.0, %v7201_v2  ;;  %v6347_v2 = vld [vmem:[#allocation2 + $0x310] sm:$0xf] }
 0x267   : > { %v3948_v63 = vsel %vm3947_vm11, %v7199_v45, %v3944_v62  ;;  %v4061_v1 = vmul.f32 %v7203_v35, %v8461_v13  ;;  %7204 = vpow2.f32 %v6754_v12  ;;  %2412 = vmatmul.bf16.gmra.mxu0 %v8109_v29  ;;  %2559 = vmatmul.bf16.gmra.mxu3 %v8109_v29  ;;  %v4071_v45 = vand.u32 2147483648, %v8461_v13 }
 0x268   : > { %v3953_v52 = vsel %vm3950_vm12, %v3952_v32, %v3948_v63  ;;  %7206 = vrcp.f32 %v8478_v20  ;;  %vm4066_vm13 = vweird.f32 %v7203_v35  ;;  %v6096_v12 = vor.u32 %v6907_v39, %v6093_v31  ;;  %v6975_v32 = vld [vmem:[#allocation2 + $0x32c] sm:$0xf0]  ;;  %2686 = vmatpush.bf16.msra.mxu2 %v6604_v34 }
 0x269   : > { %5622 = vst [vmem:[%s8223_s14 + $0x88] sm:$0xff] %v3953_v52  ;;  %v4062_v11 = vsub.f32 1.0, %v4061_v1  ;;  %v2312_v41 = vpop.f32.mrf.mxu2  ;;  %v6348_v52 = vor.u32 %v6975_v32, %v6347_v2  ;;  %vm4067_vm15 = vmor %vm4065_vm14, %vm4066_vm13  ;;  %v6091_v39 = vld [vmem:[#allocation2 + $0x110] sm:$0xf]  ;;  %vm4185_vm2 = vweird.f32 %v8478_v20 }
 0x26a   : > { %v2313_v46 = vadd.f32 %v2312_v41, %v8380_v23  ;;  %v2266_v18 = vpop.f32.mrf.mxu1  ;;  %v2364_v47 = vpop.f32.mrf.mxu3  ;;  %v4072_v41 = vor.u32 1.1754944e-38, %v4071_v45  ;;  %2735 = vmatpush.bf16.msra.mxu3 %v6096_v12  ;;  %v4189_v45 = vand.u32 2147483647, %v8478_v20  ;;  %v6911_v34 = vld [vmem:[#allocation2 + $0x12c] sm:$0xf0] }
 0x26b   : > { %v4063_v56 = vmul.f32 %v7203_v35, %v4062_v11  ;;  %v2267_v57 = vadd.f32 %v2266_v18, %v2218_v43  ;;  %v2171_v43 = vadd.f32 %v8253_v24, %v8364_v30  ;;  %2637 = vmatpush.bf16.msra.mxu1 %v6348_v52  ;;  %v6092_v12 = vor.u32 %v6911_v34, %v6091_v39 }
 0x26c   : > { %v2219_v62 = vpop.f32.mrf.mxu0  ;;  %v8488_v55 = vadd.f32 %v2361_v8, %v2313_v46  ;;  %vm4190_vm4 = vcmp.eq.f32.partialorder %v4189_v45, 8.507059e+37 }
 0x26d   : > { %v7205_v17 = vpop.eup %7204  ;;  %v4064_v63 = vadd.f32 %v7203_v35, %v4063_v56  ;;  %v6762_v1 = vmul.f32 -1.442695, %v2267_v57  ;;  %2461 = vmatmul.bf16.gmra.mxu1 %v8100_v5  ;;  %v2220_v24 = vadd.f32 %v2219_v62, %v2171_v43  ;;  %v4191_v56 = vand.u32 2147483648, %v8478_v20  ;;  %2588 = vmatpush.bf16.msra.mxu0 %v6092_v12  ;;  %v6061_v12 = vld [vmem:[#allocation2 + $0xf0] sm:$0xf0] }
 0x26e   : > { %v7207_v11 = vpop.eup %7206  ;;  %v8495_v60 = vadd.f32 1.0, %v7205_v17  ;;  %2510 = vmatmul.bf16.gmra.mxu2 %v8107_v28  ;;  %v2174_v43 = vadd.f32 %v8266_v10, %v8364_v30 }
 0x26f   : > { %v4068_v8 = vsel %vm4067_vm15, %v7203_v35, %v4064_v63  ;;  %v4181_v13 = vmul.f32 %v7207_v11, %v8478_v20  ;;  %7208 = vpow2.f32 %v6762_v1  ;;  %vm4186_vm1 = vweird.f32 %v7207_v11 }
 0x270   : > { %v4073_v46 = vsel %vm4070_vm0, %v4072_v41, %v4068_v8  ;;  %7210 = vrcp.f32 %v8495_v60  ;;  %vm4187_vm3 = vmor %vm4185_vm2, %vm4186_vm1  ;;  %v4192_v41 = vor.u32 1.1754944e-38, %v4191_v56  ;;  %v4309_v10 = vand.u32 2147483647, %v8495_v60 }
 0x271   : > { %5630 = vst [vmem:[%s8223_s14 + $0xc8] sm:$0xff] %v4073_v46  ;;  %v4182_v18 = vsub.f32 1.0, %v4181_v13  ;;  %v2315_v59 = vpop.f32.mrf.mxu2  ;;  %vm4305_vm6 = vweird.f32 %v8495_v60 }
 0x272   : > { %v2316_v57 = vadd.f32 %v2315_v59, %v8380_v23  ;;  %v2268_v35 = vpop.f32.mrf.mxu1  ;;  %v2366_v38 = vpop.f32.mrf.mxu3  ;;  %v6571_v59 = vld [vmem:[#allocation2 + $0x4d0] sm:$0xf]  ;;  %vm4310_vm8 = vcmp.eq.f32.partialorder %v4309_v10, 8.507059e+37 }
 0x273   : > { %v4183_v31 = vmul.f32 %v7207_v11, %v4182_v18  ;;  %v2269_v2 = vadd.f32 %v2268_v35, %v2220_v24  ;;  %v6899_v35 = vld [vmem:[#allocation2 + $0xd4] sm:$0xf] }
 0x274   : > { %v2222_v32 = vpop.f32.mrf.mxu0  ;;  %v8504_v17 = vadd.f32 %v2364_v47, %v2316_v57  ;;  %v7031_v57 = vld [vmem:[#allocation2 + $0x4ec] sm:$0xf0] }
 0x275   : > { %v7209_v63 = vpop.eup %7208  ;;  %v4184_v62 = vadd.f32 %v7207_v11, %v4183_v31  ;;  %v6770_v1 = vmul.f32 -1.442695, %v2269_v2  ;;  %v2223_v18 = vadd.f32 %v2222_v32, %v2174_v43  ;;  %v6572_v2 = vor.u32 %v7031_v57, %v6571_v59 }
 0x276   : > { %v7211_v52 = vpop.eup %7210  ;;  %v8509_v8 = vadd.f32 1.0, %v7209_v63  ;;  %v6315_v63 = vld [vmem:[#allocation2 + $0x2d0] sm:$0xf] }
 0x277   : > { %v4188_v13 = vsel %vm4187_vm3, %v7207_v11, %v4184_v62  ;;  %v4301_v47 = vmul.f32 %v7211_v52, %v8495_v60  ;;  %7212 = vpow2.f32 %v6770_v1  ;;  %2417 = vmatmul.bf16.gmra.mxu0 %v8125_v4  ;;  %2564 = vmatmul.bf16.gmra.mxu3 %v8125_v4  ;;  %v4311_v11 = vand.u32 2147483648, %v8495_v60 }
 0x278   : > { %v4193_v20 = vsel %vm4190_vm4, %v4192_v41, %v4188_v13  ;;  %7214 = vrcp.f32 %v8509_v8  ;;  %vm4306_vm5 = vweird.f32 %v7211_v52  ;;  %v6064_v1 = vor.u32 %v6899_v35, %v6061_v12  ;;  %v6967_v41 = vld [vmem:[#allocation2 + $0x2ec] sm:$0xf0]  ;;  %2687 = vmatpush.bf16.msra.mxu2 %v6572_v2 }
 0x279   : > { %5638 = vst [vmem:[%s8223_s14 + $0x108] sm:$0xff] %v4193_v20  ;;  %v4302_v46 = vsub.f32 1.0, %v4301_v47  ;;  %v2317_v24 = vpop.f32.mrf.mxu2  ;;  %v6316_v20 = vor.u32 %v6967_v41, %v6315_v63  ;;  %vm4307_vm7 = vmor %vm4305_vm6, %vm4306_vm5  ;;  %v6059_v35 = vld [vmem:[#allocation2 + $0xd0] sm:$0xf]  ;;  %vm4425_vm10 = vweird.f32 %v8509_v8 }
 0x27a   : > { %v2318_v39 = vadd.f32 %v2317_v24, %v8380_v23  ;;  %v2271_v45 = vpop.f32.mrf.mxu1  ;;  %v2369_v56 = vpop.f32.mrf.mxu3  ;;  %v4312_v24 = vor.u32 1.1754944e-38, %v4311_v11  ;;  %2736 = vmatpush.bf16.msra.mxu3 %v6064_v1  ;;  %v4429_v11 = vand.u32 2147483647, %v8509_v8  ;;  %v6903_v2 = vld [vmem:[#allocation2 + $0xec] sm:$0xf0] }
 0x27b   : > { %v4303_v34 = vmul.f32 %v7211_v52, %v4302_v46  ;;  %v2272_v31 = vadd.f32 %v2271_v45, %v2223_v18  ;;  %v2176_v18 = vadd.f32 %v8279_v19, %v8364_v30  ;;  %2638 = vmatpush.bf16.msra.mxu1 %v6316_v20  ;;  %v6060_v1 = vor.u32 %v6903_v2, %v6059_v35 }
 0x27c   : > { %v2224_v62 = vpop.f32.mrf.mxu0  ;;  %v8519_v32 = vadd.f32 %v2366_v38, %v2318_v39  ;;  %vm4430_vm12 = vcmp.eq.f32.partialorder %v4429_v11, 8.507059e+37 }
 0x27d   : > { %v7213_v43 = vpop.eup %7212  ;;  %v4304_v13 = vadd.f32 %v7211_v52, %v4303_v34  ;;  %v6778_v47 = vmul.f32 -1.442695, %v2272_v31  ;;  %2466 = vmatmul.bf16.gmra.mxu1 %v8116_v48  ;;  %v2225_v19 = vadd.f32 %v2224_v62, %v2176_v18  ;;  %v4431_v34 = vand.u32 2147483648, %v8509_v8  ;;  %2589 = vmatpush.bf16.msra.mxu0 %v6060_v1  ;;  %v6029_v1 = vld [vmem:[#allocation2 + $0xb0] sm:$0xf0] }
 0x27e   : > { %v7215_v46 = vpop.eup %7214  ;;  %v8526_v59 = vadd.f32 1.0, %v7213_v43  ;;  %2515 = vmatmul.bf16.gmra.mxu2 %v8123_v3  ;;  %v2179_v18 = vadd.f32 %v8292_v40, %v8364_v30 }
 0x27f   : > { %v4308_v38 = vsel %vm4307_vm7, %v7211_v52, %v4304_v13  ;;  %v4421_v60 = vmul.f32 %v7215_v46, %v8509_v8  ;;  %7216 = vpow2.f32 %v6778_v47  ;;  %vm4426_vm9 = vweird.f32 %v7215_v46 }
 0x280   : > { %v4313_v39 = vsel %vm4310_vm8, %v4312_v24, %v4308_v38  ;;  %7218 = vrcp.f32 %v8526_v59  ;;  %vm4427_vm11 = vmor %vm4425_vm10, %vm4426_vm9  ;;  %v4432_v24 = vor.u32 1.1754944e-38, %v4431_v34  ;;  %v4549_v40 = vand.u32 2147483647, %v8526_v59 }
 0x281   : > { %5646 = vst [vmem:[%s8223_s14 + $0x148] sm:$0xff] %v4313_v39  ;;  %v4422_v45 = vsub.f32 1.0, %v4421_v60  ;;  %v2320_v57 = vpop.f32.mrf.mxu2  ;;  %vm4545_vm14 = vweird.f32 %v8526_v59 }
 0x282   : > { %v2321_v31 = vadd.f32 %v2320_v57, %v8380_v23  ;;  %v2273_v52 = vpop.f32.mrf.mxu1  ;;  %v2371_v10 = vpop.f32.mrf.mxu3  ;;  %v6539_v57 = vld [vmem:[#allocation2 + $0x490] sm:$0xf]  ;;  %vm4550_vm0 = vcmp.eq.f32.partialorder %v4549_v40, 8.507059e+37 }
 0x283   : > { %v4423_v12 = vmul.f32 %v7215_v46, %v4422_v45  ;;  %v2274_v63 = vadd.f32 %v2273_v52, %v2225_v19  ;;  %v6891_v52 = vld [vmem:[#allocation2 + $0x94] sm:$0xf] }
 0x284   : > { %v2227_v41 = vpop.f32.mrf.mxu0  ;;  %v8535_v43 = vadd.f32 %v2369_v56, %v2321_v31  ;;  %v7023_v31 = vld [vmem:[#allocation2 + $0x4ac] sm:$0xf0] }
 0x285   : > { %v7217_v13 = vpop.eup %7216  ;;  %v4424_v62 = vadd.f32 %v7215_v46, %v4423_v12  ;;  %v6786_v47 = vmul.f32 -1.442695, %v2274_v63  ;;  %v2228_v45 = vadd.f32 %v2227_v41, %v2179_v18  ;;  %v6540_v63 = vor.u32 %v7023_v31, %v6539_v57  ;;  %v6027_v41 = vld [vmem:[#allocation2 + $0x90] sm:$0xf] }
 0x286   : > { %v7219_v20 = vpop.eup %7218  ;;  %v8540_v38 = vadd.f32 1.0, %v7217_v13  ;;  %v6283_v13 = vld [vmem:[#allocation2 + $0x290] sm:$0xf]  ;;  %v2181_v57 = vadd.f32 %v8311_v44, %v8364_v30  ;;  %v6883_v44 = vld [vmem:[#allocation2 + $0x54] sm:$0xf] }
 0x287   : > { %v4428_v60 = vsel %vm4427_vm11, %v7215_v46, %v4424_v62  ;;  %v4541_v56 = vmul.f32 %v7219_v20, %v8526_v59  ;;  %7220 = vpow2.f32 %v6786_v47  ;;  %2422 = vmatmul.bf16.gmra.mxu0 %v8141_v51  ;;  %2569 = vmatmul.bf16.gmra.mxu3 %v8141_v51  ;;  %v4551_v46 = vand.u32 2147483648, %v8526_v59  ;;  %v6895_v18 = vld [vmem:[#allocation2 + $0xac] sm:$0xf0] }
 0x288   : > { %v4433_v8 = vsel %vm4430_vm12, %v4432_v24, %v4428_v60  ;;  %7222 = vrcp.f32 %v8540_v38  ;;  %vm4546_vm13 = vweird.f32 %v7219_v20  ;;  %v6032_v47 = vor.u32 %v6891_v52, %v6029_v1  ;;  %v6959_v24 = vld [vmem:[#allocation2 + $0x2ac] sm:$0xf0]  ;;  %2688 = vmatpush.bf16.msra.mxu2 %v6540_v63 }
 0x289   : > { %5654 = vst [vmem:[%s8223_s14 + $0x188] sm:$0xff] %v4433_v8  ;;  %v4542_v39 = vsub.f32 1.0, %v4541_v56  ;;  %v2322_v19 = vpop.f32.mrf.mxu2  ;;  %vm4547_vm15 = vmor %vm4545_vm14, %vm4546_vm13  ;;  %v6028_v59 = vor.u32 %v6895_v18, %v6027_v41  ;;  %v4671_v40 = vand.u32 2147483648, %v8540_v38  ;;  %v6887_v18 = vld [vmem:[#allocation2 + $0x6c] sm:$0xf0]  ;;  %vm4665_vm2 = vweird.f32 %v8540_v38 }
 0x28a   : > { %v2323_v35 = vadd.f32 %v2322_v19, %v8380_v23  ;;  %v2276_v11 = vpop.f32.mrf.mxu1  ;;  %v2374_v34 = vpop.f32.mrf.mxu3  ;;  %2737 = vmatpush.bf16.msra.mxu3 %v6032_v47 }
 0x28b   : > { %v4543_v2 = vmul.f32 %v7219_v20, %v4542_v39  ;;  %v2277_v12 = vadd.f32 %v2276_v11, %v2228_v45  ;;  %v6284_v39 = vor.u32 %v6959_v24, %v6283_v13  ;;  %v4552_v11 = vor.u32 1.1754944e-38, %v4551_v46  ;;  %2590 = vmatpush.bf16.msra.mxu0 %v6028_v59  ;;  %v5995_v13 = vld [vmem:[#allocation2 + $0x50] sm:$0xf] }
 0x28c   : > { %v2229_v62 = vpop.f32.mrf.mxu0  ;;  %v8550_v60 = vadd.f32 %v2371_v10, %v2323_v35 }
 0x28d   : > { %v7221_v56 = vpop.eup %7220  ;;  %v4544_v8 = vadd.f32 %v7219_v20, %v4543_v2  ;;  %v6794_v19 = vmul.f32 -1.442695, %v2277_v12  ;;  %2471 = vmatmul.bf16.gmra.mxu1 %v8132_v25  ;;  %v5997_v2 = vld [vmem:[#allocation2 + $0x70] sm:$0xf0]  ;;  %v2230_v12 = vadd.f32 %v2229_v62, %v2181_v57 }
 0x28e   : > { %v8554_v45 = vpop.eup %7222  ;;  %v8559_v10 = vadd.f32 1.0, %v7221_v56  ;;  %2520 = vmatmul.bf16.gmra.mxu2 %v8139_v50  ;;  %2639 = vmatpush.bf16.msra.mxu1 %v6284_v39  ;;  %v6000_v1 = vor.u32 %v6883_v44, %v5997_v2  ;;  %v6875_v39 = vld [vmem:[#allocation2 + $0x14] sm:$0xf]  ;;  %v6879_v2 = vld [vmem:[#allocation2 + $0x2c] sm:$0xf0] }
 0x28f   : > { %v4548_v35 = vsel %vm4547_vm15, %v7219_v20, %v4544_v8  ;;  %v4661_v31 = vmul.f32 %v8554_v45, %v8540_v38  ;;  %7224 = vpow2.f32 %v6794_v19  ;;  %v4669_v20 = vand.u32 2147483647, %v8540_v38  ;;  %v5965_v57 = vld [vmem:[#allocation2 + $0x30] sm:$0xf0] }
 0x290   : > { %v4553_v52 = vsel %vm4550_vm0, %v4552_v11, %v4548_v35  ;;  %7226 = vrcp.f32 %v8559_v10  ;;  %vm4666_vm1 = vweird.f32 %v8554_v45  ;;  %2738 = vmatpush.bf16.msra.mxu3 %v6000_v1  ;;  %v5996_v19 = vor.u32 %v6887_v18, %v5995_v13  ;;  %v5963_v11 = vld [vmem:[#allocation2 + $0x10] sm:$0xf] }
 0x291   : > { %5662 = vst [vmem:[%s8223_s14 + $0x1c8] sm:$0xff] %v4553_v52  ;;  %v4662_v46 = vsub.f32 1.0, %v4661_v31  ;;  %v2325_v63 = vpop.f32.mrf.mxu2  ;;  %v5968_v44 = vor.u32 %v6875_v39, %v5965_v57  ;;  %vm4667_vm3 = vmor %vm4665_vm2, %vm4666_vm1  ;;  %v6507_v1 = vld [vmem:[#allocation2 + $0x450] sm:$0xf]  ;;  %vm4670_vm4 = vcmp.eq.f32.partialorder %v4669_v20, 8.507059e+37  ;;  %v4791_v57 = vand.u32 2147483648, %v8559_v10 }
 0x292   : > { %v2326_v47 = vadd.f32 %v2325_v63, %v8380_v23  ;;  %v2278_v24 = vpop.f32.mrf.mxu1  ;;  %v2376_v41 = vpop.f32.mrf.mxu3  ;;  %2591 = vmatpush.bf16.msra.mxu0 %v5996_v19  ;;  %v4672_v63 = vor.u32 1.1754944e-38, %v4671_v40  ;;  %v7015_v13 = vld [vmem:[#allocation2 + $0x46c] sm:$0xf0]  ;;  %vm4785_vm6 = vweird.f32 %v8559_v10 }
 0x293   : > { %v4663_v56 = vmul.f32 %v8554_v45, %v4662_v46  ;;  %v2279_v8 = vadd.f32 %v2278_v24, %v2230_v12  ;;  %v2184_v12 = vadd.f32 %v8334_v22, %v8364_v30  ;;  %v6251_v22 = vld [vmem:[#allocation2 + $0x250] sm:$0xf]  ;;  %v6508_v19 = vor.u32 %v7015_v13, %v6507_v1 }
 0x294   : > { %v2232_v62 = vpop.f32.mrf.mxu0  ;;  %v8571_v59 = vadd.f32 %v2374_v34, %v2326_v47  ;;  %v5964_v47 = vor.u32 %v6879_v2, %v5963_v11  ;;  %v6951_v18 = vld [vmem:[#allocation2 + $0x26c] sm:$0xf0]  ;;  %2739 = vmatpush.bf16.msra.mxu3 %v5968_v44 }
 0x295   : > { %v7225_v35 = vpop.eup %7224  ;;  %v4664_v31 = vadd.f32 %v8554_v45, %v4663_v56  ;;  %v6802_v52 = vmul.f32 -1.442695, %v2279_v8  ;;  %v4789_v56 = vand.u32 2147483647, %v8559_v10  ;;  %v6252_v39 = vor.u32 %v6951_v18, %v6251_v22  ;;  %v7007_v2 = vld [vmem:[#allocation2 + $0x42c] sm:$0xf0]  ;;  %2689 = vmatpush.bf16.msra.mxu2 %v6508_v19 }
 0x296   : > { %v8575_v46 = vpop.eup %7226  ;;  %v8581_v34 = vadd.f32 1.0, %v7225_v35  ;;  %2592 = vmatpush.bf16.msra.mxu0 %v5964_v47  ;;  %v6943_v1 = vld [vmem:[#allocation2 + $0x22c] sm:$0xf0] }
 0x297   : > { %v4668_v38 = vsel %vm4667_vm3, %v8554_v45, %v4664_v31  ;;  %v4781_v24 = vmul.f32 %v8575_v46, %v8559_v10  ;;  %7228 = vpow2.f32 %v6802_v52  ;;  %2427 = vmatmul.bf16.gmra.mxu0 %v8157_v36  ;;  %2574 = vmatmul.bf16.gmra.mxu3 %v8157_v36  ;;  %v2233_v45 = vadd.f32 %v2232_v62, %v2184_v12  ;;  %v6475_v52 = vld [vmem:[#allocation2 + $0x410] sm:$0xf] }
 0x298   : > { %v4673_v40 = vsel %vm4670_vm4, %v4672_v63, %v4668_v38  ;;  %7230 = vrcp.f32 %v8581_v34  ;;  %vm4786_vm5 = vweird.f32 %v8575_v46  ;;  %2640 = vmatpush.bf16.msra.mxu1 %v6252_v39  ;;  %v6476_v62 = vor.u32 %v7007_v2, %v6475_v52  ;;  %v6219_v12 = vld [vmem:[#allocation2 + $0x210] sm:$0xf] }
 0x299   : > { %5670 = vst [vmem:[%s8223_s14 + $0x208] sm:$0xff] %v4673_v40  ;;  %v4782_v8 = vsub.f32 1.0, %v4781_v24  ;;  %v2327_v20 = vpop.f32.mrf.mxu2  ;;  %v6220_v47 = vor.u32 %v6943_v1, %v6219_v12  ;;  %vm4787_vm7 = vmor %vm4785_vm6, %vm4786_vm5  ;;  %vm4790_vm8 = vcmp.eq.f32.partialorder %v4789_v56, 8.507059e+37  ;;  %v4909_v56 = vand.u32 2147483647, %v8581_v34 }
 0x29a   : > { %v2328_v11 = vadd.f32 %v2327_v20, %v8380_v23  ;;  %v2281_v35 = vpop.f32.mrf.mxu1  ;;  %v2379_v31 = vpop.f32.mrf.mxu3  ;;  %2690 = vmatpush.bf16.msra.mxu2 %v6476_v62  ;;  %vm4905_vm10 = vweird.f32 %v8581_v34 }
 0x29b   : > { %v4783_v63 = vmul.f32 %v8575_v46, %v4782_v8  ;;  %v2282_v44 = vadd.f32 %v2281_v35, %v2233_v45  ;;  %v2186_v8 = vadd.f32 %v8345_v49, %v8364_v30  ;;  %v4792_v45 = vor.u32 1.1754944e-38, %v4791_v57 }
 0x29c   : > { %v2234_v13 = vpop.f32.mrf.mxu0  ;;  %v8595_v38 = vadd.f32 %v2376_v41, %v2328_v11  ;;  %v10727_v41 = vld [vmem:[#allocation19_spill] sm:$0xff]  ;;  %2641 = vmatpush.bf16.msra.mxu1 %v6220_v47  ;;  %v4911_v57 = vand.u32 2147483648, %v8581_v34  ;;  %vm4910_vm12 = vcmp.eq.f32.partialorder %v4909_v56, 8.507059e+37 }
 0x29d   : > { %v7229_v24 = vpop.eup %7228  ;;  %v4784_v22 = vadd.f32 %v8575_v46, %v4783_v63  ;;  %v6810_v18 = vmul.f32 -1.442695, %v2282_v44  ;;  %2476 = vmatmul.bf16.gmra.mxu1 %v8148_v16  ;;  %v2235_v11 = vadd.f32 %v2234_v13, %v2186_v8 }
 0x29e   : > { %v7231_v40 = vpop.eup %7230  ;;  %v8604_v20 = vadd.f32 1.0, %v7229_v24  ;;  %2525 = vmatmul.bf16.gmra.mxu2 %v10727_v41 }
 0x29f   : > { %v4788_v19 = vsel %vm4787_vm7, %v8575_v46, %v4784_v22  ;;  %v4901_v10 = vmul.f32 %v7231_v40, %v8581_v34  ;;  %7232 = vpow2.f32 %v6810_v18  ;;  %vm4906_vm9 = vweird.f32 %v7231_v40 }
 0x2a0   : > { %v4793_v39 = vsel %vm4790_vm8, %v4792_v45, %v4788_v19  ;;  %7234 = vrcp.f32 %v8604_v20  ;;  %v2189_v22 = vadd.f32 %v8352_v26, %v8364_v30  ;;  %vm4907_vm11 = vmor %vm4905_vm10, %vm4906_vm9  ;;  %v4912_v18 = vor.u32 1.1754944e-38, %v4911_v57 }
 0x2a1   : > { %5678 = vst [vmem:[%s8223_s14 + $0x248] sm:$0xff] %v4793_v39  ;;  %v4902_v49 = vsub.f32 1.0, %v4901_v10  ;;  %v2330_v35 = vpop.f32.mrf.mxu2  ;;  %v5031_v39 = vand.u32 2147483648, %v8604_v20  ;;  %v5029_v57 = vand.u32 2147483647, %v8604_v20  ;;  %vm5025_vm14 = vweird.f32 %v8604_v20 }
 0x2a2   : > { %v2331_v52 = vadd.f32 %v2330_v35, %v8380_v23  ;;  %v2283_v2 = vpop.f32.mrf.mxu1  ;;  %v2381_v63 = vpop.f32.mrf.mxu3 }
 0x2a3   : > { %v4903_v46 = vmul.f32 %v7231_v40, %v4902_v49  ;;  %v2284_v44 = vadd.f32 %v2283_v2, %v2235_v11  ;;  %vm5030_vm0 = vcmp.eq.f32.partialorder %v5029_v57, 8.507059e+37 }
 0x2a4   : > { %v2237_v62 = vpop.f32.mrf.mxu0  ;;  %v8614_v12 = vadd.f32 %v2379_v31, %v2331_v52 }
 0x2a5   : > { %v7233_v1 = vpop.eup %7232  ;;  %v4904_v47 = vadd.f32 %v7231_v40, %v4903_v46  ;;  %v6818_v13 = vmul.f32 -1.442695, %v2284_v44  ;;  %v2238_v10 = vadd.f32 %v2237_v62, %v2189_v22 }
 0x2a6   : > { %v7235_v24 = vpop.eup %7234  ;;  %v8619_v8 = vadd.f32 1.0, %v7233_v1 }
 0x2a7   : > { %v4908_v45 = vsel %vm4907_vm11, %v7231_v40, %v4904_v47  ;;  %v5021_v19 = vmul.f32 %v7235_v24, %v8604_v20  ;;  %7236 = vpow2.f32 %v6818_v13  ;;  %2432 = vmatmul.bf16.gmra.mxu0 %v8173_v7  ;;  %2579 = vmatmul.bf16.gmra.mxu3 %v8173_v7  ;;  %vm5026_vm13 = vweird.f32 %v7235_v24 }
 0x2a8   : > { %v4913_v31 = vsel %vm4910_vm12, %v4912_v18, %v4908_v45  ;;  %7238 = vrcp.f32 %v8619_v8  ;;  %v2191_v47 = vadd.f32 %v8361_v37, %v8364_v30  ;;  %vm5027_vm15 = vmor %vm5025_vm14, %vm5026_vm13  ;;  %v5032_v13 = vor.u32 1.1754944e-38, %v5031_v39 }
 0x2a9   : > { %5686 = vst [vmem:[%s8223_s14 + $0x288] sm:$0xff] %v4913_v31  ;;  %v5022_v34 = vsub.f32 1.0, %v5021_v19  ;;  %v2332_v26 = vpop.f32.mrf.mxu2  ;;  %v5151_v37 = vand.u32 2147483648, %v8619_v8  ;;  %vm5145_vm2 = vweird.f32 %v8619_v8 }
 0x2aa   : > { %v2333_v49 = vadd.f32 %v2332_v26, %v8380_v23  ;;  %v2286_v40 = vpop.f32.mrf.mxu1  ;;  %v2384_v11 = vpop.f32.mrf.mxu3 }
 0x2ab   : > { %v5023_v35 = vmul.f32 %v7235_v24, %v5022_v34  ;;  %v2287_v52 = vadd.f32 %v2286_v40, %v2238_v10 }
 0x2ac   : > { %v2239_v2 = vpop.f32.mrf.mxu0  ;;  %v8629_v46 = vadd.f32 %v2381_v63, %v2333_v49 }
 0x2ad   : > { %v7237_v56 = vpop.eup %7236  ;;  %v5024_v44 = vadd.f32 %v7235_v24, %v5023_v35  ;;  %v6826_v62 = vmul.f32 -1.442695, %v2287_v52  ;;  %2481 = vmatmul.bf16.gmra.mxu1 %v8164_v58  ;;  %v2240_v19 = vadd.f32 %v2239_v2, %v2191_v47 }
 0x2ae   : > { %v7239_v1 = vpop.eup %7238  ;;  %v8635_v22 = vadd.f32 1.0, %v7237_v56  ;;  %2530 = vmatmul.bf16.gmra.mxu2 %v8171_v6 }
 0x2af   : > { %v5028_v63 = vsel %vm5027_vm15, %v7235_v24, %v5024_v44  ;;  %v5141_v18 = vmul.f32 %v7239_v1, %v8619_v8  ;;  %7240 = vpow2.f32 %v6826_v62  ;;  %vm5146_vm1 = vweird.f32 %v7239_v1 }
 0x2b0   : > { %v5033_v45 = vsel %vm5030_vm0, %v5032_v13, %v5028_v63  ;;  %7242 = vrcp.f32 %v8635_v22  ;;  %v5149_v24 = vand.u32 2147483647, %v8619_v8  ;;  %vm5147_vm3 = vmor %vm5145_vm2, %vm5146_vm1  ;;  %v5152_v44 = vor.u32 1.1754944e-38, %v5151_v37  ;;  %v6195_v37 = vld [vmem:[#allocation2 + $0x1d8] sm:$0xf] }
 0x2b1   : > { %5694 = vst [vmem:[%s8223_s14 + $0x2c8] sm:$0xff] %v5033_v45  ;;  %v5142_v20 = vsub.f32 1.0, %v5141_v18  ;;  %v2335_v31 = vpop.f32.mrf.mxu2  ;;  %v5269_v18 = vand.u32 2147483647, %v8635_v22  ;;  %v5271_v45 = vand.u32 2147483648, %v8635_v22  ;;  %vm5265_vm6 = vweird.f32 %v8635_v22 }
 0x2b2   : > { %v2336_v30 = vadd.f32 %v2335_v31, %v8380_v23  ;;  %v2288_v34 = vpop.f32.mrf.mxu1  ;;  %v2386_v10 = vpop.f32.mrf.mxu3  ;;  %vm5150_vm4 = vcmp.eq.f32.partialorder %v5149_v24, 8.507059e+37 }
 0x2b3   : > { %v5143_v26 = vmul.f32 %v7239_v1, %v5142_v20  ;;  %v2289_v39 = vadd.f32 %v2288_v34, %v2240_v19  ;;  %v7635_v34 = vld [vmem:[%s10685_s6] sm:$0xff]  ;;  %vm5270_vm8 = vcmp.eq.f32.partialorder %v5269_v18, 8.507059e+37 }
 0x2b4   : > { %v2398_v49 = vpop.f32.mrf.mxu0  ;;  %v8644_v40 = vadd.f32 %v2384_v11, %v2336_v30  ;;  %v6936_v30 = vld [vmem:[#allocation2 + $0x1f4] sm:$0xf0] }
 0x2b5   : > { %v7241_v35 = vpop.eup %7240  ;;  %v5144_v57 = vadd.f32 %v7239_v1, %v5143_v26  ;;  %v6834_v52 = vmul.f32 -1.442695, %v2289_v39  ;;  %v2399_v2 = vadd.f32 %v2398_v49, %v8400_v9  ;;  %v8661_v26 = vperm.slane %v7635_v34, 3  ;;  %v6451_v49 = vld [vmem:[#allocation2 + $0x3d8] sm:$0xf] }
 0x2b6   : > { %v7243_v56 = vpop.eup %7242  ;;  %v8648_v62 = vadd.f32 1.0, %v7241_v35  ;;  %v6196_v39 = vor.u32 %v6936_v30, %v6195_v37  ;;  %v7000_v35 = vld [vmem:[#allocation2 + $0x3f4] sm:$0xf0] }
 0x2b7   : > { %v5148_v47 = vsel %vm5147_vm3, %v7239_v1, %v5144_v57  ;;  %v5261_v13 = vmul.f32 %v7243_v56, %v8635_v22  ;;  %7244 = vpow2.f32 %v6834_v52  ;;  %2593 = vmatmul.bf16.vlgmr.msra.gmra.mxu0 %v8052_v27  ;;  %2740 = vmatmul.bf16.vlgmr.msra.gmra.mxu3 %v8052_v27  ;;  %v6715_v9 = vmul.f32 -1.442695, %v2399_v2 }
 0x2b8   : > { %v5153_v11 = vsel %vm5150_vm4, %v5152_v44, %v5148_v47  ;;  %7246 = vrcp.f32 %v8648_v62  ;;  %vm5266_vm5 = vweird.f32 %v7243_v56  ;;  %v10728_v44 = vld [vmem:[#allocation8_spill] sm:$0xff]  ;;  %v6452_v47 = vor.u32 %v7000_v35, %v6451_v49  ;;  %2879 = vmatpush.bf16.msrb.mxu2 %v6196_v39  ;;  %v7059_v39 = vld [vmem:[#allocation2 + $0x5d4] sm:$0xf] }
 0x2b9   : > { %5702 = vst [vmem:[%s8223_s14 + $0x308] sm:$0xff] %v5153_v11  ;;  %v5262_v8 = vsub.f32 1.0, %v5261_v13  ;;  %v2337_v63 = vpop.f32.mrf.mxu2  ;;  %7248 = vpow2.f32 %v6715_v9  ;;  %vm5267_vm7 = vmor %vm5265_vm6, %vm5266_vm5  ;;  %v5272_v11 = vor.u32 1.1754944e-38, %v5271_v45  ;;  %v10729_v9 = vld [vmem:[#allocation9_spill] sm:$0xff]  ;;  %v5389_v22 = vand.u32 2147483647, %v8648_v62 }
 0x2ba   : > { %v2338_v1 = vadd.f32 %v2337_v63, %v8380_v23  ;;  %v2447_v20 = vpop.f32.mrf.mxu1  ;;  %v2545_v19 = vpop.f32.mrf.mxu3  ;;  %2928 = vmatpush.bf16.msrb.mxu3 %v6452_v47  ;;  %vm5385_vm10 = vweird.f32 %v8648_v62 }
 0x2bb   : > { %v5263_v31 = vmul.f32 %v7243_v56, %v5262_v8  ;;  %v2448_v18 = vadd.f32 %v2447_v20, %v8661_v26  ;;  %vm8681_vm11 = vcmp.eq.f32.partialorder %v5389_v22, 8.507059e+37 }
 0x2bc   : > { %v2400_v24 = vpop.f32.mrf.mxu0  ;;  %v8663_v57 = vadd.f32 %v2386_v10, %v2338_v1 }
 0x2bd   : > { %v7245_v23 = vpop.eup %7244  ;;  %v5264_v52 = vadd.f32 %v7243_v56, %v5263_v31  ;;  %v2401_v2 = vadd.f32 %v2400_v24, %v8428_v21  ;;  %2642 = vmatmul.bf16.vlgmr.msra.gmra.mxu1 %v10728_v44  ;;  %v5391_v31 = vand.u32 2147483648, %v8648_v62 }
 0x2be   : > { %v7247_v13 = vpop.eup %7246  ;;  %v8669_v8 = vadd.f32 1.0, %v7245_v23  ;;  %2691 = vmatmul.bf16.vlgmr.msra.gmra.mxu2 %v10729_v9  ;;  %v6701_v23 = vld [vmem:[#allocation2 + $0x5f0] sm:$0xf0] }
 0x2bf   : > { %v5268_v10 = vsel %vm5267_vm7, %v7243_v56, %v5264_v52  ;;  %v5381_v63 = vmul.f32 %v7247_v13, %v8648_v62  ;;  %v6723_v1 = vmul.f32 -1.442695, %v2401_v2  ;;  %v7249_v45 = vpop.eup %7248  ;;  %vm5386_vm9 = vweird.f32 %v7247_v13  ;;  %v6445_v62 = vld [vmem:[#allocation2 + $0x3f0] sm:$0xf0] }
 0x2c0   : > { %v5273_v21 = vsel %vm5270_vm8, %v5272_v11, %v5268_v10  ;;  %7250 = vrcp.f32 %v8669_v8  ;;  %v8678_v56 = vadd.f32 1.0, %v7249_v45  ;;  %v5392_v20 = vor.u32 1.1754944e-38, %v5391_v31  ;;  %vm5387_vm12 = vmor %vm5385_vm10, %vm5386_vm9 }
 0x2c1   : > { %5710 = vst [vmem:[%s8223_s14 + $0x348] sm:$0xff] %v5273_v21  ;;  %v5382_v37 = vsub.f32 1.0, %v5381_v63  ;;  %7252 = vpow2.f32 %v6723_v1  ;;  %v2496_v30 = vpop.f32.mrf.mxu2  ;;  %v6704_v10 = vor.u32 %v7059_v39, %v6701_v23  ;;  %v5509_v21 = vand.u32 2147483647, %v8669_v8 }
 0x2c2   : > { %v2497_v34 = vadd.f32 %v2496_v30, %v2448_v18  ;;  %v2449_v24 = vpop.f32.mrf.mxu1  ;;  %v2547_v49 = vpop.f32.mrf.mxu3  ;;  %7254 = vrcp.f32 %v8678_v56  ;;  %v6995_v18 = vld [vmem:[#allocation2 + $0x3d4] sm:$0xf]  ;;  %v5511_v31 = vand.u32 2147483648, %v8669_v8  ;;  %vm5505_vm13 = vweird.f32 %v8669_v8 }
 0x2c3   : > { %v5383_v35 = vmul.f32 %v7247_v13, %v5382_v37  ;;  %2830 = vmatpush.bf16.msrb.mxu1 %v6704_v10  ;;  %vm8706_vm15 = vcmp.eq.f32.partialorder %v5509_v21, 8.507059e+37  ;;  %vm3720_vm1 = vweird.f32 %v8678_v56 }
 0x2c4   : > { %v2403_v2 = vpop.f32.mrf.mxu0  ;;  %v2546_v11 = vadd.f32 %v2545_v19, %v2497_v34 }
 0x2c5   : > { %v5384_v47 = vadd.f32 %v7247_v13, %v5383_v35  ;;  %v2404_v63 = vadd.f32 %v2403_v2, %v8438_v42  ;;  %v6448_v35 = vor.u32 %v6995_v18, %v6445_v62  ;;  %v2450_v2 = vadd.f32 %v2449_v24, %v8661_v26 }
 0x2c6   : > { %v7251_v1 = vpop.eup %7250  ;;  %v6716_v30 = vmul.f32 -1.442695, %v2546_v11  ;;  %v3724_v18 = vand.u32 2147483647, %v8678_v56 }
 0x2c7   : > { %v7253_v22 = vpop.eup %7252  ;;  %v5388_v45 = vsel %vm5387_vm12, %v7247_v13, %v5384_v47  ;;  %v5501_v37 = vmul.f32 %v7251_v1, %v8669_v8  ;;  %2598 = vmatmul.bf16.gmra.mxu0 %v8068_v61  ;;  %v6731_v34 = vmul.f32 -1.442695, %v2404_v63  ;;  %2745 = vmatmul.bf16.gmra.mxu3 %v8068_v61  ;;  %vm5506_vm14 = vweird.f32 %v7251_v1 }
 0x2c8   : > { %v5393_v42 = vsel %vm8681_vm11, %v5392_v20, %v5388_v45  ;;  %v8693_v19 = vadd.f32 1.0, %v7253_v22  ;;  %7256 = vpow2.f32 %v6716_v30  ;;  %v8697_v23 = vpop.eup %7254  ;;  %2781 = vmatpush.bf16.msrb.mxu0 %v6448_v35  ;;  %v5512_v63 = vor.u32 1.1754944e-38, %v5511_v31  ;;  %v6928_v35 = vld [vmem:[#allocation2 + $0x1b4] sm:$0xf0]  ;;  %vm5507_vm0 = vmor %vm5505_vm13, %vm5506_vm14  ;;  %v10734_v31 = vld [vmem:[#allocation12_spill] sm:$0xff] }
 0x2c9   : > { %5718 = vst [vmem:[%s8223_s14 + $0x388] sm:$0xff] %v5393_v42  ;;  %v5502_v39 = vsub.f32 1.0, %v5501_v37  ;;  %v2498_v13 = vpop.f32.mrf.mxu2  ;;  %v3716_v11 = vmul.f32 %v8697_v23, %v8678_v56  ;;  %v3726_v37 = vand.u32 2147483648, %v8678_v56  ;;  %v6163_v42 = vld [vmem:[#allocation2 + $0x198] sm:$0xf]  ;;  %vm3721_vm2 = vweird.f32 %v8697_v23 }
 0x2ca   : > { %7258 = vrcp.f32 %v8693_v19  ;;  %v2452_v52 = vpop.f32.mrf.mxu1  ;;  %v8702_v20 = vpop.f32.mrf.mxu3  ;;  %v2499_v62 = vadd.f32 %v2498_v13, %v2450_v2  ;;  %v6992_v13 = vld [vmem:[#allocation2 + $0x3b4] sm:$0xf0]  ;;  %vm8723_vm3 = vcmp.eq.f32.partialorder %v3724_v18, 8.507059e+37  ;;  %vm3722_vm4 = vmor %vm3720_vm1, %vm3721_vm2  ;;  %v3846_v18 = vand.u32 2147483648, %v8693_v19 }
 0x2cb   : > { %v5503_v47 = vmul.f32 %v7251_v1, %v5502_v39  ;;  %7260 = vpow2.f32 %v6731_v34  ;;  %v3717_v45 = vsub.f32 1.0, %v3716_v11  ;;  %v6164_v34 = vor.u32 %v6928_v35, %v6163_v42  ;;  %v6419_v39 = vld [vmem:[#allocation2 + $0x398] sm:$0xf] }
 0x2cc   : > { %v2405_v22 = vpop.f32.mrf.mxu0  ;;  %v2548_v21 = vadd.f32 %v2547_v49, %v2499_v62  ;;  %vm3840_vm6 = vweird.f32 %v8693_v19 }
 0x2cd   : > { %v5504_v24 = vadd.f32 %v7251_v1, %v5503_v47  ;;  %v2406_v30 = vadd.f32 %v2405_v22, %v8457_v15  ;;  %2647 = vmatmul.bf16.gmra.mxu1 %v8075_v14  ;;  %v3718_v47 = vmul.f32 %v8697_v23, %v3717_v45  ;;  %v6420_v22 = vor.u32 %v6992_v13, %v6419_v39 }
 0x2ce   : > { %2696 = vmatmul.bf16.gmra.mxu2 %v10734_v31  ;;  %v7257_v15 = vpop.eup %7256  ;;  %v6724_v62 = vmul.f32 -1.442695, %v2548_v21 }
 0x2cf   : > { %v5508_v2 = vsel %vm5507_vm0, %v7251_v1, %v5504_v24  ;;  %v6739_v11 = vmul.f32 -1.442695, %v2406_v30  ;;  %v8727_v49 = vadd.f32 1.0, %v7257_v15  ;;  %2880 = vmatpush.bf16.msrb.mxu2 %v6164_v34  ;;  %v3719_v1 = vadd.f32 %v8697_v23, %v3718_v47  ;;  %2929 = vmatpush.bf16.msrb.mxu3 %v6420_v22 }
 0x2d0   : > { %v7259_v14 = vpop.eup %7258  ;;  %v5513_v8 = vsel %vm8706_vm15, %v5512_v63, %v5508_v2  ;;  %v3727_v24 = vor.u32 1.1754944e-38, %v3726_v37  ;;  %v3844_v63 = vand.u32 2147483647, %v8693_v19  ;;  %v2453_v30 = vadd.f32 %v2452_v52, %v8661_v26  ;;  %v7051_v52 = vld [vmem:[#allocation2 + $0x594] sm:$0xf] }
 0x2d1   : > { %v7261_v42 = vpop.eup %7260  ;;  %5726 = vst [vmem:[%s8223_s14 + $0x3c8] sm:$0xff] %v5513_v8  ;;  %v3836_v45 = vmul.f32 %v7259_v14, %v8693_v19  ;;  %7262 = vpow2.f32 %v6739_v11  ;;  %v2501_v10 = vpop.f32.mrf.mxu2  ;;  %v3723_v21 = vsel %vm3722_vm4, %v8697_v23, %v3719_v1  ;;  %vm3841_vm5 = vweird.f32 %v7259_v14  ;;  %v6669_v23 = vld [vmem:[#allocation2 + $0x5b0] sm:$0xf0] }
 0x2d2   : > { %7264 = vrcp.f32 %v8727_v49  ;;  %v2454_v37 = vpop.f32.mrf.mxu1  ;;  %v8740_v35 = vpop.f32.mrf.mxu3  ;;  %v8743_v39 = vadd.f32 1.0, %v7261_v42  ;;  %v3728_v56 = vsel %vm8723_vm3, %v3727_v24, %v3723_v21  ;;  %v2502_v13 = vadd.f32 %v2501_v10, %v2453_v30  ;;  %vm3842_vm8 = vmor %vm3840_vm6, %vm3841_vm5 }
 0x2d3   : > { %v3837_v34 = vsub.f32 1.0, %v3836_v45  ;;  %7266 = vpow2.f32 %v6724_v62  ;;  %5607 = vst [vmem:[%s8223_s14 + $0x10] sm:$0xff] %v3728_v56  ;;  %vm8752_vm7 = vcmp.eq.f32.partialorder %v3844_v63, 8.507059e+37  ;;  %v3847_v62 = vor.u32 1.1754944e-38, %v3846_v18 }
 0x2d4   : > { %v2408_v15 = vpop.f32.mrf.mxu0  ;;  %7268 = vrcp.f32 %v8743_v39  ;;  %v2551_v47 = vadd.f32 %v8702_v20, %v2502_v13  ;;  %v6672_v42 = vor.u32 %v7051_v52, %v6669_v23  ;;  %v3739_v24 = vand.u32 2147483647, %v8727_v49  ;;  %v6413_v23 = vld [vmem:[#allocation2 + $0x3b0] sm:$0xf0] }
 0x2d5   : > { %v3838_v2 = vmul.f32 %v7259_v14, %v3837_v34  ;;  %v2409_v11 = vadd.f32 %v2408_v15, %v8473_v0  ;;  %v3741_v19 = vand.u32 2147483648, %v8727_v49  ;;  %v3964_v18 = vand.u32 2147483647, %v8743_v39 }
 0x2d6   : > { %v6732_v45 = vmul.f32 -1.442695, %v2551_v47  ;;  %v3966_v30 = vand.u32 2147483648, %v8743_v39  ;;  %2831 = vmatpush.bf16.msrb.mxu1 %v6672_v42  ;;  %v6987_v47 = vld [vmem:[#allocation2 + $0x394] sm:$0xf]  ;;  %vm3735_vm9 = vweird.f32 %v8727_v49  ;;  %vm8776_vm10 = vcmp.eq.f32.partialorder %v3739_v24, 8.507059e+37 }
 0x2d7   : > { %v7263_v22 = vpop.eup %7262  ;;  %v3839_v8 = vadd.f32 %v7259_v14, %v3838_v2  ;;  %2603 = vmatmul.bf16.gmra.mxu0 %v8084_v33  ;;  %2750 = vmatmul.bf16.gmra.mxu3 %v8084_v33  ;;  %v6747_v13 = vmul.f32 -1.442695, %v2409_v11  ;;  %v2455_v42 = vadd.f32 %v2454_v37, %v8661_v26  ;;  %vm3960_vm12 = vweird.f32 %v8743_v39 }
 0x2d8   : > { %v7265_v1 = vpop.eup %7264  ;;  %v8759_v20 = vadd.f32 1.0, %v7263_v22  ;;  %v6416_v24 = vor.u32 %v6987_v47, %v6413_v23  ;;  %vm8786_vm13 = vcmp.eq.f32.partialorder %v3964_v18, 8.507059e+37 }
 0x2d9   : > { %v7267_v0 = vpop.eup %7266  ;;  %v3843_v10 = vsel %vm3842_vm8, %v7259_v14, %v3839_v8  ;;  %v3731_v63 = vmul.f32 %v7265_v1, %v8727_v49  ;;  %v2503_v21 = vpop.f32.mrf.mxu2  ;;  %vm3736_vm11 = vweird.f32 %v7265_v1 }
 0x2da   : > { %v3848_v34 = vsel %vm8752_vm7, %v3847_v62, %v3843_v10  ;;  %v8767_v56 = vadd.f32 1.0, %v7267_v0  ;;  %7270 = vrcp.f32 %v8759_v20  ;;  %v8770_v15 = vpop.f32.mrf.mxu1  ;;  %v8772_v2 = vpop.f32.mrf.mxu3  ;;  %v3742_v62 = vor.u32 1.1754944e-38, %v3741_v19  ;;  %vm3737_vm14 = vmor %vm3735_vm9, %vm3736_vm11  ;;  %2782 = vmatpush.bf16.msrb.mxu0 %v6416_v24 }
 0x2db   : > { %v7269_v14 = vpop.eup %7268  ;;  %5615 = vst [vmem:[%s8223_s14 + $0x50] sm:$0xff] %v3848_v34  ;;  %v3732_v52 = vsub.f32 1.0, %v3731_v63  ;;  %7272 = vpow2.f32 %v6732_v45  ;;  %v3967_v63 = vor.u32 1.1754944e-38, %v3966_v30  ;;  %v2504_v34 = vadd.f32 %v2503_v21, %v2455_v42 }
 0x2dc   : > { %v3956_v8 = vmul.f32 %v7269_v14, %v8743_v39  ;;  %7274 = vrcp.f32 %v8767_v56  ;;  %v2410_v11 = vpop.f32.mrf.mxu0  ;;  %vm3961_vm15 = vweird.f32 %v7269_v14  ;;  %vm4080_vm0 = vweird.f32 %v8759_v20 }
 0x2dd   : > { %v3733_v61 = vmul.f32 %v7265_v1, %v3732_v52  ;;  %2652 = vmatmul.bf16.gmra.mxu1 %v8091_v53  ;;  %7276 = vpow2.f32 %v6747_v13  ;;  %v2411_v19 = vadd.f32 %v2410_v11, %v8488_v55  ;;  %v4084_v30 = vand.u32 2147483647, %v8759_v20  ;;  %v6131_v11 = vld [vmem:[#allocation2 + $0x158] sm:$0xf]  ;;  %vm3962_vm1 = vmor %vm3960_vm12, %vm3961_vm15 }
 0x2de   : > { %v3957_v45 = vsub.f32 1.0, %v3956_v8  ;;  %2701 = vmatmul.bf16.gmra.mxu2 %v8093_v54  ;;  %v2553_v21 = vadd.f32 %v8740_v35, %v2504_v34  ;;  %v4086_v42 = vand.u32 2147483648, %v8759_v20  ;;  %vm3855_vm4 = vweird.f32 %v8767_v56 }
 0x2df   : > { %v3734_v0 = vadd.f32 %v7265_v1, %v3733_v61  ;;  %vm4085_vm6 = vcmp.eq.f32.partialorder %v4084_v30, 8.507059e+37 }
 0x2e0   : > { %v8790_v52 = vpop.eup %7270  ;;  %v3958_v37 = vmul.f32 %v7269_v14, %v3957_v45 }
 0x2e1   : > { %v7273_v13 = vpop.eup %7272  ;;  %v3738_v18 = vsel %vm3737_vm14, %v7265_v1, %v3734_v0  ;;  %v4076_v47 = vmul.f32 %v8790_v52, %v8759_v20  ;;  %v2506_v23 = vpop.f32.mrf.mxu2  ;;  %v6920_v1 = vld [vmem:[#allocation2 + $0x174] sm:$0xf0]  ;;  %v6755_v0 = vmul.f32 -1.442695, %v2411_v19  ;;  %vm4081_vm2 = vweird.f32 %v8790_v52 }
 0x2e2   : > { %v8800_v49 = vpop.eup %7274  ;;  %v3743_v8 = vsel %vm8776_vm10, %v3742_v62, %v3738_v18  ;;  %v3959_v61 = vadd.f32 %v7269_v14, %v3958_v37  ;;  %v8805_v55 = vadd.f32 1.0, %v7273_v13  ;;  %v2459_v45 = vpop.f32.mrf.mxu1  ;;  %v6740_v62 = vmul.f32 -1.442695, %v2553_v21  ;;  %v6387_v21 = vld [vmem:[#allocation2 + $0x358] sm:$0xf]  ;;  %vm8834_vm5 = vmor %vm4080_vm0, %vm4081_vm2 }
 0x2e3   : > { %v8807_v24 = vpop.f32.mrf.mxu3  ;;  %5608 = vst [vmem:[%s8223_s14 + $0x18] sm:$0xff] %v3743_v8  ;;  %v3851_v35 = vmul.f32 %v8800_v49, %v8767_v56  ;;  %v4077_v22 = vsub.f32 1.0, %v4076_v47  ;;  %v7277_v34 = vpop.eup %7276  ;;  %v3859_v13 = vand.u32 2147483647, %v8767_v56  ;;  %v3861_v18 = vand.u32 2147483648, %v8767_v56 }
 0x2e4   : > { %v3963_v37 = vsel %vm3962_vm1, %v7269_v14, %v3959_v61  ;;  %7278 = vrcp.f32 %v8805_v55  ;;  %v2413_v8 = vpop.f32.mrf.mxu0  ;;  %v8823_v47 = vadd.f32 1.0, %v7277_v34  ;;  %v2458_v14 = vadd.f32 %v8770_v15, %v8661_v26  ;;  %v6984_v61 = vld [vmem:[#allocation2 + $0x374] sm:$0xf0] }
 0x2e5   : > { %v3968_v39 = vsel %vm8786_vm13, %v3967_v63, %v3963_v37  ;;  %v3852_v54 = vsub.f32 1.0, %v3851_v35  ;;  %v4078_v53 = vmul.f32 %v8790_v52, %v4077_v22  ;;  %7280 = vpow2.f32 %v6740_v62 }
 0x2e6   : > { %5623 = vst [vmem:[%s8223_s14 + $0x90] sm:$0xff] %v3968_v39  ;;  %v6132_v19 = vor.u32 %v6920_v1, %v6131_v11  ;;  %vm3856_vm3 = vweird.f32 %v8800_v49  ;;  %7282 = vpow2.f32 %v6755_v0  ;;  %v4087_v15 = vor.u32 1.1754944e-38, %v4086_v42 }
 0x2e7   : > { %v3853_v33 = vmul.f32 %v8800_v49, %v3852_v54  ;;  %v4079_v10 = vadd.f32 %v8790_v52, %v4078_v53  ;;  %2608 = vmatmul.bf16.gmra.mxu0 %v8100_v5  ;;  %7284 = vrcp.f32 %v8823_v47  ;;  %2755 = vmatmul.bf16.gmra.mxu3 %v8100_v5  ;;  %v6388_v56 = vor.u32 %v6984_v61, %v6387_v21  ;;  %vm3857_vm7 = vmor %vm3855_vm4, %vm3856_vm3 }
 0x2e8   : > { %2881 = vmatpush.bf16.msrb.mxu2 %v6132_v19  ;;  %v2507_v20 = vadd.f32 %v2506_v23, %v2458_v14  ;;  %vm3860_vm8 = vcmp.eq.f32.partialorder %v3859_v13, 8.507059e+37  ;;  %v3862_v30 = vor.u32 1.1754944e-38, %v3861_v18  ;;  %v2460_v35 = vadd.f32 %v2459_v45, %v8661_v26  ;;  %v7043_v45 = vld [vmem:[#allocation2 + $0x554] sm:$0xf] }
 0x2e9   : > { %v3854_v53 = vadd.f32 %v8800_v49, %v3853_v33  ;;  %v4083_v54 = vsel %vm8834_vm5, %v8790_v52, %v4079_v10  ;;  %v2508_v11 = vpop.f32.mrf.mxu2  ;;  %v3979_v23 = vand.u32 2147483647, %v8805_v55  ;;  %2930 = vmatpush.bf16.msrb.mxu3 %v6388_v56  ;;  %v3981_v13 = vand.u32 2147483648, %v8805_v55  ;;  %v6637_v18 = vld [vmem:[#allocation2 + $0x570] sm:$0xf0] }
 0x2ea   : > { %v8844_v1 = vpop.eup %7278  ;;  %v4088_v42 = vsel %vm4085_vm6, %v4087_v15, %v4083_v54  ;;  %v2462_v22 = vpop.f32.mrf.mxu1  ;;  %v2556_v0 = vadd.f32 %v8772_v2, %v2507_v20  ;;  %v2414_v39 = vadd.f32 %v2413_v8, %v8504_v17  ;;  %v2509_v14 = vadd.f32 %v2508_v11, %v2460_v35 }
 0x2eb   : > { %v8849_v62 = vpop.f32.mrf.mxu3  ;;  %v3858_v33 = vsel %vm3857_vm7, %v8800_v49, %v3854_v53  ;;  %5631 = vst [vmem:[%s8223_s14 + $0xd0] sm:$0xff] %v4088_v42  ;;  %v3971_v52 = vmul.f32 %v8844_v1, %v8805_v55  ;;  %v7281_v34 = vpop.eup %7280  ;;  %v4204_v61 = vand.u32 2147483647, %v8823_v47  ;;  %v6640_v63 = vor.u32 %v7043_v45, %v6637_v18  ;;  %v6912_v18 = vld [vmem:[#allocation2 + $0x134] sm:$0xf0] }
 0x2ec   : > { %v3863_v37 = vsel %vm3860_vm8, %v3862_v30, %v3858_v33  ;;  %v2415_v19 = vpop.f32.mrf.mxu0  ;;  %v7283_v49 = vpop.eup %7282  ;;  %v8861_v10 = vadd.f32 1.0, %v7281_v34  ;;  %vm3976_vm9 = vweird.f32 %v8844_v1  ;;  %v4206_v15 = vand.u32 2147483648, %v8823_v47  ;;  %v6979_v33 = vld [vmem:[#allocation2 + $0x354] sm:$0xf] }
 0x2ed   : > { %5616 = vst [vmem:[%s8223_s14 + $0x58] sm:$0xff] %v3863_v37  ;;  %v3972_v21 = vsub.f32 1.0, %v3971_v52  ;;  %2657 = vmatmul.bf16.gmra.mxu1 %v8107_v28  ;;  %v8864_v2 = vpop.eup %7284  ;;  %v8868_v53 = vadd.f32 1.0, %v7283_v49  ;;  %v6748_v17 = vmul.f32 -1.442695, %v2556_v0  ;;  %vm3975_vm10 = vweird.f32 %v8805_v55 }
 0x2ee   : > { %2706 = vmatmul.bf16.gmra.mxu2 %v8109_v29  ;;  %v4196_v54 = vmul.f32 %v8864_v2, %v8823_v47  ;;  %7286 = vrcp.f32 %v8861_v10  ;;  %2832 = vmatpush.bf16.msrb.mxu1 %v6640_v63  ;;  %v6763_v56 = vmul.f32 -1.442695, %v2414_v39  ;;  %vm8876_vm11 = vcmp.eq.f32.partialorder %v3979_v23, 8.507059e+37  ;;  %v6381_v52 = vld [vmem:[#allocation2 + $0x370] sm:$0xf0]  ;;  %vm3977_vm12 = vmor %vm3975_vm10, %vm3976_vm9 }
 0x2ef   : > { %v3973_v8 = vmul.f32 %v8844_v1, %v3972_v21  ;;  %7288 = vrcp.f32 %v8868_v53  ;;  %v2558_v11 = vadd.f32 %v8807_v24, %v2509_v14  ;;  %v3982_v42 = vor.u32 1.1754944e-38, %v3981_v13  ;;  %v6099_v24 = vld [vmem:[#allocation2 + $0x118] sm:$0xf] }
 0x2f0   : > { %v4197_v35 = vsub.f32 1.0, %v4196_v54  ;;  %v2416_v0 = vadd.f32 %v2415_v19, %v8519_v32  ;;  %vm4200_vm13 = vweird.f32 %v8823_v47  ;;  %vm8887_vm14 = vcmp.eq.f32.partialorder %v4204_v61, 8.507059e+37  ;;  %v6355_v39 = vld [vmem:[#allocation2 + $0x318] sm:$0xf] }
 0x2f1   : > { %v3974_v30 = vadd.f32 %v8844_v1, %v3973_v8  ;;  %v2511_v34 = vpop.f32.mrf.mxu2  ;;  %v4207_v23 = vor.u32 1.1754944e-38, %v4206_v15  ;;  %7290 = vpow2.f32 %v6748_v17  ;;  %vm4201_vm15 = vweird.f32 %v8864_v2  ;;  %v6976_v61 = vld [vmem:[#allocation2 + $0x334] sm:$0xf0] }
 0x2f2   : > { %v8891_v37 = vpop.f32.mrf.mxu1  ;;  %v4198_v45 = vmul.f32 %v8864_v2, %v4197_v35  ;;  %7292 = vpow2.f32 %v6763_v56  ;;  %v6384_v19 = vor.u32 %v6979_v33, %v6381_v52  ;;  %v6756_v49 = vmul.f32 -1.442695, %v2558_v11  ;;  %vm4202_vm0 = vmor %vm4200_vm13, %vm4201_vm15 }
 0x2f3   : > { %v8893_v13 = vpop.f32.mrf.mxu3  ;;  %v3978_v32 = vsel %vm3977_vm12, %v8844_v1, %v3974_v30  ;;  %v2463_v21 = vadd.f32 %v2462_v22, %v8661_v26  ;;  %v6771_v17 = vmul.f32 -1.442695, %v2416_v0  ;;  %v6100_v8 = vor.u32 %v6912_v18, %v6099_v24 }
 0x2f4   : > { %v3983_v14 = vsel %vm8876_vm11, %v3982_v42, %v3978_v32  ;;  %v8901_v63 = vpop.f32.mrf.mxu0  ;;  %v8903_v15 = vpop.eup %7286  ;;  %v4199_v1 = vadd.f32 %v8864_v2, %v4198_v45  ;;  %v6356_v54 = vor.u32 %v6976_v61, %v6355_v39  ;;  %vm4095_vm1 = vweird.f32 %v8861_v10  ;;  %2783 = vmatpush.bf16.msrb.mxu0 %v6384_v19 }
 0x2f5   : > { %5624 = vst [vmem:[%s8223_s14 + $0x98] sm:$0xff] %v3983_v14  ;;  %v8907_v56 = vpop.eup %7288  ;;  %v4091_v22 = vmul.f32 %v8903_v15, %v8861_v10  ;;  %v4099_v20 = vand.u32 2147483647, %v8861_v10  ;;  %7294 = vpow2.f32 %v6756_v49  ;;  %v4101_v30 = vand.u32 2147483648, %v8861_v10  ;;  %2882 = vmatpush.bf16.msrb.mxu2 %v6100_v8 }
 0x2f6   : > { %v4203_v11 = vsel %vm4202_vm0, %v8864_v2, %v4199_v1  ;;  %v4316_v42 = vmul.f32 %v8907_v56, %v8868_v53  ;;  %7296 = vpow2.f32 %v6771_v17  ;;  %2931 = vmatpush.bf16.msrb.mxu3 %v6356_v54  ;;  %vm4320_vm2 = vweird.f32 %v8868_v53 }
 0x2f7   : > { %v7291_v47 = vpop.eup %7290  ;;  %v4208_v35 = vsel %vm8887_vm14, %v4207_v23, %v4203_v11  ;;  %v4092_v33 = vsub.f32 1.0, %v4091_v22  ;;  %v2512_v52 = vadd.f32 %v2511_v34, %v2463_v21  ;;  %2613 = vmatmul.bf16.gmra.mxu0 %v8116_v48  ;;  %2760 = vmatmul.bf16.gmra.mxu3 %v8116_v48  ;;  %v4324_v24 = vand.u32 2147483647, %v8868_v53 }
 0x2f8   : > { %v7293_v2 = vpop.eup %7292  ;;  %5639 = vst [vmem:[%s8223_s14 + $0x110] sm:$0xff] %v4208_v35  ;;  %v4317_v0 = vsub.f32 1.0, %v4316_v42  ;;  %v4326_v32 = vand.u32 2147483648, %v8868_v53  ;;  %v8929_v45 = vadd.f32 1.0, %v7291_v47  ;;  %vm4096_vm3 = vweird.f32 %v8903_v15 }
 0x2f9   : > { %v2513_v18 = vpop.f32.mrf.mxu2  ;;  %v4093_v55 = vmul.f32 %v8903_v15, %v4092_v33  ;;  %vm8933_vm4 = vcmp.eq.f32.partialorder %v4099_v20, 8.507059e+37  ;;  %v8937_v23 = vadd.f32 1.0, %v7293_v2  ;;  %v4102_v19 = vor.u32 1.1754944e-38, %v4101_v30  ;;  %vm4097_vm6 = vmor %vm4095_vm1, %vm4096_vm3 }
 0x2fa   : > { %v8939_v39 = vpop.f32.mrf.mxu1  ;;  %v4318_v49 = vmul.f32 %v8907_v56, %v4317_v0  ;;  %vm4321_vm5 = vweird.f32 %v8907_v56  ;;  %7298 = vrcp.f32 %v8929_v45  ;;  %v4221_v1 = vand.u32 2147483648, %v8929_v45 }
 0x2fb   : > { %v8941_v14 = vpop.f32.mrf.mxu3  ;;  %v7295_v21 = vpop.eup %7294  ;;  %v4094_v61 = vadd.f32 %v8903_v15, %v4093_v55  ;;  %7300 = vrcp.f32 %v8937_v23  ;;  %v2561_v17 = vadd.f32 %v8849_v62, %v2512_v52  ;;  %vm4325_vm7 = vcmp.eq.f32.partialorder %v4324_v24, 8.507059e+37  ;;  %vm4322_vm8 = vmor %vm4320_vm2, %vm4321_vm5 }
 0x2fc   : > { %v2420_v8 = vpop.f32.mrf.mxu0  ;;  %v7297_v54 = vpop.eup %7296  ;;  %v4319_v22 = vadd.f32 %v8907_v56, %v4318_v49  ;;  %v4327_v20 = vor.u32 1.1754944e-38, %v4326_v32  ;;  %v4446_v11 = vand.u32 2147483648, %v8937_v23  ;;  %v4219_v62 = vand.u32 2147483647, %v8929_v45  ;;  %v6605_v32 = vld [vmem:[#allocation2 + $0x530] sm:$0xf0] }
 0x2fd   : > { %2662 = vmatmul.bf16.gmra.mxu1 %v8123_v3  ;;  %v4098_v30 = vsel %vm4097_vm6, %v8903_v15, %v4094_v61  ;;  %v8963_v10 = vadd.f32 1.0, %v7295_v21  ;;  %v8965_v42 = vadd.f32 1.0, %v7297_v54  ;;  %v4444_v15 = vand.u32 2147483647, %v8937_v23 }
 0x2fe   : > { %2711 = vmatmul.bf16.gmra.mxu2 %v8125_v4  ;;  %v4103_v47 = vsel %vm8933_vm4, %v4102_v19, %v4098_v30  ;;  %v4323_v35 = vsel %vm4322_vm8, %v8907_v56, %v4319_v22  ;;  %v2465_v53 = vadd.f32 %v8891_v37, %v8661_v26  ;;  %v8975_v52 = vor.u32 1.1754944e-38, %v4221_v1  ;;  %v7035_v56 = vld [vmem:[#allocation2 + $0x514] sm:$0xf] }
 0x2ff   : > { %5632 = vst [vmem:[%s8223_s14 + $0xd8] sm:$0xff] %v4103_v47  ;;  %v4328_v33 = vsel %vm4325_vm7, %v4327_v20, %v4323_v35  ;;  %7302 = vrcp.f32 %v8963_v10  ;;  %v6764_v2 = vmul.f32 -1.442695, %v2561_v17  ;;  %v8981_v24 = vor.u32 1.1754944e-38, %v4446_v11  ;;  %v6971_v1 = vld [vmem:[#allocation2 + $0x314] sm:$0xf] }
 0x300   : > { %v8978_v0 = vpop.eup %7298  ;;  %5647 = vst [vmem:[%s8223_s14 + $0x150] sm:$0xff] %v4328_v33  ;;  %7304 = vrcp.f32 %v8965_v42  ;;  %v2419_v55 = vadd.f32 %v8901_v63, %v8535_v43  ;;  %v2514_v37 = vadd.f32 %v2513_v18, %v2465_v53  ;;  %vm4215_vm9 = vweird.f32 %v8929_v45  ;;  %v6349_v43 = vld [vmem:[#allocation2 + $0x330] sm:$0xf0] }
 0x301   : > { %v8986_v34 = vpop.f32.mrf.mxu2  ;;  %v8988_v19 = vpop.eup %7300  ;;  %v4211_v49 = vmul.f32 %v8978_v0, %v8929_v45  ;;  %vm8993_vm10 = vcmp.eq.f32.partialorder %v4219_v62, 8.507059e+37  ;;  %vm4440_vm11 = vweird.f32 %v8937_v23  ;;  %vm4216_vm12 = vweird.f32 %v8978_v0 }
 0x302   : > { %v8999_v63 = vpop.f32.mrf.mxu1  ;;  %v4436_v17 = vmul.f32 %v8988_v19, %v8937_v23  ;;  %vm9006_vm13 = vcmp.eq.f32.partialorder %v4444_v15, 8.507059e+37  ;;  %v4564_v20 = vand.u32 2147483647, %v8965_v42  ;;  %7306 = vpow2.f32 %v6764_v2  ;;  %vm4217_vm2 = vmor %vm4215_vm9, %vm4216_vm12 }
 0x303   : > { %v9001_v18 = vpop.f32.mrf.mxu3  ;;  %v4212_v11 = vsub.f32 1.0, %v4211_v49  ;;  %v6608_v62 = vor.u32 %v7035_v56, %v6605_v32  ;;  %vm4335_vm14 = vweird.f32 %v8963_v10  ;;  %v6779_v53 = vmul.f32 -1.442695, %v2419_v55  ;;  %v6067_v32 = vld [vmem:[#allocation2 + $0xd8] sm:$0xf] }
 0x304   : > { %v9013_v47 = vpop.f32.mrf.mxu0  ;;  %v4437_v35 = vsub.f32 1.0, %v4436_v17  ;;  %v6352_v33 = vor.u32 %v6971_v1, %v6349_v43  ;;  %v2563_v15 = vadd.f32 %v8893_v13, %v2514_v37  ;;  %vm4441_vm15 = vweird.f32 %v8988_v19  ;;  %v6904_v49 = vld [vmem:[#allocation2 + $0xf4] sm:$0xf0] }
 0x305   : > { %v9017_v61 = vpop.eup %7302  ;;  %v4213_v22 = vmul.f32 %v8978_v0, %v4212_v11  ;;  %2833 = vmatpush.bf16.msrb.mxu1 %v6608_v62  ;;  %v2468_v2 = vadd.f32 %v8939_v39, %v8661_v26  ;;  %v2421_v56 = vadd.f32 %v2420_v8, %v8550_v60  ;;  %7308 = vpow2.f32 %v6779_v53  ;;  %v6323_v37 = vld [vmem:[#allocation2 + $0x2d8] sm:$0xf]  ;;  %vm4442_vm3 = vmor %vm4440_vm11, %vm4441_vm15 }
 0x306   : > { %v9024_v17 = vpop.eup %7304  ;;  %v4438_v55 = vmul.f32 %v8988_v19, %v4437_v35  ;;  %v4331_v13 = vmul.f32 %v9017_v61, %v8963_v10  ;;  %vm4336_vm0 = vweird.f32 %v9017_v61  ;;  %2784 = vmatpush.bf16.msrb.mxu0 %v6352_v33  ;;  %v6968_v1 = vld [vmem:[#allocation2 + $0x2f4] sm:$0xf0]  ;;  %v6772_v39 = vmul.f32 -1.442695, %v2563_v15 }
 0x307   : > { %v4214_v43 = vadd.f32 %v8978_v0, %v4213_v22  ;;  %v4556_v60 = vmul.f32 %v9024_v17, %v8965_v42  ;;  %vm4561_vm1 = vweird.f32 %v9024_v17  ;;  %2618 = vmatmul.bf16.gmra.mxu0 %v8132_v25  ;;  %2765 = vmatmul.bf16.gmra.mxu3 %v8132_v25  ;;  %v6787_v62 = vmul.f32 -1.442695, %v2421_v56  ;;  %vm4337_vm6 = vmor %vm4335_vm14, %vm4336_vm0 }
 0x308   : > { %v4439_v8 = vadd.f32 %v8988_v19, %v4438_v55  ;;  %v4332_v11 = vsub.f32 1.0, %v4331_v13  ;;  %v6068_v22 = vor.u32 %v6904_v49, %v6067_v32  ;;  %v7307_v53 = vpop.eup %7306  ;;  %7310 = vpow2.f32 %v6772_v39 }
 0x309   : > { %v2518_v35 = vpop.f32.mrf.mxu2  ;;  %v4218_v33 = vsel %vm4217_vm2, %v8978_v0, %v4214_v43  ;;  %v4557_v15 = vsub.f32 1.0, %v4556_v60  ;;  %v6324_v30 = vor.u32 %v6968_v1, %v6323_v37  ;;  %v9055_v49 = vadd.f32 1.0, %v7307_v53 }
 0x30a   : > { %v9046_v45 = vpop.f32.mrf.mxu1  ;;  %v4223_v56 = vsel %vm8993_vm10, %v8975_v52, %v4218_v33  ;;  %v4443_v32 = vsel %vm4442_vm3, %v8988_v19, %v4439_v8  ;;  %v4333_v0 = vmul.f32 %v9017_v61, %v4332_v11  ;;  %2883 = vmatpush.bf16.msrb.mxu2 %v6068_v22  ;;  %7312 = vpow2.f32 %v6787_v62  ;;  %v6573_v22 = vld [vmem:[#allocation2 + $0x4f0] sm:$0xf0] }
 0x30b   : > { %v9048_v55 = vpop.f32.mrf.mxu3  ;;  %5640 = vst [vmem:[%s8223_s14 + $0x118] sm:$0xff] %v4223_v56  ;;  %v4448_v23 = vsel %vm9006_vm13, %v8981_v24, %v4443_v32  ;;  %v4558_v13 = vmul.f32 %v9024_v17, %v4557_v15  ;;  %2932 = vmatpush.bf16.msrb.mxu3 %v6324_v30  ;;  %v2517_v37 = vadd.f32 %v8986_v34, %v2468_v2  ;;  %v7309_v52 = vpop.eup %7308  ;;  %v10755_v1 = vand.u32 2147483647, %v8963_v10 }
 0x30c   : > { %v9063_v21 = vpop.f32.mrf.mxu0  ;;  %5655 = vst [vmem:[%s8223_s14 + $0x190] sm:$0xff] %v4448_v23  ;;  %v4334_v19 = vadd.f32 %v9017_v61, %v4333_v0  ;;  %vm4560_vm5 = vweird.f32 %v8965_v42  ;;  %7314 = vrcp.f32 %v9055_v49  ;;  %v10758_v24 = vand.u32 2147483648, %v8963_v10 }
 0x30d   : > { %vm9069_vm4 = vcmp.eq.f32.partialorder %v10755_v1, 8.507059e+37  ;;  %2667 = vmatmul.bf16.gmra.mxu1 %v8139_v50  ;;  %v4559_v54 = vadd.f32 %v9024_v17, %v4558_v13  ;;  %v9083_v30 = vadd.f32 1.0, %v7309_v52  ;;  %v2566_v2 = vadd.f32 %v8941_v14, %v2517_v37  ;;  %vm4562_vm7 = vmor %vm4560_vm5, %vm4561_vm1 }
 0x30e   : > { %v4342_v34 = vor.u32 1.1754944e-38, %v10758_v24  ;;  %2716 = vmatmul.bf16.gmra.mxu2 %v8141_v51  ;;  %v4338_v60 = vsel %vm4337_vm6, %v9017_v61, %v4334_v19  ;;  %vm4565_vm8 = vcmp.eq.f32.partialorder %v4564_v20, 8.507059e+37  ;;  %v10759_v10 = vand.u32 2147483648, %v8965_v42  ;;  %v7311_v11 = vpop.eup %7310  ;;  %v7027_v61 = vld [vmem:[#allocation2 + $0x4d4] sm:$0xf] }
 0x30f   : > { %v2470_v8 = vadd.f32 %v8999_v63, %v8661_v26  ;;  %v4563_v62 = vsel %vm4562_vm7, %v9024_v17, %v4559_v54  ;;  %7316 = vrcp.f32 %v9083_v30  ;;  %v2424_v20 = vadd.f32 %v9013_v47, %v8571_v59 }
 0x310   : > { %v4567_v39 = vor.u32 1.1754944e-38, %v10759_v10  ;;  %v4343_v14 = vsel %vm9069_vm4, %v4342_v34, %v4338_v60  ;;  %v4459_v53 = vand.u32 2147483647, %v9055_v49  ;;  %v7313_v63 = vpop.eup %7312  ;;  %v4461_v56 = vand.u32 2147483648, %v9055_v49  ;;  %v6963_v60 = vld [vmem:[#allocation2 + $0x2d4] sm:$0xf] }
 0x311   : > { %5648 = vst [vmem:[%s8223_s14 + $0x158] sm:$0xff] %v4343_v14  ;;  %v2519_v33 = vadd.f32 %v2518_v35, %v2470_v8  ;;  %v9104_v15 = vpop.f32.mrf.mxu2  ;;  %v9108_v32 = vadd.f32 1.0, %v7311_v11  ;;  %v6780_v17 = vmul.f32 -1.442695, %v2566_v2  ;;  %v6576_v0 = vor.u32 %v7027_v61, %v6573_v22  ;;  %v6317_v10 = vld [vmem:[#allocation2 + $0x2f0] sm:$0xf0] }
 0x312   : > { %v4568_v42 = vsel %vm4565_vm8, %v4567_v39, %v4563_v62  ;;  %v9110_v23 = vpop.f32.mrf.mxu1  ;;  %v7315_v59 = vpop.eup %7314  ;;  %v4684_v47 = vand.u32 2147483647, %v9083_v30  ;;  %v9115_v37 = vadd.f32 1.0, %v7313_v63  ;;  %v4686_v52 = vand.u32 2147483648, %v9083_v30 }
 0x313   : > { %5663 = vst [vmem:[%s8223_s14 + $0x1d0] sm:$0xff] %v4568_v42  ;;  %v9112_v13 = vpop.f32.mrf.mxu3  ;;  %v4451_v35 = vmul.f32 %v7315_v59, %v9055_v49  ;;  %7318 = vrcp.f32 %v9108_v32  ;;  %2834 = vmatpush.bf16.msrb.mxu1 %v6576_v0  ;;  %v6795_v19 = vmul.f32 -1.442695, %v2424_v20  ;;  %vm9122_vm9 = vcmp.eq.f32.partialorder %v4459_v53, 8.507059e+37 }
 0x314   : > { %v9120_v1 = vpop.f32.mrf.mxu0  ;;  %7320 = vrcp.f32 %v9115_v37  ;;  %v2568_v24 = vadd.f32 %v9001_v18, %v2519_v33  ;;  %vm4455_vm10 = vweird.f32 %v9055_v49  ;;  %v4462_v2 = vor.u32 1.1754944e-38, %v4461_v56 }
 0x315   : > { %v9128_v34 = vpop.eup %7316  ;;  %v4452_v54 = vsub.f32 1.0, %v4451_v35  ;;  %7322 = vpow2.f32 %v6780_v17  ;;  %vm4456_vm11 = vweird.f32 %v7315_v59  ;;  %vm4680_vm12 = vweird.f32 %v9083_v30 }
 0x316   : > { %v4676_v39 = vmul.f32 %v9128_v34, %v9083_v30  ;;  %vm9134_vm13 = vcmp.eq.f32.partialorder %v4684_v47, 8.507059e+37  ;;  %v4687_v11 = vor.u32 1.1754944e-38, %v4686_v52  ;;  %v4579_v14 = vand.u32 2147483647, %v9108_v32  ;;  %vm9150_vm15 = vmor %vm4455_vm10, %vm4456_vm11  ;;  %v6035_v47 = vld [vmem:[#allocation2 + $0x98] sm:$0xf] }
 0x317   : > { %v4453_v18 = vmul.f32 %v7315_v59, %v4452_v54  ;;  %7324 = vpow2.f32 %v6795_v19  ;;  %2623 = vmatmul.bf16.gmra.mxu0 %v8148_v16  ;;  %2770 = vmatmul.bf16.gmra.mxu3 %v8148_v16  ;;  %vm4575_vm14 = vweird.f32 %v9108_v32  ;;  %v4581_v61 = vand.u32 2147483648, %v9108_v32  ;;  %v6896_v54 = vld [vmem:[#allocation2 + $0xb4] sm:$0xf0] }
 0x318   : > { %v4677_v62 = vsub.f32 1.0, %v4676_v39  ;;  %v6320_v22 = vor.u32 %v6963_v60, %v6317_v10  ;;  %v6788_v20 = vmul.f32 -1.442695, %v2568_v24  ;;  %vm4800_vm0 = vweird.f32 %v9115_v37  ;;  %v6291_v60 = vld [vmem:[#allocation2 + $0x298] sm:$0xf] }
 0x319   : > { %v9143_v42 = vpop.f32.mrf.mxu2  ;;  %v9145_v53 = vpop.eup %7318  ;;  %v4454_v33 = vadd.f32 %v7315_v59, %v4453_v18  ;;  %v4804_v56 = vand.u32 2147483647, %v9115_v37  ;;  %v4806_v17 = vand.u32 2147483648, %v9115_v37  ;;  %v2426_v0 = vadd.f32 %v9063_v21, %v8595_v38  ;;  %v6960_v38 = vld [vmem:[#allocation2 + $0x2b4] sm:$0xf0] }
 0x31a   : > { %v9159_v35 = vpop.f32.mrf.mxu1  ;;  %v9163_v19 = vpop.eup %7320  ;;  %v4678_v49 = vmul.f32 %v9128_v34, %v4677_v62  ;;  %vm4681_vm1 = vweird.f32 %v9128_v34  ;;  %v4571_v24 = vmul.f32 %v9145_v53, %v9108_v32  ;;  %2785 = vmatpush.bf16.msrb.mxu0 %v6320_v22  ;;  %7326 = vpow2.f32 %v6788_v20 }
 0x31b   : > { %v9161_v52 = vpop.f32.mrf.mxu3  ;;  %v7323_v21 = vpop.eup %7322  ;;  %v4458_v10 = vsel %vm9150_vm15, %v7315_v59, %v4454_v33  ;;  %vm9171_vm2 = vcmp.eq.f32.partialorder %v4579_v14, 8.507059e+37  ;;  %v4796_v18 = vmul.f32 %v9163_v19, %v9115_v37  ;;  %v6803_v62 = vmul.f32 -1.442695, %v2426_v0  ;;  %vm4682_vm3 = vmor %vm4680_vm12, %vm4681_vm1 }
 0x31c   : > { %v9177_v16 = vpop.f32.mrf.mxu0  ;;  %v4463_v22 = vsel %vm9122_vm9, %v4462_v2, %v4458_v10  ;;  %v4679_v20 = vadd.f32 %v9128_v34, %v4678_v49  ;;  %v4572_v51 = vsub.f32 1.0, %v4571_v24  ;;  %v9182_v50 = vadd.f32 1.0, %v7323_v21 }
 0x31d   : > { %2672 = vmatmul.bf16.gmra.mxu1 %v10727_v41  ;;  %v7325_v59 = vpop.eup %7324  ;;  %5656 = vst [vmem:[%s8223_s14 + $0x198] sm:$0xff] %v4463_v22  ;;  %v4797_v14 = vsub.f32 1.0, %v4796_v18  ;;  %7328 = vpow2.f32 %v6803_v62  ;;  %v6036_v33 = vor.u32 %v6896_v54, %v6035_v47  ;;  %v6292_v43 = vor.u32 %v6960_v38, %v6291_v60  ;;  %v6541_v18 = vld [vmem:[#allocation2 + $0x4b0] sm:$0xf0] }
 0x31e   : > { %2721 = vmatmul.bf16.gmra.mxu2 %v8157_v36  ;;  %v4683_v2 = vsel %vm4682_vm3, %v9128_v34, %v4679_v20  ;;  %v4573_v63 = vmul.f32 %v9145_v53, %v4572_v51  ;;  %vm4576_vm4 = vweird.f32 %v9145_v53  ;;  %7330 = vrcp.f32 %v9182_v50 }
 0x31f   : > { %v4688_v0 = vsel %vm9134_vm13, %v4687_v11, %v4683_v2  ;;  %v4798_v30 = vmul.f32 %v9163_v19, %v4797_v14  ;;  %vm4801_vm5 = vweird.f32 %v9163_v19  ;;  %2884 = vmatpush.bf16.msrb.mxu2 %v6036_v33  ;;  %2933 = vmatpush.bf16.msrb.mxu3 %v6292_v43  ;;  %v2429_v47 = vadd.f32 %v9120_v1, %v8614_v12  ;;  %vm4577_vm6 = vmor %vm4575_vm14, %vm4576_vm4 }
 0x320   : > { %v7327_v49 = vpop.eup %7326  ;;  %5671 = vst [vmem:[%s8223_s14 + $0x210] sm:$0xff] %v4688_v0  ;;  %v4574_v51 = vadd.f32 %v9145_v53, %v4573_v63  ;;  %v4582_v34 = vor.u32 1.1754944e-38, %v4581_v61  ;;  %v9203_v24 = vadd.f32 1.0, %v7325_v59  ;;  %v2473_v8 = vadd.f32 %v9046_v45, %v8661_v26  ;;  %vm4802_vm8 = vmor %vm4800_vm0, %vm4801_vm5  ;;  %v6955_v59 = vld [vmem:[#allocation2 + $0x294] sm:$0xf] }
 0x321   : > { %v9207_v11 = vpop.f32.mrf.mxu2  ;;  %v4799_v54 = vadd.f32 %v9163_v19, %v4798_v30  ;;  %vm9214_vm7 = vcmp.eq.f32.partialorder %v4804_v56, 8.507059e+37  ;;  %v4807_v1 = vor.u32 1.1754944e-38, %v4806_v17  ;;  %v9218_v61 = vadd.f32 1.0, %v7327_v49 }
 0x322   : > { %v9220_v60 = vpop.f32.mrf.mxu1  ;;  %v4578_v38 = vsel %vm4577_vm6, %v9145_v53, %v4574_v51  ;;  %v4699_v32 = vand.u32 2147483647, %v9182_v50  ;;  %7332 = vrcp.f32 %v9203_v24  ;;  %v2522_v56 = vadd.f32 %v9104_v15, %v2473_v8  ;;  %v7019_v53 = vld [vmem:[#allocation2 + $0x494] sm:$0xf] }
 0x323   : > { %v9222_v45 = vpop.f32.mrf.mxu3  ;;  %v7329_v17 = vpop.eup %7328  ;;  %v4583_v21 = vsel %vm9171_vm2, %v4582_v34, %v4578_v38  ;;  %v4803_v10 = vsel %vm4802_vm8, %v9163_v19, %v4799_v54  ;;  %7334 = vrcp.f32 %v9218_v61  ;;  %v6811_v62 = vmul.f32 -1.442695, %v2429_v47  ;;  %v6285_v19 = vld [vmem:[#allocation2 + $0x2b0] sm:$0xf0] }
 0x324   : > { %v9236_v37 = vpop.f32.mrf.mxu0  ;;  %v9238_v22 = vpop.eup %7330  ;;  %5664 = vst [vmem:[%s8223_s14 + $0x1d8] sm:$0xff] %v4583_v21  ;;  %v4808_v15 = vsel %vm9214_vm7, %v4807_v1, %v4803_v10  ;;  %v4701_v20 = vand.u32 2147483648, %v9182_v50  ;;  %v2475_v39 = vadd.f32 %v9110_v23, %v8661_v26  ;;  %vm4695_vm9 = vweird.f32 %v9182_v50 }
 0x325   : > { %5679 = vst [vmem:[%s8223_s14 + $0x250] sm:$0xff] %v4808_v15  ;;  %v4691_v14 = vmul.f32 %v9238_v22, %v9182_v50  ;;  %v4924_v33 = vand.u32 2147483647, %v9203_v24  ;;  %v4926_v43 = vand.u32 2147483648, %v9203_v24  ;;  %v4819_v2 = vand.u32 2147483647, %v9218_v61 }
 0x326   : > { %v9253_v63 = vadd.f32 1.0, %v7329_v17  ;;  %v2571_v0 = vadd.f32 %v9048_v55, %v2522_v56  ;;  %v6544_v30 = vor.u32 %v7019_v53, %v6541_v18  ;;  %vm9256_vm10 = vcmp.eq.f32.partialorder %v4699_v32, 8.507059e+37  ;;  %v6259_v55 = vld [vmem:[#allocation2 + $0x258] sm:$0xf] }
 0x327   : > { %v4692_v23 = vsub.f32 1.0, %v4691_v14  ;;  %7336 = vpow2.f32 %v6811_v62  ;;  %v6288_v49 = vor.u32 %v6955_v59, %v6285_v19  ;;  %2628 = vmatmul.bf16.gmra.mxu0 %v8164_v58  ;;  %2775 = vmatmul.bf16.gmra.mxu3 %v8164_v58  ;;  %v4702_v34 = vor.u32 1.1754944e-38, %v4701_v20  ;;  %v6003_v56 = vld [vmem:[#allocation2 + $0x58] sm:$0xf] }
 0x328   : > { %v9262_v51 = vpop.eup %7332  ;;  %vm4920_vm11 = vweird.f32 %v9203_v24  ;;  %vm4815_vm12 = vweird.f32 %v9218_v61  ;;  %7338 = vrcp.f32 %v9253_v63  ;;  %2835 = vmatpush.bf16.msrb.mxu1 %v6544_v30  ;;  %vm4696_vm13 = vweird.f32 %v9238_v22  ;;  %v6888_v17 = vld [vmem:[#allocation2 + $0x74] sm:$0xf0] }
 0x329   : > { %v9267_v8 = vpop.f32.mrf.mxu2  ;;  %v9269_v54 = vpop.eup %7334  ;;  %v4693_v12 = vmul.f32 %v9238_v22, %v4692_v23  ;;  %v4916_v1 = vmul.f32 %v9262_v51, %v9203_v24  ;;  %vm9275_vm14 = vcmp.eq.f32.partialorder %v4924_v33, 8.507059e+37  ;;  %v6796_v32 = vmul.f32 -1.442695, %v2571_v0  ;;  %2786 = vmatpush.bf16.msrb.mxu0 %v6288_v49  ;;  %v6952_v20 = vld [vmem:[#allocation2 + $0x274] sm:$0xf0]  ;;  %vm4697_vm0 = vmor %vm4695_vm9, %vm4696_vm13 }
 0x32a   : > { %v9279_v21 = vpop.f32.mrf.mxu1  ;;  %v4927_v53 = vor.u32 1.1754944e-38, %v4926_v43  ;;  %v4811_v18 = vmul.f32 %v9269_v54, %v9218_v61  ;;  %vm9285_vm15 = vcmp.eq.f32.partialorder %v4819_v2, 8.507059e+37  ;;  %v4821_v15 = vand.u32 2147483648, %v9218_v61 }
 0x32b   : > { %v9281_v10 = vpop.f32.mrf.mxu3  ;;  %v4694_v59 = vadd.f32 %v9238_v22, %v4693_v12  ;;  %v4917_v19 = vsub.f32 1.0, %v4916_v1  ;;  %7340 = vpow2.f32 %v6796_v32  ;;  %v2524_v14 = vadd.f32 %v9143_v42, %v2475_v39 }
 0x32c   : > { %v9292_v33 = vpop.f32.mrf.mxu0  ;;  %vm4921_vm1 = vweird.f32 %v9262_v51  ;;  %v4812_v43 = vsub.f32 1.0, %v4811_v18  ;;  %v2431_v2 = vadd.f32 %v9177_v16, %v8629_v46  ;;  %v6004_v0 = vor.u32 %v6888_v17, %v6003_v56 }
 0x32d   : > { %2677 = vmatmul.bf16.gmra.mxu1 %v8171_v6  ;;  %v7337_v30 = vpop.eup %7336  ;;  %v4698_v42 = vsel %vm4697_vm0, %v9238_v22, %v4694_v59  ;;  %v4918_v39 = vmul.f32 %v9262_v51, %v4917_v19  ;;  %v2573_v23 = vadd.f32 %v9112_v13, %v2524_v14  ;;  %v6260_v49 = vor.u32 %v6952_v20, %v6259_v55  ;;  %vm4922_vm3 = vmor %vm4920_vm11, %vm4921_vm1 }
 0x32e   : > { %2726 = vmatmul.bf16.gmra.mxu2 %v8173_v7  ;;  %v7339_v50 = vpop.eup %7338  ;;  %v4703_v12 = vsel %vm9256_vm10, %v4702_v34, %v4698_v42  ;;  %v4813_v1 = vmul.f32 %v9269_v54, %v4812_v43  ;;  %vm4816_vm2 = vweird.f32 %v9269_v54  ;;  %v9310_v16 = vadd.f32 1.0, %v7337_v30  ;;  %v7011_v43 = vld [vmem:[#allocation2 + $0x454] sm:$0xf] }
 0x32f   : > { %2885 = vmatpush.bf16.msrb.mxu2 %v6004_v0  ;;  %5672 = vst [vmem:[%s8223_s14 + $0x218] sm:$0xff] %v4703_v12  ;;  %v4919_v46 = vadd.f32 %v9262_v51, %v4918_v39  ;;  %v5036_v22 = vmul.f32 %v7339_v50, %v9253_v63  ;;  %v6804_v13 = vmul.f32 -1.442695, %v2573_v23  ;;  %v6819_v55 = vmul.f32 -1.442695, %v2431_v2  ;;  %2934 = vmatpush.bf16.msrb.mxu3 %v6260_v49  ;;  %vm4817_vm4 = vmor %vm4815_vm12, %vm4816_vm2 }
 0x330   : > { %v4814_v47 = vadd.f32 %v9269_v54, %v4813_v1  ;;  %v4822_v34 = vor.u32 1.1754944e-38, %v4821_v15  ;;  %v5044_v32 = vand.u32 2147483647, %v9253_v63  ;;  %7342 = vrcp.f32 %v9310_v16  ;;  %v6509_v2 = vld [vmem:[#allocation2 + $0x470] sm:$0xf0] }
 0x331   : > { %v9322_v56 = vpop.f32.mrf.mxu2  ;;  %v7341_v17 = vpop.eup %7340  ;;  %v4923_v18 = vsel %vm4922_vm3, %v9262_v51, %v4919_v46  ;;  %v5037_v24 = vsub.f32 1.0, %v5036_v22  ;;  %v5046_v20 = vand.u32 2147483648, %v9253_v63  ;;  %7344 = vpow2.f32 %v6804_v13  ;;  %v6947_v42 = vld [vmem:[#allocation2 + $0x254] sm:$0xf] }
 0x332   : > { %v9330_v15 = vpop.f32.mrf.mxu1  ;;  %v4928_v19 = vsel %vm9275_vm14, %v4927_v53, %v4923_v18  ;;  %v4818_v14 = vsel %vm4817_vm4, %v9269_v54, %v4814_v47  ;;  %v9337_v51 = vadd.f32 1.0, %v7341_v17  ;;  %v2478_v61 = vadd.f32 %v9159_v35, %v8661_v26  ;;  %v6253_v39 = vld [vmem:[#allocation2 + $0x270] sm:$0xf0] }
 0x333   : > { %v9332_v59 = vpop.f32.mrf.mxu3  ;;  %5687 = vst [vmem:[%s8223_s14 + $0x290] sm:$0xff] %v4928_v19  ;;  %v4823_v0 = vsel %vm9285_vm15, %v4822_v34, %v4818_v14  ;;  %v5038_v30 = vmul.f32 %v7339_v50, %v5037_v24  ;;  %vm5041_vm5 = vweird.f32 %v7339_v50  ;;  %7346 = vpow2.f32 %v6819_v55 }
 0x334   : > { %v9344_v38 = vpop.f32.mrf.mxu0  ;;  %5680 = vst [vmem:[%s8223_s14 + $0x258] sm:$0xff] %v4823_v0  ;;  %vm5040_vm6 = vweird.f32 %v9253_v63  ;;  %7348 = vrcp.f32 %v9337_v51  ;;  %v5164_v35 = vand.u32 2147483647, %v9310_v16  ;;  %v2527_v53 = vadd.f32 %v9207_v11, %v2478_v61 }
 0x335   : > { %v5039_v54 = vadd.f32 %v7339_v50, %v5038_v30  ;;  %v6512_v23 = vor.u32 %v7011_v43, %v6509_v2  ;;  %vm5042_vm7 = vmor %vm5040_vm6, %vm5041_vm5  ;;  %v5047_v49 = vor.u32 1.1754944e-38, %v5046_v20  ;;  %v2480_v12 = vadd.f32 %v9220_v60, %v8661_v26 }
 0x336   : > { %v7343_v62 = vpop.eup %7342  ;;  %v2434_v1 = vadd.f32 %v9236_v37, %v8644_v40  ;;  %v6256_v46 = vor.u32 %v6947_v42, %v6253_v39  ;;  %vm5045_vm8 = vcmp.eq.f32.partialorder %v5044_v32, 8.507059e+37  ;;  %v2576_v55 = vadd.f32 %v9161_v52, %v2527_v53  ;;  %v5971_v42 = vld [vmem:[#allocation2 + $0x18] sm:$0xf] }
 0x337   : > { %v7345_v63 = vpop.eup %7344  ;;  %v5043_v22 = vsel %vm5042_vm7, %v7339_v50, %v5039_v54  ;;  %v5156_v13 = vmul.f32 %v7343_v62, %v9310_v16  ;;  %2836 = vmatpush.bf16.msrb.mxu1 %v6512_v23  ;;  %v5166_v47 = vand.u32 2147483648, %v9310_v16  ;;  %v2529_v60 = vadd.f32 %v9267_v8, %v2480_v12  ;;  %v6880_v39 = vld [vmem:[#allocation2 + $0x34] sm:$0xf0] }
 0x338   : > { %v5048_v11 = vsel %vm5045_vm8, %v5047_v49, %v5043_v22  ;;  %v9358_v34 = vadd.f32 1.0, %v7345_v63  ;;  %2787 = vmatpush.bf16.msrb.mxu0 %v6256_v46  ;;  %vm5160_vm9 = vweird.f32 %v9310_v16  ;;  %vm9365_vm10 = vcmp.eq.f32.partialorder %v5164_v35, 8.507059e+37  ;;  %v6227_v23 = vld [vmem:[#allocation2 + $0x218] sm:$0xf]  ;;  %v7003_v63 = vld [vmem:[#allocation2 + $0x414] sm:$0xf] }
 0x339   : > { %v9361_v17 = vpop.f32.mrf.mxu2  ;;  %v7347_v40 = vpop.eup %7346  ;;  %5695 = vst [vmem:[%s8223_s14 + $0x2d0] sm:$0xff] %v5048_v11  ;;  %v5157_v37 = vsub.f32 1.0, %v5156_v13  ;;  %v6812_v52 = vmul.f32 -1.442695, %v2576_v55  ;;  %v4939_v20 = vand.u32 2147483647, %v9337_v51  ;;  %vm5161_vm11 = vweird.f32 %v7343_v62 }
 0x33a   : > { %v9369_v32 = vpop.f32.mrf.mxu1  ;;  %v7349_v24 = vpop.eup %7348  ;;  %7350 = vrcp.f32 %v9358_v34  ;;  %v6827_v8 = vmul.f32 -1.442695, %v2434_v1  ;;  %v9376_v61 = vadd.f32 1.0, %v7347_v40  ;;  %v2436_v43 = vadd.f32 %v9292_v33, %v8663_v57  ;;  %vm5162_vm15 = vmor %vm5160_vm9, %vm5161_vm11  ;;  %v6944_v33 = vld [vmem:[#allocation2 + $0x234] sm:$0xf0] }
 0x33b   : > { %v9371_v18 = vpop.f32.mrf.mxu3  ;;  %v4931_v19 = vmul.f32 %v7349_v24, %v9337_v51  ;;  %v5158_v14 = vmul.f32 %v7343_v62, %v5157_v37  ;;  %vm4935_vm12 = vweird.f32 %v9337_v51  ;;  %v5167_v0 = vor.u32 1.1754944e-38, %v5166_v47  ;;  %v6477_v22 = vld [vmem:[#allocation2 + $0x430] sm:$0xf0] }
 0x33c   : > { %v9380_v2 = vpop.f32.mrf.mxu0  ;;  %7352 = vpow2.f32 %v6812_v52  ;;  %v2578_v30 = vadd.f32 %v9222_v45, %v2529_v60  ;;  %v4941_v35 = vand.u32 2147483648, %v9337_v51  ;;  %vm4936_vm13 = vweird.f32 %v7349_v24 }
 0x33d   : > { %v4932_v54 = vsub.f32 1.0, %v4931_v19  ;;  %v5159_v53 = vadd.f32 %v7343_v62, %v5158_v14  ;;  %7354 = vrcp.f32 %v9376_v61  ;;  %vm9386_vm14 = vcmp.eq.f32.partialorder %v4939_v20, 8.507059e+37  ;;  %vm4937_vm0 = vmor %vm4935_vm12, %vm4936_vm13 }
 0x33e   : > { %7356 = vpow2.f32 %v6827_v8  ;;  %v6820_v45 = vmul.f32 -1.442695, %v2578_v30  ;;  %v6835_v1 = vmul.f32 -1.442695, %v2436_v43  ;;  %v5972_v46 = vor.u32 %v6880_v39, %v5971_v42 }
 0x33f   : > { %v4933_v49 = vmul.f32 %v7349_v24, %v4932_v54  ;;  %v5163_v12 = vsel %vm5162_vm15, %v7343_v62, %v5159_v53  ;;  %v5059_v11 = vand.u32 2147483647, %v9358_v34  ;;  %v2483_v16 = vadd.f32 %v9279_v21, %v8661_v26 }
 0x340   : > { %v9393_v13 = vpop.eup %7350  ;;  %v5168_v55 = vsel %vm9365_vm10, %v5167_v0, %v5163_v12  ;;  %7358 = vpow2.f32 %v6820_v45  ;;  %v4942_v40 = vor.u32 1.1754944e-38, %v4941_v35  ;;  %v5061_v37 = vand.u32 2147483648, %v9358_v34  ;;  %2886 = vmatpush.bf16.msrb.mxu2 %v5972_v46 }
 0x341   : > { %v9400_v47 = vpop.f32.mrf.mxu2  ;;  %v4934_v60 = vadd.f32 %v7349_v24, %v4933_v49  ;;  %5703 = vst [vmem:[%s8223_s14 + $0x310] sm:$0xff] %v5168_v55  ;;  %v5051_v62 = vmul.f32 %v9393_v13, %v9358_v34  ;;  %7360 = vpow2.f32 %v6835_v1  ;;  %v6228_v21 = vor.u32 %v6944_v33, %v6227_v23 }
 0x342   : > { %v9406_v52 = vpop.f32.mrf.mxu1  ;;  %v7353_v20 = vpop.eup %7352  ;;  %v2532_v8 = vadd.f32 %v9322_v56, %v2483_v16  ;;  %v6480_v19 = vor.u32 %v7003_v63, %v6477_v22  ;;  %v5284_v30 = vand.u32 2147483647, %v9376_v61  ;;  %vm5055_vm1 = vweird.f32 %v9358_v34  ;;  %v7636_v22 = vld [vmem:[%s10685_s6] sm:$0xff] }
 0x343   : > { %v9408_v50 = vpop.f32.mrf.mxu3  ;;  %v9414_v14 = vpop.eup %7354  ;;  %v4938_v43 = vsel %vm4937_vm0, %v7349_v24, %v4934_v60  ;;  %v5052_v0 = vsub.f32 1.0, %v5051_v62  ;;  %v9417_v42 = vadd.f32 1.0, %v7353_v20  ;;  %vm9424_vm2 = vcmp.eq.f32.partialorder %v5059_v11, 8.507059e+37  ;;  %2935 = vmatpush.bf16.msrb.mxu3 %v6228_v21  ;;  %2887 = vmatmul.bf16.vlgmr.msrb.gmra.mxu2 %v8052_v27 }
 0x344   : > { %v9419_v39 = vpop.f32.mrf.mxu0  ;;  %v7357_v54 = vpop.eup %7356  ;;  %v4943_v51 = vsel %vm9386_vm14, %v4942_v40, %v4938_v43  ;;  %v5276_v56 = vmul.f32 %v9414_v14, %v9376_v61  ;;  %2837 = vmatpush.bf16.msrb.mxu1 %v6480_v19  ;;  %vm5056_vm3 = vweird.f32 %v9393_v13  ;;  %v5062_v53 = vor.u32 1.1754944e-38, %v5061_v37 }
 0x345   : > { %5688 = vst [vmem:[%s8223_s14 + $0x298] sm:$0xff] %v4943_v51  ;;  %v5053_v24 = vmul.f32 %v9393_v13, %v5052_v0  ;;  %7362 = vrcp.f32 %v9417_v42  ;;  %vm5280_vm4 = vweird.f32 %v9376_v61  ;;  %v9436_v45 = vadd.f32 1.0, %v7357_v54  ;;  %vm5057_vm6 = vmor %vm5055_vm1, %vm5056_vm3 }
 0x346   : > { %v7359_v23 = vpop.eup %7358  ;;  %v5277_v57 = vsub.f32 1.0, %v5276_v56  ;;  %v2581_v33 = vadd.f32 %v9281_v10, %v2532_v8  ;;  %vm9440_vm5 = vcmp.eq.f32.partialorder %v5284_v30, 8.507059e+37  ;;  %v5286_v1 = vand.u32 2147483648, %v9376_v61  ;;  %2936 = vmatmul.bf16.vlgmr.msrb.gmra.mxu3 %v10728_v44  ;;  %v6939_v56 = vld [vmem:[#allocation2 + $0x214] sm:$0xf] }
 0x347   : > { %v5054_v49 = vadd.f32 %v9393_v13, %v5053_v24  ;;  %v9445_v46 = vadd.f32 1.0, %v7359_v23  ;;  %2838 = vmatmul.bf16.vlgmr.msrb.gmra.mxu1 %v10729_v9  ;;  %v7361_v63 = vpop.eup %7360  ;;  %vm5281_vm7 = vweird.f32 %v9414_v14  ;;  %7364 = vrcp.f32 %v9436_v45  ;;  %v6221_v24 = vld [vmem:[#allocation2 + $0x230] sm:$0xf0] }
 0x348   : > { %v5278_v10 = vmul.f32 %v9414_v14, %v5277_v57  ;;  %v9459_v55 = vperm.slane %v7636_v22, 4  ;;  %v5179_v34 = vand.u32 2147483647, %v9417_v42  ;;  %v5181_v60 = vand.u32 2147483648, %v9417_v42  ;;  %vm5282_vm8 = vmor %vm5280_vm4, %vm5281_vm7  ;;  %v6996_v22 = vld [vmem:[#allocation2 + $0x3dc] sm:$0xf] }
 0x349   : > { %v9461_v11 = vpop.f32.mrf.mxu2  ;;  %v5058_v16 = vsel %vm5057_vm6, %v9393_v13, %v5054_v49  ;;  %7366 = vrcp.f32 %v9445_v46  ;;  %v5406_v20 = vand.u32 2147483648, %v9436_v45  ;;  %v6828_v21 = vmul.f32 -1.442695, %v2581_v33 }
 0x34a   : > { %v9467_v40 = vpop.f32.mrf.mxu1  ;;  %v5063_v62 = vsel %vm9424_vm2, %v5062_v53, %v5058_v16  ;;  %v5279_v37 = vadd.f32 %v9414_v14, %v5278_v10  ;;  %v5287_v13 = vor.u32 1.1754944e-38, %v5286_v1  ;;  %v5404_v43 = vand.u32 2147483647, %v9436_v45 }
 0x34b   : > { %v9473_v8 = vpop.f32.mrf.mxu3  ;;  %v9475_v19 = vpop.eup %7362  ;;  %5696 = vst [vmem:[%s8223_s14 + $0x2d8] sm:$0xff] %v5063_v62  ;;  %v9483_v0 = vadd.f32 1.0, %v7361_v63  ;;  %v2485_v30 = vadd.f32 %v9330_v15, %v8661_v26  ;;  %vm5175_vm9 = vweird.f32 %v9417_v42  ;;  %v5299_v61 = vand.u32 2147483647, %v9445_v46  ;;  %v6453_v62 = vld [vmem:[#allocation2 + $0x3f8] sm:$0xf0] }
 0x34c   : > { %v9487_v54 = vpop.f32.mrf.mxu0  ;;  %v5283_v51 = vsel %vm5282_vm8, %v9414_v14, %v5279_v37  ;;  %v5171_v35 = vmul.f32 %v9475_v19, %v9417_v42  ;;  %vm9496_vm10 = vcmp.eq.f32.partialorder %v5179_v34, 8.507059e+37  ;;  %v2595_v26 = vadd.f32 %v9344_v38, %v9459_v55  ;;  %v7060_v37 = vld [vmem:[#allocation2 + $0x5dc] sm:$0xf] }
 0x34d   : > { %v5288_v53 = vsel %vm9440_vm5, %v5287_v13, %v5283_v51  ;;  %7368 = vrcp.f32 %v9483_v0  ;;  %v9503_v15 = vpop.eup %7364  ;;  %v5182_v57 = vor.u32 1.1754944e-38, %v5181_v60  ;;  %v9506_v33 = vor.u32 1.1754944e-38, %v5406_v20  ;;  %v6709_v20 = vld [vmem:[#allocation2 + $0x5f8] sm:$0xf0] }
 0x34e   : > { %5711 = vst [vmem:[%s8223_s14 + $0x350] sm:$0xff] %v5288_v53  ;;  %v5172_v14 = vsub.f32 1.0, %v5171_v35  ;;  %7370 = vpow2.f32 %v6828_v21  ;;  %v5396_v12 = vmul.f32 %v9503_v15, %v9436_v45  ;;  %vm9512_vm11 = vcmp.eq.f32.partialorder %v5404_v43, 8.507059e+37 }
 0x34f   : > { %v9508_v49 = vpop.eup %7366  ;;  %v5301_v63 = vand.u32 2147483648, %v9445_v46  ;;  %v6224_v38 = vor.u32 %v6939_v56, %v6221_v24  ;;  %v2534_v10 = vadd.f32 %v9361_v17, %v2485_v30  ;;  %vm5176_vm12 = vweird.f32 %v9475_v19 }
 0x350   : > { %v5173_v16 = vmul.f32 %v9475_v19, %v5172_v14  ;;  %vm5400_vm13 = vweird.f32 %v9436_v45  ;;  %v5291_v34 = vmul.f32 %v9508_v49, %v9445_v46  ;;  %vm9523_vm14 = vcmp.eq.f32.partialorder %v5299_v61, 8.507059e+37  ;;  %vm5177_vm1 = vmor %vm5175_vm9, %vm5176_vm12 }
 0x351   : > { %v9527_v21 = vpop.f32.mrf.mxu2  ;;  %v5397_v17 = vsub.f32 1.0, %v5396_v12  ;;  %v5524_v13 = vand.u32 2147483647, %v9483_v0  ;;  %v5526_v43 = vand.u32 2147483648, %v9483_v0  ;;  %2788 = vmatpush.bf16.msrb.mxu0 %v6224_v38  ;;  %v2583_v30 = vadd.f32 %v9332_v59, %v2534_v10 }
 0x352   : > { %v9532_v51 = vpop.f32.mrf.mxu1  ;;  %v5174_v35 = vadd.f32 %v9475_v19, %v5173_v16  ;;  %vm5401_vm15 = vweird.f32 %v9503_v15  ;;  %v5292_v61 = vsub.f32 1.0, %v5291_v34  ;;  %vm5296_vm0 = vweird.f32 %v9508_v49 }
 0x353   : > { %v9537_v56 = vpop.f32.mrf.mxu3  ;;  %v9539_v24 = vpop.eup %7368  ;;  %v5398_v59 = vmul.f32 %v9503_v15, %v5397_v17  ;;  %v6836_v53 = vmul.f32 -1.442695, %v2583_v30  ;;  %v6456_v14 = vor.u32 %v6996_v22, %v6453_v62  ;;  %v6712_v12 = vor.u32 %v7060_v37, %v6709_v20  ;;  %vm9564_vm2 = vmor %vm5400_vm13, %vm5401_vm15  ;;  %v6197_v37 = vld [vmem:[#allocation2 + $0x1f8] sm:$0xf0]  ;;  %v10793_v20 = vld [vmem:[#allocation10_spill] sm:$0xff] }
 0x354   : > { %10790 = vst [vmem:[#allocation19_spill] sm:$0xff] %v9537_v56  ;;  %v9546_v38 = vpop.f32.mrf.mxu0  ;;  %v7371_v10 = vpop.eup %7370  ;;  %v5178_v16 = vsel %vm5177_vm1, %v9475_v19, %v5174_v35  ;;  %v5293_v34 = vmul.f32 %v9508_v49, %v5292_v61  ;;  %v5516_v56 = vmul.f32 %v9539_v24, %v9483_v0  ;;  %2789 = vmatmul.bf16.vlgmr.msrb.gmra.mxu0 %v10728_v44  ;;  %vm5295_vm3 = vweird.f32 %v9445_v46  ;;  %v10794_v46 = vld [vmem:[#allocation11_spill] sm:$0xff] }
 0x355   : > { %v2644_v42 = vadd.f32 %v9369_v32, %v2595_v26  ;;  %v5183_v17 = vsel %vm9496_vm10, %v5182_v57, %v5178_v16  ;;  %v5399_v22 = vadd.f32 %v9503_v15, %v5398_v59  ;;  %v9557_v62 = vadd.f32 1.0, %v7371_v10  ;;  %3075 = vmatpush.bf16.msra.mxu2 %v6456_v14  ;;  %3124 = vmatpush.bf16.msra.mxu3 %v6712_v12  ;;  %v6932_v57 = vld [vmem:[#allocation2 + $0x1dc] sm:$0xf]  ;;  %vm5297_vm4 = vmor %vm5295_vm3, %vm5296_vm0  ;;  %v6707_v61 = vld [vmem:[#allocation2 + $0x5d8] sm:$0xf] }
 0x356   : > { %7372 = vpow2.f32 %v6836_v53  ;;  %5704 = vst [vmem:[%s8223_s14 + $0x318] sm:$0xff] %v5183_v17  ;;  %v5294_v32 = vadd.f32 %v9508_v49, %v5293_v34  ;;  %v5517_v23 = vsub.f32 1.0, %v5516_v56  ;;  %2892 = vmatmul.bf16.gmra.mxu2 %v10793_v20  ;;  %v5302_v30 = vor.u32 1.1754944e-38, %v5301_v63  ;;  %2941 = vmatmul.bf16.gmra.mxu3 %v10794_v46  ;;  %v7064_v56 = vld [vmem:[#allocation2 + $0x5f4] sm:$0xf0] }
 0x357   : > { %v2693_v26 = vadd.f32 %v9400_v47, %v2644_v42  ;;  %v5403_v45 = vsel %vm9564_vm2, %v9503_v15, %v5399_v22  ;;  %vm5521_vm5 = vweird.f32 %v9539_v24  ;;  %7374 = vrcp.f32 %v9557_v62  ;;  %2843 = vmatmul.bf16.gmra.mxu1 %v10734_v31  ;;  %v6988_v17 = vld [vmem:[#allocation2 + $0x39c] sm:$0xf] }
 0x358   : > { %v5408_v47 = vsel %vm9512_vm11, %v9506_v33, %v5403_v45  ;;  %v5298_v35 = vsel %vm5297_vm4, %v9508_v49, %v5294_v32  ;;  %v5518_v15 = vmul.f32 %v9539_v24, %v5517_v23  ;;  %v2597_v63 = vadd.f32 %v9380_v2, %v9459_v55  ;;  %v6421_v22 = vld [vmem:[#allocation2 + $0x3b8] sm:$0xf0] }
 0x359   : > { %v9588_v59 = vpop.f32.mrf.mxu2  ;;  %5719 = vst [vmem:[%s8223_s14 + $0x390] sm:$0xff] %v5408_v47  ;;  %v5303_v53 = vsel %vm9523_vm14, %v5302_v30, %v5298_v35  ;;  %vm5520_vm6 = vweird.f32 %v9483_v0  ;;  %v6717_v14 = vmul.f32 -1.442695, %v2693_v26  ;;  %v6200_v1 = vor.u32 %v6932_v57, %v6197_v37  ;;  %v7052_v19 = vld [vmem:[#allocation2 + $0x59c] sm:$0xf] }
 0x35a   : > { %v9594_v33 = vpop.f32.mrf.mxu1  ;;  %5712 = vst [vmem:[%s8223_s14 + $0x358] sm:$0xff] %v5303_v53  ;;  %v5519_v49 = vadd.f32 %v9539_v24, %v5518_v15  ;;  %vm9600_vm7 = vmor %vm5520_vm6, %vm5521_vm5  ;;  %vm9604_vm8 = vcmp.eq.f32.partialorder %v5524_v13, 8.507059e+37  ;;  %v5527_v60 = vor.u32 1.1754944e-38, %v5526_v43  ;;  %v2646_v0 = vadd.f32 %v9406_v52, %v2597_v63  ;;  %v6677_v26 = vld [vmem:[#allocation2 + $0x5b8] sm:$0xf0] }
 0x35b   : > { %v9609_v10 = vpop.f32.mrf.mxu3  ;;  %7376 = vpow2.f32 %v6717_v14  ;;  %3026 = vmatpush.bf16.msra.mxu1 %v6200_v1  ;;  %v2600_v34 = vadd.f32 %v9419_v39, %v9459_v55  ;;  %v6708_v42 = vor.u32 %v7064_v56, %v6707_v61  ;;  %v5419_v52 = vand.u32 2147483647, %v9557_v62  ;;  %v6165_v35 = vld [vmem:[#allocation2 + $0x1b8] sm:$0xf0]  ;;  %v6675_v53 = vld [vmem:[#allocation2 + $0x598] sm:$0xf] }
 0x35c   : > { %v7373_v16 = vpop.eup %7372  ;;  %v9613_v13 = vpop.f32.mrf.mxu0  ;;  %v5523_v43 = vsel %vm9600_vm7, %v9539_v24, %v5519_v49  ;;  %v2695_v23 = vadd.f32 %v9461_v11, %v2646_v0  ;;  %v6424_v45 = vor.u32 %v6988_v17, %v6421_v22  ;;  %v6680_v30 = vor.u32 %v7052_v19, %v6677_v26  ;;  %v6924_v24 = vld [vmem:[#allocation2 + $0x19c] sm:$0xf]  ;;  %v7056_v14 = vld [vmem:[#allocation2 + $0x5b4] sm:$0xf0] }
 0x35d   : > { %v9619_v32 = vadd.f32 1.0, %v7373_v16  ;;  %v7375_v57 = vpop.eup %7374  ;;  %v5528_v39 = vsel %vm9604_vm8, %v5527_v60, %v5523_v43  ;;  %2977 = vmatpush.bf16.msra.mxu0 %v6708_v42  ;;  %v2649_v37 = vadd.f32 %v9467_v40, %v2600_v34  ;;  %v5421_v15 = vand.u32 2147483648, %v9557_v62  ;;  %v6980_v22 = vld [vmem:[#allocation2 + $0x35c] sm:$0xf] }
 0x35e   : > { %5727 = vst [vmem:[%s8223_s14 + $0x3d0] sm:$0xff] %v5528_v39  ;;  %v5411_v47 = vmul.f32 %v7375_v57, %v9557_v62  ;;  %v6725_v11 = vmul.f32 -1.442695, %v2695_v23  ;;  %v2602_v63 = vadd.f32 %v9487_v54, %v9459_v55  ;;  %3076 = vmatpush.bf16.msra.mxu2 %v6424_v45  ;;  %3125 = vmatpush.bf16.msra.mxu3 %v6680_v30  ;;  %vm5415_vm9 = vweird.f32 %v9557_v62  ;;  %v6645_v45 = vld [vmem:[#allocation2 + $0x578] sm:$0xf0] }
 0x35f   : > { %7378 = vrcp.f32 %v9619_v32  ;;  %v2698_v61 = vadd.f32 %v9527_v21, %v2649_v37  ;;  %v6168_v56 = vor.u32 %v6924_v24, %v6165_v35  ;;  %vm5416_vm10 = vweird.f32 %v7375_v57  ;;  %v7044_v37 = vld [vmem:[#allocation2 + $0x55c] sm:$0xf]  ;;  %v10801_v35 = vld [vmem:[#allocation13_spill] sm:$0xff] }
 0x360   : > { %v5412_v40 = vsub.f32 1.0, %v5411_v47  ;;  %7380 = vpow2.f32 %v6725_v11  ;;  %v2651_v12 = vadd.f32 %v9532_v51, %v2602_v63  ;;  %v6676_v21 = vor.u32 %v7056_v14, %v6675_v53  ;;  %v6389_v51 = vld [vmem:[#allocation2 + $0x378] sm:$0xf0]  ;;  %vm5417_vm12 = vmor %vm5415_vm9, %vm5416_vm10  ;;  %v10802_v63 = vld [vmem:[#allocation14_spill] sm:$0xff] }
 0x361   : > { %v2702_v1 = vpop.f32.mrf.mxu2  ;;  %v7377_v49 = vpop.eup %7376  ;;  %v6733_v2 = vmul.f32 -1.442695, %v2698_v61  ;;  %3027 = vmatpush.bf16.msra.mxu1 %v6168_v56  ;;  %vm9640_vm11 = vcmp.eq.f32.partialorder %v5419_v52, 8.507059e+37  ;;  %v5422_v42 = vor.u32 1.1754944e-38, %v5421_v15  ;;  %v5539_v26 = vand.u32 2147483647, %v9619_v32 }
 0x362   : > { %v9634_v60 = vpop.f32.mrf.mxu1  ;;  %v5413_v0 = vmul.f32 %v7375_v57, %v5412_v40  ;;  %v9636_v54 = vadd.f32 1.0, %v7377_v49  ;;  %v2700_v17 = vadd.f32 %v9588_v59, %v2651_v12  ;;  %v2605_v52 = vadd.f32 %v9546_v38, %v9459_v55  ;;  %2978 = vmatpush.bf16.msra.mxu0 %v6676_v21  ;;  %v10803_v61 = vld [vmem:[#allocation15_spill] sm:$0xff] }
 0x363   : > { %v9638_v16 = vpop.f32.mrf.mxu3  ;;  %7382 = vpow2.f32 %v6733_v2  ;;  %v5541_v47 = vand.u32 2147483648, %v9619_v32  ;;  %v6392_v38 = vor.u32 %v6980_v22, %v6389_v51  ;;  %vm5535_vm13 = vweird.f32 %v9619_v32  ;;  %v6916_v2 = vld [vmem:[#allocation2 + $0x15c] sm:$0xf] }
 0x364   : > { %v9645_v19 = vpop.f32.mrf.mxu0  ;;  %v5414_v23 = vadd.f32 %v7375_v57, %v5413_v0  ;;  %7384 = vrcp.f32 %v9636_v54  ;;  %2794 = vmatmul.bf16.gmra.mxu0 %v10794_v46  ;;  %v6741_v39 = vmul.f32 -1.442695, %v2700_v17  ;;  %v2654_v24 = vadd.f32 %v9594_v33, %v2605_v52  ;;  %v6133_v12 = vld [vmem:[#allocation2 + $0x178] sm:$0xf0]  ;;  %v6643_v52 = vld [vmem:[#allocation2 + $0x558] sm:$0xf] }
 0x365   : > { %v9647_v43 = vpop.eup %7378  ;;  %3077 = vmatpush.bf16.msra.mxu2 %v6392_v38  ;;  %vm9672_vm15 = vcmp.eq.f32.partialorder %v5539_v26, 8.507059e+37  ;;  %v5542_v34 = vor.u32 1.1754944e-38, %v5541_v47  ;;  %vm3750_vm2 = vweird.f32 %v9636_v54 }
 0x366   : > { %v5531_v59 = vmul.f32 %v9647_v43, %v9619_v32  ;;  %v5418_v30 = vsel %vm5417_vm12, %v7375_v57, %v5414_v23  ;;  %2897 = vmatmul.bf16.gmra.mxu2 %v10801_v35  ;;  %v7381_v15 = vpop.eup %7380  ;;  %2946 = vmatmul.bf16.gmra.mxu3 %v10802_v63  ;;  %7386 = vpow2.f32 %v6741_v39  ;;  %v6648_v57 = vor.u32 %v7044_v37, %v6645_v45 }
 0x367   : > { %v5423_v62 = vsel %vm9640_vm11, %v5422_v42, %v5418_v30  ;;  %2848 = vmatmul.bf16.gmra.mxu1 %v10803_v61  ;;  %v9667_v40 = vadd.f32 1.0, %v7381_v15  ;;  %v2703_v56 = vadd.f32 %v2702_v1, %v2654_v24  ;;  %vm5536_vm14 = vweird.f32 %v9647_v43  ;;  %v7048_v30 = vld [vmem:[#allocation2 + $0x574] sm:$0xf0] }
 0x368   : > { %v5532_v11 = vsub.f32 1.0, %v5531_v59  ;;  %5720 = vst [vmem:[%s8223_s14 + $0x398] sm:$0xff] %v5423_v62  ;;  %v3754_v1 = vand.u32 2147483647, %v9636_v54  ;;  %v2607_v42 = vadd.f32 %v9613_v13, %v9459_v55  ;;  %3126 = vmatpush.bf16.msra.mxu3 %v6648_v57  ;;  %v3756_v23 = vand.u32 2147483648, %v9636_v54  ;;  %vm5537_vm0 = vmor %vm5535_vm13, %vm5536_vm14 }
 0x369   : > { %v2704_v33 = vpop.f32.mrf.mxu2  ;;  %v7383_v53 = vpop.eup %7382  ;;  %7388 = vrcp.f32 %v9667_v40  ;;  %v3874_v13 = vand.u32 2147483647, %v9667_v40  ;;  %v6749_v39 = vmul.f32 -1.442695, %v2703_v56  ;;  %v6136_v37 = vor.u32 %v6916_v2, %v6133_v12 }
 0x36a   : > { %v5533_v14 = vmul.f32 %v9647_v43, %v5532_v11  ;;  %v9676_v0 = vpop.f32.mrf.mxu1  ;;  %v7385_v21 = vpop.eup %7384  ;;  %v9687_v26 = vadd.f32 1.0, %v7383_v53  ;;  %v2656_v45 = vadd.f32 %v9634_v60, %v2607_v42  ;;  %v3876_v15 = vand.u32 2147483648, %v9667_v40 }
 0x36b   : > { %v9682_v17 = vpop.f32.mrf.mxu3  ;;  %v3746_v51 = vmul.f32 %v7385_v21, %v9636_v54  ;;  %vm3751_vm1 = vweird.f32 %v7385_v21  ;;  %3028 = vmatpush.bf16.msra.mxu1 %v6136_v37  ;;  %v6644_v60 = vor.u32 %v7048_v30, %v6643_v52  ;;  %vm9708_vm3 = vcmp.eq.f32.partialorder %v3754_v1, 8.507059e+37  ;;  %v6357_v54 = vld [vmem:[#allocation2 + $0x338] sm:$0xf0] }
 0x36c   : > { %v5534_v22 = vadd.f32 %v9647_v43, %v5533_v14  ;;  %v9689_v59 = vpop.f32.mrf.mxu0  ;;  %v7387_v47 = vpop.eup %7386  ;;  %7390 = vrcp.f32 %v9687_v26  ;;  %v2705_v57 = vadd.f32 %v2704_v33, %v2656_v45  ;;  %v3757_v53 = vor.u32 1.1754944e-38, %v3756_v23  ;;  %vm3752_vm5 = vmor %vm3750_vm2, %vm3751_vm1  ;;  %v6613_v23 = vld [vmem:[#allocation2 + $0x538] sm:$0xf0] }
 0x36d   : > { %v3747_v38 = vsub.f32 1.0, %v3746_v51  ;;  %v9702_v62 = vadd.f32 1.0, %v7387_v47  ;;  %7392 = vpow2.f32 %v6749_v39  ;;  %vm9715_vm4 = vcmp.eq.f32.partialorder %v3874_v13, 8.507059e+37  ;;  %2979 = vmatpush.bf16.msra.mxu0 %v6644_v60  ;;  %v7036_v51 = vld [vmem:[#allocation2 + $0x51c] sm:$0xf] }
 0x36e   : > { %v5538_v24 = vsel %vm5537_vm0, %v9647_v43, %v5534_v22  ;;  %v3877_v33 = vor.u32 1.1754944e-38, %v3876_v15  ;;  %vm3870_vm6 = vweird.f32 %v9667_v40  ;;  %v2610_v42 = vadd.f32 %v9645_v19, %v9459_v55  ;;  %v6908_v60 = vld [vmem:[#allocation2 + $0x11c] sm:$0xf] }
 0x36f   : > { %v5543_v32 = vsel %vm9672_vm15, %v5542_v34, %v5538_v24  ;;  %v3748_v11 = vmul.f32 %v7385_v21, %v3747_v38  ;;  %v9705_v56 = vpop.eup %7388  ;;  %7394 = vrcp.f32 %v9702_v62  ;;  %v6972_v34 = vld [vmem:[#allocation2 + $0x31c] sm:$0xf]  ;;  %v6757_v22 = vmul.f32 -1.442695, %v2705_v57 }
 0x370   : > { %5728 = vst [vmem:[%s8223_s14 + $0x3d8] sm:$0xff] %v5543_v32  ;;  %v3866_v2 = vmul.f32 %v9705_v56, %v9667_v40  ;;  %v3994_v45 = vand.u32 2147483647, %v9687_v26  ;;  %v3996_v30 = vand.u32 2147483648, %v9687_v26  ;;  %vm3871_vm7 = vweird.f32 %v9705_v56  ;;  %v6101_v57 = vld [vmem:[#allocation2 + $0x138] sm:$0xf0] }
 0x371   : > { %v2707_v14 = vpop.f32.mrf.mxu2  ;;  %v3749_v49 = vadd.f32 %v7385_v21, %v3748_v11  ;;  %v2659_v24 = vadd.f32 %v9676_v0, %v2610_v42  ;;  %7396 = vpow2.f32 %v6757_v22  ;;  %v6360_v32 = vor.u32 %v6972_v34, %v6357_v54  ;;  %vm9759_vm10 = vmor %vm3870_vm6, %vm3871_vm7 }
 0x372   : > { %v2660_v1 = vpop.f32.mrf.mxu1  ;;  %v9725_v13 = vpop.eup %7390  ;;  %v3867_v37 = vsub.f32 1.0, %v3866_v2  ;;  %v6616_v11 = vor.u32 %v7036_v51, %v6613_v23  ;;  %v6104_v0 = vor.u32 %v6908_v60, %v6101_v57  ;;  %vm3990_vm8 = vweird.f32 %v9687_v26  ;;  %v6611_v51 = vld [vmem:[#allocation2 + $0x518] sm:$0xf] }
 0x373   : > { %v9723_v52 = vpop.f32.mrf.mxu3  ;;  %v3753_v39 = vsel %vm3752_vm5, %v7385_v21, %v3749_v49  ;;  %v3986_v19 = vmul.f32 %v9725_v13, %v9687_v26  ;;  %v7393_v21 = vpop.eup %7392  ;;  %v2708_v2 = vadd.f32 %v2707_v14, %v2659_v24  ;;  %vm9747_vm9 = vcmp.eq.f32.partialorder %v3994_v45, 8.507059e+37  ;;  %3078 = vmatpush.bf16.msra.mxu2 %v6360_v32  ;;  %v7028_v14 = vld [vmem:[#allocation2 + $0x4dc] sm:$0xf] }
 0x374   : > { %v3758_v47 = vsel %vm9708_vm3, %v3757_v53, %v3753_v39  ;;  %2799 = vmatmul.bf16.gmra.mxu0 %v10802_v63  ;;  %v9736_v38 = vpop.f32.mrf.mxu0  ;;  %v3868_v15 = vmul.f32 %v9705_v56, %v3867_v37  ;;  %v9742_v49 = vadd.f32 1.0, %v7393_v21  ;;  %vm3991_vm11 = vweird.f32 %v9725_v13  ;;  %3127 = vmatpush.bf16.msra.mxu3 %v6616_v11 }
 0x375   : > { %5609 = vst [vmem:[%s8223_s14 + $0x20] sm:$0xff] %v3758_v47  ;;  %v9740_v43 = vpop.eup %7394  ;;  %v3987_v53 = vsub.f32 1.0, %v3986_v19  ;;  %v2612_v22 = vadd.f32 %v9689_v59, %v9459_v55  ;;  %v3997_v37 = vor.u32 1.1754944e-38, %v3996_v30  ;;  %v6765_v47 = vmul.f32 -1.442695, %v2708_v2  ;;  %3029 = vmatpush.bf16.msra.mxu1 %v6104_v0  ;;  %vm3992_vm12 = vmor %vm3990_vm8, %vm3991_vm11 }
 0x376   : > { %2902 = vmatmul.bf16.gmra.mxu2 %v8100_v5  ;;  %v3869_v42 = vadd.f32 %v9705_v56, %v3868_v15  ;;  %v4106_v34 = vmul.f32 %v9740_v43, %v9702_v62  ;;  %2951 = vmatmul.bf16.gmra.mxu3 %v8107_v28  ;;  %7398 = vrcp.f32 %v9742_v49  ;;  %v7040_v19 = vld [vmem:[#allocation2 + $0x534] sm:$0xf0]  ;;  %v4116_v15 = vand.u32 2147483648, %v9702_v62  ;;  %v6964_v0 = vld [vmem:[#allocation2 + $0x2dc] sm:$0xf] }
 0x377   : > { %2853 = vmatmul.bf16.gmra.mxu1 %v8109_v29  ;;  %v3988_v54 = vmul.f32 %v9725_v13, %v3987_v53  ;;  %v2661_v32 = vadd.f32 %v2660_v1, %v2612_v22  ;;  %v7397_v60 = vpop.eup %7396  ;;  %vm4111_vm13 = vweird.f32 %v9740_v43  ;;  %v4114_v12 = vand.u32 2147483647, %v9702_v62 }
 0x378   : > { %v3873_v40 = vsel %vm9759_vm10, %v9705_v56, %v3869_v42  ;;  %v4107_v45 = vsub.f32 1.0, %v4106_v34  ;;  %7400 = vpow2.f32 %v6765_v47  ;;  %v9786_v1 = vadd.f32 1.0, %v7397_v60  ;;  %v6325_v42 = vld [vmem:[#allocation2 + $0x2f8] sm:$0xf0] }
 0x379   : > { %v2709_v23 = vpop.f32.mrf.mxu2  ;;  %v3878_v21 = vsel %vm9715_vm4, %v3877_v33, %v3873_v40  ;;  %v3989_v59 = vadd.f32 %v9725_v13, %v3988_v54  ;;  %v6612_v30 = vor.u32 %v7040_v19, %v6611_v51  ;;  %vm4110_vm14 = vweird.f32 %v9702_v62  ;;  %v6581_v54 = vld [vmem:[#allocation2 + $0x4f8] sm:$0xf0] }
 0x37a   : > { %v2663_v24 = vpop.f32.mrf.mxu1  ;;  %5617 = vst [vmem:[%s8223_s14 + $0x60] sm:$0xff] %v3878_v21  ;;  %v4108_v56 = vmul.f32 %v9740_v43, %v4107_v45  ;;  %v2710_v57 = vadd.f32 %v2709_v23, %v2661_v32  ;;  %vm4112_vm15 = vmor %vm4110_vm14, %vm4111_vm13  ;;  %7402 = vrcp.f32 %v9786_v1  ;;  %v2615_v39 = vadd.f32 %v9736_v38, %v9459_v55 }
 0x37b   : > { %v9775_v11 = vpop.f32.mrf.mxu3  ;;  %v3993_v33 = vsel %vm3992_vm12, %v9725_v13, %v3989_v59  ;;  %v4117_v13 = vor.u32 1.1754944e-38, %v4116_v15  ;;  %2980 = vmatpush.bf16.msra.mxu0 %v6612_v30  ;;  %vm4115_vm0 = vcmp.eq.f32.partialorder %v4114_v12, 8.507059e+37  ;;  %v4234_v40 = vand.u32 2147483647, %v9742_v49  ;;  %v6900_v59 = vld [vmem:[#allocation2 + $0xdc] sm:$0xf] }
 0x37c   : > { %v2616_v53 = vpop.f32.mrf.mxu0  ;;  %v3998_v2 = vsel %vm9747_vm9, %v3997_v37, %v3993_v33  ;;  %v4109_v26 = vadd.f32 %v9740_v43, %v4108_v56  ;;  %v9792_v34 = vpop.eup %7398  ;;  %v6773_v51 = vmul.f32 -1.442695, %v2710_v57  ;;  %v2664_v37 = vadd.f32 %v2663_v24, %v2615_v39  ;;  %v6069_v15 = vld [vmem:[#allocation2 + $0xf8] sm:$0xf0]  ;;  %v6579_v33 = vld [vmem:[#allocation2 + $0x4d8] sm:$0xf] }
 0x37d   : > { %5625 = vst [vmem:[%s8223_s14 + $0xa0] sm:$0xff] %v3998_v2  ;;  %v4226_v22 = vmul.f32 %v9792_v34, %v9742_v49  ;;  %v6328_v38 = vor.u32 %v6964_v0, %v6325_v42  ;;  %v6584_v21 = vor.u32 %v7028_v14, %v6581_v54  ;;  %v6072_v12 = vor.u32 %v6900_v59, %v6069_v15  ;;  %v7032_v30 = vld [vmem:[#allocation2 + $0x4f4] sm:$0xf0]  ;;  %v6549_v59 = vld [vmem:[#allocation2 + $0x4b8] sm:$0xf0] }
 0x37e   : > { %v4113_v62 = vsel %vm4112_vm15, %v9740_v43, %v4109_v26  ;;  %v7401_v47 = vpop.eup %7400  ;;  %7404 = vpow2.f32 %v6773_v51  ;;  %v4236_v43 = vand.u32 2147483648, %v9742_v49  ;;  %vm4231_vm1 = vweird.f32 %v9792_v34 }
 0x37f   : > { %v4118_v23 = vsel %vm4115_vm0, %v4117_v13, %v4113_v62  ;;  %v4227_v19 = vsub.f32 1.0, %v4226_v22  ;;  %v9806_v60 = vadd.f32 1.0, %v7401_v47  ;;  %3079 = vmatpush.bf16.msra.mxu2 %v6328_v38  ;;  %3128 = vmatpush.bf16.msra.mxu3 %v6584_v21  ;;  %v6580_v57 = vor.u32 %v7032_v30, %v6579_v33  ;;  %v7020_v21 = vld [vmem:[#allocation2 + $0x49c] sm:$0xf] }
 0x380   : > { %5633 = vst [vmem:[%s8223_s14 + $0xe0] sm:$0xff] %v4118_v23  ;;  %v7403_v2 = vpop.eup %7402  ;;  %vm4230_vm2 = vweird.f32 %v9742_v49  ;;  %3030 = vmatpush.bf16.msra.mxu1 %v6072_v12  ;;  %v2617_v39 = vadd.f32 %v2616_v53, %v9459_v55  ;;  %vm4235_vm4 = vcmp.eq.f32.partialorder %v4234_v40, 8.507059e+37  ;;  %v4237_v49 = vor.u32 1.1754944e-38, %v4236_v43  ;;  %v6956_v23 = vld [vmem:[#allocation2 + $0x29c] sm:$0xf] }
 0x381   : > { %v2712_v45 = vpop.f32.mrf.mxu2  ;;  %v4228_v24 = vmul.f32 %v9792_v34, %v4227_v19  ;;  %7406 = vrcp.f32 %v9806_v60  ;;  %v4346_v13 = vmul.f32 %v7403_v2, %v9786_v1  ;;  %2981 = vmatpush.bf16.msra.mxu0 %v6580_v57  ;;  %vm4232_vm3 = vmor %vm4230_vm2, %vm4231_vm1  ;;  %v4354_v54 = vand.u32 2147483647, %v9786_v1 }
 0x382   : > { %v2665_v32 = vpop.f32.mrf.mxu1  ;;  %v2713_v56 = vadd.f32 %v2712_v45, %v2664_v37  ;;  %v6293_v37 = vld [vmem:[#allocation2 + $0x2b8] sm:$0xf0]  ;;  %v4356_v40 = vand.u32 2147483648, %v9786_v1  ;;  %vm4351_vm5 = vweird.f32 %v7403_v2  ;;  %vm4350_vm6 = vweird.f32 %v9786_v1 }
 0x383   : > { %v9813_v26 = vpop.f32.mrf.mxu3  ;;  %v4229_v42 = vadd.f32 %v9792_v34, %v4228_v24  ;;  %v4347_v51 = vsub.f32 1.0, %v4346_v13  ;;  %v2666_v53 = vadd.f32 %v2665_v32, %v2617_v39  ;;  %v6296_v38 = vor.u32 %v6956_v23, %v6293_v37  ;;  %vm4352_vm7 = vmor %vm4350_vm6, %vm4351_vm5  ;;  %v6892_v23 = vld [vmem:[#allocation2 + $0x9c] sm:$0xf] }
 0x384   : > { %2804 = vmatmul.bf16.gmra.mxu0 %v8107_v28  ;;  %v2619_v0 = vpop.f32.mrf.mxu0  ;;  %v6781_v14 = vmul.f32 -1.442695, %v2713_v56  ;;  %v7405_v62 = vpop.eup %7404  ;;  %v6552_v56 = vor.u32 %v7020_v21, %v6549_v59  ;;  %vm4355_vm8 = vcmp.eq.f32.partialorder %v4354_v54, 8.507059e+37  ;;  %v4357_v24 = vor.u32 1.1754944e-38, %v4356_v40  ;;  %v6037_v37 = vld [vmem:[#allocation2 + $0xb8] sm:$0xf0] }
 0x385   : > { %v4233_v22 = vsel %vm4232_vm3, %v9792_v34, %v4229_v42  ;;  %v9826_v47 = vadd.f32 1.0, %v7405_v62  ;;  %v4348_v34 = vmul.f32 %v7403_v2, %v4347_v51  ;;  %3080 = vmatpush.bf16.msra.mxu2 %v6296_v38  ;;  %v4474_v62 = vand.u32 2147483647, %v9806_v60  ;;  %v6547_v21 = vld [vmem:[#allocation2 + $0x498] sm:$0xf] }
 0x386   : > { %2907 = vmatmul.bf16.gmra.mxu2 %v8116_v48  ;;  %2956 = vmatmul.bf16.gmra.mxu3 %v8123_v3  ;;  %7408 = vpow2.f32 %v6781_v14  ;;  %v4238_v45 = vsel %vm4235_vm4, %v4237_v49, %v4233_v22  ;;  %v2620_v14 = vadd.f32 %v2619_v0, %v9459_v55  ;;  %v4476_v1 = vand.u32 2147483648, %v9806_v60  ;;  %v7024_v59 = vld [vmem:[#allocation2 + $0x4b4] sm:$0xf0] }
 0x387   : > { %2858 = vmatmul.bf16.gmra.mxu1 %v8125_v4  ;;  %5641 = vst [vmem:[%s8223_s14 + $0x120] sm:$0xff] %v4238_v45  ;;  %v7407_v12 = vpop.eup %7406  ;;  %7410 = vrcp.f32 %v9826_v47  ;;  %v4349_v32 = vadd.f32 %v7403_v2, %v4348_v34  ;;  %3129 = vmatpush.bf16.msra.mxu3 %v6552_v56  ;;  %vm4470_vm10 = vweird.f32 %v9806_v60  ;;  %vm4475_vm12 = vcmp.eq.f32.partialorder %v4474_v62, 8.507059e+37 }
 0x388   : > { %v4466_v33 = vmul.f32 %v7407_v12, %v9806_v60  ;;  %vm4471_vm9 = vweird.f32 %v7407_v12  ;;  %v4477_v34 = vor.u32 1.1754944e-38, %v4476_v1  ;;  %v4596_v60 = vand.u32 2147483648, %v9826_v47 }
 0x389   : > { %v2714_v19 = vpop.f32.mrf.mxu2  ;;  %v4353_v13 = vsel %vm4352_vm7, %v7403_v2, %v4349_v32  ;;  %vm4472_vm11 = vmor %vm4470_vm10, %vm4471_vm9  ;;  %vm4590_vm14 = vweird.f32 %v9826_v47 }
 0x38a   : > { %v2715_v15 = vadd.f32 %v2714_v19, %v2666_v53  ;;  %v2668_v43 = vpop.f32.mrf.mxu1  ;;  %v4467_v39 = vsub.f32 1.0, %v4466_v33  ;;  %v4358_v49 = vsel %vm4355_vm8, %v4357_v24, %v4353_v13  ;;  %v4594_v33 = vand.u32 2147483647, %v9826_v47 }
 0x38b   : > { %v9837_v51 = vpop.f32.mrf.mxu3  ;;  %5649 = vst [vmem:[%s8223_s14 + $0x160] sm:$0xff] %v4358_v49  ;;  %v2669_v54 = vadd.f32 %v2668_v43, %v2620_v14 }
 0x38c   : > { %v6789_v30 = vmul.f32 -1.442695, %v2715_v15  ;;  %v2621_v57 = vpop.f32.mrf.mxu0  ;;  %v7409_v42 = vpop.eup %7408  ;;  %v4468_v53 = vmul.f32 %v7407_v12, %v4467_v39  ;;  %v6040_v15 = vor.u32 %v6892_v23, %v6037_v37  ;;  %v6548_v39 = vor.u32 %v7024_v59, %v6547_v21  ;;  %v6948_v37 = vld [vmem:[#allocation2 + $0x25c] sm:$0xf] }
 0x38d   : > { %v9835_v22 = vadd.f32 1.0, %v7409_v42  ;;  %v7411_v2 = vpop.eup %7410  ;;  %v2622_v49 = vadd.f32 %v2621_v57, %v9459_v55  ;;  %v7012_v57 = vld [vmem:[#allocation2 + $0x45c] sm:$0xf]  ;;  %vm4595_vm0 = vcmp.eq.f32.partialorder %v4594_v33, 8.507059e+37 }
 0x38e   : > { %7412 = vpow2.f32 %v6789_v30  ;;  %v4469_v45 = vadd.f32 %v7407_v12, %v4468_v53  ;;  %v4586_v40 = vmul.f32 %v7411_v2, %v9826_v47  ;;  %3031 = vmatpush.bf16.msra.mxu1 %v6040_v15  ;;  %vm4591_vm13 = vweird.f32 %v7411_v2  ;;  %2982 = vmatpush.bf16.msra.mxu0 %v6548_v39  ;;  %v10814_v53 = vld [vmem:[#allocation16_spill] sm:$0xff]  ;;  %v6517_v47 = vld [vmem:[#allocation2 + $0x478] sm:$0xf0] }
 0x38f   : > { %7414 = vrcp.f32 %v9835_v22  ;;  %vm4592_vm15 = vmor %vm4590_vm14, %vm4591_vm13  ;;  %v4714_v33 = vand.u32 2147483647, %v9835_v22  ;;  %vm4710_vm2 = vweird.f32 %v9835_v22 }
 0x390   : > { %v4473_v56 = vsel %vm4472_vm11, %v7407_v12, %v4469_v45  ;;  %v4587_v32 = vsub.f32 1.0, %v4586_v40  ;;  %v4597_v45 = vor.u32 1.1754944e-38, %v4596_v60 }
 0x391   : > { %v2717_v0 = vpop.f32.mrf.mxu2  ;;  %v4478_v24 = vsel %vm4475_vm12, %v4477_v34, %v4473_v56  ;;  %v6520_v56 = vor.u32 %v7012_v57, %v6517_v47  ;;  %vm4715_vm4 = vcmp.eq.f32.partialorder %v4714_v33, 8.507059e+37 }
 0x392   : > { %v2718_v19 = vadd.f32 %v2717_v0, %v2669_v54  ;;  %v2670_v38 = vpop.f32.mrf.mxu1  ;;  %5657 = vst [vmem:[%s8223_s14 + $0x1a0] sm:$0xff] %v4478_v24  ;;  %v4588_v14 = vmul.f32 %v7411_v2, %v4587_v32  ;;  %v10815_v54 = vld [vmem:[#allocation17_spill] sm:$0xff]  ;;  %v6261_v0 = vld [vmem:[#allocation2 + $0x278] sm:$0xf0] }
 0x393   : > { %v2671_v23 = vadd.f32 %v2670_v38, %v2622_v49  ;;  %v9857_v40 = vpop.f32.mrf.mxu3  ;;  %v6264_v21 = vor.u32 %v6948_v37, %v6261_v0  ;;  %v4716_v38 = vand.u32 2147483648, %v9835_v22  ;;  %3130 = vmatpush.bf16.msra.mxu3 %v6520_v56 }
 0x394   : > { %v7413_v43 = vpop.eup %7412  ;;  %v6797_v30 = vmul.f32 -1.442695, %v2718_v19  ;;  %2809 = vmatmul.bf16.gmra.mxu0 %v8123_v3  ;;  %v2624_v13 = vpop.f32.mrf.mxu0  ;;  %v4589_v62 = vadd.f32 %v7411_v2, %v4588_v14 }
 0x395   : > { %v9846_v42 = vadd.f32 1.0, %v7413_v43  ;;  %v7415_v12 = vpop.eup %7414  ;;  %3081 = vmatpush.bf16.msra.mxu2 %v6264_v21 }
 0x396   : > { %7416 = vpow2.f32 %v6797_v30  ;;  %2912 = vmatmul.bf16.gmra.mxu2 %v8132_v25  ;;  %v4706_v1 = vmul.f32 %v7415_v12, %v9835_v22  ;;  %2961 = vmatmul.bf16.gmra.mxu3 %v10814_v53  ;;  %v4593_v59 = vsel %vm4592_vm15, %v7411_v2, %v4589_v62  ;;  %vm4711_vm1 = vweird.f32 %v7415_v12 }
 0x397   : > { %7418 = vrcp.f32 %v9846_v42  ;;  %2863 = vmatmul.bf16.gmra.mxu1 %v10815_v54  ;;  %v4598_v32 = vsel %vm4595_vm0, %v4597_v45, %v4593_v59  ;;  %v2625_v62 = vadd.f32 %v2624_v13, %v9459_v55  ;;  %vm4712_vm3 = vmor %vm4710_vm2, %vm4711_vm1  ;;  %v6884_v45 = vld [vmem:[#allocation2 + $0x5c] sm:$0xf]  ;;  %v4836_v47 = vand.u32 2147483648, %v9846_v42 }
 0x398   : > { %v4707_v34 = vsub.f32 1.0, %v4706_v1  ;;  %5665 = vst [vmem:[%s8223_s14 + $0x1e0] sm:$0xff] %v4598_v32  ;;  %v4717_v1 = vor.u32 1.1754944e-38, %v4716_v38  ;;  %vm4830_vm6 = vweird.f32 %v9846_v42 }
 0x399   : > { %v2719_v19 = vpop.f32.mrf.mxu2 }
 0x39a   : > { %v2720_v15 = vadd.f32 %v2719_v19, %v2671_v23  ;;  %v2673_v43 = vpop.f32.mrf.mxu1  ;;  %v4708_v24 = vmul.f32 %v7415_v12, %v4707_v34  ;;  %v4834_v23 = vand.u32 2147483647, %v9846_v42  ;;  %v6005_v19 = vld [vmem:[#allocation2 + $0x78] sm:$0xf0]  ;;  %v6515_v34 = vld [vmem:[#allocation2 + $0x458] sm:$0xf] }
 0x39b   : > { %v2674_v22 = vadd.f32 %v2673_v43, %v2625_v62  ;;  %v6008_v13 = vor.u32 %v6884_v45, %v6005_v19 }
 0x39c   : > { %v7417_v30 = vpop.eup %7416  ;;  %v6805_v60 = vmul.f32 -1.442695, %v2720_v15  ;;  %v4709_v14 = vadd.f32 %v7415_v12, %v4708_v24  ;;  %v2626_v37 = vpop.f32.mrf.mxu0  ;;  %v7016_v15 = vld [vmem:[#allocation2 + $0x474] sm:$0xf0]  ;;  %vm4835_vm8 = vcmp.eq.f32.partialorder %v4834_v23, 8.507059e+37 }
 0x39d   : > { %v7419_v39 = vpop.eup %7418  ;;  %v9863_v2 = vadd.f32 1.0, %v7417_v30  ;;  %v6516_v30 = vor.u32 %v7016_v15, %v6515_v34  ;;  %v9871_v24 = vpop.f32.mrf.mxu3  ;;  %3032 = vmatpush.bf16.msra.mxu1 %v6008_v13 }
 0x39e   : > { %v4826_v49 = vmul.f32 %v7419_v39, %v9846_v42  ;;  %7420 = vpow2.f32 %v6805_v60  ;;  %v4713_v0 = vsel %vm4712_vm3, %v7415_v12, %v4709_v14  ;;  %vm4831_vm5 = vweird.f32 %v7419_v39  ;;  %v10816_v42 = vld [vmem:[#allocation18_spill] sm:$0xff] }
 0x39f   : > { %7422 = vrcp.f32 %v9863_v2  ;;  %v4718_v21 = vsel %vm4715_vm4, %v4717_v1, %v4713_v0  ;;  %2983 = vmatpush.bf16.msra.mxu0 %v6516_v30  ;;  %vm4832_vm7 = vmor %vm4830_vm6, %vm4831_vm5  ;;  %v4837_v14 = vor.u32 1.1754944e-38, %v4836_v47  ;;  %v2627_v0 = vadd.f32 %v2626_v37, %v9459_v55  ;;  %v6229_v47 = vld [vmem:[#allocation2 + $0x238] sm:$0xf0] }
 0x3a0   : > { %v4827_v57 = vsub.f32 1.0, %v4826_v49  ;;  %5673 = vst [vmem:[%s8223_s14 + $0x220] sm:$0xff] %v4718_v21  ;;  %v4954_v45 = vand.u32 2147483647, %v9863_v2  ;;  %v4956_v19 = vand.u32 2147483648, %v9863_v2  ;;  %vm4950_vm10 = vweird.f32 %v9863_v2 }
 0x3a1   : > { %v2722_v59 = vpop.f32.mrf.mxu2 }
 0x3a2   : > { %v4828_v56 = vmul.f32 %v7419_v39, %v4827_v57  ;;  %v2723_v32 = vadd.f32 %v2722_v59, %v2674_v22  ;;  %v2675_v38 = vpop.f32.mrf.mxu1  ;;  %v7004_v59 = vld [vmem:[#allocation2 + $0x41c] sm:$0xf]  ;;  %vm4955_vm12 = vcmp.eq.f32.partialorder %v4954_v45, 8.507059e+37 }
 0x3a3   : > { %v2676_v23 = vadd.f32 %v2675_v38, %v2627_v0 }
 0x3a4   : > { %v7421_v12 = vpop.eup %7420  ;;  %v4829_v43 = vadd.f32 %v7419_v39, %v4828_v56  ;;  %v6813_v33 = vmul.f32 -1.442695, %v2723_v32  ;;  %2814 = vmatmul.bf16.gmra.mxu0 %v10814_v53  ;;  %v2629_v21 = vpop.f32.mrf.mxu0  ;;  %v6485_v56 = vld [vmem:[#allocation2 + $0x438] sm:$0xf0] }
 0x3a5   : > { %v7423_v60 = vpop.eup %7422  ;;  %v9875_v49 = vadd.f32 1.0, %v7421_v12  ;;  %v6488_v30 = vor.u32 %v7004_v59, %v6485_v56 }
 0x3a6   : > { %v4833_v62 = vsel %vm4832_vm7, %v7419_v39, %v4829_v43  ;;  %v4946_v1 = vmul.f32 %v7423_v60, %v9863_v2  ;;  %7424 = vpow2.f32 %v6813_v33  ;;  %2917 = vmatmul.bf16.gmra.mxu2 %v10816_v42  ;;  %2966 = vmatmul.bf16.gmra.mxu3 %v10727_v41  ;;  %v6940_v39 = vld [vmem:[#allocation2 + $0x21c] sm:$0xf]  ;;  %vm4951_vm9 = vweird.f32 %v7423_v60  ;;  %v6483_v2 = vld [vmem:[#allocation2 + $0x418] sm:$0xf] }
 0x3a7   : > { %v4838_v57 = vsel %vm4835_vm8, %v4837_v14, %v4833_v62  ;;  %7426 = vrcp.f32 %v9875_v49  ;;  %2868 = vmatmul.bf16.gmra.mxu1 %v8157_v36  ;;  %v6232_v15 = vor.u32 %v6940_v39, %v6229_v47  ;;  %vm4952_vm11 = vmor %vm4950_vm10, %vm4951_vm9  ;;  %v4957_v14 = vor.u32 1.1754944e-38, %v4956_v19  ;;  %3131 = vmatpush.bf16.msra.mxu3 %v6488_v30  ;;  %v7008_v39 = vld [vmem:[#allocation2 + $0x434] sm:$0xf0]  ;;  %v6876_v19 = vld [vmem:[#allocation2 + $0x1c] sm:$0xf] }
 0x3a8   : > { %5681 = vst [vmem:[%s8223_s14 + $0x260] sm:$0xff] %v4838_v57  ;;  %v4947_v22 = vsub.f32 1.0, %v4946_v1  ;;  %v9889_v1 = vpop.f32.mrf.mxu3  ;;  %v6484_v47 = vor.u32 %v7008_v39, %v6483_v2  ;;  %v5074_v59 = vand.u32 2147483647, %v9875_v49  ;;  %vm5070_vm14 = vweird.f32 %v9875_v49 }
 0x3a9   : > { %v2724_v37 = vpop.f32.mrf.mxu2  ;;  %3082 = vmatpush.bf16.msra.mxu2 %v6232_v15 }
 0x3aa   : > { %v4948_v13 = vmul.f32 %v7423_v60, %v4947_v22  ;;  %v2725_v34 = vadd.f32 %v2724_v37, %v2676_v23  ;;  %v2678_v32 = vpop.f32.mrf.mxu1  ;;  %v2630_v22 = vadd.f32 %v2629_v21, %v9459_v55  ;;  %2984 = vmatpush.bf16.msra.mxu0 %v6484_v47  ;;  %vm5075_vm0 = vcmp.eq.f32.partialorder %v5074_v59, 8.507059e+37 }
 0x3ac   : > { %v7425_v12 = vpop.eup %7424  ;;  %v4949_v43 = vadd.f32 %v7423_v60, %v4948_v13  ;;  %v6821_v33 = vmul.f32 -1.442695, %v2725_v34  ;;  %v2679_v45 = vadd.f32 %v2678_v32, %v2630_v22  ;;  %v5076_v13 = vand.u32 2147483648, %v9875_v49  ;;  %v5973_v34 = vld [vmem:[#allocation2 + $0x38] sm:$0xf0]  ;;  %v2631_v30 = vpop.f32.mrf.mxu0 }
 0x3ad   : > { %v7427_v38 = vpop.eup %7426  ;;  %v9887_v62 = vadd.f32 1.0, %v7425_v12  ;;  %v5976_v56 = vor.u32 %v6876_v19, %v5973_v34  ;;  %v2632_v2 = vadd.f32 %v2631_v30, %v9459_v55 }
 0x3ae   : > { %v4953_v0 = vsel %vm4952_vm11, %v7423_v60, %v4949_v43  ;;  %v5066_v57 = vmul.f32 %v7427_v38, %v9875_v49  ;;  %7428 = vpow2.f32 %v6821_v33  ;;  %vm5071_vm13 = vweird.f32 %v7427_v38 }
 0x3af   : > { %v4958_v23 = vsel %vm4955_vm12, %v4957_v14, %v4953_v0  ;;  %7430 = vrcp.f32 %v9887_v62  ;;  %3033 = vmatpush.bf16.msra.mxu1 %v5976_v56  ;;  %vm5072_vm15 = vmor %vm5070_vm14, %vm5071_vm13  ;;  %v5077_v14 = vor.u32 1.1754944e-38, %v5076_v13  ;;  %v5194_v55 = vand.u32 2147483647, %v9887_v62 }
 0x3b0   : > { %5689 = vst [vmem:[%s8223_s14 + $0x2a0] sm:$0xff] %v4958_v23  ;;  %v5067_v37 = vsub.f32 1.0, %v5066_v57  ;;  %v9901_v49 = vpop.f32.mrf.mxu3  ;;  %vm5190_vm2 = vweird.f32 %v9887_v62 }
 0x3b1   : > { %v2727_v60 = vpop.f32.mrf.mxu2  ;;  %vm5195_vm4 = vcmp.eq.f32.partialorder %v5194_v55, 8.507059e+37 }
 0x3b2   : > { %v5068_v15 = vmul.f32 %v7427_v38, %v5067_v37  ;;  %v2728_v21 = vadd.f32 %v2727_v60, %v2679_v45  ;;  %v2680_v57 = vpop.f32.mrf.mxu1 }
 0x3b3   : > { %v2681_v45 = vadd.f32 %v2680_v57, %v2632_v2 }
 0x3b4   : > { %v7429_v12 = vpop.eup %7428  ;;  %v5069_v43 = vadd.f32 %v7427_v38, %v5068_v15  ;;  %v6829_v33 = vmul.f32 -1.442695, %v2728_v21  ;;  %2819 = vmatmul.bf16.gmra.mxu0 %v10727_v41 }
 0x3b5   : > { %v7431_v32 = vpop.eup %7430  ;;  %v3665_v0 = vadd.f32 1.0, %v7429_v12 }
 0x3b6   : > { %v5073_v22 = vsel %vm5072_vm15, %v7427_v38, %v5069_v43  ;;  %v5186_v23 = vmul.f32 %v7431_v32, %v9887_v62  ;;  %7432 = vpow2.f32 %v6829_v33  ;;  %2922 = vmatmul.bf16.gmra.mxu2 %v8164_v58  ;;  %2971 = vmatmul.bf16.gmra.mxu3 %v8171_v6  ;;  %v5196_v38 = vand.u32 2147483648, %v9887_v62 }
 0x3b7   : > { %v5078_v39 = vsel %vm5075_vm0, %v5077_v14, %v5073_v22  ;;  %7434 = vrcp.f32 %v3665_v0  ;;  %2873 = vmatmul.bf16.gmra.mxu1 %v8173_v7  ;;  %vm5191_vm1 = vweird.f32 %v7431_v32  ;;  %v5316_v14 = vand.u32 2147483648, %v3665_v0 }
 0x3b8   : > { %5697 = vst [vmem:[%s8223_s14 + $0x2e0] sm:$0xff] %v5078_v39  ;;  %v5187_v37 = vsub.f32 1.0, %v5186_v23  ;;  %vm5192_vm3 = vmor %vm5190_vm2, %vm5191_vm1  ;;  %v5197_v21 = vor.u32 1.1754944e-38, %v5196_v38  ;;  %v9911_v57 = vpop.f32.mrf.mxu3  ;;  %v5314_v23 = vand.u32 2147483647, %v3665_v0  ;;  %vm5310_vm6 = vweird.f32 %v3665_v0 }
 0x3b9   : > { %v2729_v19 = vpop.f32.mrf.mxu2 }
 0x3ba   : > { %v5188_v47 = vmul.f32 %v7431_v32, %v5187_v37  ;;  %v2730_v59 = vadd.f32 %v2729_v19, %v2681_v45  ;;  %vm5315_vm8 = vcmp.eq.f32.partialorder %v5314_v23, 8.507059e+37 }
 0x3bc   : > { %v7433_v13 = vpop.eup %7432  ;;  %v5189_v60 = vadd.f32 %v7431_v32, %v5188_v47  ;;  %v6837_v34 = vmul.f32 -1.442695, %v2730_v59  ;;  %v9917_v47 = vld [vmem:[%s10685_s6] sm:$0xff] }
 0x3bd   : > { %v7435_v15 = vpop.eup %7434  ;;  %v3673_v56 = vadd.f32 1.0, %v7433_v13  ;;  %v9920_v55 = vperm.slane %v9917_v47, 6 }
 0x3be   : > { %v5193_v30 = vsel %vm5192_vm3, %v7431_v32, %v5189_v60  ;;  %v5306_v12 = vmul.f32 %v7435_v15, %v3665_v0  ;;  %7436 = vpow2.f32 %v6837_v34  ;;  %vm5311_vm5 = vweird.f32 %v7435_v15 }
 0x3bf   : > { %v5198_v43 = vsel %vm5195_vm4, %v5197_v21, %v5193_v30  ;;  %7438 = vrcp.f32 %v3673_v56  ;;  %vm5312_vm7 = vmor %vm5310_vm6, %vm5311_vm5  ;;  %v5317_v32 = vor.u32 1.1754944e-38, %v5316_v14  ;;  %v5436_v13 = vand.u32 2147483648, %v3673_v56 }
 0x3c0   : > { %5705 = vst [vmem:[%s8223_s14 + $0x320] sm:$0xff] %v5198_v43  ;;  %v5307_v33 = vsub.f32 1.0, %v5306_v12  ;;  %vm5430_vm10 = vweird.f32 %v3673_v56 }
 0x3c1   : > { %v5437_v14 = vor.u32 1.1754944e-38, %v5436_v13 }
 0x3c2   : > { %v5308_v22 = vmul.f32 %v7435_v15, %v5307_v33  ;;  %v9930_v33 = vperm.slane %v9917_v47, 5 }
 0x3c4   : > { %v7437_v62 = vpop.eup %7436  ;;  %v5309_v2 = vadd.f32 %v7435_v15, %v5308_v22  ;;  %2824 = vmatmul.bf16.gmra.mxu0 %v8171_v6  ;;  %v2839_v45 = vpop.f32.mrf.mxu1 }
 0x3c5   : > { %v7439_v39 = vpop.eup %7438  ;;  %v3681_v37 = vadd.f32 1.0, %v7437_v62 }
 0x3c6   : > { %v5313_v38 = vsel %vm5312_vm7, %v7435_v15, %v5309_v2  ;;  %v5426_v19 = vmul.f32 %v7439_v39, %v3673_v56  ;;  %3083 = vmatmul.bf16.vlgmr.msra.gmra.mxu2 %v10728_v44  ;;  %3132 = vmatmul.bf16.vlgmr.msra.gmra.mxu3 %v10729_v9  ;;  %v2888_v60 = vpop.f32.mrf.mxu2  ;;  %vm5431_vm9 = vweird.f32 %v7439_v39  ;;  %v5434_v15 = vand.u32 2147483647, %v3673_v56 }
 0x3c7   : > { %v5318_v59 = vsel %vm5315_vm8, %v5317_v32, %v5313_v38  ;;  %7440 = vrcp.f32 %v3681_v37  ;;  %3034 = vmatmul.bf16.vlgmr.msra.gmra.mxu1 %v8052_v27  ;;  %v2889_v21 = vadd.f32 %v2888_v60, %v9920_v55  ;;  %vm5432_vm11 = vmor %vm5430_vm10, %vm5431_vm9  ;;  %v2742_v32 = vadd.f32 %v9371_v18, %v9930_v33 }
 0x3c8   : > { %5713 = vst [vmem:[%s8223_s14 + $0x360] sm:$0xff] %v5318_v59  ;;  %v5427_v0 = vsub.f32 1.0, %v5426_v19  ;;  %vm5435_vm12 = vcmp.eq.f32.partialorder %v5434_v15, 8.507059e+37  ;;  %v5556_v38 = vand.u32 2147483648, %v3681_v37  ;;  %vm5550_vm14 = vweird.f32 %v3681_v37 }
 0x3c9   : > { %v2937_v30 = vpop.f32.mrf.mxu3 }
 0x3ca   : > { %v5428_v34 = vmul.f32 %v7439_v39, %v5427_v0  ;;  %v9927_v43 = vadd.f32 %v2937_v30, %v2889_v21  ;;  %v5554_v0 = vand.u32 2147483647, %v3681_v37  ;;  %v5557_v21 = vor.u32 1.1754944e-38, %v5556_v38 }
 0x3cc   : > { %v5429_v12 = vadd.f32 %v7439_v39, %v5428_v34  ;;  %v2841_v27 = vpop.f32.mrf.mxu1  ;;  %vm5555_vm0 = vcmp.eq.f32.partialorder %v5554_v0, 8.507059e+37 }
 0x3cd   : > { %v7441_v44 = vpop.eup %7440 }
 0x3ce   : > { %v5433_v22 = vsel %vm5432_vm11, %v7439_v39, %v5429_v12  ;;  %v5546_v23 = vmul.f32 %v7441_v44, %v3681_v37  ;;  %v2890_v56 = vpop.f32.mrf.mxu2  ;;  %vm5551_vm13 = vweird.f32 %v7441_v44  ;;  %v2744_v37 = vadd.f32 %v9408_v50, %v9930_v33 }
 0x3cf   : > { %v5438_v62 = vsel %vm5435_vm12, %v5437_v14, %v5433_v22  ;;  %v2891_v60 = vadd.f32 %v2890_v56, %v9920_v55  ;;  %vm5552_vm15 = vmor %vm5550_vm14, %vm5551_vm13 }
 0x3d0   : > { %5721 = vst [vmem:[%s8223_s14 + $0x3a0] sm:$0xff] %v5438_v62  ;;  %v5547_v2 = vsub.f32 1.0, %v5546_v23 }
 0x3d1   : > { %v2790_v19 = vpop.f32.mrf.mxu0  ;;  %v2939_v34 = vpop.f32.mrf.mxu3 }
 0x3d2   : > { %v5548_v59 = vmul.f32 %v7441_v44, %v5547_v2  ;;  %v2791_v13 = vadd.f32 %v2790_v19, %v2742_v32  ;;  %v9936_v15 = vadd.f32 %v2939_v34, %v2891_v60 }
 0x3d4   : > { %v5549_v39 = vadd.f32 %v7441_v44, %v5548_v59  ;;  %2985 = vmatmul.bf16.vlgmr.msra.gmra.mxu0 %v10729_v9  ;;  %v2840_v18 = vadd.f32 %v2839_v45, %v2791_v13  ;;  %v2844_v30 = vpop.f32.mrf.mxu1 }
 0x3d6   : > { %v5553_v12 = vsel %vm5552_vm15, %v7441_v44, %v5549_v39  ;;  %v6718_v22 = vmul.f32 -1.442695, %v2840_v18  ;;  %3088 = vmatmul.bf16.gmra.mxu2 %v10794_v46  ;;  %3137 = vmatmul.bf16.gmra.mxu3 %v10734_v31 }
 0x3d7   : > { %v5558_v14 = vsel %vm5555_vm0, %v5557_v21, %v5553_v12  ;;  %3039 = vmatmul.bf16.gmra.mxu1 %v10793_v20  ;;  %v2747_v20 = vadd.f32 %v9473_v8, %v9930_v33 }
 0x3d8   : > { %5729 = vst [vmem:[%s8223_s14 + $0x3e0] sm:$0xff] %v5558_v14  ;;  %7442 = vpow2.f32 %v6718_v22  ;;  %v10817_v14 = vld [vmem:[#allocation19_spill] sm:$0xff] }
 0x3d9   : > { %v2792_v9 = vpop.f32.mrf.mxu0  ;;  %v2893_v23 = vpop.f32.mrf.mxu2  ;;  %v2749_v22 = vadd.f32 %v10817_v14, %v9930_v33 }
 0x3da   : > { %v2793_v62 = vadd.f32 %v2792_v9, %v2744_v37  ;;  %v2942_v45 = vpop.f32.mrf.mxu3  ;;  %v2894_v44 = vadd.f32 %v2893_v23, %v9920_v55 }
 0x3dc   : > { %v2842_v2 = vadd.f32 %v2841_v27, %v2793_v62  ;;  %v2846_v32 = vpop.f32.mrf.mxu1  ;;  %v9946_v38 = vadd.f32 %v2942_v45, %v2894_v44 }
 0x3de   : > { %v7443_v46 = vpop.eup %7442  ;;  %v6726_v56 = vmul.f32 -1.442695, %v2842_v2 }
 0x3df   : > { %v3562_v19 = vadd.f32 1.0, %v7443_v46 }
 0x3e0   : > { %7444 = vpow2.f32 %v6726_v56 }
 0x3e1   : > { %7446 = vrcp.f32 %v3562_v19  ;;  %v2795_v50 = vpop.f32.mrf.mxu0  ;;  %v2895_v59 = vpop.f32.mrf.mxu2  ;;  %v3769_v45 = vand.u32 2147483647, %v3562_v19  ;;  %v3771_v44 = vand.u32 2147483648, %v3562_v19  ;;  %vm3765_vm2 = vweird.f32 %v3562_v19 }
 0x3e2   : > { %v2796_v0 = vadd.f32 %v2795_v50, %v2747_v20  ;;  %v2944_v60 = vpop.f32.mrf.mxu3  ;;  %v2896_v13 = vadd.f32 %v2895_v59, %v9920_v55 }
 0x3e3   : > { %vm3770_vm4 = vcmp.eq.f32.partialorder %v3769_v45, 8.507059e+37 }
 0x3e4   : > { %2990 = vmatmul.bf16.gmra.mxu0 %v10734_v31  ;;  %v2845_v27 = vadd.f32 %v2844_v30, %v2796_v0  ;;  %v2849_v34 = vpop.f32.mrf.mxu1  ;;  %v9952_v39 = vadd.f32 %v2944_v60, %v2896_v13  ;;  %v2752_v60 = vadd.f32 %v9609_v10, %v9930_v33  ;;  %v3772_v13 = vor.u32 1.1754944e-38, %v3771_v44 }
 0x3e6   : > { %v7445_v21 = vpop.eup %7444  ;;  %v6734_v18 = vmul.f32 -1.442695, %v2845_v27  ;;  %3093 = vmatmul.bf16.gmra.mxu2 %v10802_v63  ;;  %3142 = vmatmul.bf16.gmra.mxu3 %v10803_v61 }
 0x3e7   : > { %v7447_v12 = vpop.eup %7446  ;;  %v9955_v8 = vadd.f32 1.0, %v7445_v21  ;;  %3044 = vmatmul.bf16.gmra.mxu1 %v10801_v35 }
 0x3e8   : > { %v3761_v37 = vmul.f32 %v7447_v12, %v3562_v19  ;;  %7448 = vpow2.f32 %v6734_v18  ;;  %vm3766_vm1 = vweird.f32 %v7447_v12 }
 0x3e9   : > { %7450 = vrcp.f32 %v9955_v8  ;;  %v2797_v31 = vpop.f32.mrf.mxu0  ;;  %v2898_v30 = vpop.f32.mrf.mxu2  ;;  %vm3767_vm3 = vmor %vm3765_vm2, %vm3766_vm1  ;;  %vm3885_vm6 = vweird.f32 %v9955_v8 }
 0x3ea   : > { %v3762_v9 = vsub.f32 1.0, %v3761_v37  ;;  %v2798_v23 = vadd.f32 %v2797_v31, %v2749_v22  ;;  %v2947_v62 = vpop.f32.mrf.mxu3  ;;  %v2899_v63 = vadd.f32 %v2898_v30, %v9920_v55  ;;  %v3889_v30 = vand.u32 2147483647, %v9955_v8 }
 0x3ec   : > { %v3763_v2 = vmul.f32 %v7447_v12, %v3762_v9  ;;  %v2847_v46 = vadd.f32 %v2846_v32, %v2798_v23  ;;  %v2851_v35 = vpop.f32.mrf.mxu1  ;;  %v9963_v56 = vadd.f32 %v2947_v62, %v2899_v63  ;;  %v3891_v9 = vand.u32 2147483648, %v9955_v8 }
 0x3ed   : > { %vm3890_vm8 = vcmp.eq.f32.partialorder %v3889_v30, 8.507059e+37 }
 0x3ee   : > { %v7449_v20 = vpop.eup %7448  ;;  %v3764_v50 = vadd.f32 %v7447_v12, %v3763_v2  ;;  %v6742_v59 = vmul.f32 -1.442695, %v2847_v46 }
 0x3ef   : > { %v7451_v0 = vpop.eup %7450  ;;  %v9967_v27 = vadd.f32 1.0, %v7449_v20  ;;  %v2754_v20 = vadd.f32 %v9638_v16, %v9930_v33 }
 0x3f0   : > { %v3768_v21 = vsel %vm3767_vm3, %v7447_v12, %v3764_v50  ;;  %v3881_v32 = vmul.f32 %v7451_v0, %v9955_v8  ;;  %7452 = vpow2.f32 %v6742_v59  ;;  %vm3886_vm5 = vweird.f32 %v7451_v0 }
 0x3f1   : > { %v3773_v18 = vsel %vm3770_vm4, %v3772_v13, %v3768_v21  ;;  %7454 = vrcp.f32 %v9967_v27  ;;  %v2800_v14 = vpop.f32.mrf.mxu0  ;;  %v2900_v22 = vpop.f32.mrf.mxu2  ;;  %vm3887_vm7 = vmor %vm3885_vm6, %vm3886_vm5  ;;  %v3892_v50 = vor.u32 1.1754944e-38, %v3891_v9  ;;  %vm4005_vm10 = vweird.f32 %v9967_v27 }
 0x3f2   : > { %5610 = vst [vmem:[%s8223_s14 + $0x28] sm:$0xff] %v3773_v18  ;;  %v3882_v19 = vsub.f32 1.0, %v3881_v32  ;;  %v2801_v37 = vadd.f32 %v2800_v14, %v2752_v60  ;;  %v2949_v31 = vpop.f32.mrf.mxu3  ;;  %v2901_v10 = vadd.f32 %v2900_v22, %v9920_v55  ;;  %v4009_v18 = vand.u32 2147483647, %v9967_v27 }
 0x3f3   : > { %v2757_v9 = vadd.f32 %v9682_v17, %v9930_v33 }
 0x3f4   : > { %v3883_v12 = vmul.f32 %v7451_v0, %v3882_v19  ;;  %2995 = vmatmul.bf16.gmra.mxu0 %v10803_v61  ;;  %v2850_v23 = vadd.f32 %v2849_v34, %v2801_v37  ;;  %v2854_v62 = vpop.f32.mrf.mxu1  ;;  %v9976_v63 = vadd.f32 %v2949_v31, %v2901_v10  ;;  %vm4010_vm12 = vcmp.eq.f32.partialorder %v4009_v18, 8.507059e+37 }
 0x3f6   : > { %v7453_v45 = vpop.eup %7452  ;;  %v3884_v44 = vadd.f32 %v7451_v0, %v3883_v12  ;;  %v6750_v2 = vmul.f32 -1.442695, %v2850_v23  ;;  %3098 = vmatmul.bf16.gmra.mxu2 %v8107_v28  ;;  %3147 = vmatmul.bf16.gmra.mxu3 %v8109_v29 }
 0x3f7   : > { %v7455_v46 = vpop.eup %7454  ;;  %v9982_v59 = vadd.f32 1.0, %v7453_v45  ;;  %3049 = vmatmul.bf16.gmra.mxu1 %v8100_v5  ;;  %v4011_v5 = vand.u32 2147483648, %v9967_v27 }
 0x3f8   : > { %v3888_v61 = vsel %vm3887_vm7, %v7451_v0, %v3884_v44  ;;  %v4001_v34 = vmul.f32 %v7455_v46, %v9967_v27  ;;  %7456 = vpow2.f32 %v6750_v2  ;;  %vm4006_vm9 = vweird.f32 %v7455_v46 }
 0x3f9   : > { %v3893_v8 = vsel %vm3890_vm8, %v3892_v50, %v3888_v61  ;;  %7458 = vrcp.f32 %v9982_v59  ;;  %v2802_v28 = vpop.f32.mrf.mxu0  ;;  %v2903_v60 = vpop.f32.mrf.mxu2  ;;  %vm4007_vm11 = vmor %vm4005_vm10, %vm4006_vm9  ;;  %v4012_v12 = vor.u32 1.1754944e-38, %v4011_v5  ;;  %vm4125_vm14 = vweird.f32 %v9982_v59 }
 0x3fa   : > { %5618 = vst [vmem:[%s8223_s14 + $0x68] sm:$0xff] %v3893_v8  ;;  %v4002_v16 = vsub.f32 1.0, %v4001_v34  ;;  %v2803_v13 = vadd.f32 %v2802_v28, %v2754_v20  ;;  %v2952_v21 = vpop.f32.mrf.mxu3  ;;  %v2904_v32 = vadd.f32 %v2903_v60, %v9920_v55  ;;  %v4129_v34 = vand.u32 2147483647, %v9982_v59 }
 0x3fb   : > { %v4131_v8 = vand.u32 2147483648, %v9982_v59  ;;  %v2759_v5 = vadd.f32 %v9723_v52, %v9930_v33 }
 0x3fc   : > { %v4003_v0 = vmul.f32 %v7455_v46, %v4002_v16  ;;  %v2852_v14 = vadd.f32 %v2851_v35, %v2803_v13  ;;  %v2856_v22 = vpop.f32.mrf.mxu1  ;;  %v9992_v19 = vadd.f32 %v2952_v21, %v2904_v32  ;;  %vm4130_vm0 = vcmp.eq.f32.partialorder %v4129_v34, 8.507059e+37 }
 0x3fe   : > { %v7457_v37 = vpop.eup %7456  ;;  %v4004_v31 = vadd.f32 %v7455_v46, %v4003_v0  ;;  %v6758_v10 = vmul.f32 -1.442695, %v2852_v14  ;;  %v4132_v0 = vor.u32 1.1754944e-38, %v4131_v8 }
 0x3ff   : > { %v7459_v30 = vpop.eup %7458  ;;  %v9997_v23 = vadd.f32 1.0, %v7457_v37 }
 0x400   : > { %v4008_v45 = vsel %vm4007_vm11, %v7455_v46, %v4004_v31  ;;  %v4121_v35 = vmul.f32 %v7459_v30, %v9982_v59  ;;  %7460 = vpow2.f32 %v6758_v10  ;;  %vm4126_vm13 = vweird.f32 %v7459_v30 }
 0x401   : > { %v4013_v44 = vsel %vm4010_vm12, %v4012_v12, %v4008_v45  ;;  %7462 = vrcp.f32 %v9997_v23  ;;  %v2805_v2 = vpop.f32.mrf.mxu0  ;;  %v2905_v20 = vpop.f32.mrf.mxu2  ;;  %vm4127_vm15 = vmor %vm4125_vm14, %vm4126_vm13  ;;  %v4249_v12 = vand.u32 2147483647, %v9997_v23  ;;  %vm4245_vm2 = vweird.f32 %v9997_v23 }
 0x402   : > { %5626 = vst [vmem:[%s8223_s14 + $0xa8] sm:$0xff] %v4013_v44  ;;  %v4122_v27 = vsub.f32 1.0, %v4121_v35  ;;  %v2806_v50 = vadd.f32 %v2805_v2, %v2757_v9  ;;  %v2954_v61 = vpop.f32.mrf.mxu3  ;;  %v2906_v17 = vadd.f32 %v2905_v20, %v9920_v55 }
 0x403   : > { %vm4250_vm4 = vcmp.eq.f32.partialorder %v4249_v12, 8.507059e+37 }
 0x404   : > { %v4123_v46 = vmul.f32 %v7459_v30, %v4122_v27  ;;  %3000 = vmatmul.bf16.gmra.mxu0 %v8109_v29  ;;  %v2855_v28 = vadd.f32 %v2854_v62, %v2806_v50  ;;  %v2859_v60 = vpop.f32.mrf.mxu1  ;;  %v10006_v16 = vadd.f32 %v2954_v61, %v2906_v17  ;;  %v2762_v61 = vadd.f32 %v9775_v11, %v9930_v33 }
 0x406   : > { %v7461_v13 = vpop.eup %7460  ;;  %v4124_v21 = vadd.f32 %v7459_v30, %v4123_v46  ;;  %v6766_v32 = vmul.f32 -1.442695, %v2855_v28  ;;  %3103 = vmatmul.bf16.gmra.mxu2 %v8123_v3  ;;  %3152 = vmatmul.bf16.gmra.mxu3 %v8125_v4 }
 0x407   : > { %v7463_v18 = vpop.eup %7462  ;;  %v10012_v14 = vadd.f32 1.0, %v7461_v13  ;;  %3054 = vmatmul.bf16.gmra.mxu1 %v8116_v48  ;;  %v4251_v48 = vand.u32 2147483648, %v9997_v23 }
 0x408   : > { %v4128_v29 = vsel %vm4127_vm15, %v7459_v30, %v4124_v21  ;;  %v4241_v62 = vmul.f32 %v7463_v18, %v9997_v23  ;;  %7464 = vpow2.f32 %v6766_v32  ;;  %vm4246_vm1 = vweird.f32 %v7463_v18 }
 0x409   : > { %v4133_v59 = vsel %vm4130_vm0, %v4132_v0, %v4128_v29  ;;  %7466 = vrcp.f32 %v10012_v14  ;;  %v2807_v3 = vpop.f32.mrf.mxu0  ;;  %v2908_v37 = vpop.f32.mrf.mxu2  ;;  %vm4247_vm3 = vmor %vm4245_vm2, %vm4246_vm1  ;;  %v4252_v17 = vor.u32 1.1754944e-38, %v4251_v48  ;;  %v4371_v0 = vand.u32 2147483648, %v10012_v14 }
 0x40a   : > { %5634 = vst [vmem:[%s8223_s14 + $0xe8] sm:$0xff] %v4133_v59  ;;  %v4242_v52 = vsub.f32 1.0, %v4241_v62  ;;  %v2808_v31 = vadd.f32 %v2807_v3, %v2759_v5  ;;  %v2957_v10 = vpop.f32.mrf.mxu3  ;;  %v2909_v9 = vadd.f32 %v2908_v37, %v9920_v55  ;;  %v4369_v5 = vand.u32 2147483647, %v10012_v14 }
 0x40b   : > { %vm4365_vm6 = vweird.f32 %v10012_v14 }
 0x40c   : > { %v4243_v30 = vmul.f32 %v7463_v18, %v4242_v52  ;;  %v2857_v45 = vadd.f32 %v2856_v22, %v2808_v31  ;;  %v2861_v35 = vpop.f32.mrf.mxu1  ;;  %v10022_v44 = vadd.f32 %v2957_v10, %v2909_v9  ;;  %v2764_v10 = vadd.f32 %v9813_v26, %v9930_v33 }
 0x40d   : > { %v4372_v9 = vor.u32 1.1754944e-38, %v4371_v0  ;;  %vm4370_vm8 = vcmp.eq.f32.partialorder %v4369_v5, 8.507059e+37 }
 0x40e   : > { %v7465_v2 = vpop.eup %7464  ;;  %v4244_v20 = vadd.f32 %v7463_v18, %v4243_v30  ;;  %v6774_v27 = vmul.f32 -1.442695, %v2857_v45 }
 0x40f   : > { %v7467_v50 = vpop.eup %7466  ;;  %v10027_v34 = vadd.f32 1.0, %v7465_v2 }
 0x410   : > { %v4248_v8 = vsel %vm4247_vm3, %v7463_v18, %v4244_v20  ;;  %v4361_v22 = vmul.f32 %v7467_v50, %v10012_v14  ;;  %7468 = vpow2.f32 %v6774_v27  ;;  %vm4366_vm5 = vweird.f32 %v7467_v50 }
 0x411   : > { %v4253_v46 = vsel %vm4250_vm4, %v4252_v17, %v4248_v8  ;;  %7470 = vrcp.f32 %v10027_v34  ;;  %v2810_v28 = vpop.f32.mrf.mxu0  ;;  %v2910_v13 = vpop.f32.mrf.mxu2  ;;  %vm4367_vm7 = vmor %vm4365_vm6, %vm4366_vm5  ;;  %v4489_v20 = vand.u32 2147483647, %v10027_v34  ;;  %vm4485_vm10 = vweird.f32 %v10027_v34 }
 0x412   : > { %5642 = vst [vmem:[%s8223_s14 + $0x128] sm:$0xff] %v4253_v46  ;;  %v4362_v23 = vsub.f32 1.0, %v4361_v22  ;;  %v2811_v21 = vadd.f32 %v2810_v28, %v2762_v61  ;;  %v2959_v32 = vpop.f32.mrf.mxu3  ;;  %v2911_v11 = vadd.f32 %v2910_v13, %v9920_v55  ;;  %v2767_v13 = vadd.f32 %v9837_v51, %v9930_v33 }
 0x413   : > { %vm4490_vm12 = vcmp.eq.f32.partialorder %v4489_v20, 8.507059e+37 }
 0x414   : > { %v4363_v18 = vmul.f32 %v7467_v50, %v4362_v23  ;;  %3005 = vmatmul.bf16.gmra.mxu0 %v8125_v4  ;;  %v2860_v29 = vadd.f32 %v2859_v60, %v2811_v21  ;;  %v2864_v62 = vpop.f32.mrf.mxu1  ;;  %v10036_v59 = vadd.f32 %v2959_v32, %v2911_v11 }
 0x416   : > { %v7469_v3 = vpop.eup %7468  ;;  %v4364_v37 = vadd.f32 %v7467_v50, %v4363_v18  ;;  %v6782_v52 = vmul.f32 -1.442695, %v2860_v29  ;;  %3108 = vmatmul.bf16.gmra.mxu2 %v10814_v53  ;;  %3157 = vmatmul.bf16.gmra.mxu3 %v10815_v54 }
 0x417   : > { %v7471_v31 = vpop.eup %7470  ;;  %v10042_v12 = vadd.f32 1.0, %v7469_v3  ;;  %3059 = vmatmul.bf16.gmra.mxu1 %v8132_v25  ;;  %v4491_v25 = vand.u32 2147483648, %v10027_v34 }
 0x418   : > { %v4368_v4 = vsel %vm4367_vm7, %v7467_v50, %v4364_v37  ;;  %v4481_v60 = vmul.f32 %v7471_v31, %v10027_v34  ;;  %7472 = vpow2.f32 %v6782_v52  ;;  %vm4486_vm9 = vweird.f32 %v7471_v31 }
 0x419   : > { %v4373_v14 = vsel %vm4370_vm8, %v4372_v9, %v4368_v4  ;;  %7474 = vrcp.f32 %v10042_v12  ;;  %v2812_v53 = vpop.f32.mrf.mxu0  ;;  %v2913_v48 = vpop.f32.mrf.mxu2  ;;  %vm4487_vm11 = vmor %vm4485_vm10, %vm4486_vm9  ;;  %v4492_v23 = vor.u32 1.1754944e-38, %v4491_v25  ;;  %v4609_v3 = vand.u32 2147483647, %v10042_v12 }
 0x41a   : > { %5650 = vst [vmem:[%s8223_s14 + $0x168] sm:$0xff] %v4373_v14  ;;  %v4482_v26 = vsub.f32 1.0, %v4481_v60  ;;  %v2813_v30 = vadd.f32 %v2812_v53, %v2764_v10  ;;  %v2962_v45 = vpop.f32.mrf.mxu3  ;;  %v2914_v2 = vadd.f32 %v2913_v48, %v9920_v55  ;;  %v4611_v37 = vand.u32 2147483648, %v10042_v12 }
 0x41b   : > { %vm4605_vm14 = vweird.f32 %v10042_v12  ;;  %v2769_v48 = vadd.f32 %v9857_v40, %v9930_v33  ;;  %vm4610_vm0 = vcmp.eq.f32.partialorder %v4609_v3, 8.507059e+37 }
 0x41c   : > { %v4483_v27 = vmul.f32 %v7471_v31, %v4482_v26  ;;  %v2862_v50 = vadd.f32 %v2861_v35, %v2813_v30  ;;  %v2866_v61 = vpop.f32.mrf.mxu1  ;;  %v10052_v17 = vadd.f32 %v2962_v45, %v2914_v2  ;;  %v4612_v26 = vor.u32 1.1754944e-38, %v4611_v37 }
 0x41e   : > { %v7473_v8 = vpop.eup %7472  ;;  %v4484_v22 = vadd.f32 %v7471_v31, %v4483_v27  ;;  %v6790_v46 = vmul.f32 -1.442695, %v2862_v50 }
 0x41f   : > { %v7475_v28 = vpop.eup %7474  ;;  %v10057_v21 = vadd.f32 1.0, %v7473_v8 }
 0x420   : > { %v4488_v32 = vsel %vm4487_vm11, %v7471_v31, %v4484_v22  ;;  %v4601_v35 = vmul.f32 %v7475_v28, %v10042_v12  ;;  %7476 = vpow2.f32 %v6790_v46  ;;  %vm4606_vm13 = vweird.f32 %v7475_v28 }
 0x421   : > { %v4493_v11 = vsel %vm4490_vm12, %v4492_v23, %v4488_v32  ;;  %7478 = vrcp.f32 %v10057_v21  ;;  %v2815_v5 = vpop.f32.mrf.mxu0  ;;  %v2915_v0 = vpop.f32.mrf.mxu2  ;;  %vm4607_vm15 = vmor %vm4605_vm14, %vm4606_vm13  ;;  %v4729_v27 = vand.u32 2147483647, %v10057_v21  ;;  %vm4725_vm2 = vweird.f32 %v10057_v21 }
 0x422   : > { %5658 = vst [vmem:[%s8223_s14 + $0x1a8] sm:$0xff] %v4493_v11  ;;  %v4602_v34 = vsub.f32 1.0, %v4601_v35  ;;  %v2816_v18 = vadd.f32 %v2815_v5, %v2767_v13  ;;  %v2964_v29 = vpop.f32.mrf.mxu3  ;;  %v2916_v51 = vadd.f32 %v2915_v0, %v9920_v55  ;;  %v2772_v35 = vadd.f32 %v9871_v24, %v9930_v33 }
 0x423   : > { %vm4730_vm4 = vcmp.eq.f32.partialorder %v4729_v27, 8.507059e+37 }
 0x424   : > { %v4603_v52 = vmul.f32 %v7475_v28, %v4602_v34  ;;  %3010 = vmatmul.bf16.gmra.mxu0 %v10815_v54  ;;  %v2865_v31 = vadd.f32 %v2864_v62, %v2816_v18  ;;  %v2869_v10 = vpop.f32.mrf.mxu1  ;;  %v10066_v9 = vadd.f32 %v2964_v29, %v2916_v51 }
 0x426   : > { %v7477_v4 = vpop.eup %7476  ;;  %v4604_v60 = vadd.f32 %v7475_v28, %v4603_v52  ;;  %v6798_v14 = vmul.f32 -1.442695, %v2865_v31  ;;  %3113 = vmatmul.bf16.gmra.mxu2 %v10727_v41  ;;  %3162 = vmatmul.bf16.gmra.mxu3 %v8157_v36 }
 0x427   : > { %v7479_v53 = vpop.eup %7478  ;;  %v10072_v30 = vadd.f32 1.0, %v7477_v4  ;;  %3064 = vmatmul.bf16.gmra.mxu1 %v10816_v42  ;;  %v4731_v42 = vand.u32 2147483648, %v10057_v21 }
 0x428   : > { %v4608_v54 = vsel %vm4607_vm15, %v7475_v28, %v4604_v60  ;;  %v4721_v62 = vmul.f32 %v7479_v53, %v10057_v21  ;;  %7480 = vpow2.f32 %v6798_v14  ;;  %vm4726_vm1 = vweird.f32 %v7479_v53 }
 0x429   : > { %v4613_v12 = vsel %vm4610_vm0, %v4612_v26, %v4608_v54  ;;  %7482 = vrcp.f32 %v10072_v30  ;;  %v2817_v41 = vpop.f32.mrf.mxu0  ;;  %v2918_v45 = vpop.f32.mrf.mxu2  ;;  %vm4727_vm3 = vmor %vm4725_vm2, %vm4726_vm1  ;;  %v4732_v11 = vor.u32 1.1754944e-38, %v4731_v42  ;;  %v4849_v37 = vand.u32 2147483647, %v10072_v30 }
 0x42a   : > { %5666 = vst [vmem:[%s8223_s14 + $0x1e8] sm:$0xff] %v4613_v12  ;;  %v4722_v40 = vsub.f32 1.0, %v4721_v62  ;;  %v2818_v2 = vadd.f32 %v2817_v41, %v2769_v48  ;;  %v2967_v20 = vpop.f32.mrf.mxu3  ;;  %v2919_v25 = vadd.f32 %v2918_v45, %v9920_v55  ;;  %v4851_v52 = vand.u32 2147483648, %v10072_v30 }
 0x42b   : > { %vm4845_vm6 = vweird.f32 %v10072_v30  ;;  %v2774_v62 = vadd.f32 %v9889_v1, %v9930_v33  ;;  %vm4850_vm8 = vcmp.eq.f32.partialorder %v4849_v37, 8.507059e+37  ;;  %v10120_v37 = vperm.slane %v9917_v47, 7 }
 0x42c   : > { %v4723_v50 = vmul.f32 %v7479_v53, %v4722_v40  ;;  %v2867_v8 = vadd.f32 %v2866_v61, %v2818_v2  ;;  %v2871_v22 = vpop.f32.mrf.mxu1  ;;  %v10082_v46 = vadd.f32 %v2967_v20, %v2919_v25  ;;  %v4852_v12 = vor.u32 1.1754944e-38, %v4851_v52 }
 0x42e   : > { %v7481_v28 = vpop.eup %7480  ;;  %v4724_v13 = vadd.f32 %v7479_v53, %v4723_v50  ;;  %v6806_v23 = vmul.f32 -1.442695, %v2867_v8 }
 0x42f   : > { %v7483_v32 = vpop.eup %7482  ;;  %v10087_v5 = vadd.f32 1.0, %v7481_v28 }
 0x430   : > { %v4728_v0 = vsel %vm4727_vm3, %v7479_v53, %v4724_v13  ;;  %v4841_v61 = vmul.f32 %v7483_v32, %v10072_v30  ;;  %7484 = vpow2.f32 %v6806_v23  ;;  %vm4846_vm5 = vweird.f32 %v7483_v32 }
 0x431   : > { %v4733_v34 = vsel %vm4730_vm4, %v4732_v11, %v4728_v0  ;;  %7486 = vrcp.f32 %v10087_v5  ;;  %v2820_v18 = vpop.f32.mrf.mxu0  ;;  %v2920_v29 = vpop.f32.mrf.mxu2  ;;  %vm4847_vm7 = vmor %vm4845_vm6, %vm4846_vm5  ;;  %v4969_v25 = vand.u32 2147483647, %v10087_v5  ;;  %v4971_v27 = vand.u32 2147483648, %v10087_v5 }
 0x432   : > { %5674 = vst [vmem:[%s8223_s14 + $0x228] sm:$0xff] %v4733_v34  ;;  %v4842_v21 = vsub.f32 1.0, %v4841_v61  ;;  %v2821_v51 = vadd.f32 %v2820_v18, %v2772_v35  ;;  %v2969_v3 = vpop.f32.mrf.mxu3  ;;  %v2921_v24 = vadd.f32 %v2920_v29, %v9920_v55  ;;  %vm4965_vm10 = vweird.f32 %v10087_v5 }
 0x433   : > { %v2777_v35 = vadd.f32 %v9901_v49, %v9930_v33  ;;  %v4972_v11 = vor.u32 1.1754944e-38, %v4971_v27  ;;  %vm4970_vm12 = vcmp.eq.f32.partialorder %v4969_v25, 8.507059e+37 }
 0x434   : > { %v4843_v31 = vmul.f32 %v7483_v32, %v4842_v21  ;;  %3015 = vmatmul.bf16.gmra.mxu0 %v8157_v36  ;;  %v2870_v4 = vadd.f32 %v2869_v10, %v2821_v51  ;;  %v2874_v60 = vpop.f32.mrf.mxu1  ;;  %v10096_v14 = vadd.f32 %v2969_v3, %v2921_v24 }
 0x436   : > { %v7485_v53 = vpop.eup %7484  ;;  %v4844_v48 = vadd.f32 %v7483_v32, %v4843_v31  ;;  %v6814_v26 = vmul.f32 -1.442695, %v2870_v4  ;;  %3118 = vmatmul.bf16.gmra.mxu2 %v8171_v6  ;;  %3167 = vmatmul.bf16.gmra.mxu3 %v8173_v7 }
 0x437   : > { %v7487_v54 = vpop.eup %7486  ;;  %v3650_v41 = vadd.f32 1.0, %v7485_v53  ;;  %3069 = vmatmul.bf16.gmra.mxu1 %v8164_v58 }
 0x438   : > { %v4848_v36 = vsel %vm4847_vm7, %v7483_v32, %v4844_v48  ;;  %v4961_v10 = vmul.f32 %v7487_v54, %v10087_v5  ;;  %7488 = vpow2.f32 %v6814_v26  ;;  %vm4966_vm9 = vweird.f32 %v7487_v54 }
 0x439   : > { %v4853_v30 = vsel %vm4850_vm8, %v4852_v12, %v4848_v36  ;;  %7490 = vrcp.f32 %v3650_v41  ;;  %v2822_v6 = vpop.f32.mrf.mxu0  ;;  %v2923_v45 = vpop.f32.mrf.mxu2  ;;  %vm4967_vm11 = vmor %vm4965_vm10, %vm4966_vm9  ;;  %v5089_v49 = vand.u32 2147483647, %v3650_v41  ;;  %v5091_v24 = vand.u32 2147483648, %v3650_v41 }
 0x43a   : > { %5682 = vst [vmem:[%s8223_s14 + $0x268] sm:$0xff] %v4853_v30  ;;  %v4962_v40 = vsub.f32 1.0, %v4961_v10  ;;  %v2823_v2 = vadd.f32 %v2822_v6, %v2774_v62  ;;  %v2972_v1 = vpop.f32.mrf.mxu3  ;;  %v2924_v20 = vadd.f32 %v2923_v45, %v9920_v55  ;;  %vm5085_vm14 = vweird.f32 %v3650_v41 }
 0x43b   : > { %vm5090_vm0 = vcmp.eq.f32.partialorder %v5089_v49, 8.507059e+37  ;;  %v5092_v47 = vor.u32 1.1754944e-38, %v5091_v24 }
 0x43c   : > { %v4963_v58 = vmul.f32 %v7487_v54, %v4962_v40  ;;  %v2872_v42 = vadd.f32 %v2871_v22, %v2823_v2  ;;  %v2876_v50 = vpop.f32.mrf.mxu1  ;;  %v10109_v8 = vadd.f32 %v2972_v1, %v2924_v20 }
 0x43e   : > { %v7489_v28 = vpop.eup %7488  ;;  %v4964_v13 = vadd.f32 %v7487_v54, %v4963_v58  ;;  %v6822_v23 = vmul.f32 -1.442695, %v2872_v42 }
 0x43f   : > { %v7491_v32 = vpop.eup %7490  ;;  %v10114_v0 = vadd.f32 1.0, %v7489_v28 }
 0x440   : > { %v4968_v61 = vsel %vm4967_vm11, %v7487_v54, %v4964_v13  ;;  %v5081_v22 = vmul.f32 %v7491_v32, %v3650_v41  ;;  %7492 = vpow2.f32 %v6822_v23  ;;  %vm5086_vm13 = vweird.f32 %v7491_v32 }
 0x441   : > { %v4973_v34 = vsel %vm4970_vm12, %v4972_v11, %v4968_v61  ;;  %7494 = vrcp.f32 %v10114_v0  ;;  %v2825_v18 = vpop.f32.mrf.mxu0  ;;  %v2925_v29 = vpop.f32.mrf.mxu2  ;;  %vm5087_vm15 = vmor %vm5085_vm14, %vm5086_vm13  ;;  %v5209_v40 = vand.u32 2147483647, %v10114_v0  ;;  %v5211_v2 = vand.u32 2147483648, %v10114_v0 }
 0x442   : > { %5690 = vst [vmem:[%s8223_s14 + $0x2a8] sm:$0xff] %v4973_v34  ;;  %v5082_v5 = vsub.f32 1.0, %v5081_v22  ;;  %v2826_v21 = vadd.f32 %v2825_v18, %v2777_v35  ;;  %v2974_v51 = vpop.f32.mrf.mxu3  ;;  %v2926_v3 = vadd.f32 %v2925_v29, %v9920_v55  ;;  %v2779_v55 = vadd.f32 %v9911_v57, %v9930_v33 }
 0x443   : > { %vm5205_vm2 = vweird.f32 %v10114_v0  ;;  %vm5210_vm4 = vcmp.eq.f32.partialorder %v5209_v40, 8.507059e+37 }
 0x444   : > { %v5083_v52 = vmul.f32 %v7491_v32, %v5082_v5  ;;  %3020 = vmatmul.bf16.gmra.mxu0 %v8173_v7  ;;  %v2875_v31 = vadd.f32 %v2874_v60, %v2826_v21  ;;  %v3035_v4 = vpop.f32.mrf.mxu1  ;;  %v10123_v53 = vadd.f32 %v2974_v51, %v2926_v3 }
 0x445   : > { %v3036_v60 = vadd.f32 %v3035_v4, %v10120_v37 }
 0x446   : > { %v7493_v48 = vpop.eup %7492  ;;  %v5084_v26 = vadd.f32 %v7491_v32, %v5083_v52  ;;  %v6830_v54 = vmul.f32 -1.442695, %v2875_v31 }
 0x447   : > { %v7495_v62 = vpop.eup %7494  ;;  %v10127_v12 = vadd.f32 1.0, %v7493_v48 }
 0x448   : > { %v5088_v36 = vsel %vm5087_vm15, %v7491_v32, %v5084_v26  ;;  %v5201_v7 = vmul.f32 %v7495_v62, %v10114_v0  ;;  %7496 = vpow2.f32 %v6830_v54  ;;  %vm5206_vm1 = vweird.f32 %v7495_v62 }
 0x449   : > { %v5093_v10 = vsel %vm5090_vm0, %v5092_v47, %v5088_v36  ;;  %7498 = vrcp.f32 %v10127_v12  ;;  %v2827_v41 = vpop.f32.mrf.mxu0  ;;  %v3084_v30 = vpop.f32.mrf.mxu2  ;;  %vm5207_vm3 = vmor %vm5205_vm2, %vm5206_vm1  ;;  %v5212_v32 = vor.u32 1.1754944e-38, %v5211_v2  ;;  %v5331_v21 = vand.u32 2147483648, %v10127_v12 }
 0x44a   : > { %5698 = vst [vmem:[%s8223_s14 + $0x2e8] sm:$0xff] %v5093_v10  ;;  %v5202_v6 = vsub.f32 1.0, %v5201_v7  ;;  %v2828_v45 = vadd.f32 %v2827_v41, %v2779_v55  ;;  %v3133_v57 = vpop.f32.mrf.mxu3  ;;  %v3085_v33 = vadd.f32 %v3084_v30, %v3036_v60  ;;  %v5329_v49 = vand.u32 2147483647, %v10127_v12 }
 0x44b   : > { %vm5325_vm6 = vweird.f32 %v10127_v12 }
 0x44c   : > { %v5203_v1 = vmul.f32 %v7495_v62, %v5202_v6  ;;  %v2877_v20 = vadd.f32 %v2876_v50, %v2828_v45  ;;  %v3134_v25 = vadd.f32 %v3133_v57, %v3085_v33  ;;  %v3037_v27 = vpop.f32.mrf.mxu1  ;;  %vm5330_vm8 = vcmp.eq.f32.partialorder %v5329_v49, 8.507059e+37 }
 0x44d   : > { %v3038_v34 = vadd.f32 %v3037_v27, %v10120_v37 }
 0x44e   : > { %v7497_v58 = vpop.eup %7496  ;;  %v5204_v42 = vadd.f32 %v7495_v62, %v5203_v1  ;;  %v6838_v28 = vmul.f32 -1.442695, %v2877_v20  ;;  %v6720_v13 = vmul.f32 -1.442695, %v3134_v25 }
 0x44f   : > { %v7499_v23 = vpop.eup %7498  ;;  %v10136_v35 = vadd.f32 1.0, %v7497_v58 }
 0x450   : > { %v5208_v11 = vsel %vm5207_vm3, %v7495_v62, %v5204_v42  ;;  %v5321_v61 = vmul.f32 %v7499_v23, %v10127_v12  ;;  %7500 = vpow2.f32 %v6838_v28  ;;  %vm5326_vm5 = vweird.f32 %v7499_v23 }
 0x451   : > { %v5213_v50 = vsel %vm5210_vm4, %v5212_v32, %v5208_v11  ;;  %7502 = vrcp.f32 %v10136_v35  ;;  %v2986_v22 = vpop.f32.mrf.mxu0  ;;  %v3086_v0 = vpop.f32.mrf.mxu2  ;;  %vm5327_vm7 = vmor %vm5325_vm6, %vm5326_vm5  ;;  %v5449_v45 = vand.u32 2147483647, %v10136_v35  ;;  %v5451_v57 = vand.u32 2147483648, %v10136_v35 }
 0x452   : > { %5706 = vst [vmem:[%s8223_s14 + $0x328] sm:$0xff] %v5213_v50  ;;  %v5322_v18 = vsub.f32 1.0, %v5321_v61  ;;  %v2987_v29 = vadd.f32 %v2986_v22, %v9927_v43  ;;  %7504 = vpow2.f32 %v6720_v13  ;;  %v3135_v5 = vpop.f32.mrf.mxu3  ;;  %v3087_v51 = vadd.f32 %v3086_v0, %v3038_v34 }
 0x453   : > { %v5332_v43 = vor.u32 1.1754944e-38, %v5331_v21  ;;  %vm5445_vm10 = vweird.f32 %v10136_v35  ;;  %v5452_v13 = vor.u32 1.1754944e-38, %v5451_v57  ;;  %vm5450_vm12 = vcmp.eq.f32.partialorder %v5449_v45, 8.507059e+37 }
 0x454   : > { %v5323_v3 = vmul.f32 %v7499_v23, %v5322_v18  ;;  %v6719_v24 = vmul.f32 -1.442695, %v2987_v29  ;;  %v3040_v52 = vpop.f32.mrf.mxu1  ;;  %v3136_v31 = vadd.f32 %v3135_v5, %v3087_v51 }
 0x455   : > { %v3041_v33 = vadd.f32 %v3040_v52, %v10120_v37 }
 0x456   : > { %v7501_v4 = vpop.eup %7500  ;;  %v5324_v48 = vadd.f32 %v7499_v23, %v5323_v3  ;;  %7506 = vpow2.f32 %v6719_v24  ;;  %v6728_v62 = vmul.f32 -1.442695, %v3136_v31 }
 0x457   : > { %v7503_v26 = vpop.eup %7502  ;;  %v10146_v54 = vadd.f32 1.0, %v7501_v4 }
 0x458   : > { %v7505_v55 = vpop.eup %7504  ;;  %v5328_v47 = vsel %vm5327_vm7, %v7499_v23, %v5324_v48  ;;  %v5441_v36 = vmul.f32 %v7503_v26, %v10136_v35  ;;  %vm5446_vm9 = vweird.f32 %v7503_v26 }
 0x459   : > { %v5333_v7 = vsel %vm5330_vm8, %v5332_v43, %v5328_v47  ;;  %7508 = vrcp.f32 %v10146_v54  ;;  %v2988_v60 = vpop.f32.mrf.mxu0  ;;  %v3089_v10 = vpop.f32.mrf.mxu2  ;;  %v10152_v30 = vadd.f32 1.0, %v7505_v55  ;;  %v5569_v25 = vand.u32 2147483647, %v10146_v54  ;;  %vm5447_vm11 = vmor %vm5445_vm10, %vm5446_vm9 }
 0x45a   : > { %5714 = vst [vmem:[%s8223_s14 + $0x368] sm:$0xff] %v5333_v7  ;;  %v5442_v41 = vsub.f32 1.0, %v5441_v36  ;;  %v2989_v12 = vadd.f32 %v2988_v60, %v9936_v15  ;;  %v3138_v6 = vpop.f32.mrf.mxu3  ;;  %7510 = vpow2.f32 %v6728_v62  ;;  %v5571_v15 = vand.u32 2147483648, %v10146_v54 }
 0x45b   : > { %7512 = vrcp.f32 %v10152_v30  ;;  %v3090_v42 = vadd.f32 %v3089_v10, %v3041_v33  ;;  %vm5565_vm13 = vweird.f32 %v10146_v54  ;;  %vm10166_vm14 = vcmp.eq.f32.partialorder %v5569_v25, 8.507059e+37 }
 0x45c   : > { %v7507_v40 = vpop.eup %7506  ;;  %v5443_v2 = vmul.f32 %v7503_v26, %v5442_v41  ;;  %v6727_v1 = vmul.f32 -1.442695, %v2989_v12  ;;  %v3042_v20 = vpop.f32.mrf.mxu1  ;;  %v5572_v35 = vor.u32 1.1754944e-38, %v5571_v15  ;;  %vm3795_vm15 = vweird.f32 %v10152_v30 }
 0x45d   : > { %v10160_v27 = vadd.f32 1.0, %v7507_v40  ;;  %v3139_v21 = vadd.f32 %v3138_v6, %v3090_v42  ;;  %v3799_v49 = vand.u32 2147483647, %v10152_v30  ;;  %v3801_v24 = vand.u32 2147483648, %v10152_v30 }
 0x45e   : > { %v5444_v58 = vadd.f32 %v7503_v26, %v5443_v2  ;;  %7514 = vpow2.f32 %v6727_v1  ;;  %v3043_v55 = vadd.f32 %v3042_v20, %v10120_v37 }
 0x45f   : > { %v7509_v28 = vpop.eup %7508  ;;  %7516 = vrcp.f32 %v10160_v27  ;;  %v6736_v7 = vmul.f32 -1.442695, %v3139_v21  ;;  %vm3780_vm2 = vweird.f32 %v10160_v27  ;;  %v3786_v60 = vand.u32 2147483648, %v10160_v27 }
 0x460   : > { %v5448_v23 = vsel %vm5447_vm11, %v7503_v26, %v5444_v58  ;;  %v5561_v32 = vmul.f32 %v7509_v28, %v10146_v54  ;;  %v7511_v11 = vpop.eup %7510  ;;  %vm5566_vm0 = vweird.f32 %v7509_v28  ;;  %v3784_v26 = vand.u32 2147483647, %v10160_v27 }
 0x461   : > { %v5453_v61 = vsel %vm5450_vm12, %v5452_v13, %v5448_v23  ;;  %v2991_v22 = vpop.f32.mrf.mxu0  ;;  %v3091_v34 = vpop.f32.mrf.mxu2  ;;  %v10174_v5 = vadd.f32 1.0, %v7511_v11  ;;  %vm5567_vm1 = vmor %vm5565_vm13, %vm5566_vm0  ;;  %vm10200_vm6 = vcmp.eq.f32.partialorder %v3799_v49, 8.507059e+37  ;;  %v3787_v15 = vor.u32 1.1754944e-38, %v3786_v60 }
 0x462   : > { %v10170_v0 = vpop.eup %7512  ;;  %5722 = vst [vmem:[%s8223_s14 + $0x3a8] sm:$0xff] %v5453_v61  ;;  %v5562_v18 = vsub.f32 1.0, %v5561_v32  ;;  %v2992_v29 = vadd.f32 %v2991_v22, %v9946_v38  ;;  %v3140_v51 = vpop.f32.mrf.mxu3  ;;  %v3092_v10 = vadd.f32 %v3091_v34, %v3043_v55  ;;  %vm10196_vm5 = vcmp.eq.f32.partialorder %v3784_v26, 8.507059e+37 }
 0x463   : > { %v3791_v3 = vmul.f32 %v10170_v0, %v10152_v30  ;;  %7518 = vrcp.f32 %v10174_v5  ;;  %vm3796_vm3 = vweird.f32 %v10170_v0  ;;  %v3802_v58 = vor.u32 1.1754944e-38, %v3801_v24 }
 0x464   : > { %v7515_v52 = vpop.eup %7514  ;;  %v5563_v31 = vmul.f32 %v7509_v28, %v5562_v18  ;;  %v6735_v4 = vmul.f32 -1.442695, %v2992_v29  ;;  %v3045_v38 = vpop.f32.mrf.mxu1  ;;  %vm3797_vm7 = vmor %vm3795_vm15, %vm3796_vm3  ;;  %vm3915_vm8 = vweird.f32 %v10174_v5  ;;  %v3919_v29 = vand.u32 2147483647, %v10174_v5 }
 0x465   : > { %v7517_v48 = vpop.eup %7516  ;;  %v10183_v43 = vadd.f32 1.0, %v7515_v52  ;;  %v3792_v62 = vsub.f32 1.0, %v3791_v3 }
 0x466   : > { %v5564_v47 = vadd.f32 %v7509_v28, %v5563_v31  ;;  %v3776_v36 = vmul.f32 %v7517_v48, %v10160_v27  ;;  %7520 = vpow2.f32 %v6735_v4  ;;  %vm3781_vm4 = vweird.f32 %v7517_v48 }
 0x467   : > { %7522 = vrcp.f32 %v10183_v43  ;;  %v3793_v6 = vmul.f32 %v10170_v0, %v3792_v62  ;;  %vm3782_vm9 = vmor %vm3780_vm2, %vm3781_vm4  ;;  %v3921_v27 = vand.u32 2147483648, %v10174_v5  ;;  %v3904_v52 = vand.u32 2147483647, %v10183_v43 }
 0x468   : > { %v5568_v41 = vsel %vm5567_vm1, %v7509_v28, %v5564_v47  ;;  %v3777_v12 = vsub.f32 1.0, %v3776_v36  ;;  %7524 = vpow2.f32 %v6736_v7  ;;  %v3141_v28 = vadd.f32 %v3140_v51, %v3092_v10 }
 0x469   : > { %v5573_v45 = vsel %vm10166_vm14, %v5572_v35, %v5568_v41  ;;  %v2993_v33 = vpop.f32.mrf.mxu0  ;;  %v3094_v40 = vpop.f32.mrf.mxu2  ;;  %v3794_v20 = vadd.f32 %v10170_v0, %v3793_v6  ;;  %v3046_v51 = vadd.f32 %v3045_v38, %v10120_v37  ;;  %v3906_v31 = vand.u32 2147483648, %v10183_v43 }
 0x46a   : > { %v10204_v2 = vpop.eup %7518  ;;  %5730 = vst [vmem:[%s8223_s14 + $0x3e8] sm:$0xff] %v5573_v45  ;;  %v3778_v1 = vmul.f32 %v7517_v48, %v3777_v12  ;;  %v2994_v25 = vadd.f32 %v2993_v33, %v9952_v39  ;;  %v3143_v61 = vpop.f32.mrf.mxu3  ;;  %v6744_v34 = vmul.f32 -1.442695, %v3141_v28  ;;  %vm3900_vm12 = vweird.f32 %v10183_v43 }
 0x46b   : > { %v3911_v42 = vmul.f32 %v10204_v2, %v10174_v5  ;;  %v3798_v32 = vsel %vm3797_vm7, %v10170_v0, %v3794_v20  ;;  %vm3916_vm10 = vweird.f32 %v10204_v2  ;;  %v3095_v26 = vadd.f32 %v3094_v40, %v3046_v51 }
 0x46c   : > { %v7521_v13 = vpop.eup %7520  ;;  %v3779_v23 = vadd.f32 %v7517_v48, %v3778_v1  ;;  %v6743_v11 = vmul.f32 -1.442695, %v2994_v25  ;;  %v3047_v39 = vpop.f32.mrf.mxu1  ;;  %v3803_v30 = vsel %vm10200_vm6, %v3802_v58, %v3798_v32  ;;  %vm3917_vm13 = vmor %vm3915_vm8, %vm3916_vm10  ;;  %vm3920_vm14 = vcmp.eq.f32.partialorder %v3919_v29, 8.507059e+37 }
 0x46d   : > { %v7523_v50 = vpop.eup %7522  ;;  %v10220_v35 = vadd.f32 1.0, %v7521_v13  ;;  %v3912_v22 = vsub.f32 1.0, %v3911_v42  ;;  %5612 = vst [vmem:[%s8223_s14 + $0x38] sm:$0xff] %v3803_v30  ;;  %v3922_v36 = vor.u32 1.1754944e-38, %v3921_v27  ;;  %v3144_v12 = vadd.f32 %v3143_v61, %v3095_v26 }
 0x46e   : > { %v3783_v18 = vsel %vm3782_vm9, %v7517_v48, %v3779_v23  ;;  %v3896_v0 = vmul.f32 %v7523_v50, %v10183_v43  ;;  %7526 = vpow2.f32 %v6743_v11  ;;  %v7525_v3 = vpop.eup %7524  ;;  %vm3901_vm11 = vweird.f32 %v7523_v50 }
 0x46f   : > { %v3788_v21 = vsel %vm10196_vm5, %v3787_v15, %v3783_v18  ;;  %7528 = vrcp.f32 %v10220_v35  ;;  %v3913_v24 = vmul.f32 %v10204_v2, %v3912_v22  ;;  %v10235_v4 = vadd.f32 1.0, %v7525_v3  ;;  %vm3902_vm15 = vmor %vm3900_vm12, %vm3901_vm11 }
 0x470   : > { %5611 = vst [vmem:[%s8223_s14 + $0x30] sm:$0xff] %v3788_v21  ;;  %v3897_v49 = vsub.f32 1.0, %v3896_v0  ;;  %7530 = vpow2.f32 %v6744_v34  ;;  %vm3905_vm0 = vcmp.eq.f32.partialorder %v3904_v52, 8.507059e+37  ;;  %v4024_v40 = vand.u32 2147483647, %v10220_v35 }
 0x471   : > { %v2996_v48 = vpop.f32.mrf.mxu0  ;;  %v3096_v62 = vpop.f32.mrf.mxu2  ;;  %v3914_v38 = vadd.f32 %v10204_v2, %v3913_v24  ;;  %7532 = vrcp.f32 %v10235_v4  ;;  %v4026_v20 = vand.u32 2147483648, %v10220_v35  ;;  %v3048_v25 = vadd.f32 %v3047_v39, %v10120_v37 }
 0x472   : > { %v3898_v55 = vmul.f32 %v7523_v50, %v3897_v49  ;;  %v2997_v47 = vadd.f32 %v2996_v48, %v9963_v56  ;;  %v3907_v56 = vor.u32 1.1754944e-38, %v3906_v31  ;;  %v6752_v42 = vmul.f32 -1.442695, %v3144_v12 }
 0x473   : > { %v3918_v10 = vsel %vm3917_vm13, %v10204_v2, %v3914_v38  ;;  %v3145_v2 = vpop.f32.mrf.mxu3  ;;  %v4039_v13 = vand.u32 2147483647, %v10235_v4  ;;  %v4041_v23 = vand.u32 2147483648, %v10235_v4  ;;  %v3097_v11 = vadd.f32 %v3096_v62, %v3048_v25 }
 0x474   : > { %v7527_v7 = vpop.eup %7526  ;;  %v3899_v60 = vadd.f32 %v7523_v50, %v3898_v55  ;;  %v6751_v41 = vmul.f32 -1.442695, %v2997_v47  ;;  %v10244_v6 = vpop.f32.mrf.mxu1  ;;  %v3923_v5 = vsel %vm3920_vm14, %v3922_v36, %v3918_v10  ;;  %vm4020_vm1 = vweird.f32 %v10220_v35 }
 0x475   : > { %v7529_v45 = vpop.eup %7528  ;;  %v10247_v43 = vadd.f32 1.0, %v7527_v7  ;;  %5620 = vst [vmem:[%s8223_s14 + $0x78] sm:$0xff] %v3923_v5  ;;  %vm10262_vm3 = vcmp.eq.f32.partialorder %v4024_v40, 8.507059e+37  ;;  %v4027_v22 = vor.u32 1.1754944e-38, %v4026_v20  ;;  %vm4035_vm4 = vweird.f32 %v10235_v4 }
 0x476   : > { %v7531_v54 = vpop.eup %7530  ;;  %v3903_v57 = vsel %vm3902_vm15, %v7523_v50, %v3899_v60  ;;  %v4016_v33 = vmul.f32 %v7529_v45, %v10220_v35  ;;  %7534 = vpow2.f32 %v6751_v41  ;;  %vm4021_vm2 = vweird.f32 %v7529_v45 }
 0x477   : > { %v3908_v1 = vsel %vm3905_vm0, %v3907_v56, %v3903_v57  ;;  %7536 = vrcp.f32 %v10247_v43  ;;  %v10256_v58 = vadd.f32 1.0, %v7531_v54  ;;  %v7533_v28 = vpop.eup %7532  ;;  %vm4022_vm5 = vmor %vm4020_vm1, %vm4021_vm2  ;;  %vm10269_vm6 = vcmp.eq.f32.partialorder %v4039_v13, 8.507059e+37 }
 0x478   : > { %5619 = vst [vmem:[%s8223_s14 + $0x70] sm:$0xff] %v3908_v1  ;;  %v4017_v15 = vsub.f32 1.0, %v4016_v33  ;;  %v4031_v30 = vmul.f32 %v7533_v28, %v10235_v4  ;;  %v4042_v51 = vor.u32 1.1754944e-38, %v4041_v23  ;;  %v3146_v49 = vadd.f32 %v3145_v2, %v3097_v11 }
 0x479   : > { %v2998_v32 = vpop.f32.mrf.mxu0  ;;  %v3099_v61 = vpop.f32.mrf.mxu2  ;;  %7538 = vrcp.f32 %v10256_v58  ;;  %vm4036_vm7 = vweird.f32 %v7533_v28  ;;  %vm4140_vm8 = vweird.f32 %v10247_v43  ;;  %v4144_v48 = vand.u32 2147483647, %v10247_v43 }
 0x47a   : > { %v4018_v50 = vmul.f32 %v7529_v45, %v4017_v15  ;;  %v4032_v0 = vsub.f32 1.0, %v4031_v30  ;;  %v2999_v29 = vadd.f32 %v2998_v32, %v9976_v63  ;;  %7540 = vpow2.f32 %v6752_v42  ;;  %vm4037_vm9 = vmor %vm4035_vm4, %vm4036_vm7 }
 0x47b   : > { %v4146_v62 = vand.u32 2147483648, %v10247_v43  ;;  %v3148_v47 = vpop.f32.mrf.mxu3  ;;  %v4159_v7 = vand.u32 2147483647, %v10256_v58  ;;  %v4161_v60 = vand.u32 2147483648, %v10256_v58  ;;  %v6760_v41 = vmul.f32 -1.442695, %v3146_v49 }
 0x47c   : > { %v7535_v34 = vpop.eup %7534  ;;  %v4019_v18 = vadd.f32 %v7529_v45, %v4018_v50  ;;  %v3052_v35 = vpop.f32.mrf.mxu1  ;;  %v4033_v31 = vmul.f32 %v7533_v28, %v4032_v0  ;;  %v6759_v38 = vmul.f32 -1.442695, %v2999_v29  ;;  %v3051_v12 = vadd.f32 %v10244_v6, %v10120_v37 }
 0x47d   : > { %v7537_v21 = vpop.eup %7536  ;;  %v10273_v3 = vadd.f32 1.0, %v7535_v34  ;;  %vm4145_vm12 = vcmp.eq.f32.partialorder %v4144_v48, 8.507059e+37  ;;  %v4147_v25 = vor.u32 1.1754944e-38, %v4146_v62  ;;  %vm4155_vm13 = vweird.f32 %v10256_v58 }
 0x47e   : > { %v4023_v24 = vsel %vm4022_vm5, %v7529_v45, %v4019_v18  ;;  %v4136_v52 = vmul.f32 %v7537_v21, %v10247_v43  ;;  %v4034_v55 = vadd.f32 %v7533_v28, %v4033_v31  ;;  %vm4141_vm10 = vweird.f32 %v7537_v21 }
 0x47f   : > { %v4028_v63 = vsel %vm10262_vm3, %v4027_v22, %v4023_v24  ;;  %7542 = vrcp.f32 %v10273_v3  ;;  %v7539_v36 = vpop.eup %7538  ;;  %v3100_v33 = vadd.f32 %v3099_v61, %v3051_v12  ;;  %vm4142_vm11 = vmor %vm4140_vm8, %vm4141_vm10  ;;  %vm10301_vm15 = vcmp.eq.f32.partialorder %v4159_v7, 8.507059e+37 }
 0x480   : > { %5627 = vst [vmem:[%s8223_s14 + $0xb0] sm:$0xff] %v4028_v63  ;;  %v4137_v26 = vsub.f32 1.0, %v4136_v52  ;;  %v7541_v45 = vpop.eup %7540  ;;  %v4038_v5 = vsel %vm4037_vm9, %v7533_v28, %v4034_v55  ;;  %v4151_v54 = vmul.f32 %v7539_v36, %v10256_v58  ;;  %7544 = vpow2.f32 %v6759_v38 }
 0x481   : > { %v3001_v10 = vpop.f32.mrf.mxu0  ;;  %v4043_v4 = vsel %vm10269_vm6, %v4042_v51, %v4038_v5  ;;  %v10292_v57 = vadd.f32 1.0, %v7541_v45  ;;  %v3101_v40 = vpop.f32.mrf.mxu2  ;;  %7546 = vpow2.f32 %v6760_v41  ;;  %vm4156_vm14 = vweird.f32 %v7539_v36 }
 0x482   : > { %v4138_v56 = vmul.f32 %v7537_v21, %v4137_v26  ;;  %5628 = vst [vmem:[%s8223_s14 + $0xb8] sm:$0xff] %v4043_v4  ;;  %v4152_v1 = vsub.f32 1.0, %v4151_v54  ;;  %v3002_v20 = vadd.f32 %v3001_v10, %v9992_v19  ;;  %v3053_v43 = vadd.f32 %v3052_v35, %v10120_v37  ;;  %vm4157_vm0 = vmor %vm4155_vm13, %vm4156_vm14 }
 0x483   : > { %7548 = vrcp.f32 %v10292_v57  ;;  %v4162_v50 = vor.u32 1.1754944e-38, %v4161_v60  ;;  %v3149_v30 = vadd.f32 %v3148_v47, %v3100_v33  ;;  %v4264_v22 = vand.u32 2147483647, %v10273_v3  ;;  %v3150_v51 = vpop.f32.mrf.mxu3 }
 0x484   : > { %v4139_v2 = vadd.f32 %v7537_v21, %v4138_v56  ;;  %v3055_v15 = vpop.f32.mrf.mxu1  ;;  %v4153_v13 = vmul.f32 %v7539_v36, %v4152_v1  ;;  %v6767_v32 = vmul.f32 -1.442695, %v3002_v20  ;;  %v4266_v34 = vand.u32 2147483648, %v10273_v3 }
 0x485   : > { %v7543_v6 = vpop.eup %7542  ;;  %v3102_v0 = vadd.f32 %v3101_v40, %v3053_v43  ;;  %vm4260_vm2 = vweird.f32 %v10273_v3  ;;  %v4279_v58 = vand.u32 2147483647, %v10292_v57  ;;  %v6768_v48 = vmul.f32 -1.442695, %v3149_v30 }
 0x486   : > { %v4143_v42 = vsel %vm4142_vm11, %v7537_v21, %v4139_v2  ;;  %v4256_v28 = vmul.f32 %v7543_v6, %v10273_v3  ;;  %v4154_v61 = vadd.f32 %v7539_v36, %v4153_v13  ;;  %v7545_v39 = vpop.eup %7544  ;;  %7550 = vpow2.f32 %v6767_v32 }
 0x487   : > { %v4148_v23 = vsel %vm4145_vm12, %v4147_v25, %v4143_v42  ;;  %v7547_v29 = vpop.eup %7546  ;;  %vm4261_vm1 = vweird.f32 %v7543_v6  ;;  %v10311_v27 = vadd.f32 1.0, %v7545_v39  ;;  %v4267_v26 = vor.u32 1.1754944e-38, %v4266_v34 }
 0x488   : > { %5635 = vst [vmem:[%s8223_s14 + $0xf0] sm:$0xff] %v4148_v23  ;;  %v4257_v11 = vsub.f32 1.0, %v4256_v28  ;;  %v4158_v35 = vsel %vm4157_vm0, %v7539_v36, %v4154_v61  ;;  %v10317_v52 = vadd.f32 1.0, %v7547_v29  ;;  %vm4262_vm3 = vmor %vm4260_vm2, %vm4261_vm1  ;;  %v3151_v3 = vadd.f32 %v3150_v51, %v3102_v0 }
 0x489   : > { %v3003_v18 = vpop.f32.mrf.mxu0  ;;  %v7549_v49 = vpop.eup %7548  ;;  %v4163_v24 = vsel %vm10301_vm15, %v4162_v50, %v4158_v35  ;;  %7552 = vrcp.f32 %v10311_v27  ;;  %vm4265_vm4 = vcmp.eq.f32.partialorder %v4264_v22, 8.507059e+37  ;;  %v4281_v47 = vand.u32 2147483648, %v10292_v57 }
 0x48a   : > { %v4258_v21 = vmul.f32 %v7543_v6, %v4257_v11  ;;  %5636 = vst [vmem:[%s8223_s14 + $0xf8] sm:$0xff] %v4163_v24  ;;  %v3004_v63 = vadd.f32 %v3003_v18, %v10006_v16  ;;  %v4271_v62 = vmul.f32 %v7549_v49, %v10292_v57  ;;  %7554 = vrcp.f32 %v10317_v52  ;;  %v3104_v55 = vpop.f32.mrf.mxu2 }
 0x48b   : > { %vm4275_vm5 = vweird.f32 %v10292_v57  ;;  %vm10326_vm6 = vcmp.eq.f32.partialorder %v4279_v58, 8.507059e+37  ;;  %v4384_v41 = vand.u32 2147483647, %v10311_v27  ;;  %7556 = vpow2.f32 %v6768_v48  ;;  %v3153_v13 = vpop.f32.mrf.mxu3 }
 0x48c   : > { %v4259_v31 = vadd.f32 %v7543_v6, %v4258_v21  ;;  %v7551_v36 = vpop.eup %7550  ;;  %v4272_v60 = vsub.f32 1.0, %v4271_v62  ;;  %v10330_v10 = vpop.f32.mrf.mxu1  ;;  %v6775_v45 = vmul.f32 -1.442695, %v3004_v63  ;;  %vm4276_vm7 = vweird.f32 %v7549_v49 }
 0x48d   : > { %v10334_v12 = vadd.f32 1.0, %v7551_v36  ;;  %v6776_v54 = vmul.f32 -1.442695, %v3151_v3  ;;  %v3056_v4 = vadd.f32 %v3055_v15, %v10120_v37  ;;  %vm4380_vm8 = vweird.f32 %v10311_v27  ;;  %vm4277_vm10 = vmor %vm4275_vm5, %vm4276_vm7 }
 0x48e   : > { %v4263_v38 = vsel %vm4262_vm3, %v7543_v6, %v4259_v31  ;;  %v4273_v56 = vmul.f32 %v7549_v49, %v4272_v60  ;;  %v4386_v40 = vand.u32 2147483648, %v10311_v27  ;;  %v4282_v2 = vor.u32 1.1754944e-38, %v4281_v47 }
 0x48f   : > { %v4268_v7 = vsel %vm4265_vm4, %v4267_v26, %v4263_v38  ;;  %v7553_v33 = vpop.eup %7552  ;;  %7558 = vrcp.f32 %v10334_v12  ;;  %v3105_v25 = vadd.f32 %v3104_v55, %v3056_v4  ;;  %vm10341_vm9 = vcmp.eq.f32.partialorder %v4384_v41, 8.507059e+37 }
 0x490   : > { %5643 = vst [vmem:[%s8223_s14 + $0x130] sm:$0xff] %v4268_v7  ;;  %v7555_v1 = vpop.eup %7554  ;;  %v4376_v20 = vmul.f32 %v7553_v33, %v10311_v27  ;;  %v4274_v6 = vadd.f32 %v7549_v49, %v4273_v56  ;;  %7560 = vpow2.f32 %v6775_v45  ;;  %vm4395_vm11 = vweird.f32 %v10317_v52 }
 0x491   : > { %v3006_v5 = vpop.f32.mrf.mxu0  ;;  %v4391_v15 = vmul.f32 %v7555_v1, %v10317_v52  ;;  %v4399_v28 = vand.u32 2147483647, %v10317_v52  ;;  %7562 = vpow2.f32 %v6776_v54  ;;  %v7557_v43 = vpop.eup %7556  ;;  %vm4381_vm12 = vweird.f32 %v7553_v33 }
 0x492   : > { %v4377_v23 = vsub.f32 1.0, %v4376_v20  ;;  %v4278_v19 = vsel %vm4277_vm10, %v7549_v49, %v4274_v6  ;;  %v3007_v32 = vadd.f32 %v3006_v5, %v10022_v44  ;;  %v4401_v61 = vand.u32 2147483648, %v10317_v52  ;;  %v3106_v34 = vpop.f32.mrf.mxu2  ;;  %vm4382_vm15 = vmor %vm4380_vm8, %vm4381_vm12 }
 0x493   : > { %v4283_v11 = vsel %vm10326_vm6, %v4282_v2, %v4278_v19  ;;  %v4392_v57 = vsub.f32 1.0, %v4391_v15  ;;  %v10356_v30 = vadd.f32 1.0, %v7557_v43  ;;  %v3154_v22 = vadd.f32 %v3153_v13, %v3105_v25  ;;  %v3155_v56 = vpop.f32.mrf.mxu3 }
 0x494   : > { %v4378_v50 = vmul.f32 %v7553_v33, %v4377_v23  ;;  %5644 = vst [vmem:[%s8223_s14 + $0x138] sm:$0xff] %v4283_v11  ;;  %v6783_v39 = vmul.f32 -1.442695, %v3007_v32  ;;  %v4387_v0 = vor.u32 1.1754944e-38, %v4386_v40  ;;  %vm4396_vm13 = vweird.f32 %v7555_v1  ;;  %v3060_v58 = vpop.f32.mrf.mxu1 }
 0x495   : > { %v7559_v18 = vpop.eup %7558  ;;  %v4393_v29 = vmul.f32 %v7555_v1, %v4392_v57  ;;  %vm10358_vm14 = vcmp.eq.f32.partialorder %v4399_v28, 8.507059e+37  ;;  %v4504_v49 = vand.u32 2147483647, %v10334_v12  ;;  %7564 = vrcp.f32 %v10356_v30  ;;  %vm4397_vm0 = vmor %vm4395_vm11, %vm4396_vm13 }
 0x496   : > { %v7561_v21 = vpop.eup %7560  ;;  %v4379_v35 = vadd.f32 %v7553_v33, %v4378_v50  ;;  %v4496_v51 = vmul.f32 %v7559_v18, %v10334_v12  ;;  %v4506_v31 = vand.u32 2147483648, %v10334_v12  ;;  %v4402_v48 = vor.u32 1.1754944e-38, %v4401_v61 }
 0x497   : > { %v4394_v63 = vadd.f32 %v7555_v1, %v4393_v29  ;;  %v10369_v26 = vadd.f32 1.0, %v7561_v21  ;;  %v7563_v62 = vpop.eup %7562  ;;  %7566 = vpow2.f32 %v6783_v39  ;;  %v6784_v38 = vmul.f32 -1.442695, %v3154_v22 }
 0x498   : > { %v4383_v3 = vsel %vm4382_vm15, %v7553_v33, %v4379_v35  ;;  %v4497_v55 = vsub.f32 1.0, %v4496_v51  ;;  %vm4500_vm1 = vweird.f32 %v10334_v12  ;;  %vm4501_vm2 = vweird.f32 %v7559_v18 }
 0x499   : > { %v3008_v24 = vpop.f32.mrf.mxu0  ;;  %v4388_v27 = vsel %vm10341_vm9, %v4387_v0, %v4383_v3  ;;  %v4398_v47 = vsel %vm4397_vm0, %v7555_v1, %v4394_v63  ;;  %7568 = vrcp.f32 %v10369_v26  ;;  %vm10379_vm3 = vcmp.eq.f32.partialorder %v4504_v49, 8.507059e+37  ;;  %vm4502_vm4 = vmor %vm4500_vm1, %vm4501_vm2 }
 0x49a   : > { %5651 = vst [vmem:[%s8223_s14 + $0x170] sm:$0xff] %v4388_v27  ;;  %v4498_v36 = vmul.f32 %v7559_v18, %v4497_v55  ;;  %v4403_v52 = vsel %vm10358_vm14, %v4402_v48, %v4398_v47  ;;  %v4507_v60 = vor.u32 1.1754944e-38, %v4506_v31  ;;  %v10386_v16 = vadd.f32 1.0, %v7563_v62  ;;  %v3109_v42 = vpop.f32.mrf.mxu2 }
 0x49b   : > { %5652 = vst [vmem:[%s8223_s14 + $0x178] sm:$0xff] %v4403_v52  ;;  %v3009_v41 = vadd.f32 %v3008_v24, %v10036_v59  ;;  %v3058_v45 = vadd.f32 %v10330_v10, %v10120_v37  ;;  %v7565_v5 = vpop.eup %7564  ;;  %v4519_v4 = vand.u32 2147483647, %v10356_v30  ;;  %7570 = vpow2.f32 %v6784_v38 }
 0x49c   : > { %v4499_v54 = vadd.f32 %v7559_v18, %v4498_v36  ;;  %v10393_v33 = vadd.f32 %v3060_v58, %v10120_v37  ;;  %v4511_v40 = vmul.f32 %v7565_v5, %v10356_v30  ;;  %v4521_v59 = vand.u32 2147483648, %v10356_v30  ;;  %v10415_v11 = vpop.f32.mrf.mxu1  ;;  %v3158_v58 = vpop.f32.mrf.mxu3 }
 0x49d   : > { %7572 = vrcp.f32 %v10386_v16  ;;  %v3107_v10 = vadd.f32 %v3106_v34, %v3058_v45  ;;  %v7567_v2 = vpop.eup %7566  ;;  %v4624_v20 = vand.u32 2147483647, %v10369_v26  ;;  %vm4515_vm5 = vweird.f32 %v10356_v30 }
 0x49e   : > { %v4503_v1 = vsel %vm4502_vm4, %v7559_v18, %v4499_v54  ;;  %v6791_v6 = vmul.f32 -1.442695, %v3009_v41  ;;  %v4512_v28 = vsub.f32 1.0, %v4511_v40  ;;  %v10404_v13 = vadd.f32 1.0, %v7567_v2 }
 0x49f   : > { %v7569_v15 = vpop.eup %7568  ;;  %v4508_v12 = vsel %vm10379_vm3, %v4507_v60, %v4503_v1  ;;  %vm4620_vm6 = vweird.f32 %v10369_v26  ;;  %v4626_v32 = vand.u32 2147483648, %v10369_v26  ;;  %vm10411_vm7 = vcmp.eq.f32.partialorder %v4519_v4, 8.507059e+37 }
 0x4a0   : > { %5659 = vst [vmem:[%s8223_s14 + $0x1b0] sm:$0xff] %v4508_v12  ;;  %v4616_v19 = vmul.f32 %v7569_v15, %v10369_v26  ;;  %v4513_v57 = vmul.f32 %v7565_v5, %v4512_v28  ;;  %vm4516_vm8 = vweird.f32 %v7565_v5  ;;  %v4522_v61 = vor.u32 1.1754944e-38, %v4521_v59 }
 0x4a1   : > { %v3011_v25 = vpop.f32.mrf.mxu0  ;;  %7574 = vrcp.f32 %v10404_v13  ;;  %v7571_v50 = vpop.eup %7570  ;;  %vm10418_vm9 = vcmp.eq.f32.partialorder %v4624_v20, 8.507059e+37  ;;  %v4639_v22 = vand.u32 2147483647, %v10386_v16  ;;  %v3156_v44 = vadd.f32 %v3155_v56, %v3107_v10  ;;  %vm4517_vm11 = vmor %vm4515_vm5, %vm4516_vm8 }
 0x4a2   : > { %v3012_v23 = vadd.f32 %v3011_v25, %v10052_v17  ;;  %v4617_v17 = vsub.f32 1.0, %v4616_v19  ;;  %7576 = vpow2.f32 %v6791_v6  ;;  %v4514_v18 = vadd.f32 %v7565_v5, %v4513_v57  ;;  %v10445_v60 = vpop.f32.mrf.mxu2 }
 0x4a3   : > { %v7573_v34 = vpop.eup %7572  ;;  %v10423_v0 = vadd.f32 1.0, %v7571_v50  ;;  %vm4621_vm10 = vweird.f32 %v7569_v15  ;;  %v4627_v35 = vor.u32 1.1754944e-38, %v4626_v32  ;;  %vm4635_vm12 = vweird.f32 %v10386_v16 }
 0x4a4   : > { %v6799_v29 = vmul.f32 -1.442695, %v3012_v23  ;;  %v4618_v21 = vmul.f32 %v7569_v15, %v4617_v17  ;;  %v4631_v51 = vmul.f32 %v7573_v34, %v10386_v16  ;;  %v4518_v49 = vsel %vm4517_vm11, %v7565_v5, %v4514_v18  ;;  %vm4622_vm14 = vmor %vm4620_vm6, %vm4621_vm10  ;;  %v10453_v4 = vpop.f32.mrf.mxu1 }
 0x4a5   : > { %v4641_v24 = vand.u32 2147483648, %v10386_v16  ;;  %7578 = vrcp.f32 %v10423_v0  ;;  %v4523_v63 = vsel %vm10411_vm7, %v4522_v61, %v4518_v49  ;;  %vm10434_vm13 = vcmp.eq.f32.partialorder %v4639_v22, 8.507059e+37  ;;  %v3160_v61 = vpop.f32.mrf.mxu3 }
 0x4a6   : > { %v4619_v31 = vadd.f32 %v7569_v15, %v4618_v21  ;;  %v4632_v48 = vsub.f32 1.0, %v4631_v51  ;;  %5660 = vst [vmem:[%s8223_s14 + $0x1b8] sm:$0xff] %v4523_v63  ;;  %v4744_v55 = vand.u32 2147483647, %v10404_v13  ;;  %7580 = vpow2.f32 %v6799_v29 }
 0x4a7   : > { %v7575_v3 = vpop.eup %7574  ;;  %v6792_v38 = vmul.f32 -1.442695, %v3156_v44  ;;  %vm4636_vm15 = vweird.f32 %v7573_v34  ;;  %v4642_v41 = vor.u32 1.1754944e-38, %v4641_v24  ;;  %vm4740_vm0 = vweird.f32 %v10404_v13 }
 0x4a8   : > { %v7577_v47 = vpop.eup %7576  ;;  %v4623_v36 = vsel %vm4622_vm14, %v7569_v15, %v4619_v31  ;;  %v4736_v7 = vmul.f32 %v7575_v3, %v10404_v13  ;;  %v4633_v52 = vmul.f32 %v7573_v34, %v4632_v48  ;;  %vm10456_vm1 = vcmp.eq.f32.partialorder %v4744_v55, 8.507059e+37  ;;  %vm4637_vm2 = vmor %vm4635_vm12, %vm4636_vm15 }
 0x4a9   : > { %v3013_v30 = vpop.f32.mrf.mxu0  ;;  %v4628_v26 = vsel %vm10418_vm9, %v4627_v35, %v4623_v36  ;;  %v10449_v45 = vadd.f32 1.0, %v7577_v47  ;;  %7582 = vpow2.f32 %v6792_v38  ;;  %v4746_v10 = vand.u32 2147483648, %v10404_v13 }
 0x4aa   : > { %v3014_v27 = vadd.f32 %v3013_v30, %v10066_v9  ;;  %5667 = vst [vmem:[%s8223_s14 + $0x1f0] sm:$0xff] %v4628_v26  ;;  %v4737_v56 = vsub.f32 1.0, %v4736_v7  ;;  %v4634_v5 = vadd.f32 %v7573_v34, %v4633_v52  ;;  %v3110_v9 = vadd.f32 %v3109_v42, %v10393_v33  ;;  %v3114_v51 = vpop.f32.mrf.mxu2 }
 0x4ab   : > { %v7579_v40 = vpop.eup %7578  ;;  %7584 = vrcp.f32 %v10449_v45  ;;  %vm4741_vm3 = vweird.f32 %v7575_v3  ;;  %v4759_v25 = vand.u32 2147483647, %v10423_v0  ;;  %v4761_v42 = vand.u32 2147483648, %v10423_v0 }
 0x4ac   : > { %v6807_v54 = vmul.f32 -1.442695, %v3014_v27  ;;  %v4738_v2 = vmul.f32 %v7575_v3, %v4737_v56  ;;  %v4638_v33 = vsel %vm4637_vm2, %v7573_v34, %v4634_v5  ;;  %v4751_v1 = vmul.f32 %v7579_v40, %v10423_v0  ;;  %v7581_v20 = vpop.eup %7580  ;;  %vm4742_vm4 = vmor %vm4740_vm0, %vm4741_vm3  ;;  %v3067_v62 = vpop.f32.mrf.mxu1 }
 0x4ad   : > { %v4643_v6 = vsel %vm10434_vm13, %v4642_v41, %v4638_v33  ;;  %v10471_v12 = vadd.f32 1.0, %v7581_v20  ;;  %v3159_v28 = vadd.f32 %v3158_v58, %v3110_v9  ;;  %v4747_v32 = vor.u32 1.1754944e-38, %v4746_v10 }
 0x4ae   : > { %7586 = vpow2.f32 %v6807_v54  ;;  %v4739_v15 = vadd.f32 %v7575_v3, %v4738_v2  ;;  %5668 = vst [vmem:[%s8223_s14 + $0x1f8] sm:$0xff] %v4643_v6  ;;  %v4752_v16 = vsub.f32 1.0, %v4751_v1  ;;  %v4864_v43 = vand.u32 2147483647, %v10449_v45  ;;  %v3163_v54 = vpop.f32.mrf.mxu3 }
 0x4af   : > { %v7583_v19 = vpop.eup %7582  ;;  %v4866_v57 = vand.u32 2147483648, %v10449_v45  ;;  %vm4755_vm5 = vweird.f32 %v10423_v0  ;;  %vm4756_vm6 = vweird.f32 %v7579_v40  ;;  %7588 = vrcp.f32 %v10471_v12 }
 0x4b0   : > { %v4743_v50 = vsel %vm4742_vm4, %v7575_v3, %v4739_v15  ;;  %v4753_v17 = vmul.f32 %v7579_v40, %v4752_v16  ;;  %vm10482_vm7 = vcmp.eq.f32.partialorder %v4759_v25, 8.507059e+37  ;;  %v10486_v34 = vadd.f32 1.0, %v7583_v19  ;;  %vm4757_vm10 = vmor %vm4755_vm5, %vm4756_vm6 }
 0x4b1   : > { %v3016_v23 = vpop.f32.mrf.mxu0  ;;  %v7585_v39 = vpop.eup %7584  ;;  %v4748_v22 = vsel %vm10456_vm1, %v4747_v32, %v4743_v50  ;;  %v4762_v21 = vor.u32 1.1754944e-38, %v4761_v42  ;;  %v6800_v35 = vmul.f32 -1.442695, %v3159_v28  ;;  %vm4860_vm8 = vweird.f32 %v10449_v45 }
 0x4b2   : > { %v3017_v18 = vadd.f32 %v3016_v23, %v10082_v46  ;;  %5675 = vst [vmem:[%s8223_s14 + $0x230] sm:$0xff] %v4748_v22  ;;  %v4856_v29 = vmul.f32 %v7585_v39, %v10449_v45  ;;  %v4754_v44 = vadd.f32 %v7579_v40, %v4753_v17  ;;  %vm10492_vm9 = vcmp.eq.f32.partialorder %v4864_v43, 8.507059e+37  ;;  %v3116_v42 = vpop.f32.mrf.mxu2 }
 0x4b3   : > { %v4867_v58 = vor.u32 1.1754944e-38, %v4866_v57  ;;  %7590 = vrcp.f32 %v10486_v34  ;;  %v4984_v63 = vand.u32 2147483647, %v10471_v12  ;;  %v3063_v48 = vadd.f32 %v10415_v11, %v10120_v37 }
 0x4b4   : > { %v7587_v49 = vpop.eup %7586  ;;  %v4857_v46 = vsub.f32 1.0, %v4856_v29  ;;  %v4758_v31 = vsel %vm4757_vm10, %v7579_v40, %v4754_v44  ;;  %7592 = vpow2.f32 %v6800_v35  ;;  %v6815_v55 = vmul.f32 -1.442695, %v3017_v18 }
 0x4b5   : > { %v4763_v30 = vsel %vm10482_vm7, %v4762_v21, %v4758_v31  ;;  %v10505_v3 = vadd.f32 1.0, %v7587_v49  ;;  %v7589_v38 = vpop.eup %7588  ;;  %vm4861_vm11 = vweird.f32 %v7585_v39  ;;  %v3112_v27 = vadd.f32 %v10445_v60, %v3063_v48 }
 0x4b6   : > { %v4858_v0 = vmul.f32 %v7585_v39, %v4857_v46  ;;  %5676 = vst [vmem:[%s8223_s14 + $0x238] sm:$0xff] %v4763_v30  ;;  %v3066_v47 = vadd.f32 %v10453_v4, %v10120_v37  ;;  %v4976_v11 = vmul.f32 %v7589_v38, %v10471_v12  ;;  %vm4980_vm12 = vweird.f32 %v10471_v12  ;;  %vm4862_vm14 = vmor %vm4860_vm8, %vm4861_vm11 }
 0x4b7   : > { %7594 = vrcp.f32 %v10505_v3  ;;  %v3068_v7 = vadd.f32 %v3067_v62, %v10120_v37  ;;  %vm10515_vm13 = vcmp.eq.f32.partialorder %v4984_v63, 8.507059e+37  ;;  %v4986_v41 = vand.u32 2147483648, %v10471_v12 }
 0x4b8   : > { %v4859_v52 = vadd.f32 %v7585_v39, %v4858_v0  ;;  %7596 = vpow2.f32 %v6815_v55  ;;  %v4977_v56 = vsub.f32 1.0, %v4976_v11  ;;  %v3161_v5 = vadd.f32 %v3160_v61, %v3112_v27  ;;  %v3070_v55 = vpop.f32.mrf.mxu1 }
 0x4b9   : > { %v3018_v36 = vpop.f32.mrf.mxu0  ;;  %v7591_v60 = vpop.eup %7590  ;;  %v3115_v4 = vadd.f32 %v3114_v51, %v3066_v47  ;;  %v4879_v10 = vand.u32 2147483647, %v10486_v34  ;;  %v4881_v2 = vand.u32 2147483648, %v10486_v34  ;;  %vm4981_vm15 = vweird.f32 %v7589_v38 }
 0x4ba   : > { %v3019_v9 = vadd.f32 %v3018_v36, %v10096_v14  ;;  %v4863_v40 = vsel %vm4862_vm14, %v7585_v39, %v4859_v52  ;;  %v4871_v59 = vmul.f32 %v7591_v60, %v10486_v34  ;;  %v7593_v33 = vpop.eup %7592  ;;  %v4978_v45 = vmul.f32 %v7589_v38, %v4977_v56  ;;  %vm4982_vm1 = vmor %vm4980_vm12, %vm4981_vm15 }
 0x4bb   : > { %v4868_v1 = vsel %vm10492_vm9, %v4867_v58, %v4863_v40  ;;  %v6808_v20 = vmul.f32 -1.442695, %v3161_v5  ;;  %v4987_v6 = vor.u32 1.1754944e-38, %v4986_v41  ;;  %vm4875_vm0 = vweird.f32 %v10486_v34  ;;  %v3165_v34 = vpop.f32.mrf.mxu3 }
 0x4bc   : > { %5683 = vst [vmem:[%s8223_s14 + $0x270] sm:$0xff] %v4868_v1  ;;  %v4872_v25 = vsub.f32 1.0, %v4871_v59  ;;  %v10530_v14 = vadd.f32 1.0, %v7593_v33  ;;  %v4979_v16 = vadd.f32 %v7589_v38, %v4978_v45  ;;  %v6823_v28 = vmul.f32 -1.442695, %v3019_v9 }
 0x4bd   : > { %v7595_v15 = vpop.eup %7594  ;;  %7598 = vpow2.f32 %v6808_v20  ;;  %v3164_v23 = vadd.f32 %v3163_v54, %v3115_v4  ;;  %vm4876_vm2 = vweird.f32 %v7591_v60  ;;  %vm10536_vm3 = vcmp.eq.f32.partialorder %v4879_v10, 8.507059e+37 }
 0x4be   : > { %v7597_v19 = vpop.eup %7596  ;;  %v4873_v32 = vmul.f32 %v7591_v60, %v4872_v25  ;;  %v5096_v43 = vmul.f32 %v7595_v15, %v10505_v3  ;;  %7600 = vrcp.f32 %v10530_v14  ;;  %v4983_v61 = vsel %vm4982_vm1, %v7589_v38, %v4979_v16  ;;  %vm4877_vm4 = vmor %vm4875_vm0, %vm4876_vm2 }
 0x4bf   : > { %v4882_v17 = vor.u32 1.1754944e-38, %v4881_v2  ;;  %v3117_v39 = vadd.f32 %v3116_v42, %v3068_v7  ;;  %v4988_v22 = vsel %vm10515_vm13, %v4987_v6, %v4983_v61  ;;  %v10542_v18 = vadd.f32 1.0, %v7597_v19  ;;  %v3119_v7 = vpop.f32.mrf.mxu2 }
 0x4c0   : > { %v4874_v13 = vadd.f32 %v7591_v60, %v4873_v32  ;;  %v5097_v12 = vsub.f32 1.0, %v5096_v43  ;;  %5691 = vst [vmem:[%s8223_s14 + $0x2b0] sm:$0xff] %v4988_v22  ;;  %v5104_v29 = vand.u32 2147483647, %v10505_v3  ;;  %v5106_v44 = vand.u32 2147483648, %v10505_v3  ;;  %v3072_v32 = vpop.f32.mrf.mxu1 }
 0x4c1   : > { %v3021_v57 = vpop.f32.mrf.mxu0  ;;  %7602 = vpow2.f32 %v6823_v28  ;;  %v6816_v21 = vmul.f32 -1.442695, %v3164_v23  ;;  %vm5101_vm5 = vweird.f32 %v7595_v15  ;;  %vm5100_vm6 = vweird.f32 %v10505_v3 }
 0x4c2   : > { %v4878_v35 = vsel %vm4877_vm4, %v7591_v60, %v4874_v13  ;;  %v5098_v51 = vmul.f32 %v7595_v15, %v5097_v12  ;;  %7604 = vrcp.f32 %v10542_v18  ;;  %v3022_v63 = vadd.f32 %v3021_v57, %v10109_v8  ;;  %vm5102_vm7 = vmor %vm5100_vm6, %vm5101_vm5 }
 0x4c3   : > { %v7599_v49 = vpop.eup %7598  ;;  %v4883_v24 = vsel %vm10536_vm3, %v4882_v17, %v4878_v35  ;;  %7606 = vpow2.f32 %v6816_v21  ;;  %v3166_v48 = vadd.f32 %v3165_v34, %v3117_v39  ;;  %vm5105_vm8 = vcmp.eq.f32.partialorder %v5104_v29, 8.507059e+37  ;;  %v3168_v42 = vpop.f32.mrf.mxu3 }
 0x4c4   : > { %v7601_v58 = vpop.eup %7600  ;;  %5684 = vst [vmem:[%s8223_s14 + $0x278] sm:$0xff] %v4883_v24  ;;  %v5099_v46 = vadd.f32 %v7595_v15, %v5098_v51  ;;  %v10554_v31 = vadd.f32 1.0, %v7599_v49  ;;  %v5107_v62 = vor.u32 1.1754944e-38, %v5106_v44  ;;  %v4999_v3 = vand.u32 2147483647, %v10530_v14 }
 0x4c5   : > { %v4991_v30 = vmul.f32 %v7601_v58, %v10530_v14  ;;  %v5001_v0 = vand.u32 2147483648, %v10530_v14  ;;  %v6831_v8 = vmul.f32 -1.442695, %v3022_v63  ;;  %v6824_v41 = vmul.f32 -1.442695, %v3166_v48 }
 0x4c6   : > { %v5103_v38 = vsel %vm5102_vm7, %v7595_v15, %v5099_v46  ;;  %7608 = vrcp.f32 %v10554_v31  ;;  %v3071_v60 = vadd.f32 %v3070_v55, %v10120_v37  ;;  %vm4995_vm9 = vweird.f32 %v10530_v14 }
 0x4c7   : > { %v7603_v47 = vpop.eup %7602  ;;  %v5108_v36 = vsel %vm5105_vm8, %v5107_v62, %v5103_v38  ;;  %v4992_v11 = vsub.f32 1.0, %v4991_v30  ;;  %vm4996_vm10 = vweird.f32 %v7601_v58  ;;  %vm10568_vm11 = vcmp.eq.f32.partialorder %v4999_v3, 8.507059e+37  ;;  %v3121_v12 = vpop.f32.mrf.mxu2 }
 0x4c8   : > { %v7605_v52 = vpop.eup %7604  ;;  %5699 = vst [vmem:[%s8223_s14 + $0x2f0] sm:$0xff] %v5108_v36  ;;  %v10562_v26 = vadd.f32 1.0, %v7603_v47  ;;  %v5002_v40 = vor.u32 1.1754944e-38, %v5001_v0  ;;  %v5224_v59 = vand.u32 2147483647, %v10542_v18  ;;  %vm4997_vm12 = vmor %vm4995_vm9, %vm4996_vm10  ;;  %v5226_v1 = vand.u32 2147483648, %v10542_v18 }
 0x4c9   : > { %v3023_v27 = vpop.f32.mrf.mxu0  ;;  %v7607_v5 = vpop.eup %7606  ;;  %v4993_v54 = vmul.f32 %v7601_v58, %v4992_v11  ;;  %v5216_v9 = vmul.f32 %v7605_v52, %v10542_v18  ;;  %v5119_v45 = vand.u32 2147483647, %v10554_v31  ;;  %vm5221_vm13 = vweird.f32 %v7605_v52 }
 0x4ca   : > { %v3024_v56 = vadd.f32 %v3023_v27, %v10123_v53  ;;  %7610 = vrcp.f32 %v10562_v26  ;;  %v10574_v33 = vadd.f32 1.0, %v7607_v5  ;;  %vm5220_vm14 = vweird.f32 %v10542_v18 }
 0x4cb   : > { %v4994_v10 = vadd.f32 %v7601_v58, %v4993_v54  ;;  %v5217_v2 = vsub.f32 1.0, %v5216_v9  ;;  %7612 = vpow2.f32 %v6831_v8  ;;  %v5121_v16 = vand.u32 2147483648, %v10554_v31  ;;  %vm5222_vm0 = vmor %vm5220_vm14, %vm5221_vm13  ;;  %v3170_v47 = vpop.f32.mrf.mxu3 }
 0x4cc   : > { %v7609_v53 = vpop.eup %7608  ;;  %7614 = vpow2.f32 %v6824_v41  ;;  %v6839_v20 = vmul.f32 -1.442695, %v3024_v56  ;;  %vm10585_vm15 = vcmp.eq.f32.partialorder %v5224_v59, 8.507059e+37  ;;  %v5227_v57 = vor.u32 1.1754944e-38, %v5226_v1 }
 0x4cd   : > { %v4998_v6 = vsel %vm4997_vm12, %v7601_v58, %v4994_v10  ;;  %v5218_v25 = vmul.f32 %v7605_v52, %v5217_v2  ;;  %v5111_v14 = vmul.f32 %v7609_v53, %v10554_v31  ;;  %7616 = vrcp.f32 %v10574_v33 }
 0x4ce   : > { %v5003_v15 = vsel %vm10568_vm11, %v5002_v40, %v4998_v6  ;;  %7618 = vpow2.f32 %v6839_v20  ;;  %vm5115_vm1 = vweird.f32 %v10554_v31  ;;  %vm10590_vm2 = vcmp.eq.f32.partialorder %v5119_v45, 8.507059e+37 }
 0x4cf   : > { %5692 = vst [vmem:[%s8223_s14 + $0x2b8] sm:$0xff] %v5003_v15  ;;  %v5219_v28 = vadd.f32 %v7605_v52, %v5218_v25  ;;  %v5112_v19 = vsub.f32 1.0, %v5111_v14  ;;  %v3120_v50 = vadd.f32 %v3119_v7, %v3071_v60  ;;  %vm5116_vm3 = vweird.f32 %v7609_v53 }
 0x4d0   : > { %v7611_v43 = vpop.eup %7610  ;;  %v5122_v44 = vor.u32 1.1754944e-38, %v5121_v16  ;;  %v3073_v35 = vadd.f32 %v3072_v32, %v10120_v37  ;;  %v5346_v24 = vand.u32 2147483648, %v10562_v26  ;;  %vm5117_vm4 = vmor %vm5115_vm1, %vm5116_vm3  ;;  %v5344_v46 = vand.u32 2147483647, %v10562_v26 }
 0x4d1   : > { %v7613_v17 = vpop.eup %7612  ;;  %v5223_v39 = vsel %vm5222_vm0, %v7605_v52, %v5219_v28  ;;  %v5113_v22 = vmul.f32 %v7609_v53, %v5112_v19  ;;  %v5336_v13 = vmul.f32 %v7611_v43, %v10562_v26  ;;  %v3169_v63 = vadd.f32 %v3168_v42, %v3120_v50 }
 0x4d2   : > { %v7615_v18 = vpop.eup %7614  ;;  %v5228_v29 = vsel %vm10585_vm15, %v5227_v57, %v5223_v39  ;;  %v10597_v21 = vadd.f32 1.0, %v7613_v17  ;;  %v3122_v48 = vadd.f32 %v3121_v12, %v3073_v35  ;;  %vm5341_vm5 = vweird.f32 %v7611_v43 }
 0x4d3   : > { %5707 = vst [vmem:[%s8223_s14 + $0x330] sm:$0xff] %v5228_v29  ;;  %v5114_v51 = vadd.f32 %v7609_v53, %v5113_v22  ;;  %v5337_v49 = vsub.f32 1.0, %v5336_v13  ;;  %v10602_v34 = vadd.f32 1.0, %v7615_v18  ;;  %v7617_v58 = vpop.eup %7616  ;;  %vm5340_vm6 = vweird.f32 %v10562_v26 }
 0x4d4   : > { %7620 = vrcp.f32 %v10597_v21  ;;  %v7619_v62 = vpop.eup %7618  ;;  %v5231_v55 = vmul.f32 %v7617_v58, %v10574_v33  ;;  %v5347_v3 = vor.u32 1.1754944e-38, %v5346_v24  ;;  %v5239_v27 = vand.u32 2147483647, %v10574_v33  ;;  %vm5342_vm7 = vmor %vm5340_vm6, %vm5341_vm5 }
 0x4d5   : > { %v5118_v37 = vsel %vm5117_vm4, %v7609_v53, %v5114_v51  ;;  %v5338_v30 = vmul.f32 %v7611_v43, %v5337_v49  ;;  %7622 = vrcp.f32 %v10602_v34  ;;  %v5241_v36 = vand.u32 2147483648, %v10574_v33 }
 0x4d6   : > { %v5123_v38 = vsel %vm10590_vm2, %v5122_v44, %v5118_v37  ;;  %v5232_v0 = vsub.f32 1.0, %v5231_v55  ;;  %v10616_v11 = vadd.f32 1.0, %v7619_v62  ;;  %v6832_v8 = vmul.f32 -1.442695, %v3169_v63 }
 0x4d7   : > { %5700 = vst [vmem:[%s8223_s14 + $0x2f8] sm:$0xff] %v5123_v38  ;;  %v5339_v31 = vadd.f32 %v7611_v43, %v5338_v30  ;;  %v3171_v7 = vadd.f32 %v3170_v47, %v3122_v48  ;;  %vm5345_vm8 = vcmp.eq.f32.partialorder %v5344_v46, 8.507059e+37  ;;  %vm5236_vm9 = vweird.f32 %v7617_v58 }
 0x4d8   : > { %v5233_v26 = vmul.f32 %v7617_v58, %v5232_v0  ;;  %7624 = vrcp.f32 %v10616_v11  ;;  %vm5235_vm10 = vweird.f32 %v10574_v33  ;;  %vm5240_vm12 = vcmp.eq.f32.partialorder %v5239_v27, 8.507059e+37 }
 0x4d9   : > { %v5343_v52 = vsel %vm5342_vm7, %v7611_v43, %v5339_v31  ;;  %vm5237_vm11 = vmor %vm5235_vm10, %vm5236_vm9  ;;  %v5242_v9 = vor.u32 1.1754944e-38, %v5241_v36  ;;  %7626 = vpow2.f32 %v6832_v8  ;;  %v6840_v4 = vmul.f32 -1.442695, %v3171_v7 }
 0x4da   : > { %v7621_v41 = vpop.eup %7620  ;;  %v5348_v60 = vsel %vm5345_vm8, %v5347_v3, %v5343_v52  ;;  %v5234_v56 = vadd.f32 %v7617_v58, %v5233_v26  ;;  %v5464_v10 = vand.u32 2147483647, %v10597_v21  ;;  %v5466_v1 = vand.u32 2147483648, %v10597_v21 }
 0x4db   : > { %5715 = vst [vmem:[%s8223_s14 + $0x370] sm:$0xff] %v5348_v60  ;;  %v5456_v5 = vmul.f32 %v7621_v41, %v10597_v21  ;;  %v7623_v54 = vpop.eup %7622  ;;  %v5359_v33 = vand.u32 2147483647, %v10602_v34  ;;  %7628 = vpow2.f32 %v6840_v4  ;;  %vm5461_vm13 = vweird.f32 %v7621_v41 }
 0x4dc   : > { %v5238_v40 = vsel %vm5237_vm11, %v7617_v58, %v5234_v56  ;;  %v5351_v2 = vmul.f32 %v7623_v54, %v10602_v34  ;;  %vm5460_vm14 = vweird.f32 %v10597_v21  ;;  %v5361_v25 = vand.u32 2147483648, %v10602_v34 }
 0x4dd   : > { %v5457_v59 = vsub.f32 1.0, %v5456_v5  ;;  %v5243_v53 = vsel %vm5240_vm12, %v5242_v9, %v5238_v40  ;;  %vm5356_vm15 = vweird.f32 %v7623_v54  ;;  %vm5462_vm0 = vmor %vm5460_vm14, %vm5461_vm13  ;;  %vm5465_vm1 = vcmp.eq.f32.partialorder %v5464_v10, 8.507059e+37 }
 0x4de   : > { %5708 = vst [vmem:[%s8223_s14 + $0x338] sm:$0xff] %v5243_v53  ;;  %v5352_v20 = vsub.f32 1.0, %v5351_v2  ;;  %v7625_v6 = vpop.eup %7624  ;;  %v5467_v28 = vor.u32 1.1754944e-38, %v5466_v1  ;;  %vm5355_vm2 = vweird.f32 %v10602_v34  ;;  %vm10631_vm3 = vcmp.eq.f32.partialorder %v5359_v33, 8.507059e+37 }
 0x4df   : > { %v5458_v45 = vmul.f32 %v7621_v41, %v5457_v59  ;;  %v5576_v15 = vmul.f32 %v7625_v6, %v10616_v11  ;;  %v7627_v16 = vpop.eup %7626  ;;  %vm5357_vm4 = vmor %vm5355_vm2, %vm5356_vm15  ;;  %v5362_v17 = vor.u32 1.1754944e-38, %v5361_v25  ;;  %v5584_v39 = vand.u32 2147483647, %v10616_v11 }
 0x4e0   : > { %v5353_v42 = vmul.f32 %v7623_v54, %v5352_v20  ;;  %v3676_v57 = vadd.f32 1.0, %v7627_v16  ;;  %v5586_v22 = vand.u32 2147483648, %v10616_v11  ;;  %vm5581_vm5 = vweird.f32 %v7625_v6 }
 0x4e1   : > { %v5459_v14 = vadd.f32 %v7621_v41, %v5458_v45  ;;  %v5577_v43 = vsub.f32 1.0, %v5576_v15  ;;  %v7629_v61 = vpop.eup %7628  ;;  %vm5580_vm6 = vweird.f32 %v10616_v11  ;;  %vm5585_vm8 = vcmp.eq.f32.partialorder %v5584_v39, 8.507059e+37 }
 0x4e2   : > { %v5354_v32 = vadd.f32 %v7623_v54, %v5353_v42  ;;  %7630 = vrcp.f32 %v3676_v57  ;;  %v3684_v29 = vadd.f32 1.0, %v7629_v61  ;;  %vm5582_vm7 = vmor %vm5580_vm6, %vm5581_vm5  ;;  %v5587_v21 = vor.u32 1.1754944e-38, %v5586_v22 }
 0x4e3   : > { %v5463_v19 = vsel %vm5462_vm0, %v7621_v41, %v5459_v14  ;;  %v5578_v12 = vmul.f32 %v7625_v6, %v5577_v43  ;;  %v5481_v46 = vand.u32 2147483648, %v3676_v57  ;;  %v5479_v62 = vand.u32 2147483647, %v3676_v57 }
 0x4e4   : > { %v5468_v50 = vsel %vm5465_vm1, %v5467_v28, %v5463_v19  ;;  %v5358_v13 = vsel %vm5357_vm4, %v7623_v54, %v5354_v32  ;;  %7632 = vrcp.f32 %v3684_v29  ;;  %vm5475_vm10 = vweird.f32 %v3676_v57 }
 0x4e5   : > { %5723 = vst [vmem:[%s8223_s14 + $0x3b0] sm:$0xff] %v5468_v50  ;;  %v5363_v18 = vsel %vm10631_vm3, %v5362_v17, %v5358_v13  ;;  %v5579_v44 = vadd.f32 %v7625_v6, %v5578_v12  ;;  %v5601_v55 = vand.u32 2147483648, %v3684_v29  ;;  %v5482_v38 = vor.u32 1.1754944e-38, %v5481_v46 }
 0x4e6   : > { %5716 = vst [vmem:[%s8223_s14 + $0x378] sm:$0xff] %v5363_v18  ;;  %v5599_v3 = vand.u32 2147483647, %v3684_v29  ;;  %vm5480_vm13 = vcmp.eq.f32.partialorder %v5479_v62, 8.507059e+37  ;;  %vm5595_vm14 = vweird.f32 %v3684_v29 }
 0x4e7   : > { %v5583_v35 = vsel %vm5582_vm7, %v7625_v6, %v5579_v44  ;;  %v5602_v36 = vor.u32 1.1754944e-38, %v5601_v55 }
 0x4e8   : > { %v5588_v51 = vsel %vm5585_vm8, %v5587_v21, %v5583_v35  ;;  %v7631_v49 = vpop.eup %7630  ;;  %vm5600_vm0 = vcmp.eq.f32.partialorder %v5599_v3, 8.507059e+37 }
 0x4e9   : > { %5731 = vst [vmem:[%s8223_s14 + $0x3f0] sm:$0xff] %v5588_v51  ;;  %v5471_v24 = vmul.f32 %v7631_v49, %v3676_v57  ;;  %vm5476_vm9 = vweird.f32 %v7631_v49 }
 0x4ea   : > { %v7633_v34 = vpop.eup %7632  ;;  %vm5477_vm11 = vmor %vm5475_vm10, %vm5476_vm9 }
 0x4eb   : > { %v5472_v58 = vsub.f32 1.0, %v5471_v24  ;;  %v5591_v63 = vmul.f32 %v7633_v34, %v3684_v29  ;;  %vm5596_vm12 = vweird.f32 %v7633_v34 }
 0x4ec   : > { %vm5597_vm15 = vmor %vm5595_vm14, %vm5596_vm12 }
 0x4ed   : > { %v5473_v48 = vmul.f32 %v7631_v49, %v5472_v58  ;;  %v5592_v37 = vsub.f32 1.0, %v5591_v63 }
 0x4ef   : > { %v5474_v30 = vadd.f32 %v7631_v49, %v5473_v48  ;;  %v5593_v31 = vmul.f32 %v7633_v34, %v5592_v37 }
 0x4f1   : > { %v5478_v0 = vsel %vm5477_vm11, %v7631_v49, %v5474_v30  ;;  %v5594_v47 = vadd.f32 %v7633_v34, %v5593_v31 }
 0x4f2   : > { %v5483_v27 = vsel %vm5480_vm13, %v5482_v38, %v5478_v0 }
 0x4f3   : > { %5724 = vst [vmem:[%s8223_s14 + $0x3b8] sm:$0xff] %v5483_v27  ;;  %v5598_v11 = vsel %vm5597_vm15, %v7633_v34, %v5594_v47 }
 0x4f4   : > { %v5603_v8 = vsel %vm5600_vm0, %v5602_v36, %v5598_v11 }
 0x4f5   : > { %5732 = vst [vmem:[%s8223_s14 + $0x3f8] sm:$0xff] %v5603_v8 }
 0x4f6   : > { %7695 = shalt.err (!%p7692_p8)
}
 0x4f7   : > { %s7739_s9 = smov 1024   ;;  %s7740_s14 = smov 64  }
 0x4f8   : > { %7071 = dma.vmem_to_hbm [thread:$0]  (%p7819_p5), %s5748_s28, 16384, %s5750_s15, %s5734_s16, %s7739_s9, %s7739_s9, %s7740_s14  }
 0x4f9 PF: > { %p7083_p9 = scmp.ge.s32.totalorder %s7734_s27, 2  ;;  %s5764_s23 = sand.u32 1, %s7722_s24  }
 0x4fa   : > { %s5765_s8 = scalar_lea.sflag [#allocation4], %s5764_s23 }
 0x4fb   : > { %p7078_p10 = pnand %p7083_p9, %p7823_p6 }
 0x4fd   : > { %p7079_p11 = pneg %p7078_p10 }
 0x4ff   : > { %7717 = dma.done.wait (%p7079_p11), %s5765_s8, 16384  }
 0x500   : > { %7719 = vsyncadd (%p7079_p11), %s5765_s8, 4294950912  ;;  %p18_p12 = scmp.ge.s32.totalorder %s7806_s30, 4   ;;  %s10862_s24 = smov %s7726_s25 }
 0x501   : > { %s10863_s25 = smov %s7730_s26  ;;  %s10864_s26 = smov %s7817_s10 }
 0x502   : > { %s10865_s27 = smov %s7806_s30  ;;  %20 = sbr.rel (!%p18_p12) target bundleno = 4 (0x4), region = 88 }
 0x507   :  { %5771 = vsyncpa [#allocation3], 1 }
 0x508   :  { %5773 = vsyncpa [#allocation3 + $0x1], 1 }
 0x509   :  { %5774 = vsyncpa [#allocation4], 1 }
 0x50a   :  { %5776 = vsyncpa [#allocation4 + $0x1], 1 }

</bundles_post_ra>
